<compile_context>
chip_gen: v7x
topology: tpu7x:2x2x1
jax: 0.10.0
libtpu: 0.0.40
codegen_flags: <defaults>
</compile_context>

<pallas_src>
import jax
import jax.numpy as jnp
from jax import lax
from jax.experimental import pallas as pl
from jax.experimental.pallas import tpu as pltpu


def _round_up(x, m):
    return ((x + m - 1) // m) * m


# --------------------------------------------------------------------------------------
# Fused kernel: blocked LSTM recurrence + TLinear stack + sigmoid, lane-dense output.
# --------------------------------------------------------------------------------------
def make_fused_kernel(n_layers, TB, MH, compute_dtype):
    prec = (lax.Precision.HIGHEST if compute_dtype == jnp.float32
            else lax.Precision.DEFAULT)

    def _sigmoid(x):
        # explicit form (exp + divide) — guaranteed Mosaic lowering, f32 math.
        return 1.0 / (1.0 + jnp.exp(-x))

    def kernel(xf_ref, wih_ref, whh_ref, bg_ref, *rest):
        tl_refs = rest[:2 * n_layers]          # (w_bd, b_bd) pairs
        out_ref = rest[2 * n_layers]           # (T_pad, OUT_PAD)  f32
        hseq_scr = rest[2 * n_layers + 1]      # (T_pad, M*H)      f32

        T_pad = xf_ref.shape[0]
        n_blocks = T_pad // TB

        # ---- Hoist all loop-invariant operands ONCE (review item 6).
        wih = wih_ref[...]                     # (M*V, 4*M*H)  compute_dtype
        whh = whh_ref[...]                     # (M*H, 4*M*H)  compute_dtype
        bg = bg_ref[...]                       # (1, 4*M*H)    f32

        # ---- Blocked serial recurrence over time (review items 3/4/5/7).
        # Gate layout is gate-major: columns [g*MH : (g+1)*MH] are gate g for
        # all measurements (PyTorch order i, f, g, o) -> whole-vreg slices.
        def block_step(b, carry):
            h, c = carry                       # (1, M*H) f32 each
            t0 = pl.multiple_of(b * TB, TB)
            xblk = xf_ref[pl.ds(t0, TB), :]    # (TB, M*V) compute_dtype
            # Input projection for TB steps in one small MXU matmul, kept in
            # registers (no per-step masked load, no O(T) gate scratch).
            gx = jnp.dot(xblk, wih, preferred_element_type=jnp.float32,
                         precision=prec) + bg  # (TB, 4*M*H) f32

            h_rows = []
            for s in range(TB):                # python-unrolled: == unroll=TB
                gates = gx[s:s + 1, :] + jnp.dot(
                    h.astype(compute_dtype), whh,
                    preferred_element_type=jnp.float32, precision=prec)
                i_g = _sigmoid(gates[:, 0 * MH:1 * MH])
                f_g = _sigmoid(gates[:, 1 * MH:2 * MH])
                g_g = jnp.tanh(gates[:, 2 * MH:3 * MH])
                o_g = _sigmoid(gates[:, 3 * MH:4 * MH])
                c = f_g * c + i_g * g_g
                h = o_g * jnp.tanh(c)
                h_rows.append(h)

            # One full, unmasked (TB, M*H) tile store per TB steps.
            hseq_scr[pl.ds(t0, TB), :] = jnp.concatenate(h_rows, axis=0)
            return (h, c)

        h0 = jnp.zeros((1, MH), jnp.float32)
        c0 = jnp.zeros((1, MH), jnp.float32)
        lax.fori_loop(0, n_blocks, block_step, (h0, c0))

        # ---- Epilogue: block-diagonal TLinear stack (+ReLU between layers),
        # final sigmoid, single lane-dense (last dim multiple of 128) store.
        y = hseq_scr[...].astype(compute_dtype)                 # (T_pad, M*H)
        for layer in range(n_layers):
            w = tl_refs[2 * layer][...]                         # compute_dtype
            b = tl_refs[2 * layer + 1][...]                     # f32
            y = jnp.dot(y, w, preferred_element_type=jnp.float32,
                        precision=prec) + b
            if layer < n_layers - 1:
                y = jnp.maximum(y, 0.0).astype(compute_dtype)
        out_ref[...] = _sigmoid(y)

    return kernel


# --------------------------------------------------------------------------------------
# Wrapper-side weight re-layout (pure parameter preprocessing, done once).
# --------------------------------------------------------------------------------------
def build_lstm_bd(w_ih, w_hh, b_ih, b_hh, M):
    """Gate-major, measurement-block-diagonal LSTM weights.

    wih_bd[m*V+v, g*M*H + m*H + j] = w_ih[g*H+j, v]
    whh_bd[m*H+k, g*M*H + m*H + j] = w_hh[g*H+j, k]
    b_bd[0,       g*M*H + m*H + j] = b_ih[g*H+j] + b_hh[g*H+j]
    """
    fourH, V = w_ih.shape
    H = fourH // 4
    eye = jnp.eye(M, dtype=jnp.float32)
    wih_g = w_ih.reshape(4, H, V)                                   # (g, j, v)
    whh_g = w_hh.reshape(4, H, H)                                   # (g, j, k)
    wih_bd = jnp.einsum('mn,gjv->mvgnj', eye, wih_g).reshape(M * V, 4 * M * H)
    whh_bd = jnp.einsum('mn,gjk->mkgnj', eye, whh_g).reshape(M * H, 4 * M * H)
    b = (b_ih + b_hh).reshape(4, H)
    b_bd = jnp.broadcast_to(b[:, None, :], (4, M, H)).reshape(1, 4 * M * H)
    return wih_bd, whh_bd, b_bd


def build_tlinear_bd(w, b):
    """Per-measurement (M, d_in, d_out) stack -> block-diagonal (M*d_in, M*d_out)."""
    M, d_in, d_out = w.shape
    eye = jnp.eye(M, dtype=jnp.float32)
    w_bd = jnp.einsum('mn,mio->mino', eye, w).reshape(M * d_in, M * d_out)
    b_bd = b.reshape(1, M * d_out)
    return w_bd, b_bd


def propensity_forward(X, params, compute_dtype=jnp.bfloat16, TB=8):
    T, M, V = X.shape
    H = params["w_hh"].shape[1]
    n_layers = len(params["tl_weights"])
    d_last = params["tl_weights"][-1].shape[-1]
    out_cols = M * d_last
    OUT_PAD = _round_up(max(out_cols, 128), 128)   # lane-dense kernel output
    T_pad = _round_up(T, TB)
    MH = M * H

    wih_bd, whh_bd, bg_bd = build_lstm_bd(
        params["w_ih"], params["w_hh"], params["b_ih"], params["b_hh"], M)
    wih_bd = wih_bd.astype(compute_dtype)
    whh_bd = whh_bd.astype(compute_dtype)
    bg_bd = bg_bd.astype(jnp.float32)

    tl_args = []
    for li, (w, b) in enumerate(zip(params["tl_weights"], params["tl_biases"])):
        w_bd, b_bd = build_tlinear_bd(w, b)
        if li == n_layers - 1 and OUT_PAD != out_cols:
            # zero-pad last layer's columns -> sigmoid(0)=0.5 in padding, sliced off.
            w_bd = jnp.pad(w_bd, ((0, 0), (0, OUT_PAD - out_cols)))
            b_bd = jnp.pad(b_bd, ((0, 0), (0, OUT_PAD - out_cols)))
        tl_args += [w_bd.astype(compute_dtype), b_bd.astype(jnp.float32)]

    xf = X.reshape(T, M * V)                    # free HBM reshape in the wrapper
    if T_pad != T:
        xf = jnp.pad(xf, ((0, T_pad - T), (0, 0)))
    xf = xf.astype(compute_dtype)

    kernel = make_fused_kernel(n_layers, TB, MH, compute_dtype)
    args = (xf, wih_bd, whh_bd, bg_bd, *tl_args)
    vmem_spec = pl.BlockSpec(memory_space=pltpu.MemorySpace.VMEM)

    # Explicit scoped-VMEM budget (review: re-derive for v7x's smaller VMEM).
    needed = sum(int(a.size) * a.dtype.itemsize for a in args)
    needed += T_pad * OUT_PAD * 4            # output
    needed += T_pad * MH * 4                 # hseq scratch
    vmem_limit = int(min(64 << 20, max(4 << 20, 2 * needed + (1 << 20))))

    out = pl.pallas_call(
        kernel,
        out_shape=jax.ShapeDtypeStruct((T_pad, OUT_PAD), jnp.float32),
        in_specs=[vmem_spec] * len(args),
        out_specs=vmem_spec,
        scratch_shapes=[
            pltpu.VMEM((T_pad, MH), jnp.float32),   # hidden-state sequence
        ],
        compiler_params=pltpu.CompilerParams(vmem_limit_bytes=vmem_limit),
    )(*args)
    return out[:T, :out_cols]                 # == pi.flatten(1)


# --------------------------------------------------------------------------------------
# Pure-JAX reference for correctness check.
# --------------------------------------------------------------------------------------
def reference_forward(X, params):
    T, M, V = X.shape
    w_ih, w_hh = params["w_ih"], params["w_hh"]
    b = params["b_ih"] + params["b_hh"]
    H = w_hh.shape[1]

    def step(carry, x):
        h, c = carry
        gates = x @ w_ih.T + h @ w_hh.T + b
        i = jax.nn.sigmoid(gates[:, :H])
        f = jax.nn.sigmoid(gates[:, H:2 * H])
        g = jnp.tanh(gates[:, 2 * H:3 * H])
        o = jax.nn.sigmoid(gates[:, 3 * H:])
        c = f * c + i * g
        h = o * jnp.tanh(c)
        return (h, c), h

    init = (jnp.zeros((M, H), jnp.float32), jnp.zeros((M, H), jnp.float32))
    _, Hs = jax.lax.scan(step, init, X)
    y = Hs
    n = len(params["tl_weights"])
    for layer, (w, bb) in enumerate(zip(params["tl_weights"], params["tl_biases"])):
        y = jnp.einsum("tmh,mho->tmo", y, w) + bb[None, :, :]
        if layer < n - 1:
            y = jnp.maximum(y, 0.0)
    return jax.nn.sigmoid(y).reshape(T, -1)


# --------------------------------------------------------------------------------------
# Deterministic parameter construction (mirrors __init__ shapes; synthetic, no checkpoint)
# --------------------------------------------------------------------------------------
def make_params(key, num_variables, num_measurements, H_dim, hidden_dim):
    ks = jax.random.split(key, 5)
    k_lstm = 1.0 / jnp.sqrt(H_dim)
    w_ih = jax.random.uniform(ks[0], (4 * H_dim, num_variables), jnp.float32, -k_lstm, k_lstm)
    w_hh = jax.random.uniform(ks[1], (4 * H_dim, H_dim), jnp.float32, -k_lstm, k_lstm)
    b_ih = jax.random.uniform(ks[2], (4 * H_dim,), jnp.float32, -k_lstm, k_lstm)
    b_hh = jax.random.uniform(ks[3], (4 * H_dim,), jnp.float32, -k_lstm, k_lstm)

    dims = [H_dim] + list(hidden_dim)
    tl_weights, tl_biases = [], []
    wkey = ks[4]
    for i in range(len(hidden_dim)):
        wkey, k1, k2 = jax.random.split(wkey, 3)
        # torch.rand -> uniform [0, 1)
        tl_weights.append(jax.random.uniform(k1, (num_measurements, dims[i], dims[i + 1]),
                                             jnp.float32, 0.0, 1.0))
        tl_biases.append(jax.random.uniform(k2, (num_measurements, dims[i + 1]),
                                            jnp.float32, 0.0, 1.0))
    return {"w_ih": w_ih, "w_hh": w_hh, "b_ih": b_ih, "b_hh": b_hh,
            "tl_weights": tl_weights, "tl_biases": tl_biases}


if __name__ == "__main__":
    # exact-f32 reference matmuls so the f32-kernel check is tight.
    jax.config.update("jax_default_matmul_precision", "highest")

    # small, module-consistent shapes
    T, M, V = 8, 4, 4            # seq_len, num_measurements, num_variables
    H_dim = 32
    hidden_dim = [16, 8]

    key = jax.random.PRNGKey(0)
    kx, kp = jax.random.split(key)
    X = jax.random.normal(kx, (T, M, V), jnp.float32)
    params = make_params(kp, V, M, H_dim, hidden_dim)

    ref = reference_forward(X, params)

    # 1) all-f32 kernel: tight tolerance — catches any layout/transposition bug.
    out_f32 = jax.block_until_ready(
        propensity_forward(X, params, compute_dtype=jnp.float32))
    assert out_f32.shape == (T, M * hidden_dim[-1]), out_f32.shape
    assert bool(jnp.all(jnp.isfinite(out_f32)))
    err_f32 = float(jnp.max(jnp.abs(out_f32 - ref)))
    assert err_f32 < 5e-5, err_f32

    # 2) bf16-operand kernel (performance configuration): loose tolerance.
    out_bf16 = jax.block_until_ready(
        propensity_forward(X, params, compute_dtype=jnp.bfloat16))
    assert out_bf16.shape == (T, M * hidden_dim[-1]), out_bf16.shape
    assert bool(jnp.all(jnp.isfinite(out_bf16)))
    err_bf16 = float(jnp.max(jnp.abs(out_bf16 - ref)))
    assert err_bf16 < 3e-2, err_bf16

    print("KERNEL_OK")
</pallas_src>

<mosaic_0001>
module attributes {stable_mosaic.version = 11 : i64} {
  func.func @kernel(%arg0: memref<8x16xf32, #tpu.memory_space<vmem>>, %arg1: memref<16x512xf32, #tpu.memory_space<vmem>>, %arg2: memref<128x512xf32, #tpu.memory_space<vmem>>, %arg3: memref<1x512xf32, #tpu.memory_space<vmem>>, %arg4: memref<128x64xf32, #tpu.memory_space<vmem>>, %arg5: memref<1x64xf32, #tpu.memory_space<vmem>>, %arg6: memref<64x128xf32, #tpu.memory_space<vmem>>, %arg7: memref<1x128xf32, #tpu.memory_space<vmem>>, %arg8: memref<8x128xf32, #tpu.memory_space<vmem>>, %arg9: memref<8x128xf32, #tpu.memory_space<vmem>>) attributes {dimension_semantics = [], scalar_prefetch = 0 : i64, scratch_operands = 1 : i64, tpu.core_type = #tpu.core_type<tc>} {
    %c0 = arith.constant 0 : index
    %c0_0 = arith.constant 0 : index
    %0 = vector.load %arg1[%c0, %c0_0] : memref<16x512xf32, #tpu.memory_space<vmem>>, vector<16x512xf32>
    %c0_1 = arith.constant 0 : index
    %c0_2 = arith.constant 0 : index
    %1 = vector.load %arg2[%c0_1, %c0_2] : memref<128x512xf32, #tpu.memory_space<vmem>>, vector<128x512xf32>
    %c0_3 = arith.constant 0 : index
    %c0_4 = arith.constant 0 : index
    %2 = vector.load %arg3[%c0_3, %c0_4] : memref<1x512xf32, #tpu.memory_space<vmem>>, vector<1x512xf32>
    %cst = arith.constant 0.000000e+00 : f32
    %3 = vector.broadcast %cst : f32 to vector<1x128xf32>
    %cst_5 = arith.constant 0.000000e+00 : f32
    %4 = vector.broadcast %cst_5 : f32 to vector<1x128xf32>
    %c0_i32 = arith.constant 0 : i32
    %c8_i32 = arith.constant 8 : i32
    %5 = arith.muli %c0_i32, %c8_i32 : i32
    %6 = tpu.assume_multiple %5, 8 : i32
    %7 = arith.index_cast %6 : i32 to index
    %c0_6 = arith.constant 0 : index
    %8 = vector.load %arg0[%7, %c0_6] : memref<8x16xf32, #tpu.memory_space<vmem>>, vector<8x16xf32>
    %cst_7 = arith.constant dense<0.000000e+00> : vector<8x512xf32>
    %9 = tpu.matmul %8, %0, %cst_7 {dimension_numbers = #tpu.dot_dimension_numbers<[1], [0], [0], [1], [0, 0, 1, 1], [], []>, precision = #tpu.contract_precision<fp32>} : vector<8x16xf32>, vector<16x512xf32>, vector<8x512xf32> -> vector<8x512xf32>
    %10 = vector.broadcast %2 : vector<1x512xf32> to vector<8x512xf32>
    %11 = arith.addf %9, %10 : vector<8x512xf32>
    %12 = vector.extract_strided_slice %11 {offsets = [0, 0], sizes = [1, 512], strides = [1, 1]} : vector<8x512xf32> to vector<1x512xf32>
    %cst_8 = arith.constant dense<0.000000e+00> : vector<1x512xf32>
    %13 = tpu.matmul %3, %1, %cst_8 {dimension_numbers = #tpu.dot_dimension_numbers<[1], [0], [0], [1], [0, 0, 1, 1], [], []>, precision = #tpu.contract_precision<fp32>} : vector<1x128xf32>, vector<128x512xf32>, vector<1x512xf32> -> vector<1x512xf32>
    %14 = arith.addf %12, %13 : vector<1x512xf32>
    %15 = vector.extract_strided_slice %14 {offsets = [0, 0], sizes = [1, 128], strides = [1, 1]} : vector<1x512xf32> to vector<1x128xf32>
    %cst_9 = arith.constant 0.000000e+00 : f32
    %16 = vector.broadcast %cst_9 : f32 to vector<1x128xf32>
    %17 = arith.subf %16, %15 : vector<1x128xf32>
    %18 = math.exp %17 : vector<1x128xf32>
    %cst_10 = arith.constant 1.000000e+00 : f32
    %19 = vector.broadcast %cst_10 : f32 to vector<1x128xf32>
    %20 = arith.addf %19, %18 : vector<1x128xf32>
    %cst_11 = arith.constant 1.000000e+00 : f32
    %21 = vector.broadcast %cst_11 : f32 to vector<1x128xf32>
    %22 = arith.divf %21, %20 : vector<1x128xf32>
    %23 = vector.extract_strided_slice %14 {offsets = [0, 128], sizes = [1, 128], strides = [1, 1]} : vector<1x512xf32> to vector<1x128xf32>
    %cst_12 = arith.constant 0.000000e+00 : f32
    %24 = vector.broadcast %cst_12 : f32 to vector<1x128xf32>
    %25 = arith.subf %24, %23 : vector<1x128xf32>
    %26 = math.exp %25 : vector<1x128xf32>
    %cst_13 = arith.constant 1.000000e+00 : f32
    %27 = vector.broadcast %cst_13 : f32 to vector<1x128xf32>
    %28 = arith.addf %27, %26 : vector<1x128xf32>
    %cst_14 = arith.constant 1.000000e+00 : f32
    %29 = vector.broadcast %cst_14 : f32 to vector<1x128xf32>
    %30 = arith.divf %29, %28 : vector<1x128xf32>
    %31 = vector.extract_strided_slice %14 {offsets = [0, 256], sizes = [1, 128], strides = [1, 1]} : vector<1x512xf32> to vector<1x128xf32>
    %32 = math.tanh %31 : vector<1x128xf32>
    %33 = vector.extract_strided_slice %14 {offsets = [0, 384], sizes = [1, 128], strides = [1, 1]} : vector<1x512xf32> to vector<1x128xf32>
    %cst_15 = arith.constant 0.000000e+00 : f32
    %34 = vector.broadcast %cst_15 : f32 to vector<1x128xf32>
    %35 = arith.subf %34, %33 : vector<1x128xf32>
    %36 = math.exp %35 : vector<1x128xf32>
    %cst_16 = arith.constant 1.000000e+00 : f32
    %37 = vector.broadcast %cst_16 : f32 to vector<1x128xf32>
    %38 = arith.addf %37, %36 : vector<1x128xf32>
    %cst_17 = arith.constant 1.000000e+00 : f32
    %39 = vector.broadcast %cst_17 : f32 to vector<1x128xf32>
    %40 = arith.divf %39, %38 : vector<1x128xf32>
    %41 = arith.mulf %30, %4 : vector<1x128xf32>
    %42 = arith.mulf %22, %32 : vector<1x128xf32>
    %43 = arith.addf %41, %42 : vector<1x128xf32>
    %44 = math.tanh %43 : vector<1x128xf32>
    %45 = arith.mulf %40, %44 : vector<1x128xf32>
    %46 = vector.extract_strided_slice %11 {offsets = [1, 0], sizes = [1, 512], strides = [1, 1]} : vector<8x512xf32> to vector<1x512xf32>
    %cst_18 = arith.constant dense<0.000000e+00> : vector<1x512xf32>
    %47 = tpu.matmul %45, %1, %cst_18 {dimension_numbers = #tpu.dot_dimension_numbers<[1], [0], [0], [1], [0, 0, 1, 1], [], []>, precision = #tpu.contract_precision<fp32>} : vector<1x128xf32>, vector<128x512xf32>, vector<1x512xf32> -> vector<1x512xf32>
    %48 = arith.addf %46, %47 : vector<1x512xf32>
    %49 = vector.extract_strided_slice %48 {offsets = [0, 0], sizes = [1, 128], strides = [1, 1]} : vector<1x512xf32> to vector<1x128xf32>
    %cst_19 = arith.constant 0.000000e+00 : f32
    %50 = vector.broadcast %cst_19 : f32 to vector<1x128xf32>
    %51 = arith.subf %50, %49 : vector<1x128xf32>
    %52 = math.exp %51 : vector<1x128xf32>
    %cst_20 = arith.constant 1.000000e+00 : f32
    %53 = vector.broadcast %cst_20 : f32 to vector<1x128xf32>
    %54 = arith.addf %53, %52 : vector<1x128xf32>
    %cst_21 = arith.constant 1.000000e+00 : f32
    %55 = vector.broadcast %cst_21 : f32 to vector<1x128xf32>
    %56 = arith.divf %55, %54 : vector<1x128xf32>
    %57 = vector.extract_strided_slice %48 {offsets = [0, 128], sizes = [1, 128], strides = [1, 1]} : vector<1x512xf32> to vector<1x128xf32>
    %cst_22 = arith.constant 0.000000e+00 : f32
    %58 = vector.broadcast %cst_22 : f32 to vector<1x128xf32>
    %59 = arith.subf %58, %57 : vector<1x128xf32>
    %60 = math.exp %59 : vector<1x128xf32>
    %cst_23 = arith.constant 1.000000e+00 : f32
    %61 = vector.broadcast %cst_23 : f32 to vector<1x128xf32>
    %62 = arith.addf %61, %60 : vector<1x128xf32>
    %cst_24 = arith.constant 1.000000e+00 : f32
    %63 = vector.broadcast %cst_24 : f32 to vector<1x128xf32>
    %64 = arith.divf %63, %62 : vector<1x128xf32>
    %65 = vector.extract_strided_slice %48 {offsets = [0, 256], sizes = [1, 128], strides = [1, 1]} : vector<1x512xf32> to vector<1x128xf32>
    %66 = math.tanh %65 : vector<1x128xf32>
    %67 = vector.extract_strided_slice %48 {offsets = [0, 384], sizes = [1, 128], strides = [1, 1]} : vector<1x512xf32> to vector<1x128xf32>
    %cst_25 = arith.constant 0.000000e+00 : f32
    %68 = vector.broadcast %cst_25 : f32 to vector<1x128xf32>
    %69 = arith.subf %68, %67 : vector<1x128xf32>
    %70 = math.exp %69 : vector<1x128xf32>
    %cst_26 = arith.constant 1.000000e+00 : f32
    %71 = vector.broadcast %cst_26 : f32 to vector<1x128xf32>
    %72 = arith.addf %71, %70 : vector<1x128xf32>
    %cst_27 = arith.constant 1.000000e+00 : f32
    %73 = vector.broadcast %cst_27 : f32 to vector<1x128xf32>
    %74 = arith.divf %73, %72 : vector<1x128xf32>
    %75 = arith.mulf %64, %43 : vector<1x128xf32>
    %76 = arith.mulf %56, %66 : vector<1x128xf32>
    %77 = arith.addf %75, %76 : vector<1x128xf32>
    %78 = math.tanh %77 : vector<1x128xf32>
    %79 = arith.mulf %74, %78 : vector<1x128xf32>
    %80 = vector.extract_strided_slice %11 {offsets = [2, 0], sizes = [1, 512], strides = [1, 1]} : vector<8x512xf32> to vector<1x512xf32>
    %cst_28 = arith.constant dense<0.000000e+00> : vector<1x512xf32>
    %81 = tpu.matmul %79, %1, %cst_28 {dimension_numbers = #tpu.dot_dimension_numbers<[1], [0], [0], [1], [0, 0, 1, 1], [], []>, precision = #tpu.contract_precision<fp32>} : vector<1x128xf32>, vector<128x512xf32>, vector<1x512xf32> -> vector<1x512xf32>
    %82 = arith.addf %80, %81 : vector<1x512xf32>
    %83 = vector.extract_strided_slice %82 {offsets = [0, 0], sizes = [1, 128], strides = [1, 1]} : vector<1x512xf32> to vector<1x128xf32>
    %cst_29 = arith.constant 0.000000e+00 : f32
    %84 = vector.broadcast %cst_29 : f32 to vector<1x128xf32>
    %85 = arith.subf %84, %83 : vector<1x128xf32>
    %86 = math.exp %85 : vector<1x128xf32>
    %cst_30 = arith.constant 1.000000e+00 : f32
    %87 = vector.broadcast %cst_30 : f32 to vector<1x128xf32>
    %88 = arith.addf %87, %86 : vector<1x128xf32>
    %cst_31 = arith.constant 1.000000e+00 : f32
    %89 = vector.broadcast %cst_31 : f32 to vector<1x128xf32>
    %90 = arith.divf %89, %88 : vector<1x128xf32>
    %91 = vector.extract_strided_slice %82 {offsets = [0, 128], sizes = [1, 128], strides = [1, 1]} : vector<1x512xf32> to vector<1x128xf32>
    %cst_32 = arith.constant 0.000000e+00 : f32
    %92 = vector.broadcast %cst_32 : f32 to vector<1x128xf32>
    %93 = arith.subf %92, %91 : vector<1x128xf32>
    %94 = math.exp %93 : vector<1x128xf32>
    %cst_33 = arith.constant 1.000000e+00 : f32
    %95 = vector.broadcast %cst_33 : f32 to vector<1x128xf32>
    %96 = arith.addf %95, %94 : vector<1x128xf32>
    %cst_34 = arith.constant 1.000000e+00 : f32
    %97 = vector.broadcast %cst_34 : f32 to vector<1x128xf32>
    %98 = arith.divf %97, %96 : vector<1x128xf32>
    %99 = vector.extract_strided_slice %82 {offsets = [0, 256], sizes = [1, 128], strides = [1, 1]} : vector<1x512xf32> to vector<1x128xf32>
    %100 = math.tanh %99 : vector<1x128xf32>
    %101 = vector.extract_strided_slice %82 {offsets = [0, 384], sizes = [1, 128], strides = [1, 1]} : vector<1x512xf32> to vector<1x128xf32>
    %cst_35 = arith.constant 0.000000e+00 : f32
    %102 = vector.broadcast %cst_35 : f32 to vector<1x128xf32>
    %103 = arith.subf %102, %101 : vector<1x128xf32>
    %104 = math.exp %103 : vector<1x128xf32>
    %cst_36 = arith.constant 1.000000e+00 : f32
    %105 = vector.broadcast %cst_36 : f32 to vector<1x128xf32>
    %106 = arith.addf %105, %104 : vector<1x128xf32>
    %cst_37 = arith.constant 1.000000e+00 : f32
    %107 = vector.broadcast %cst_37 : f32 to vector<1x128xf32>
    %108 = arith.divf %107, %106 : vector<1x128xf32>
    %109 = arith.mulf %98, %77 : vector<1x128xf32>
    %110 = arith.mulf %90, %100 : vector<1x128xf32>
    %111 = arith.addf %109, %110 : vector<1x128xf32>
    %112 = math.tanh %111 : vector<1x128xf32>
    %113 = arith.mulf %108, %112 : vector<1x128xf32>
    %114 = vector.extract_strided_slice %11 {offsets = [3, 0], sizes = [1, 512], strides = [1, 1]} : vector<8x512xf32> to vector<1x512xf32>
    %cst_38 = arith.constant dense<0.000000e+00> : vector<1x512xf32>
    %115 = tpu.matmul %113, %1, %cst_38 {dimension_numbers = #tpu.dot_dimension_numbers<[1], [0], [0], [1], [0, 0, 1, 1], [], []>, precision = #tpu.contract_precision<fp32>} : vector<1x128xf32>, vector<128x512xf32>, vector<1x512xf32> -> vector<1x512xf32>
    %116 = arith.addf %114, %115 : vector<1x512xf32>
    %117 = vector.extract_strided_slice %116 {offsets = [0, 0], sizes = [1, 128], strides = [1, 1]} : vector<1x512xf32> to vector<1x128xf32>
    %cst_39 = arith.constant 0.000000e+00 : f32
    %118 = vector.broadcast %cst_39 : f32 to vector<1x128xf32>
    %119 = arith.subf %118, %117 : vector<1x128xf32>
    %120 = math.exp %119 : vector<1x128xf32>
    %cst_40 = arith.constant 1.000000e+00 : f32
    %121 = vector.broadcast %cst_40 : f32 to vector<1x128xf32>
    %122 = arith.addf %121, %120 : vector<1x128xf32>
    %cst_41 = arith.constant 1.000000e+00 : f32
    %123 = vector.broadcast %cst_41 : f32 to vector<1x128xf32>
    %124 = arith.divf %123, %122 : vector<1x128xf32>
    %125 = vector.extract_strided_slice %116 {offsets = [0, 128], sizes = [1, 128], strides = [1, 1]} : vector<1x512xf32> to vector<1x128xf32>
    %cst_42 = arith.constant 0.000000e+00 : f32
    %126 = vector.broadcast %cst_42 : f32 to vector<1x128xf32>
    %127 = arith.subf %126, %125 : vector<1x128xf32>
    %128 = math.exp %127 : vector<1x128xf32>
    %cst_43 = arith.constant 1.000000e+00 : f32
    %129 = vector.broadcast %cst_43 : f32 to vector<1x128xf32>
    %130 = arith.addf %129, %128 : vector<1x128xf32>
    %cst_44 = arith.constant 1.000000e+00 : f32
    %131 = vector.broadcast %cst_44 : f32 to vector<1x128xf32>
    %132 = arith.divf %131, %130 : vector<1x128xf32>
    %133 = vector.extract_strided_slice %116 {offsets = [0, 256], sizes = [1, 128], strides = [1, 1]} : vector<1x512xf32> to vector<1x128xf32>
    %134 = math.tanh %133 : vector<1x128xf32>
    %135 = vector.extract_strided_slice %116 {offsets = [0, 384], sizes = [1, 128], strides = [1, 1]} : vector<1x512xf32> to vector<1x128xf32>
    %cst_45 = arith.constant 0.000000e+00 : f32
    %136 = vector.broadcast %cst_45 : f32 to vector<1x128xf32>
    %137 = arith.subf %136, %135 : vector<1x128xf32>
    %138 = math.exp %137 : vector<1x128xf32>
    %cst_46 = arith.constant 1.000000e+00 : f32
    %139 = vector.broadcast %cst_46 : f32 to vector<1x128xf32>
    %140 = arith.addf %139, %138 : vector<1x128xf32>
    %cst_47 = arith.constant 1.000000e+00 : f32
    %141 = vector.broadcast %cst_47 : f32 to vector<1x128xf32>
    %142 = arith.divf %141, %140 : vector<1x128xf32>
    %143 = arith.mulf %132, %111 : vector<1x128xf32>
    %144 = arith.mulf %124, %134 : vector<1x128xf32>
    %145 = arith.addf %143, %144 : vector<1x128xf32>
    %146 = math.tanh %145 : vector<1x128xf32>
    %147 = arith.mulf %142, %146 : vector<1x128xf32>
    %148 = vector.extract_strided_slice %11 {offsets = [4, 0], sizes = [1, 512], strides = [1, 1]} : vector<8x512xf32> to vector<1x512xf32>
    %cst_48 = arith.constant dense<0.000000e+00> : vector<1x512xf32>
    %149 = tpu.matmul %147, %1, %cst_48 {dimension_numbers = #tpu.dot_dimension_numbers<[1], [0], [0], [1], [0, 0, 1, 1], [], []>, precision = #tpu.contract_precision<fp32>} : vector<1x128xf32>, vector<128x512xf32>, vector<1x512xf32> -> vector<1x512xf32>
    %150 = arith.addf %148, %149 : vector<1x512xf32>
    %151 = vector.extract_strided_slice %150 {offsets = [0, 0], sizes = [1, 128], strides = [1, 1]} : vector<1x512xf32> to vector<1x128xf32>
    %cst_49 = arith.constant 0.000000e+00 : f32
    %152 = vector.broadcast %cst_49 : f32 to vector<1x128xf32>
    %153 = arith.subf %152, %151 : vector<1x128xf32>
    %154 = math.exp %153 : vector<1x128xf32>
    %cst_50 = arith.constant 1.000000e+00 : f32
    %155 = vector.broadcast %cst_50 : f32 to vector<1x128xf32>
    %156 = arith.addf %155, %154 : vector<1x128xf32>
    %cst_51 = arith.constant 1.000000e+00 : f32
    %157 = vector.broadcast %cst_51 : f32 to vector<1x128xf32>
    %158 = arith.divf %157, %156 : vector<1x128xf32>
    %159 = vector.extract_strided_slice %150 {offsets = [0, 128], sizes = [1, 128], strides = [1, 1]} : vector<1x512xf32> to vector<1x128xf32>
    %cst_52 = arith.constant 0.000000e+00 : f32
    %160 = vector.broadcast %cst_52 : f32 to vector<1x128xf32>
    %161 = arith.subf %160, %159 : vector<1x128xf32>
    %162 = math.exp %161 : vector<1x128xf32>
    %cst_53 = arith.constant 1.000000e+00 : f32
    %163 = vector.broadcast %cst_53 : f32 to vector<1x128xf32>
    %164 = arith.addf %163, %162 : vector<1x128xf32>
    %cst_54 = arith.constant 1.000000e+00 : f32
    %165 = vector.broadcast %cst_54 : f32 to vector<1x128xf32>
    %166 = arith.divf %165, %164 : vector<1x128xf32>
    %167 = vector.extract_strided_slice %150 {offsets = [0, 256], sizes = [1, 128], strides = [1, 1]} : vector<1x512xf32> to vector<1x128xf32>
    %168 = math.tanh %167 : vector<1x128xf32>
    %169 = vector.extract_strided_slice %150 {offsets = [0, 384], sizes = [1, 128], strides = [1, 1]} : vector<1x512xf32> to vector<1x128xf32>
    %cst_55 = arith.constant 0.000000e+00 : f32
    %170 = vector.broadcast %cst_55 : f32 to vector<1x128xf32>
    %171 = arith.subf %170, %169 : vector<1x128xf32>
    %172 = math.exp %171 : vector<1x128xf32>
    %cst_56 = arith.constant 1.000000e+00 : f32
    %173 = vector.broadcast %cst_56 : f32 to vector<1x128xf32>
    %174 = arith.addf %173, %172 : vector<1x128xf32>
    %cst_57 = arith.constant 1.000000e+00 : f32
    %175 = vector.broadcast %cst_57 : f32 to vector<1x128xf32>
    %176 = arith.divf %175, %174 : vector<1x128xf32>
    %177 = arith.mulf %166, %145 : vector<1x128xf32>
    %178 = arith.mulf %158, %168 : vector<1x128xf32>
    %179 = arith.addf %177, %178 : vector<1x128xf32>
    %180 = math.tanh %179 : vector<1x128xf32>
    %181 = arith.mulf %176, %180 : vector<1x128xf32>
    %182 = vector.extract_strided_slice %11 {offsets = [5, 0], sizes = [1, 512], strides = [1, 1]} : vector<8x512xf32> to vector<1x512xf32>
    %cst_58 = arith.constant dense<0.000000e+00> : vector<1x512xf32>
    %183 = tpu.matmul %181, %1, %cst_58 {dimension_numbers = #tpu.dot_dimension_numbers<[1], [0], [0], [1], [0, 0, 1, 1], [], []>, precision = #tpu.contract_precision<fp32>} : vector<1x128xf32>, vector<128x512xf32>, vector<1x512xf32> -> vector<1x512xf32>
    %184 = arith.addf %182, %183 : vector<1x512xf32>
    %185 = vector.extract_strided_slice %184 {offsets = [0, 0], sizes = [1, 128], strides = [1, 1]} : vector<1x512xf32> to vector<1x128xf32>
    %cst_59 = arith.constant 0.000000e+00 : f32
    %186 = vector.broadcast %cst_59 : f32 to vector<1x128xf32>
    %187 = arith.subf %186, %185 : vector<1x128xf32>
    %188 = math.exp %187 : vector<1x128xf32>
    %cst_60 = arith.constant 1.000000e+00 : f32
    %189 = vector.broadcast %cst_60 : f32 to vector<1x128xf32>
    %190 = arith.addf %189, %188 : vector<1x128xf32>
    %cst_61 = arith.constant 1.000000e+00 : f32
    %191 = vector.broadcast %cst_61 : f32 to vector<1x128xf32>
    %192 = arith.divf %191, %190 : vector<1x128xf32>
    %193 = vector.extract_strided_slice %184 {offsets = [0, 128], sizes = [1, 128], strides = [1, 1]} : vector<1x512xf32> to vector<1x128xf32>
    %cst_62 = arith.constant 0.000000e+00 : f32
    %194 = vector.broadcast %cst_62 : f32 to vector<1x128xf32>
    %195 = arith.subf %194, %193 : vector<1x128xf32>
    %196 = math.exp %195 : vector<1x128xf32>
    %cst_63 = arith.constant 1.000000e+00 : f32
    %197 = vector.broadcast %cst_63 : f32 to vector<1x128xf32>
    %198 = arith.addf %197, %196 : vector<1x128xf32>
    %cst_64 = arith.constant 1.000000e+00 : f32
    %199 = vector.broadcast %cst_64 : f32 to vector<1x128xf32>
    %200 = arith.divf %199, %198 : vector<1x128xf32>
    %201 = vector.extract_strided_slice %184 {offsets = [0, 256], sizes = [1, 128], strides = [1, 1]} : vector<1x512xf32> to vector<1x128xf32>
    %202 = math.tanh %201 : vector<1x128xf32>
    %203 = vector.extract_strided_slice %184 {offsets = [0, 384], sizes = [1, 128], strides = [1, 1]} : vector<1x512xf32> to vector<1x128xf32>
    %cst_65 = arith.constant 0.000000e+00 : f32
    %204 = vector.broadcast %cst_65 : f32 to vector<1x128xf32>
    %205 = arith.subf %204, %203 : vector<1x128xf32>
    %206 = math.exp %205 : vector<1x128xf32>
    %cst_66 = arith.constant 1.000000e+00 : f32
    %207 = vector.broadcast %cst_66 : f32 to vector<1x128xf32>
    %208 = arith.addf %207, %206 : vector<1x128xf32>
    %cst_67 = arith.constant 1.000000e+00 : f32
    %209 = vector.broadcast %cst_67 : f32 to vector<1x128xf32>
    %210 = arith.divf %209, %208 : vector<1x128xf32>
    %211 = arith.mulf %200, %179 : vector<1x128xf32>
    %212 = arith.mulf %192, %202 : vector<1x128xf32>
    %213 = arith.addf %211, %212 : vector<1x128xf32>
    %214 = math.tanh %213 : vector<1x128xf32>
    %215 = arith.mulf %210, %214 : vector<1x128xf32>
    %216 = vector.extract_strided_slice %11 {offsets = [6, 0], sizes = [1, 512], strides = [1, 1]} : vector<8x512xf32> to vector<1x512xf32>
    %cst_68 = arith.constant dense<0.000000e+00> : vector<1x512xf32>
    %217 = tpu.matmul %215, %1, %cst_68 {dimension_numbers = #tpu.dot_dimension_numbers<[1], [0], [0], [1], [0, 0, 1, 1], [], []>, precision = #tpu.contract_precision<fp32>} : vector<1x128xf32>, vector<128x512xf32>, vector<1x512xf32> -> vector<1x512xf32>
    %218 = arith.addf %216, %217 : vector<1x512xf32>
    %219 = vector.extract_strided_slice %218 {offsets = [0, 0], sizes = [1, 128], strides = [1, 1]} : vector<1x512xf32> to vector<1x128xf32>
    %cst_69 = arith.constant 0.000000e+00 : f32
    %220 = vector.broadcast %cst_69 : f32 to vector<1x128xf32>
    %221 = arith.subf %220, %219 : vector<1x128xf32>
    %222 = math.exp %221 : vector<1x128xf32>
    %cst_70 = arith.constant 1.000000e+00 : f32
    %223 = vector.broadcast %cst_70 : f32 to vector<1x128xf32>
    %224 = arith.addf %223, %222 : vector<1x128xf32>
    %cst_71 = arith.constant 1.000000e+00 : f32
    %225 = vector.broadcast %cst_71 : f32 to vector<1x128xf32>
    %226 = arith.divf %225, %224 : vector<1x128xf32>
    %227 = vector.extract_strided_slice %218 {offsets = [0, 128], sizes = [1, 128], strides = [1, 1]} : vector<1x512xf32> to vector<1x128xf32>
    %cst_72 = arith.constant 0.000000e+00 : f32
    %228 = vector.broadcast %cst_72 : f32 to vector<1x128xf32>
    %229 = arith.subf %228, %227 : vector<1x128xf32>
    %230 = math.exp %229 : vector<1x128xf32>
    %cst_73 = arith.constant 1.000000e+00 : f32
    %231 = vector.broadcast %cst_73 : f32 to vector<1x128xf32>
    %232 = arith.addf %231, %230 : vector<1x128xf32>
    %cst_74 = arith.constant 1.000000e+00 : f32
    %233 = vector.broadcast %cst_74 : f32 to vector<1x128xf32>
    %234 = arith.divf %233, %232 : vector<1x128xf32>
    %235 = vector.extract_strided_slice %218 {offsets = [0, 256], sizes = [1, 128], strides = [1, 1]} : vector<1x512xf32> to vector<1x128xf32>
    %236 = math.tanh %235 : vector<1x128xf32>
    %237 = vector.extract_strided_slice %218 {offsets = [0, 384], sizes = [1, 128], strides = [1, 1]} : vector<1x512xf32> to vector<1x128xf32>
    %cst_75 = arith.constant 0.000000e+00 : f32
    %238 = vector.broadcast %cst_75 : f32 to vector<1x128xf32>
    %239 = arith.subf %238, %237 : vector<1x128xf32>
    %240 = math.exp %239 : vector<1x128xf32>
    %cst_76 = arith.constant 1.000000e+00 : f32
    %241 = vector.broadcast %cst_76 : f32 to vector<1x128xf32>
    %242 = arith.addf %241, %240 : vector<1x128xf32>
    %cst_77 = arith.constant 1.000000e+00 : f32
    %243 = vector.broadcast %cst_77 : f32 to vector<1x128xf32>
    %244 = arith.divf %243, %242 : vector<1x128xf32>
    %245 = arith.mulf %234, %213 : vector<1x128xf32>
    %246 = arith.mulf %226, %236 : vector<1x128xf32>
    %247 = arith.addf %245, %246 : vector<1x128xf32>
    %248 = math.tanh %247 : vector<1x128xf32>
    %249 = arith.mulf %244, %248 : vector<1x128xf32>
    %250 = vector.extract_strided_slice %11 {offsets = [7, 0], sizes = [1, 512], strides = [1, 1]} : vector<8x512xf32> to vector<1x512xf32>
    %cst_78 = arith.constant dense<0.000000e+00> : vector<1x512xf32>
    %251 = tpu.matmul %249, %1, %cst_78 {dimension_numbers = #tpu.dot_dimension_numbers<[1], [0], [0], [1], [0, 0, 1, 1], [], []>, precision = #tpu.contract_precision<fp32>} : vector<1x128xf32>, vector<128x512xf32>, vector<1x512xf32> -> vector<1x512xf32>
    %252 = arith.addf %250, %251 : vector<1x512xf32>
    %253 = vector.extract_strided_slice %252 {offsets = [0, 0], sizes = [1, 128], strides = [1, 1]} : vector<1x512xf32> to vector<1x128xf32>
    %cst_79 = arith.constant 0.000000e+00 : f32
    %254 = vector.broadcast %cst_79 : f32 to vector<1x128xf32>
    %255 = arith.subf %254, %253 : vector<1x128xf32>
    %256 = math.exp %255 : vector<1x128xf32>
    %cst_80 = arith.constant 1.000000e+00 : f32
    %257 = vector.broadcast %cst_80 : f32 to vector<1x128xf32>
    %258 = arith.addf %257, %256 : vector<1x128xf32>
    %cst_81 = arith.constant 1.000000e+00 : f32
    %259 = vector.broadcast %cst_81 : f32 to vector<1x128xf32>
    %260 = arith.divf %259, %258 : vector<1x128xf32>
    %261 = vector.extract_strided_slice %252 {offsets = [0, 128], sizes = [1, 128], strides = [1, 1]} : vector<1x512xf32> to vector<1x128xf32>
    %cst_82 = arith.constant 0.000000e+00 : f32
    %262 = vector.broadcast %cst_82 : f32 to vector<1x128xf32>
    %263 = arith.subf %262, %261 : vector<1x128xf32>
    %264 = math.exp %263 : vector<1x128xf32>
    %cst_83 = arith.constant 1.000000e+00 : f32
    %265 = vector.broadcast %cst_83 : f32 to vector<1x128xf32>
    %266 = arith.addf %265, %264 : vector<1x128xf32>
    %cst_84 = arith.constant 1.000000e+00 : f32
    %267 = vector.broadcast %cst_84 : f32 to vector<1x128xf32>
    %268 = arith.divf %267, %266 : vector<1x128xf32>
    %269 = vector.extract_strided_slice %252 {offsets = [0, 256], sizes = [1, 128], strides = [1, 1]} : vector<1x512xf32> to vector<1x128xf32>
    %270 = math.tanh %269 : vector<1x128xf32>
    %271 = vector.extract_strided_slice %252 {offsets = [0, 384], sizes = [1, 128], strides = [1, 1]} : vector<1x512xf32> to vector<1x128xf32>
    %cst_85 = arith.constant 0.000000e+00 : f32
    %272 = vector.broadcast %cst_85 : f32 to vector<1x128xf32>
    %273 = arith.subf %272, %271 : vector<1x128xf32>
    %274 = math.exp %273 : vector<1x128xf32>
    %cst_86 = arith.constant 1.000000e+00 : f32
    %275 = vector.broadcast %cst_86 : f32 to vector<1x128xf32>
    %276 = arith.addf %275, %274 : vector<1x128xf32>
    %cst_87 = arith.constant 1.000000e+00 : f32
    %277 = vector.broadcast %cst_87 : f32 to vector<1x128xf32>
    %278 = arith.divf %277, %276 : vector<1x128xf32>
    %279 = arith.mulf %268, %247 : vector<1x128xf32>
    %280 = arith.mulf %260, %270 : vector<1x128xf32>
    %281 = arith.addf %279, %280 : vector<1x128xf32>
    %282 = math.tanh %281 : vector<1x128xf32>
    %283 = arith.mulf %278, %282 : vector<1x128xf32>
    %284 = tpu.concatenate %45, %79, %113, %147, %181, %215, %249, %283 in 0 : vector<1x128xf32>, vector<1x128xf32>, vector<1x128xf32>, vector<1x128xf32>, vector<1x128xf32>, vector<1x128xf32>, vector<1x128xf32>, vector<1x128xf32> -> vector<8x128xf32>
    %285 = arith.index_cast %6 : i32 to index
    %c0_88 = arith.constant 0 : index
    %286 = vector.load %arg9[%285, %c0_88] : memref<8x128xf32, #tpu.memory_space<vmem>>, vector<8x128xf32>
    tpu.vector_store %arg9[%285, %c0_88], %284 {strides = array<i32>} : memref<8x128xf32, #tpu.memory_space<vmem>>, vector<8x128xf32>,
    %c1_i32 = arith.constant 1 : i32
    %c0_89 = arith.constant 0 : index
    %c0_90 = arith.constant 0 : index
    %287 = vector.load %arg9[%c0_89, %c0_90] : memref<8x128xf32, #tpu.memory_space<vmem>>, vector<8x128xf32>
    %c0_91 = arith.constant 0 : index
    %c0_92 = arith.constant 0 : index
    %288 = vector.load %arg4[%c0_91, %c0_92] : memref<128x64xf32, #tpu.memory_space<vmem>>, vector<128x64xf32>
    %c0_93 = arith.constant 0 : index
    %c0_94 = arith.constant 0 : index
    %289 = vector.load %arg5[%c0_93, %c0_94] : memref<1x64xf32, #tpu.memory_space<vmem>>, vector<1x64xf32>
    %cst_95 = arith.constant dense<0.000000e+00> : vector<8x64xf32>
    %290 = tpu.matmul %287, %288, %cst_95 {dimension_numbers = #tpu.dot_dimension_numbers<[1], [0], [0], [1], [0, 0, 1, 1], [], []>, precision = #tpu.contract_precision<fp32>} : vector<8x128xf32>, vector<128x64xf32>, vector<8x64xf32> -> vector<8x64xf32>
    %291 = vector.broadcast %289 : vector<1x64xf32> to vector<8x64xf32>
    %292 = arith.addf %290, %291 : vector<8x64xf32>
    %cst_96 = arith.constant 0.000000e+00 : f32
    %293 = vector.broadcast %cst_96 : f32 to vector<8x64xf32>
    %294 = arith.maximumf %292, %293 : vector<8x64xf32>
    %c0_97 = arith.constant 0 : index
    %c0_98 = arith.constant 0 : index
    %295 = vector.load %arg6[%c0_97, %c0_98] : memref<64x128xf32, #tpu.memory_space<vmem>>, vector<64x128xf32>
    %c0_99 = arith.constant 0 : index
    %c0_100 = arith.constant 0 : index
    %296 = vector.load %arg7[%c0_99, %c0_100] : memref<1x128xf32, #tpu.memory_space<vmem>>, vector<1x128xf32>
    %cst_101 = arith.constant dense<0.000000e+00> : vector<8x128xf32>
    %297 = tpu.matmul %294, %295, %cst_101 {dimension_numbers = #tpu.dot_dimension_numbers<[1], [0], [0], [1], [0, 0, 1, 1], [], []>, precision = #tpu.contract_precision<fp32>} : vector<8x64xf32>, vector<64x128xf32>, vector<8x128xf32> -> vector<8x128xf32>
    %298 = vector.broadcast %296 : vector<1x128xf32> to vector<8x128xf32>
    %299 = arith.addf %297, %298 : vector<8x128xf32>
    %cst_102 = arith.constant 0.000000e+00 : f32
    %300 = vector.broadcast %cst_102 : f32 to vector<8x128xf32>
    %301 = arith.subf %300, %299 : vector<8x128xf32>
    %302 = math.exp %301 : vector<8x128xf32>
    %cst_103 = arith.constant 1.000000e+00 : f32
    %303 = vector.broadcast %cst_103 : f32 to vector<8x128xf32>
    %304 = arith.addf %303, %302 : vector<8x128xf32>
    %cst_104 = arith.constant 1.000000e+00 : f32
    %305 = vector.broadcast %cst_104 : f32 to vector<8x128xf32>
    %306 = arith.divf %305, %304 : vector<8x128xf32>
    %c0_105 = arith.constant 0 : index
    %c0_106 = arith.constant 0 : index
    %307 = vector.load %arg8[%c0_105, %c0_106] : memref<8x128xf32, #tpu.memory_space<vmem>>, vector<8x128xf32>
    tpu.vector_store %arg8[%c0_105, %c0_106], %306 {strides = array<i32>} : memref<8x128xf32, #tpu.memory_space<vmem>>, vector<8x128xf32>,
    return
  }
}

</mosaic_0001>

<bundles_post_ra>
// kernel: tpu_custom_call.1
= control target key start
LH: loop header
LB: loop body
LE: loop exit
PB: predicated region body
PF: predicated region fallthrough
CT: control target
= control target key end

     0   :  { %13 = vsyncpa [#allocation4], 0  ;;  %s24066_s0 = inlined_call_operand.vmem [shape: f32[8,16], index: 0, kind: input, shape index: {}]   ;;  %s24067_s1 = inlined_call_operand.vmem [shape: f32[16,512], index: 1, kind: input, shape index: {}]   ;;  %s24068_s2 = inlined_call_operand.hbm [shape: f32[128,512], index: 2, kind: input, shape index: {}]   ;;  %s24069_s3 = inlined_call_operand.vmem [shape: f32[1,512], index: 3, kind: input, shape index: {}]   ;;  %s24070_s4 = inlined_call_operand.vmem [shape: f32[128,64], index: 4, kind: input, shape index: {}]   ;;  %s24071_s5 = inlined_call_operand.vmem [shape: f32[1,64], index: 5, kind: input, shape index: {}]   ;;  %s24072_s6 = inlined_call_operand.vmem [shape: f32[64,128], index: 6, kind: input, shape index: {}]   ;;  %s24073_s7 = inlined_call_operand.vmem [shape: f32[1,128], index: 7, kind: input, shape index: {}]   ;;  %s24074_s8 = inlined_call_operand.hbm [shape: f32[8,128], index: 8, kind: output, shape index: {}]  }
   0x1   :  { %14 = vsyncpa [#allocation5], 0  ;;  %s20596_s27 = smov [#allocation3]   ;;  %s20548_s9 = scalar_lea.hbm %s24068_s2, 8192 }
   0x2   :  { %s24_s28 = sshll.u32 %s20596_s27, 4  ;;  %p20549_p0 = scmp.ne.s32.totalorder %s24068_s2, %s20548_s9  ;;  %s25_s28 = int_to_ptr.vmem [resolvable:$true] %s24_s28 }
   0x3   :  { %p20552_p1 = scmp.lt.u32.totalorder %s20548_s9, %s24068_s2 }
   0x5   :  { %p20554_p2 = pnand %p20552_p1, %p20549_p0 }
   0x7   :  { %20557 = shalt.err (!%p20554_p2)
}
   0x8   :  { %s20558_s14 = scalar_lea.vmem %s25_s28, 8192  ;;  %p20563_p4 = scmp.lt.s32.totalorder %s25_s28, %s25_s28 }
   0x9   :  { %p20559_p3 = scmp.ne.s32.totalorder %s25_s28, %s20558_s14  ;;  %p20564_p5 = scmp.lt.s32.totalorder %s20558_s14, %s20558_s14 }
   0xb   :  { %p20565_p6 = por %p20564_p5, %p20563_p4 }
   0xd   :  { %p20566_p7 = pnand %p20565_p6, %p20559_p3 }
   0xf   :  { %20569 = shalt.err (!%p20566_p7)
}
  0x10   :  { %s20597_s15 = smov 512   ;;  %s20598_s16 = smov 32  }
  0x11   :  { %30 = dma.hbm_to_vmem [thread:$0]  %s24068_s2, 8192, %s25_s28, [#allocation4], %s20597_s15, %s20597_s15, %s20598_s16  }
  0x12   :  { %20592 = dma.done.wait [#allocation4], 8192  }
  0x13   :  { %20593 = vsyncadd [#allocation4], 4294959104  ;;  %v24092_v0 = vmov 0.0   ;;  %vm139_vm0 = vcmask 130048   ;;  %v45_v1 = vld [vmem:[%s24067_s1 + $0x8] sm:$0xff]  ;;  %v44_v3 = vld [vmem:[%s24067_s1] sm:$0xff] }
  0x14   :  { %211 = vmatprep.mubr.f32.mxu1 %v24092_v0  ;;  %550 = vmatprep.mubr.f32.mxu0 %v24092_v0  ;;  %v49_v2 = vld [vmem:[%s24067_s1 + $0x28] sm:$0xff]  ;;  %v143_v4 = vand.u32 4294901760, %v45_v1  ;;  %v48_v6 = vld [vmem:[%s24067_s1 + $0x20] sm:$0xff]  ;;  %v145_v7 = vand.u32 4294901760, %v44_v3  ;;  %vm15126_vm1 = vcmask 1040384   ;;  %vm15128_vm2 = vcmask 1041408  }
  0x15   :  { %v147_v5 = vand.u32 4294901760, %v49_v2  ;;  %v117_v8 = vld [vmem:[%s24066_s0] sm:$0xff]  ;;  %v53_v9 = vld [vmem:[#allocation3 + $0x8] sm:$0xff]  ;;  %v149_v10 = vand.u32 4294901760, %v48_v6  ;;  %vm15130_vm3 = vcmask 1042432   ;;  %vm15132_vm4 = vcmask 1043456  }
  0x16   :  { %v141_v11 = vsel %vm139_vm0, %v117_v8, 0  ;;  %v57_v12 = vld [vmem:[#allocation3 + $0x28] sm:$0xff]  ;;  %v1125_v13 = vand.u32 4294901760, %v53_v9  ;;  %v20679_v15 = vsub.f32 %v45_v1, %v143_v4  ;;  %v20683_v17 = vsub.f32 %v44_v3, %v145_v7  ;;  %v52_v38 = vld [vmem:[#allocation3] sm:$0xff]  ;;  %s20602_s12 = smov [#allocation6]  }
  0x17   :  { %v20677_v14 = vpack.c.bf16 %v147_v5, %v143_v4  ;;  %v20681_v16 = vsub.f32 %v49_v2, %v147_v5  ;;  %v20685_v18 = vpack.c.bf16 %v149_v10, %v145_v7  ;;  %v20687_v19 = vsub.f32 %v48_v6, %v149_v10  ;;  %v56_v39 = vld [vmem:[#allocation3 + $0x20] sm:$0xff]  ;;  %v61_v48 = vld [vmem:[#allocation3 + $0x48] sm:$0xff] }
  0x18   :  { %v20689_v20 = vand.u32 4294901760, %v141_v11  ;;  %v1129_v21 = vand.u32 4294901760, %v57_v12  ;;  %v225_v22 = vand.u32 4294901760, %v20679_v15  ;;  %v231_v24 = vand.u32 4294901760, %v20683_v17  ;;  %v65_v53 = vld [vmem:[#allocation3 + $0x68] sm:$0xff]  ;;  %v60_v54 = vld [vmem:[#allocation3 + $0x40] sm:$0xff] }
  0x19   :  { %16868 = vmatprep.subr.bf16.mxu1 %v20677_v14  ;;  %v237_v23 = vand.u32 4294901760, %v20681_v16  ;;  %v20695_v25 = vsub.f32 %v53_v9, %v1125_v13  ;;  %v243_v26 = vand.u32 4294901760, %v20687_v19  ;;  %v16875_v47 = vpack.c.bf16 %v20681_v16, %v20679_v15  ;;  %v64_v55 = vld [vmem:[#allocation3 + $0x60] sm:$0xff]  ;;  %v69_v60 = vld [vmem:[#allocation3 + $0x88] sm:$0xff] }
  0x1a   :  { %16870 = vmatpush1.bf16.msra.mxu1 %v20685_v18  ;;  %v20700_v27 = vsub.f32 %v141_v11, %v20689_v20  ;;  %v20702_v28 = vpack.c.bf16 %v1129_v21, %v1125_v13  ;;  %v20704_v29 = vsub.f32 %v57_v12, %v1129_v21  ;;  %v226_v30 = vsub.f32 %v20679_v15, %v225_v22  ;;  %v73_v2 = vld [vmem:[#allocation3 + $0xa8] sm:$0xff] }
  0x1b   :  { %v238_v31 = vsub.f32 %v20681_v16, %v237_v23  ;;  %v16883_v32 = vpack.c.bf16 %v237_v23, %v225_v22  ;;  %v232_v33 = vsub.f32 %v20683_v17, %v231_v24  ;;  %v244_v34 = vsub.f32 %v20687_v19, %v243_v26 }
  0x1c   :  { %24436 = vst [vmem:[#allocation9_spill] sm:$0xff] %v20702_v28  ;;  %v16885_v35 = vpack.c.bf16 %v243_v26, %v231_v24  ;;  %v20711_v36 = vand.u32 4294901760, %v20700_v27  ;;  %v24090_v37 = vand.u32 4294901760, %v20695_v25  ;;  %v227_v40 = vand.u32 4294901760, %v226_v30  ;;  %v68_v30 = vld [vmem:[#allocation3 + $0x80] sm:$0xff] }
  0x1d   :  { %v239_v41 = vand.u32 4294901760, %v238_v31  ;;  %16884 = vmatprep.subr.bf16.mxu0 %v16883_v32  ;;  %v233_v42 = vand.u32 4294901760, %v232_v33  ;;  %v24089_v43 = vand.u32 4294901760, %v20704_v29  ;;  %v245_v44 = vand.u32 4294901760, %v244_v34 }
  0x1e   :  { %16886 = vmatpush1.bf16.msra.mxu0 %v16885_v35  ;;  %v215_v45 = vsub.f32 %v20700_v27, %v20711_v36  ;;  %v1231_v46 = vsub.f32 %v20695_v25, %v24090_v37  ;;  %v1127_v51 = vand.u32 4294901760, %v52_v38  ;;  %v1131_v52 = vand.u32 4294901760, %v56_v39 }
  0x1f   :  { %v16871_v49 = vpack.c.bf16 %v239_v41, %v227_v40  ;;  %16888 = vmatprep.subr.bf16.mxu0 %v20677_v14  ;;  %v1243_v50 = vsub.f32 %v20704_v29, %v24089_v43  ;;  %v16873_v57 = vpack.c.bf16 %v245_v44, %v233_v42  ;;  %v16877_v59 = vpack.c.bf16 %v20687_v19, %v20683_v17  ;;  %v72_v41 = vld [vmem:[#allocation3 + $0xa0] sm:$0xff] }
  0x20   :  { %v20726_v56 = vand.u32 4294901760, %v215_v45  ;;  %v1232_v58 = vand.u32 4294901760, %v1231_v46  ;;  %v20731_v62 = vpack.c.bf16 %v1131_v52, %v1127_v51  ;;  %v20733_v63 = vsub.f32 %v52_v38, %v1127_v51 }
  0x21   :  { %16872 = vmatprep.subr.bf16.mxu1 %v16871_v49  ;;  %552 = vmatmul.mubr.f32.vlgmr.msra.gmra.mrb[0].mxu0 %v20689_v20  ;;  %v1244_v61 = vand.u32 4294901760, %v1243_v50  ;;  %v20735_v1 = vsub.f32 %v56_v39, %v1131_v52  ;;  %v1133_v3 = vand.u32 4294901760, %v61_v48  ;;  %v1137_v4 = vand.u32 4294901760, %v65_v53 }
  0x22   :  { %24437 = vst [vmem:[#allocation10_spill] sm:$0xff] %v20731_v62  ;;  %217 = vmatmul.mubr.f32.vlgmr.msra.gmra.mrb[0].mxu1 %v20726_v56  ;;  %16890 = vmatpush1.bf16.msra.mxu0 %v20685_v18  ;;  %v1135_v5 = vand.u32 4294901760, %v60_v54  ;;  %v1139_v6 = vand.u32 4294901760, %v64_v55  ;;  %v24088_v8 = vand.u32 4294901760, %v20733_v63  ;;  %v1141_v10 = vand.u32 4294901760, %v69_v60 }
  0x23   :  { %16874 = vmatpush1.bf16.msra.mxu1 %v16873_v57  ;;  %307 = vmatprep.mubr.f32.mxu1 %v24092_v0  ;;  %v20740_v7 = vpack.c.bf16 %v1244_v61, %v1232_v58  ;;  %v24087_v9 = vand.u32 4294901760, %v20735_v1  ;;  %v20745_v11 = vpack.c.bf16 %v1137_v4, %v1133_v3  ;;  %v20747_v12 = vsub.f32 %v61_v48, %v1133_v3  ;;  %v81_v57 = vld [vmem:[#allocation3 + $0xe8] sm:$0xff]  ;;  %v80_v3 = vld [vmem:[#allocation3 + $0xe0] sm:$0xff] }
  0x24   :  { %626 = vmatprep.mubr.f32.mxu0 %v24092_v0  ;;  %16876 = vmatprep.subr.bf16.mxu1 %v16875_v47  ;;  %v20749_v13 = vsub.f32 %v65_v53, %v1137_v4  ;;  %v1145_v15 = vand.u32 4294901760, %v73_v2  ;;  %v1237_v16 = vsub.f32 %v20733_v63, %v24088_v8  ;;  %v20758_v19 = vpack.c.bf16 %v1139_v6, %v1135_v5  ;;  %v77_v47 = vld [vmem:[#allocation3 + $0xc8] sm:$0xff] }
  0x25   :  { %24438 = vst [vmem:[#allocation11_spill] sm:$0xff] %v20740_v7  ;;  %24439 = vst [vmem:[#allocation12_spill] sm:$0xff] %v20745_v11  ;;  %16948 = vmatprep.subr.bf16.mxu0 %v20740_v7  ;;  %v1249_v17 = vsub.f32 %v20735_v1, %v24087_v9  ;;  %v20760_v21 = vsub.f32 %v60_v54, %v1135_v5  ;;  %v24085_v22 = vand.u32 4294901760, %v20747_v12  ;;  %v1143_v46 = vand.u32 4294901760, %v68_v30  ;;  %v97_v9 = vld [vmem:[#allocation3 + $0x168] sm:$0xff] }
  0x26   :  { %24440 = vst [vmem:[#allocation13_spill] sm:$0xff] %v20758_v19  ;;  %v24083_v23 = vand.u32 4294901760, %v20749_v13  ;;  %v20764_v24 = vsub.f32 %v64_v55, %v1139_v6  ;;  %v20766_v26 = vpack.c.bf16 %v1145_v15, %v1141_v10  ;;  %v1238_v31 = vand.u32 4294901760, %v1237_v16 }
  0x27   :  { %v1250_v32 = vand.u32 4294901760, %v1249_v17  ;;  %v24082_v33 = vand.u32 4294901760, %v20760_v21  ;;  %v20769_v34 = vsub.f32 %v69_v60, %v1141_v10  ;;  %v1255_v35 = vsub.f32 %v20747_v12, %v24085_v22 }
  0x28   :  { %24441 = vst [vmem:[#allocation14_spill] sm:$0xff] %v20766_v26  ;;  %v1267_v38 = vsub.f32 %v20749_v13, %v24083_v23  ;;  %v24081_v39 = vand.u32 4294901760, %v20764_v24  ;;  %v20778_v40 = vsub.f32 %v73_v2, %v1145_v15  ;;  %v1147_v54 = vand.u32 4294901760, %v72_v41  ;;  %v76_v2 = vld [vmem:[#allocation3 + $0xc0] sm:$0xff] }
  0x29   :  { %628 = vmatmul.mubr.f32.vlgmr.msra.gmra.mrb[0].mxu0 %v20689_v20  ;;  %v20781_v42 = vpack.c.bf16 %v1250_v32, %v1238_v31  ;;  %v1261_v44 = vsub.f32 %v20760_v21, %v24082_v33  ;;  %v24080_v45 = vand.u32 4294901760, %v20769_v34  ;;  %v1256_v48 = vand.u32 4294901760, %v1255_v35 }
  0x2a   :  { %309 = vmatmul.mubr.f32.vlgmr.msra.gmra.mrb[0].mxu1 %v20689_v20  ;;  %v1268_v49 = vand.u32 4294901760, %v1267_v38  ;;  %v1273_v50 = vsub.f32 %v20764_v24, %v24081_v39  ;;  %v24079_v51 = vand.u32 4294901760, %v20778_v40  ;;  %1452 = vmatprep.mubr.f32.mxu0 %v24092_v0  ;;  %v20797_v55 = vsub.f32 %v68_v30, %v1143_v46  ;;  %v47_v38 = vld [vmem:[%s24067_s1 + $0x18] sm:$0xff] }
  0x2b   :  { %24442 = vst [vmem:[#allocation15_spill] sm:$0xff] %v20781_v42  ;;  %16950 = vmatpush1.bf16.msra.mxu0 %v20781_v42  ;;  %16878 = vmatpush1.bf16.msra.mxu1 %v16877_v59  ;;  %v1262_v52 = vand.u32 4294901760, %v1261_v44  ;;  %v1279_v53 = vsub.f32 %v20769_v34, %v24080_v45  ;;  %v1149_v59 = vand.u32 4294901760, %v77_v47  ;;  %v20806_v5 = vpack.c.bf16 %v1147_v54, %v1143_v46 }
  0x2c   :  { %v20799_v58 = vpack.c.bf16 %v1268_v49, %v1256_v48  ;;  %v1274_v60 = vand.u32 4294901760, %v1273_v50  ;;  %387 = vmatprep.mubr.f32.mxu1 %v24092_v0  ;;  %v1291_v61 = vsub.f32 %v20778_v40, %v24079_v51  ;;  %16880 = vmatprep.subr.bf16.mxu1 %v20677_v14  ;;  %v24077_v6 = vand.u32 4294901760, %v20797_v55  ;;  %v51_v48 = vld [vmem:[%s24067_s1 + $0x38] sm:$0xff]  ;;  %v85_v49 = vld [vmem:[#allocation3 + $0x108] sm:$0xff] }
  0x2d   :  { %v1280_v4 = vand.u32 4294901760, %v1279_v53  ;;  %24444 = vst [vmem:[#allocation17_spill] sm:$0xff] %v20806_v5  ;;  %v20809_v10 = vsub.f32 %v72_v41, %v1147_v54  ;;  %v1153_v17 = vand.u32 4294901760, %v81_v57  ;;  %v20814_v30 = vsub.f32 %v77_v47, %v1149_v59 }
  0x2e   :  { %24443 = vst [vmem:[#allocation16_spill] sm:$0xff] %v20799_v58  ;;  %16952 = vmatprep.subr.bf16.mxu0 %v20799_v58  ;;  %v20812_v15 = vpack.c.bf16 %v1274_v60, %v1262_v52  ;;  %v1292_v16 = vand.u32 4294901760, %v1291_v61  ;;  %v1285_v14 = vsub.f32 %v20797_v55, %v24077_v6  ;;  %v1151_v32 = vand.u32 4294901760, %v76_v2 }
  0x2f   :  { %v24076_v31 = vand.u32 4294901760, %v20809_v10  ;;  %v1155_v35 = vand.u32 4294901760, %v80_v3  ;;  %v20826_v44 = vpack.c.bf16 %v1153_v17, %v1149_v59  ;;  %v24075_v46 = vand.u32 4294901760, %v20814_v30 }
  0x30   :  { %24445 = vst [vmem:[#allocation18_spill] sm:$0xff] %v20812_v15  ;;  %16954 = vmatpush1.bf16.msra.mxu0 %v20812_v15  ;;  %v20824_v41 = vpack.c.bf16 %v1292_v16, %v1280_v4  ;;  %v20829_v47 = vsub.f32 %v81_v57, %v1153_v17  ;;  %v1286_v50 = vand.u32 4294901760, %v1285_v14  ;;  %v20839_v54 = vsub.f32 %v76_v2, %v1151_v32  ;;  %v89_v17 = vld [vmem:[#allocation3 + $0x128] sm:$0xff] }
  0x31   :  { %24447 = vst [vmem:[#allocation20_spill] sm:$0xff] %v20826_v44  ;;  %v1297_v52 = vsub.f32 %v20809_v10, %v24076_v31  ;;  %v20837_v53 = vpack.c.bf16 %v1155_v35, %v1151_v32  ;;  %v1303_v57 = vsub.f32 %v20814_v30, %v24075_v46  ;;  %v20847_v61 = vsub.f32 %v80_v3, %v1155_v35  ;;  %v50_v35 = vld [vmem:[%s24067_s1 + $0x30] sm:$0xff] }
  0x32   :  { %24446 = vst [vmem:[#allocation19_spill] sm:$0xff] %v20824_v41  ;;  %390 = vmatmul.mubr.f32.vlgmr.msra.gmra.mrb[0].mxu1 %v20700_v27  ;;  %16956 = vmatprep.subr.bf16.mxu0 %v20824_v41  ;;  %v24078_v60 = vand.u32 4294901760, %v20829_v47  ;;  %v634_v59 = vand.u32 4294901760, %v47_v38  ;;  %v24084_v16 = vand.u32 4294901760, %v20839_v54  ;;  %v638_v2 = vand.u32 4294901760, %v51_v48 }
  0x33   :  { %24448 = vst [vmem:[#allocation21_spill] sm:$0xff] %v20837_v53  ;;  %v1298_v4 = vand.u32 4294901760, %v1297_v52  ;;  %16882 = vmatpush1.bf16.msra.mxu1 %v20685_v18  ;;  %464 = vmatprep.mubr.f32.mxu1 %v24092_v0  ;;  %v1157_v14 = vand.u32 4294901760, %v85_v49  ;;  %v1304_v32 = vand.u32 4294901760, %v1303_v57  ;;  %v24086_v31 = vand.u32 4294901760, %v20847_v61  ;;  %v46_v18 = vld [vmem:[%s24067_s1 + $0x10] sm:$0xff] }
  0x34   :  { %v1315_v46 = vsub.f32 %v20829_v47, %v24078_v60  ;;  %v20856_v3 = vsub.f32 %v47_v38, %v634_v59  ;;  %v84_v52 = vld [vmem:[#allocation3 + $0x100] sm:$0xff]  ;;  %v1309_v57 = vsub.f32 %v20839_v54, %v24084_v16  ;;  %v20869_v60 = vpack.c.bf16 %v638_v2, %v634_v59  ;;  %s16376_s1 = sshll.u32 %s20602_s12, 4  ;;  %s16377_s1 = int_to_ptr.vmem [resolvable:$true] %s16376_s1 }
  0x35   :  { %v20864_v6 = vpack.c.bf16 %v1298_v4, %v1286_v50  ;;  %v20871_v51 = vsub.f32 %v51_v48, %v638_v2  ;;  %v1321_v45 = vsub.f32 %v20847_v61, %v24086_v31  ;;  %v1161_v39 = vand.u32 4294901760, %v89_v17  ;;  %v88_v16 = vld [vmem:[#allocation3 + $0x120] sm:$0xff]  ;;  %v93_v31 = vld [vmem:[#allocation3 + $0x148] sm:$0xff]  ;;  %s20570_s13 = scalar_lea.vmem %s16377_s1, 128  ;;  %p20575_p9 = scmp.lt.s32.totalorder %s16377_s1, %s16377_s1 }
  0x36   :  { %v1316_v38 = vand.u32 4294901760, %v1315_v46  ;;  %v20876_v33 = vsub.f32 %v85_v49, %v1157_v14  ;;  %v1310_v50 = vand.u32 4294901760, %v1309_v57  ;;  %16892 = vmatprep.subr.bf16.mxu1 %v20869_v60  ;;  %v636_v4 = vand.u32 4294901760, %v46_v18  ;;  %p20571_p8 = scmp.ne.s32.totalorder %s16377_s1, %s20570_s13  ;;  %p20576_p10 = scmp.lt.s32.totalorder %s20570_s13, %s20570_s13 }
  0x37   :  { %24449 = vst [vmem:[#allocation22_spill] sm:$0xff] %v20864_v6  ;;  %16958 = vmatpush1.bf16.msra.mxu0 %v20864_v6  ;;  %v640_v23 = vand.u32 4294901760, %v50_v35  ;;  %v1159_v59 = vand.u32 4294901760, %v84_v52  ;;  %v1322_v48 = vand.u32 4294901760, %v1321_v45  ;;  %v20882_v46 = vpack.c.bf16 %v1161_v39, %v1157_v14 }
  0x38   :  { %v20880_v22 = vpack.c.bf16 %v1316_v38, %v1304_v32  ;;  %v24091_v2 = vand.u32 4294901760, %v20876_v33  ;;  %v20885_v49 = vsub.f32 %v89_v17, %v1161_v39  ;;  %v20889_v57 = vsub.f32 %v46_v18, %v636_v4  ;;  %p20577_p11 = por %p20576_p10, %p20575_p9 }
  0x39   :  { %24451 = vst [vmem:[#allocation24_spill] sm:$0xff] %v20882_v46  ;;  %v20887_v8 = vpack.c.bf16 %v640_v23, %v636_v4  ;;  %v20891_v43 = vsub.f32 %v50_v35, %v640_v23  ;;  %v20894_v37 = vpack.c.bf16 %v1322_v48, %v1310_v50  ;;  %v1163_v14 = vand.u32 4294901760, %v88_v16 }
  0x3a   :  { %24450 = vst [vmem:[#allocation23_spill] sm:$0xff] %v20880_v22  ;;  %16960 = vmatprep.subr.bf16.mxu0 %v20880_v22  ;;  %468 = vmatmul.mubr.f32.vlgmr.msra.gmra.mrb[0].mxu1 %v20711_v36  ;;  %v1327_v45 = vsub.f32 %v20876_v33, %v24091_v2  ;;  %v20900_v32 = vsub.f32 %v84_v52, %v1159_v59  ;;  %v24096_v39 = vand.u32 4294901760, %v20885_v49  ;;  %v1165_v23 = vand.u32 4294901760, %v93_v31  ;;  %v92_v52 = vld [vmem:[#allocation3 + $0x140] sm:$0xff]  ;;  %p20578_p12 = pnand %p20577_p11, %p20571_p8 }
  0x3b   :  { %24452 = vst [vmem:[#allocation25_spill] sm:$0xff] %v20894_v37  ;;  %16894 = vmatpush1.bf16.msra.mxu1 %v20887_v8  ;;  %702 = vmatprep.mubr.f32.mxu1 %v24092_v0  ;;  %v1169_v17 = vand.u32 4294901760, %v97_v9  ;;  %v24102_v18 = vand.u32 4294901760, %v20856_v3  ;;  %v20907_v38 = vpack.c.bf16 %v1163_v14, %v1159_v59  ;;  %v20910_v4 = vsub.f32 %v88_v16, %v1163_v14 }
  0x3c   :  { %16962 = vmatpush1.bf16.msra.mxu0 %v20894_v37  ;;  %v1328_v35 = vand.u32 4294901760, %v1327_v45  ;;  %v24099_v50 = vand.u32 4294901760, %v20900_v32  ;;  %v1339_v48 = vsub.f32 %v20885_v49, %v24096_v39  ;;  %v20917_v0 = vsub.f32 %v93_v31, %v1165_v23  ;;  %v96_v39 = vld [vmem:[#allocation3 + $0x160] sm:$0xff] }
  0x3d   :  { %24453 = vst [vmem:[#allocation26_spill] sm:$0xff] %v20907_v38  ;;  %v20915_v2 = vpack.c.bf16 %v1169_v17, %v1165_v23  ;;  %v20919_v22 = vsub.f32 %v97_v9, %v1169_v17  ;;  %v24113_v45 = vand.u32 4294901760, %v20910_v4  ;;  %v717_v16 = vsub.f32 %v20856_v3, %v24102_v18 }
  0x3e   :  { %v1333_v59 = vsub.f32 %v20900_v32, %v24099_v50  ;;  %708 = vmatmul.mubr.f32.vlgmr.msra.gmra.mrb[2].mxu1 %v20726_v56  ;;  %v24114_v14 = vand.u32 4294901760, %v20871_v51  ;;  %v1340_v37 = vand.u32 4294901760, %v1339_v48  ;;  %v24115_v31 = vand.u32 4294901760, %v20917_v0 }
  0x3f   :  { %24454 = vst [vmem:[#allocation27_spill] sm:$0xff] %v20915_v2  ;;  %v24117_v9 = vand.u32 4294901760, %v20919_v22  ;;  %v1167_v23 = vand.u32 4294901760, %v92_v52  ;;  %v24455_v17 = vmov 0.0   ;;  %v1345_v56 = vsub.f32 %v20910_v4, %v24113_v45  ;;  %v20950_v45 = vld [vmem:[#allocation3 + $0x188] sm:$0xff] }
  0x40   :  { %798 = vmatprep.mubr.f32.mxu1 %v24455_v17  ;;  %v1334_v50 = vand.u32 4294901760, %v1333_v59  ;;  %v718_v6 = vand.u32 4294901760, %v717_v16  ;;  %v729_v18 = vsub.f32 %v20871_v51, %v24114_v14  ;;  %v20939_v41 = vpack.c.bf16 %v1340_v37, %v1328_v35  ;;  %24457 = vst [vmem:[#allocation29_spill] sm:$0xff] %v20950_v45  ;;  %v20957_v2 = vld [vmem:[#allocation3 + $0x1a8] sm:$0xff] }
  0x41   :  { %v1351_v48 = vsub.f32 %v20917_v0, %v24115_v31  ;;  %v1363_v15 = vsub.f32 %v20919_v22, %v24117_v9  ;;  %v1171_v59 = vand.u32 4294901760, %v96_v39  ;;  %v1346_v58 = vand.u32 4294901760, %v1345_v56  ;;  %24459 = vst [vmem:[#allocation31_spill] sm:$0xff] %v20957_v2  ;;  %v20959_v9 = vld [vmem:[#allocation3 + $0x180] sm:$0xff] }
  0x42   :  { %24456 = vst [vmem:[#allocation28_spill] sm:$0xff] %v20939_v41  ;;  %v730_v42 = vand.u32 4294901760, %v729_v18  ;;  %v20947_v7 = vsub.f32 %v92_v52, %v1167_v23  ;;  %v24122_v16 = vand.u32 4294901760, %v20889_v57  ;;  %16964 = vmatprep.subr.bf16.mxu0 %v20939_v41  ;;  %24460 = vst [vmem:[#allocation32_spill] sm:$0xff] %v20959_v9  ;;  %v20967_v41 = vld [vmem:[#allocation3 + $0x1a0] sm:$0xff]  ;;  %vm15134_vm5 = vcmask 1044480  }
  0x43   :  { %v1352_v37 = vand.u32 4294901760, %v1351_v48  ;;  %v1364_v35 = vand.u32 4294901760, %v1363_v15  ;;  %v20953_v14 = vpack.c.bf16 %v1171_v59, %v1167_v23  ;;  %v20955_v31 = vsub.f32 %v96_v39, %v1171_v59  ;;  %24462 = vst [vmem:[#allocation34_spill] sm:$0xff] %v20967_v41 }
  0x44   :  { %v20961_v56 = vpack.c.bf16 %v1346_v58, %v1334_v50  ;;  %v16895_v18 = vpack.c.bf16 %v730_v42, %v718_v6  ;;  %v24121_v52 = vand.u32 4294901760, %v20947_v7  ;;  %v723_v38 = vsub.f32 %v20889_v57, %v24122_v16 }
  0x45   :  { %24458 = vst [vmem:[#allocation30_spill] sm:$0xff] %v20953_v14  ;;  %v20969_v15 = vpack.c.bf16 %v1364_v35, %v1352_v37  ;;  %v24123_v39 = vand.u32 4294901760, %v20955_v31  ;;  %v24124_v23 = vand.u32 4294901760, %v20891_v43  ;;  %v24127_v48 = vand.u32 4294901760, %v20950_v45 }
  0x46   :  { %24461 = vst [vmem:[#allocation33_spill] sm:$0xff] %v20961_v56  ;;  %16966 = vmatpush1.bf16.msra.mxu0 %v20961_v56  ;;  %16896 = vmatprep.subr.bf16.mxu1 %v16895_v18  ;;  %v1357_v42 = vsub.f32 %v20947_v7, %v24121_v52  ;;  %v724_v58 = vand.u32 4294901760, %v723_v38  ;;  %v24131_v6 = vand.u32 4294901760, %v20957_v2  ;;  %v24134_v50 = vand.u32 4294901760, %v20959_v9  ;;  %v20993_v18 = vld [vmem:[#allocation3 + $0x1c8] sm:$0xff] }
  0x47   :  { %24463 = vst [vmem:[#allocation35_spill] sm:$0xff] %v20969_v15  ;;  %16968 = vmatprep.subr.bf16.mxu0 %v20969_v15  ;;  %v1369_v59 = vsub.f32 %v20955_v31, %v24123_v39  ;;  %v735_v37 = vsub.f32 %v20891_v43, %v24124_v23  ;;  %v20990_v35 = vsub.f32 %v20950_v45, %v24127_v48  ;;  %24464 = vst [vmem:[#allocation36_spill] sm:$0xff] %v20993_v18  ;;  %v21005_v23 = vld [vmem:[#allocation3 + $0x1e8] sm:$0xff]  ;;  %vm15136_vm6 = vcmask 1045504  }
  0x48   :  { %v1358_v52 = vand.u32 4294901760, %v1357_v42  ;;  %v20998_v16 = vsub.f32 %v20957_v2, %v24131_v6  ;;  %v21003_v39 = vsub.f32 %v20959_v9, %v24134_v50  ;;  %24465 = vst [vmem:[#allocation37_spill] sm:$0xff] %v21005_v23  ;;  %v24466_v14 = vand.u32 4294901760, %v20967_v41 }
  0x49   :  { %v1370_v15 = vand.u32 4294901760, %v1369_v59  ;;  %v736_v48 = vand.u32 4294901760, %v735_v37  ;;  %v24138_v56 = vand.u32 4294901760, %v20990_v35  ;;  %v24139_v2 = vand.u32 4294901760, %v20993_v18 }
  0x4a   :  { %v24137_v38 = vand.u32 4294901760, %v20998_v16  ;;  %v21013_v6 = vsub.f32 %v20967_v41, %v24466_v14  ;;  %v24144_v37 = vand.u32 4294901760, %v21005_v23  ;;  %v24468_v9 = vand.u32 4294901760, %v21003_v39 }
  0x4b   :  { %v21016_v45 = vpack.c.bf16 %v1370_v15, %v1358_v52  ;;  %v16897_v50 = vpack.c.bf16 %v736_v48, %v724_v58  ;;  %v1375_v59 = vsub.f32 %v20990_v35, %v24138_v56  ;;  %v21032_v52 = vsub.f32 %v20993_v18, %v24139_v2  ;;  %v21034_v15 = vld [vmem:[#allocation3 + $0x1c0] sm:$0xff] }
  0x4c   :  { %v1387_v42 = vsub.f32 %v20998_v16, %v24137_v38  ;;  %v1381_v14 = vsub.f32 %v21003_v39, %v24468_v9  ;;  %v21036_v48 = vld [vmem:[#allocation3 + $0x1e0] sm:$0xff]  ;;  %v21042_v38 = vsub.f32 %v21005_v23, %v24144_v37  ;;  %v16899_v9 = vpack.c.bf16 %v20871_v51, %v20856_v3 }
  0x4d   :  { %24467 = vst [vmem:[#allocation38_spill] sm:$0xff] %v21016_v45  ;;  %24469 = vst [vmem:[#allocation39_spill] sm:$0xff] %v21036_v48  ;;  %16970 = vmatpush1.bf16.msra.mxu0 %v21016_v45  ;;  %16898 = vmatpush1.bf16.msra.mxu1 %v16897_v50  ;;  %v1376_v58 = vand.u32 4294901760, %v1375_v59  ;;  %v24470_v2 = vand.u32 4294901760, %v21013_v6  ;;  %v24146_v46 = vand.u32 4294901760, %v21032_v52  ;;  %v24149_v50 = vand.u32 4294901760, %v21034_v15 }
  0x4e   :  { %v1388_v56 = vand.u32 4294901760, %v1387_v42  ;;  %v1382_v41 = vand.u32 4294901760, %v1381_v14  ;;  %v24147_v45 = vand.u32 4294901760, %v21042_v38  ;;  %16900 = vmatprep.subr.bf16.mxu1 %v16899_v9  ;;  %v24150_v59 = vand.u32 4294901760, %v21036_v48 }
  0x4f   :  { %v1393_v18 = vsub.f32 %v21013_v6, %v24470_v2  ;;  %v16901_v37 = vpack.c.bf16 %v20891_v43, %v20889_v57  ;;  %v1399_v2 = vsub.f32 %v21032_v52, %v24146_v46  ;;  %v21067_v9 = vsub.f32 %v21034_v15, %v24149_v50 }
  0x50   :  { %v21055_v23 = vpack.c.bf16 %v1388_v56, %v1376_v58  ;;  %800 = vmatmul.mubr.f32.vlgmr.msra.gmra.mrb[2].mxu1 %v20689_v20  ;;  %v1411_v14 = vsub.f32 %v21042_v38, %v24147_v45  ;;  %v21072_v56 = vsub.f32 %v21036_v48, %v24150_v59  ;;  %v21093_v48 = vpack.c.bf16 %v20704_v29, %v20695_v25 }
  0x51   :  { %v1394_v42 = vand.u32 4294901760, %v1393_v18  ;;  %16902 = vmatpush1.bf16.msra.mxu1 %v16901_v37  ;;  %v1400_v58 = vand.u32 4294901760, %v1399_v2  ;;  %878 = vmatprep.mubr.f32.mxu1 %v24455_v17  ;;  %v1404_v45 = vand.u32 4294901760, %v21067_v9  ;;  %vm20601_vm7 = vmmov 0  }
  0x52   :  { %24471 = vst [vmem:[#allocation40_spill] sm:$0xff] %v21055_v23  ;;  %16972 = vmatprep.subr.bf16.mxu0 %v21055_v23  ;;  %v1412_v46 = vand.u32 4294901760, %v1411_v14  ;;  %v1416_v53 = vand.u32 4294901760, %v21072_v56  ;;  %16904 = vmatprep.subr.bf16.mxu1 %v20869_v60  ;;  %24476 = vst [vmem:[#allocation43_spill] sm:$0xff] %v21093_v48  ;;  %vm15138_vm8 = vcmask 1046528   ;;  %vm15822_vm9 = vcmask 523264  }
  0x53   :  { %v21075_v18 = vpack.c.bf16 %v1394_v42, %v1382_v41  ;;  %v1405_v37 = vsub.f32 %v21067_v9, %v1404_v45  ;;  %v24474_v41 = vand.u32 4294901760, %v20856_v3  ;;  %v24475_v42 = vand.u32 4294901760, %v20871_v51 }
  0x54   :  { %v21082_v50 = vpack.c.bf16 %v1412_v46, %v1400_v58  ;;  %v1417_v59 = vsub.f32 %v21072_v56, %v1416_v53  ;;  %v24478_v51 = vand.u32 4294901760, %v20695_v25  ;;  %v24479_v3 = vand.u32 4294901760, %v20704_v29 }
  0x55   :  { %24472 = vst [vmem:[#allocation41_spill] sm:$0xff] %v21075_v18  ;;  %16974 = vmatpush1.bf16.msra.mxu0 %v21075_v18  ;;  %v16907_v2 = vpack.c.bf16 %v24475_v42, %v24474_v41  ;;  %v1406_v14 = vand.u32 4294901760, %v1405_v37  ;;  %v21120_v25 = vpack.c.bf16 %v20749_v13, %v20747_v12  ;;  %v24486_v29 = vand.u32 4294901760, %v20747_v12  ;;  %v83_v18 = vld [vmem:[#allocation3 + $0xf8] sm:$0xff] }
  0x56   :  { %24473 = vst [vmem:[#allocation42_spill] sm:$0xff] %v21082_v50  ;;  %16976 = vmatprep.subr.bf16.mxu0 %v21082_v50  ;;  %v1418_v23 = vand.u32 4294901760, %v1417_v59  ;;  %v21104_v58 = vpack.c.bf16 %v24479_v3, %v24478_v51  ;;  %v21109_v59 = vpack.c.bf16 %v20735_v1, %v20733_v63  ;;  %v24487_v41 = vand.u32 4294901760, %v20749_v13  ;;  %v79_v50 = vld [vmem:[#allocation3 + $0xd8] sm:$0xff] }
  0x57   :  { %24485 = vst [vmem:[#allocation48_spill] sm:$0xff] %v21120_v25  ;;  %v24492_v51 = vand.u32 4294901760, %v20764_v24  ;;  %v24495_v12 = vand.u32 4294901760, %v20778_v40 }
  0x58   :  { %881 = vmatmul.mubr.f32.vlgmr.msra.gmra.mrb[2].mxu1 %v20700_v27  ;;  %v21096_v46 = vpack.c.bf16 %v1418_v23, %v1406_v14  ;;  %24480 = vst [vmem:[#allocation45_spill] sm:$0xff] %v21104_v58  ;;  %24481 = vst [vmem:[#allocation46_spill] sm:$0xff] %v21109_v59  ;;  %v24482_v27 = vand.u32 4294901760, %v20733_v63  ;;  %v24483_v23 = vand.u32 4294901760, %v20735_v1  ;;  %v21126_v42 = vpack.c.bf16 %v24487_v41, %v24486_v29 }
  0x59   :  { %16906 = vmatpush1.bf16.msra.mxu1 %v20887_v8  ;;  %955 = vmatprep.mubr.f32.mxu1 %v24455_v17  ;;  %v24490_v63 = vand.u32 4294901760, %v20891_v43  ;;  %v24491_v1 = vand.u32 4294901760, %v20760_v21  ;;  %v21148_v43 = vpack.c.bf16 %v20764_v24, %v20760_v21  ;;  %v21160_v41 = vpack.c.bf16 %v20778_v40, %v20769_v34 }
  0x5a   :  { %24477 = vst [vmem:[#allocation44_spill] sm:$0xff] %v21096_v46  ;;  %16908 = vmatprep.subr.bf16.mxu1 %v16907_v2  ;;  %16978 = vmatpush1.bf16.msra.mxu0 %v21096_v46  ;;  %v21115_v37 = vpack.c.bf16 %v24483_v23, %v24482_v27  ;;  %24488 = vst [vmem:[#allocation49_spill] sm:$0xff] %v21126_v42  ;;  %v24489_v2 = vand.u32 4294901760, %v20889_v57  ;;  %v24494_v27 = vand.u32 4294901760, %v20769_v34  ;;  %v24498_v57 = vand.u32 4294901760, %v20797_v55 }
  0x5b   :  { %16980 = vmatprep.subr.bf16.mxu0 %v21093_v48  ;;  %v21136_v3 = vpack.c.bf16 %v24492_v51, %v24491_v1  ;;  %24497 = vst [vmem:[#allocation52_spill] sm:$0xff] %v21148_v43  ;;  %v24499_v23 = vand.u32 4294901760, %v20809_v10  ;;  %24501 = vst [vmem:[#allocation54_spill] sm:$0xff] %v21160_v41  ;;  %v24503_v21 = vand.u32 4294901760, %v20829_v47  ;;  %v24506_v1 = vand.u32 4294901760, %v20847_v61 }
  0x5c   :  { %24484 = vst [vmem:[#allocation47_spill] sm:$0xff] %v21115_v37  ;;  %v16909_v14 = vpack.c.bf16 %v24490_v63, %v24489_v2  ;;  %v21143_v13 = vpack.c.bf16 %v24495_v12, %v24494_v27  ;;  %v24502_v2 = vand.u32 4294901760, %v20814_v30  ;;  %v24505_v63 = vand.u32 4294901760, %v20839_v54 }
  0x5d   :  { %24493 = vst [vmem:[#allocation50_spill] sm:$0xff] %v21136_v3  ;;  %1453 = vmatmul.mubr.f32.vlgmr.msra.gmra.mrb[2].mxu0 %v24455_v17  ;;  %v21155_v29 = vpack.c.bf16 %v24499_v23, %v24498_v57  ;;  %v24508_v34 = vand.u32 4294901760, %v20876_v33  ;;  %v24512_v27 = vand.u32 4294901760, %v20900_v32  ;;  %v24513_v12 = vand.u32 4294901760, %v20910_v4 }
  0x5e   :  { %24496 = vst [vmem:[#allocation51_spill] sm:$0xff] %v21143_v13  ;;  %16982 = vmatpush1.bf16.msra.mxu0 %v21109_v59  ;;  %1587 = vmatprep.mubr.f32.mxu0 %v24455_v17  ;;  %v21167_v24 = vpack.c.bf16 %v24503_v21, %v24502_v2  ;;  %v21174_v51 = vpack.c.bf16 %v24506_v1, %v24505_v63  ;;  %v24516_v23 = vand.u32 4294901760, %v20917_v0  ;;  %v24517_v2 = vand.u32 4294901760, %v20919_v22 }
  0x5f   :  { %24500 = vst [vmem:[#allocation53_spill] sm:$0xff] %v21155_v29  ;;  %16984 = vmatprep.subr.bf16.mxu0 %v21120_v25  ;;  %v21192_v57 = vpack.c.bf16 %v24513_v12, %v24512_v27  ;;  %v24522_v1 = vand.u32 4294901760, %v20990_v35  ;;  %v24527_v27 = vand.u32 4294901760, %v21013_v6 }
  0x60   :  { %959 = vmatmul.mubr.f32.vlgmr.msra.gmra.mrb[2].mxu1 %v20711_v36  ;;  %24504 = vst [vmem:[#allocation55_spill] sm:$0xff] %v21167_v24  ;;  %24507 = vst [vmem:[#allocation56_spill] sm:$0xff] %v21174_v51  ;;  %v24509_v36 = vand.u32 4294901760, %v20885_v49  ;;  %v21203_v21 = vpack.c.bf16 %v24517_v2, %v24516_v23  ;;  %v21231_v23 = vpack.c.bf16 %v20885_v49, %v20876_v33 }
  0x61   :  { %16910 = vmatpush1.bf16.msra.mxu1 %v16909_v14  ;;  %1041 = vmatprep.mubr.f32.mxu1 %v24455_v17  ;;  %v21186_v14 = vpack.c.bf16 %v20809_v10, %v20797_v55  ;;  %24514 = vst [vmem:[#allocation59_spill] sm:$0xff] %v21192_v57  ;;  %v24519_v55 = vand.u32 4294901760, %v20947_v7  ;;  %v24520_v10 = vand.u32 4294901760, %v20955_v31  ;;  %v21248_v33 = vpack.c.bf16 %v20910_v4, %v20900_v32  ;;  %v24542_v32 = vld [vmem:[#allocation24_spill] sm:$0xff]  ;;  %v24543_v4 = vld [vmem:[#allocation26_spill] sm:$0xff] }
  0x62   :  { %16912 = vmatprep.subr.bf16.mxu1 %v20869_v60  ;;  %v21181_v40 = vpack.c.bf16 %v24509_v36, %v24508_v34  ;;  %16986 = vmatpush1.bf16.msra.mxu0 %v21148_v43  ;;  %v21197_v60 = vpack.c.bf16 %v20829_v47, %v20814_v30  ;;  %24518 = vst [vmem:[#allocation61_spill] sm:$0xff] %v21203_v21  ;;  %v24523_v34 = vand.u32 4294901760, %v20998_v16  ;;  %v24526_v47 = vand.u32 4294901760, %v21003_v39 }
  0x63   :  { %24511 = vst [vmem:[#allocation58_spill] sm:$0xff] %v21186_v14  ;;  %16988 = vmatprep.subr.bf16.mxu0 %v21160_v41  ;;  %v21209_v63 = vpack.c.bf16 %v24520_v10, %v24519_v55  ;;  %v21220_v30 = vpack.c.bf16 %v20847_v61, %v20839_v54  ;;  %24529 = vst [vmem:[#allocation66_spill] sm:$0xff] %v21231_v23  ;;  %v24530_v54 = vand.u32 4294901760, %v21032_v52  ;;  %v24531_v61 = vand.u32 4294901760, %v21042_v38  ;;  %v63_v10 = vld [vmem:[#allocation3 + $0x58] sm:$0xff] }
  0x64   :  { %24510 = vst [vmem:[#allocation57_spill] sm:$0xff] %v21181_v40  ;;  %24515 = vst [vmem:[#allocation60_spill] sm:$0xff] %v21197_v60  ;;  %v21215_v36 = vpack.c.bf16 %v24523_v34, %v24522_v1  ;;  %v21226_v12 = vpack.c.bf16 %v24527_v27, %v24526_v47  ;;  %v21243_v55 = vpack.c.bf16 %v1416_v53, %v1404_v45  ;;  %v24544_v45 = vld [vmem:[#allocation29_spill] sm:$0xff]  ;;  %v67_v1 = vld [vmem:[#allocation3 + $0x78] sm:$0xff] }
  0x65   :  { %24521 = vst [vmem:[#allocation62_spill] sm:$0xff] %v21209_v63  ;;  %24525 = vst [vmem:[#allocation64_spill] sm:$0xff] %v21220_v30  ;;  %v21240_v2 = vpack.c.bf16 %v24531_v61, %v24530_v54  ;;  %v21258_v49 = vpack.c.bf16 %v20955_v31, %v20947_v7  ;;  %v21263_v53 = vpack.c.bf16 %v20998_v16, %v20990_v35  ;;  %v24545_v31 = vand.u32 4294901760, %v24544_v45  ;;  %v24546_v16 = vld [vmem:[#allocation31_spill] sm:$0xff]  ;;  %v62_v34 = vld [vmem:[#allocation3 + $0x50] sm:$0xff] }
  0x66   :  { %24524 = vst [vmem:[#allocation63_spill] sm:$0xff] %v21215_v36  ;;  %16990 = vmatpush1.bf16.msra.mxu0 %v21186_v14  ;;  %24528 = vst [vmem:[#allocation65_spill] sm:$0xff] %v21226_v12  ;;  %v21277_v7 = vpack.c.bf16 %v21042_v38, %v21032_v52  ;;  %v24549_v35 = vld [vmem:[#allocation27_spill] sm:$0xff]  ;;  %v24550_v47 = vld [vmem:[#allocation32_spill] sm:$0xff]  ;;  %v1977_v14 = vand.u32 4294901760, %v62_v34 }
  0x67   :  { %16992 = vmatprep.subr.bf16.mxu0 %v21197_v60  ;;  %24532 = vst [vmem:[#allocation67_spill] sm:$0xff] %v21240_v2  ;;  %24533 = vst [vmem:[#allocation68_spill] sm:$0xff] %v21243_v55  ;;  %v55_v38 = vld [vmem:[#allocation3 + $0x18] sm:$0xff]  ;;  %v24551_v27 = vand.u32 4294901760, %v24550_v47  ;;  %v24552_v54 = vld [vmem:[#allocation34_spill] sm:$0xff]  ;;  %v1979_v60 = vand.u32 4294901760, %v67_v1 }
  0x68   :  { %1043 = vmatmul.mubr.f32.vlgmr.msra.gmra.mrb[2].mxu1 %v20689_v20  ;;  %24534 = vst [vmem:[#allocation69_spill] sm:$0xff] %v21248_v33  ;;  %24536 = vst [vmem:[#allocation71_spill] sm:$0xff] %v21258_v49  ;;  %v59_v52 = vld [vmem:[#allocation3 + $0x38] sm:$0xff]  ;;  %v24553_v61 = vand.u32 4294901760, %v24552_v54  ;;  %v70_v47 = vld [vmem:[#allocation3 + $0x90] sm:$0xff] }
  0x69   :  { %16914 = vmatpush1.bf16.msra.mxu1 %v20887_v8  ;;  %1117 = vmatprep.mubr.f32.mxu1 %v24455_v17  ;;  %v21253_v8 = vpack.c.bf16 %v20919_v22, %v20917_v0  ;;  %24537 = vst [vmem:[#allocation72_spill] sm:$0xff] %v21263_v53  ;;  %v21272_v0 = vpack.c.bf16 %v21013_v6, %v21003_v39  ;;  %24539 = vst [vmem:[#allocation74_spill] sm:$0xff] %v21277_v7  ;;  %v24541_v22 = vld [vmem:[#allocation21_spill] sm:$0xff]  ;;  %v24547_v39 = vand.u32 4294901760, %v24546_v16  ;;  %v110_v12 = vld [vmem:[#allocation3 + $0x1d0] sm:$0xff] }
  0x6a   :  { %16916 = vmatprep.subr.bf16.mxu1 %v20702_v28  ;;  %16994 = vmatpush1.bf16.msra.mxu0 %v21220_v30  ;;  %v21311_v45 = vpack.c.bf16 %v24553_v61, %v24551_v27  ;;  %v1967_v16 = vand.u32 4294901760, %v55_v38  ;;  %v74_v30 = vld [vmem:[#allocation3 + $0xb0] sm:$0xff]  ;;  %v1975_v61 = vand.u32 4294901760, %v63_v10  ;;  %v1985_v48 = vand.u32 4294901760, %v70_v47 }
  0x6b   :  { %16996 = vmatprep.subr.bf16.mxu0 %v21231_v23  ;;  %24535 = vst [vmem:[#allocation70_spill] sm:$0xff] %v21253_v8  ;;  %24538 = vst [vmem:[#allocation73_spill] sm:$0xff] %v21272_v0  ;;  %v21302_v6 = vpack.c.bf16 %v24547_v39, %v24545_v31  ;;  %v24555_v31 = vld [vmem:[#allocation30_spill] sm:$0xff]  ;;  %v1971_v39 = vand.u32 4294901760, %v59_v52  ;;  %v1989_v46 = vand.u32 4294901760, %v74_v30 }
  0x6c   :  { %24554 = vst [vmem:[#allocation31_spill] sm:$0xff] %v21311_v45  ;;  %v114_v2 = vld [vmem:[#allocation3 + $0x1f0] sm:$0xff] }
  0x6d   :  { %24548 = vst [vmem:[#allocation29_spill] sm:$0xff] %v21302_v6  ;;  %v21330_v59 = vpack.c.bf16 %v1971_v39, %v1967_v16 }
  0x6e   :  { %16998 = vmatpush1.bf16.msra.mxu0 %v21248_v33 }
  0x6f   :  { %17000 = vmatprep.subr.bf16.mxu0 %v21253_v8  ;;  %v24558_v8 = vld [vmem:[#allocation37_spill] sm:$0xff] }
  0x70   :  { %1119 = vmatmul.mubr.f32.vlgmr.msra.gmra.mrb[2].mxu1 %v20689_v20  ;;  %v21284_v20 = vpack.c.bf16 %v21072_v56, %v21067_v9  ;;  %v54_v9 = vld [vmem:[#allocation3 + $0x10] sm:$0xff]  ;;  %v24559_v33 = vand.u32 4294901760, %v24558_v8  ;;  %v24561_v8 = vand.u32 4294901760, %v21034_v15 }
  0x71   :  { %16918 = vmatpush1.bf16.msra.mxu1 %v20731_v62  ;;  %1221 = vmatprep.mubr.f32.mxu1 %v24455_v17  ;;  %v58_v56 = vld [vmem:[#allocation3 + $0x30] sm:$0xff]  ;;  %v1969_v27 = vand.u32 4294901760, %v54_v9 }
  0x72   :  { %16920 = vmatprep.subr.bf16.mxu1 %v20745_v11  ;;  %17002 = vmatpush1.bf16.msra.mxu0 %v21258_v49  ;;  %24540 = vst [vmem:[#allocation75_spill] sm:$0xff] %v21284_v20  ;;  %v1973_v54 = vand.u32 4294901760, %v58_v56 }
  0x73   :  { %17004 = vmatprep.subr.bf16.mxu0 %v21263_v53  ;;  %v24556_v53 = vld [vmem:[#allocation36_spill] sm:$0xff]  ;;  %v21339_v15 = vsub.f32 %v54_v9, %v1969_v27  ;;  %v21357_v9 = vsub.f32 %v62_v34, %v1977_v14 }
  0x74   :  { %v24557_v49 = vand.u32 4294901760, %v24556_v53  ;;  %24565 = vst [vmem:[#allocation36_spill] sm:$0xff] %v21330_v59 }
  0x75   :  { %16922 = vmatpush1.bf16.msra.mxu1 %v20758_v19 }
  0x76   :  { %16924 = vmatprep.subr.bf16.mxu1 %v20766_v26  ;;  %17006 = vmatpush1.bf16.msra.mxu0 %v21272_v0  ;;  %v75_v0 = vld [vmem:[#allocation3 + $0xb8] sm:$0xff]  ;;  %v21318_v23 = vpack.c.bf16 %v24559_v33, %v24557_v49 }
  0x77   :  { %17008 = vmatprep.subr.bf16.mxu0 %v21277_v7  ;;  %v71_v7 = vld [vmem:[#allocation3 + $0x98] sm:$0xff]  ;;  %v1987_v53 = vand.u32 4294901760, %v75_v0 }
  0x78   :  { %24560 = vst [vmem:[#allocation32_spill] sm:$0xff] %v21318_v23  ;;  %v1983_v43 = vand.u32 4294901760, %v71_v7  ;;  %v24562_v33 = vld [vmem:[#allocation39_spill] sm:$0xff] }
  0x79   :  { %16926 = vmatpush1.bf16.msra.mxu1 %v20806_v5  ;;  %v24563_v49 = vand.u32 4294901760, %v24562_v33  ;;  %v21344_v33 = vpack.c.bf16 %v1973_v54, %v1969_v27  ;;  %v1995_v27 = vand.u32 4294901760, %v83_v18 }
  0x7a   :  { %16928 = vmatprep.subr.bf16.mxu1 %v20826_v44  ;;  %17010 = vmatpush1.bf16.msra.mxu0 %v21284_v20  ;;  %v66_v20 = vld [vmem:[#allocation3 + $0x70] sm:$0xff] }
  0x7b   :  { %17012 = vmatprep.subr.bf16.mxu0 %v20702_v28  ;;  %v1981_v41 = vand.u32 4294901760, %v66_v20  ;;  %v21327_v25 = vpack.c.bf16 %v24563_v49, %v24561_v8  ;;  %v21341_v8 = vsub.f32 %v58_v56, %v1973_v54  ;;  %24567 = vst [vmem:[#allocation39_spill] sm:$0xff] %v21344_v33  ;;  %v21346_v49 = vpack.c.bf16 %v1979_v60, %v1975_v61  ;;  %v91_v54 = vld [vmem:[#allocation3 + $0x138] sm:$0xff] }
  0x7d   :  { %16930 = vmatpush1.bf16.msra.mxu1 %v24541_v22  ;;  %1588 = vmatmul.mubr.f32.vlgmr.msra.gmra.mrb[2].mxu0 %v24455_v17  ;;  %24564 = vst [vmem:[#allocation34_spill] sm:$0xff] %v21327_v25  ;;  %24566 = vst [vmem:[#allocation37_spill] sm:$0xff] %v21341_v8  ;;  %v21359_v56 = vsub.f32 %v66_v20, %v1981_v41  ;;  %v21383_v20 = vsub.f32 %v74_v30, %v1989_v46  ;;  %v24577_v30 = vand.u32 4294901760, %v21341_v8 }
  0x7e   :  { %16932 = vmatprep.subr.bf16.mxu1 %v24542_v32  ;;  %17014 = vmatpush1.bf16.msra.mxu0 %v20731_v62  ;;  %24568 = vst [vmem:[#allocation76_spill] sm:$0xff] %v21346_v49  ;;  %v21375_v62 = vsub.f32 %v75_v0, %v1987_v53  ;;  %v2003_v0 = vand.u32 4294901760, %v91_v54 }
  0x7f   :  { %1690 = vmatprep.mubr.f32.mxu0 %v24455_v17  ;;  %17016 = vmatprep.subr.bf16.mxu0 %v20745_v11  ;;  %v21350_v11 = vsub.f32 %v67_v1, %v1979_v60  ;;  %v87_v1 = vld [vmem:[#allocation3 + $0x118] sm:$0xff] }
  0x81   :  { %16934 = vmatpush1.bf16.msra.mxu1 %v24543_v4 }
  0x82   :  { %16936 = vmatprep.subr.bf16.mxu1 %v24549_v35  ;;  %17018 = vmatpush1.bf16.msra.mxu0 %v20758_v19  ;;  %v21348_v19 = vsub.f32 %v63_v10, %v1975_v61  ;;  %v82_v10 = vld [vmem:[#allocation3 + $0xf0] sm:$0xff]  ;;  %v21381_v61 = vsub.f32 %v70_v47, %v1985_v48 }
  0x83   :  { %17020 = vmatprep.subr.bf16.mxu0 %v20766_v26  ;;  %v21337_v26 = vsub.f32 %v59_v52, %v1971_v39  ;;  %v21355_v52 = vpack.c.bf16 %v1987_v53, %v1983_v43  ;;  %v1991_v39 = vand.u32 4294901760, %v79_v50  ;;  %v86_v53 = vld [vmem:[#allocation3 + $0x110] sm:$0xff] }
  0x85   :  { %16938 = vmatpush1.bf16.msra.mxu1 %v24555_v31  ;;  %24570 = vst [vmem:[#allocation78_spill] sm:$0xff] %v21355_v52  ;;  %v21386_v34 = vpack.c.bf16 %v1995_v27, %v1991_v39 }
  0x86   :  { %16940 = vmatprep.subr.bf16.mxu1 %v21302_v6  ;;  %17022 = vmatpush1.bf16.msra.mxu0 %v20806_v5  ;;  %v21335_v5 = vsub.f32 %v55_v38, %v1967_v16  ;;  %v21353_v38 = vpack.c.bf16 %v1981_v41, %v1977_v14  ;;  %v21362_v16 = vpack.c.bf16 %v1989_v46, %v1985_v48  ;;  %v24574_v48 = vand.u32 4294901760, %v21337_v26 }
  0x87   :  { %17024 = vmatprep.subr.bf16.mxu0 %v20826_v44  ;;  %v21333_v44 = vld [vmem:[#allocation3 + $0xd0] sm:$0xff]  ;;  %24572 = vst [vmem:[#allocation80_spill] sm:$0xff] %v21386_v34  ;;  %v24576_v46 = vand.u32 4294901760, %v21339_v15 }
  0x88   :  { %24569 = vst [vmem:[#allocation77_spill] sm:$0xff] %v21353_v38  ;;  %24571 = vst [vmem:[#allocation79_spill] sm:$0xff] %v21362_v16  ;;  %v1993_v60 = vand.u32 4294901760, %v21333_v44  ;;  %v24573_v14 = vand.u32 4294901760, %v21335_v5 }
  0x89   :  { %16942 = vmatpush1.bf16.msra.mxu1 %v21311_v45  ;;  %v21400_v41 = vpack.c.bf16 %v24577_v30, %v24576_v46  ;;  %v21417_v30 = vsub.f32 %v79_v50, %v1991_v39  ;;  %v2001_v46 = vand.u32 4294901760, %v86_v53  ;;  %v24587_v39 = vand.u32 4294901760, %v21375_v62 }
  0x8a   :  { %16944 = vmatprep.subr.bf16.mxu1 %v21318_v23  ;;  %17026 = vmatpush1.bf16.msra.mxu0 %v24541_v22  ;;  %v21373_v22 = vsub.f32 %v71_v7, %v1983_v43  ;;  %v1997_v43 = vand.u32 4294901760, %v82_v10  ;;  %v1999_v7 = vand.u32 4294901760, %v87_v1  ;;  %v21394_v47 = vpack.c.bf16 %v24574_v48, %v24573_v14  ;;  %v95_v14 = vld [vmem:[#allocation3 + $0x158] sm:$0xff] }
  0x8b   :  { %17028 = vmatprep.subr.bf16.mxu0 %v24542_v32  ;;  %v90_v32 = vld [vmem:[#allocation3 + $0x130] sm:$0xff]  ;;  %24578 = vst [vmem:[#allocation82_spill] sm:$0xff] %v21400_v41  ;;  %v99_v48 = vld [vmem:[#allocation3 + $0x178] sm:$0xff]  ;;  %v21419_v41 = vsub.f32 %v83_v18, %v1995_v27 }
  0x8c   :  { %24575 = vst [vmem:[#allocation81_spill] sm:$0xff] %v21394_v47  ;;  %v21430_v47 = vpack.c.bf16 %v1997_v43, %v1993_v60  ;;  %v2005_v50 = vand.u32 4294901760, %v90_v32  ;;  %v24586_v18 = vand.u32 4294901760, %v21373_v22 }
  0x8d   :  { %16946 = vmatpush1.bf16.msra.mxu1 %v21327_v25 }
  0x8e   :  { %17108 = vmatprep.subr.bf16.mxu1 %v21330_v59  ;;  %17030 = vmatpush1.bf16.msra.mxu0 %v24543_v4  ;;  %v24580_v59 = vand.u32 4294901760, %v21350_v11  ;;  %v24583_v4 = vand.u32 4294901760, %v21359_v56  ;;  %24585 = vst [vmem:[#allocation85_spill] sm:$0xff] %v21430_v47  ;;  %v21436_v27 = vpack.c.bf16 %v24587_v39, %v24586_v18 }
  0x8f   :  { %17032 = vmatprep.subr.bf16.mxu0 %v24549_v35 }
  0x90   :  { %1222 = vmatmul.mubr.f32.vlgmr.msra.gmra.mrb[4].mxu1 %v24455_v17  ;;  %24588 = vst [vmem:[#allocation86_spill] sm:$0xff] %v21436_v27  ;;  %v21450_v27 = vsub.f32 %v87_v1, %v1999_v7  ;;  %v24594_v1 = vand.u32 4294901760, %v21417_v30 }
  0x91   :  { %17110 = vmatpush1.bf16.msra.mxu1 %v21344_v33  ;;  %2063 = vmatprep.mubr.f32.mxu1 %v24455_v17  ;;  %v24579_v33 = vand.u32 4294901760, %v21348_v19 }
  0x92   :  { %17112 = vmatprep.subr.bf16.mxu1 %v21346_v49  ;;  %v24582_v49 = vand.u32 4294901760, %v21357_v9  ;;  %17034 = vmatpush1.bf16.msra.mxu0 %v24555_v31  ;;  %v106_v31 = vld [vmem:[#allocation3 + $0x1b0] sm:$0xff] }
  0x93   :  { %v21406_v35 = vpack.c.bf16 %v24580_v59, %v24579_v33  ;;  %17036 = vmatprep.subr.bf16.mxu0 %v21302_v6  ;;  %v21439_v33 = vpack.c.bf16 %v2003_v0, %v1999_v7  ;;  %v2011_v59 = vand.u32 4294901760, %v99_v48  ;;  %v107_v6 = vld [vmem:[#allocation3 + $0x1b8] sm:$0xff] }
  0x94   :  { %v21412_v28 = vpack.c.bf16 %v24583_v4, %v24582_v49  ;;  %v21425_v4 = vsub.f32 %v21333_v44, %v1993_v60  ;;  %v21427_v49 = vsub.f32 %v82_v10, %v1997_v43  ;;  %v2007_v44 = vand.u32 4294901760, %v95_v14  ;;  %v94_v10 = vld [vmem:[#allocation3 + $0x150] sm:$0xff] }
  0x95   :  { %24581 = vst [vmem:[#allocation83_spill] sm:$0xff] %v21406_v35  ;;  %17114 = vmatpush1.bf16.msra.mxu1 %v21353_v38  ;;  %24589 = vst [vmem:[#allocation87_spill] sm:$0xff] %v21439_v33  ;;  %v24590_v35 = vand.u32 4294901760, %v21381_v61  ;;  %v24591_v60 = vand.u32 4294901760, %v21383_v20  ;;  %v103_v38 = vld [vmem:[#allocation3 + $0x198] sm:$0xff]  ;;  %v2009_v18 = vand.u32 4294901760, %v94_v10 }
  0x96   :  { %24584 = vst [vmem:[#allocation84_spill] sm:$0xff] %v21412_v28  ;;  %17116 = vmatprep.subr.bf16.mxu1 %v21355_v52  ;;  %v98_v28 = vld [vmem:[#allocation3 + $0x170] sm:$0xff]  ;;  %17038 = vmatpush1.bf16.msra.mxu0 %v21311_v45  ;;  %v21452_v52 = vsub.f32 %v91_v54, %v2003_v0  ;;  %v24595_v54 = vand.u32 4294901760, %v21419_v41  ;;  %v21471_v0 = vpack.c.bf16 %v2011_v59, %v2007_v44  ;;  %v2019_v55 = vand.u32 4294901760, %v107_v6  ;;  %v115_v45 = vld [vmem:[#allocation3 + $0x1f8] sm:$0xff] }
  0x97   :  { %v21445_v43 = vpack.c.bf16 %v24591_v60, %v24590_v35  ;;  %17040 = vmatprep.subr.bf16.mxu0 %v21318_v23  ;;  %v21457_v35 = vsub.f32 %v86_v53, %v2001_v46  ;;  %v21459_v60 = vsub.f32 %v90_v32, %v2005_v50  ;;  %v2013_v39 = vand.u32 4294901760, %v98_v28  ;;  %v102_v32 = vld [vmem:[#allocation3 + $0x190] sm:$0xff]  ;;  %v111_v23 = vld [vmem:[#allocation3 + $0x1d8] sm:$0xff] }
  0x98   :  { %v21468_v7 = vpack.c.bf16 %v24595_v54, %v24594_v1  ;;  %24597 = vst [vmem:[#allocation91_spill] sm:$0xff] %v21471_v0  ;;  %v2015_v53 = vand.u32 4294901760, %v103_v38  ;;  %v2017_v1 = vand.u32 4294901760, %v102_v32  ;;  %v2021_v54 = vand.u32 4294901760, %v106_v31 }
  0x99   :  { %24592 = vst [vmem:[#allocation88_spill] sm:$0xff] %v21445_v43  ;;  %17118 = vmatpush1.bf16.msra.mxu1 %v21362_v16  ;;  %v21462_v43 = vpack.c.bf16 %v2005_v50, %v2001_v46  ;;  %v24598_v16 = vand.u32 4294901760, %v21425_v4  ;;  %v24599_v46 = vand.u32 4294901760, %v21427_v49 }
  0x9a   :  { %24596 = vst [vmem:[#allocation90_spill] sm:$0xff] %v21468_v7  ;;  %17120 = vmatprep.subr.bf16.mxu1 %v21386_v34  ;;  %17042 = vmatpush1.bf16.msra.mxu0 %v21327_v25  ;;  %v21482_v7 = vsub.f32 %v95_v14, %v2007_v44  ;;  %v21484_v34 = vsub.f32 %v99_v48, %v2011_v59  ;;  %v24601_v14 = vand.u32 4294901760, %v21450_v27  ;;  %v24602_v48 = vand.u32 4294901760, %v21452_v52 }
  0x9b   :  { %24593 = vst [vmem:[#allocation89_spill] sm:$0xff] %v21462_v43  ;;  %v21477_v50 = vpack.c.bf16 %v24599_v46, %v24598_v16  ;;  %17044 = vmatprep.subr.bf16.mxu0 %v21104_v58  ;;  %v21489_v16 = vsub.f32 %v94_v10, %v2009_v18  ;;  %v21491_v46 = vsub.f32 %v98_v28, %v2013_v39  ;;  %v2023_v28 = vand.u32 4294901760, %v111_v23 }
  0x9c   :  { %v21500_v59 = vpack.c.bf16 %v24602_v48, %v24601_v14  ;;  %v21504_v44 = vpack.c.bf16 %v2019_v55, %v2015_v53  ;;  %v2027_v10 = vand.u32 4294901760, %v115_v45  ;;  %v2029_v14 = vand.u32 4294901760, %v114_v2 }
  0x9d   :  { %24600 = vst [vmem:[#allocation92_spill] sm:$0xff] %v21477_v50  ;;  %17122 = vmatpush1.bf16.msra.mxu1 %v21430_v47  ;;  %v21494_v50 = vpack.c.bf16 %v2013_v39, %v2009_v18  ;;  %1691 = vmatmul.mubr.f32.vlgmr.msra.gmra.mrb[2].mxu0 %v24455_v17  ;;  %v24605_v18 = vand.u32 4294901760, %v21457_v35  ;;  %v24606_v39 = vand.u32 4294901760, %v21459_v60  ;;  %v24608_v48 = vand.u32 4294901760, %v21335_v5 }
  0x9e   :  { %24603 = vst [vmem:[#allocation93_spill] sm:$0xff] %v21500_v59  ;;  %17124 = vmatprep.subr.bf16.mxu1 %v21439_v33  ;;  %24604 = vst [vmem:[#allocation94_spill] sm:$0xff] %v21504_v44  ;;  %17046 = vmatpush1.bf16.msra.mxu0 %v21115_v37  ;;  %v21516_v59 = vsub.f32 %v103_v38, %v2015_v53  ;;  %v21518_v33 = vsub.f32 %v107_v6, %v2019_v55  ;;  %v2025_v37 = vand.u32 4294901760, %v110_v12 }
  0x9f   :  { %v21510_v58 = vpack.c.bf16 %v24606_v39, %v24605_v18  ;;  %1857 = vmatprep.mubr.f32.mxu0 %v24455_v17  ;;  %17048 = vmatprep.subr.bf16.mxu0 %v21126_v42  ;;  %v21523_v18 = vsub.f32 %v102_v32, %v2017_v1  ;;  %v21525_v39 = vsub.f32 %v106_v31, %v2021_v54  ;;  %v24609_v55 = vand.u32 4294901760, %v21482_v7 }
  0xa0   :  { %v2073_v38 = vsub.f32 %v21335_v5, %v24608_v48  ;;  %v24610_v6 = vand.u32 4294901760, %v21484_v34  ;;  %v24612_v32 = vand.u32 4294901760, %v21337_v26  ;;  %v24613_v25 = vand.u32 4294901760, %v21339_v15 }
  0xa1   :  { %24607 = vst [vmem:[#allocation95_spill] sm:$0xff] %v21510_v58  ;;  %17126 = vmatpush1.bf16.msra.mxu1 %v21462_v43  ;;  %v24614_v42 = vand.u32 4294901760, %v21341_v8  ;;  %v24615_v58 = vand.u32 4294901760, %v21489_v16  ;;  %v24616_v43 = vand.u32 4294901760, %v21491_v46 }
  0xa2   :  { %v21535_v53 = vpack.c.bf16 %v24610_v6, %v24609_v55  ;;  %17128 = vmatprep.subr.bf16.mxu1 %v21471_v0  ;;  %v2085_v31 = vsub.f32 %v21337_v26, %v24612_v32  ;;  %v2079_v47 = vsub.f32 %v21339_v15, %v24613_v25  ;;  %17050 = vmatpush1.bf16.msra.mxu0 %v21136_v3  ;;  %v24264_v32 = vand.u32 4294901760, %v21518_v33 }
  0xa3   :  { %v2091_v48 = vsub.f32 %v21341_v8, %v24614_v42  ;;  %v21551_v55 = vpack.c.bf16 %v24616_v43, %v24615_v58  ;;  %v21558_v0 = vsub.f32 %v115_v45, %v2027_v10  ;;  %17052 = vmatprep.subr.bf16.mxu0 %v21143_v13  ;;  %v21563_v8 = vsub.f32 %v110_v12, %v2025_v37 }
  0xa4   :  { %24611 = vst [vmem:[#allocation96_spill] sm:$0xff] %v21535_v53  ;;  %v21556_v53 = vsub.f32 %v111_v23, %v2023_v28  ;;  %v21565_v58 = vsub.f32 %v114_v2, %v2029_v14  ;;  %v21568_v43 = vpack.c.bf16 %v2021_v54, %v2017_v1  ;;  %v21570_v6 = vpack.c.bf16 %v2027_v10, %v2023_v28 }
  0xa5   :  { %24617 = vst [vmem:[#allocation97_spill] sm:$0xff] %v21551_v55  ;;  %17130 = vmatpush1.bf16.msra.mxu1 %v21494_v50  ;;  %v2074_v23 = vand.u32 4294901760, %v2073_v38  ;;  %v24620_v45 = vand.u32 4294901760, %v21516_v59  ;;  %v2086_v42 = vand.u32 4294901760, %v2085_v31  ;;  %v24622_v12 = vand.u32 4294901760, %v21348_v19 }
  0xa6   :  { %24618 = vst [vmem:[#allocation98_spill] sm:$0xff] %v21568_v43  ;;  %24619 = vst [vmem:[#allocation99_spill] sm:$0xff] %v21570_v6  ;;  %17132 = vmatprep.subr.bf16.mxu1 %v21504_v44  ;;  %v24623_v25 = vand.u32 4294901760, %v21350_v11  ;;  %v24624_v54 = vand.u32 4294901760, %v21523_v18  ;;  %v24625_v28 = vand.u32 4294901760, %v21525_v39  ;;  %17054 = vmatpush1.bf16.msra.mxu0 %v21155_v29  ;;  %v21592_v38 = vpack.c.bf16 %v2029_v14, %v2025_v37 }
  0xa7   :  { %v21576_v13 = vpack.c.bf16 %v24264_v32, %v24620_v45  ;;  %v2097_v2 = vsub.f32 %v21348_v19, %v24622_v12  ;;  %v2080_v45 = vand.u32 4294901760, %v2079_v47  ;;  %v24273_v31 = vand.u32 4294901760, %v21556_v53  ;;  %17056 = vmatprep.subr.bf16.mxu0 %v21167_v24 }
  0xa8   :  { %v2109_v1 = vsub.f32 %v21350_v11, %v24623_v25  ;;  %v21589_v10 = vpack.c.bf16 %v24625_v28, %v24624_v54  ;;  %24627 = vst [vmem:[#allocation102_spill] sm:$0xff] %v21592_v38  ;;  %v2092_v12 = vand.u32 4294901760, %v2091_v48  ;;  %v24628_v25 = vand.u32 4294901760, %v21357_v9 }
  0xa9   :  { %24621 = vst [vmem:[#allocation100_spill] sm:$0xff] %v21576_v13  ;;  %17134 = vmatpush1.bf16.msra.mxu1 %v21568_v43  ;;  %v24629_v37 = vand.u32 4294901760, %v21359_v56  ;;  %v24630_v14 = vand.u32 4294901760, %v21373_v22  ;;  %v24631_v48 = vand.u32 4294901760, %v21375_v62  ;;  %v21619_v54 = vpack.c.bf16 %v2086_v42, %v2074_v23 }
  0xaa   :  { %24626 = vst [vmem:[#allocation101_spill] sm:$0xff] %v21589_v10  ;;  %v2103_v3 = vsub.f32 %v21357_v9, %v24628_v25  ;;  %v24632_v25 = vand.u32 4294901760, %v21558_v0  ;;  %17136 = vmatprep.subr.bf16.mxu1 %v21570_v6  ;;  %v2098_v24 = vand.u32 4294901760, %v2097_v2  ;;  %v24635_v29 = vand.u32 4294901760, %v21563_v8  ;;  %17058 = vmatpush1.bf16.msra.mxu0 %v21174_v51 }
  0xab   :  { %v2115_v47 = vsub.f32 %v21359_v56, %v24629_v37  ;;  %v2121_v28 = vsub.f32 %v21373_v22, %v24630_v14  ;;  %v2133_v32 = vsub.f32 %v21375_v62, %v24631_v48  ;;  %24634 = vst [vmem:[#allocation104_spill] sm:$0xff] %v21619_v54  ;;  %v2110_v37 = vand.u32 4294901760, %v2109_v1  ;;  %17060 = vmatprep.subr.bf16.mxu0 %v21181_v40 }
  0xac   :  { %v21616_v13 = vpack.c.bf16 %v24632_v25, %v24273_v31  ;;  %v24636_v14 = vand.u32 4294901760, %v21565_v58  ;;  %v2104_v48 = vand.u32 4294901760, %v2103_v3  ;;  %v24638_v25 = vand.u32 4294901760, %v21381_v61 }
  0xad   :  { %v24639_v42 = vand.u32 4294901760, %v21383_v20  ;;  %17138 = vmatpush1.bf16.msra.mxu1 %v21592_v38  ;;  %v21636_v2 = vpack.c.bf16 %v2092_v12, %v2080_v45  ;;  %v2116_v1 = vand.u32 4294901760, %v2115_v47  ;;  %v21639_v51 = vpack.c.bf16 %v2110_v37, %v2098_v24 }
  0xae   :  { %24633 = vst [vmem:[#allocation103_spill] sm:$0xff] %v21616_v13  ;;  %v21625_v10 = vpack.c.bf16 %v24636_v14, %v24635_v29  ;;  %v2127_v31 = vsub.f32 %v21381_v61, %v24638_v25  ;;  %v2122_v29 = vand.u32 4294901760, %v2121_v28  ;;  %v2134_v14 = vand.u32 4294901760, %v2133_v32  ;;  %17140 = vmatprep.subr.bf16.mxu1 %v21619_v54  ;;  %17062 = vmatpush1.bf16.msra.mxu0 %v21192_v57 }
  0xaf   :  { %v2139_v23 = vsub.f32 %v21383_v20, %v24639_v42  ;;  %24640 = vst [vmem:[#allocation106_spill] sm:$0xff] %v21639_v51  ;;  %v24641_v3 = vand.u32 4294901760, %v21417_v30  ;;  %v24642_v25 = vand.u32 4294901760, %v21419_v41  ;;  %17064 = vmatprep.subr.bf16.mxu0 %v21203_v21  ;;  %v24643_v12 = vand.u32 4294901760, %v21425_v4  ;;  %v24655_v21 = vld [vmem:[#allocation65_spill] sm:$0xff] }
  0xb0   :  { %24637 = vst [vmem:[#allocation105_spill] sm:$0xff] %v21625_v10  ;;  %2064 = vmatmul.mubr.f32.vlgmr.msra.gmra.mrb[6].mxu1 %v24455_v17  ;;  %v2128_v45 = vand.u32 4294901760, %v2127_v31  ;;  %v24644_v47 = vand.u32 4294901760, %v21427_v49  ;;  %v21657_v37 = vpack.c.bf16 %v2116_v1, %v2104_v48  ;;  %v21659_v42 = vpack.c.bf16 %v2134_v14, %v2122_v29 }
  0xb1   :  { %v2145_v40 = vsub.f32 %v21417_v30, %v24641_v3  ;;  %v2157_v10 = vsub.f32 %v21419_v41, %v24642_v25  ;;  %v2140_v32 = vand.u32 4294901760, %v2139_v23  ;;  %v2151_v24 = vsub.f32 %v21425_v4, %v24643_v12  ;;  %17142 = vmatpush1.bf16.msra.mxu1 %v21636_v2  ;;  %2294 = vmatprep.mubr.f32.mxu1 %v24455_v17 }
  0xb2   :  { %v2163_v28 = vsub.f32 %v21427_v49, %v24644_v47  ;;  %24645 = vst [vmem:[#allocation107_spill] sm:$0xff] %v21657_v37  ;;  %24646 = vst [vmem:[#allocation108_spill] sm:$0xff] %v21659_v42  ;;  %17144 = vmatprep.subr.bf16.mxu1 %v21639_v51  ;;  %v24647_v3 = vand.u32 4294901760, %v21450_v27  ;;  %v24648_v12 = vand.u32 4294901760, %v21452_v52  ;;  %17066 = vmatpush1.bf16.msra.mxu0 %v21209_v63  ;;  %v24651_v14 = vand.u32 4294901760, %v21459_v60 }
  0xb3   :  { %v2146_v31 = vand.u32 4294901760, %v2145_v40  ;;  %v2158_v23 = vand.u32 4294901760, %v2157_v10  ;;  %17068 = vmatprep.subr.bf16.mxu0 %v21215_v36  ;;  %v21671_v48 = vpack.c.bf16 %v2140_v32, %v2128_v45  ;;  %v2152_v1 = vand.u32 4294901760, %v2151_v24 }
  0xb4   :  { %v2169_v25 = vsub.f32 %v21450_v27, %v24647_v3  ;;  %v2181_v47 = vsub.f32 %v21452_v52, %v24648_v12  ;;  %v2164_v29 = vand.u32 4294901760, %v2163_v28  ;;  %v24650_v40 = vand.u32 4294901760, %v21457_v35 }
  0xb5   :  { %24649 = vst [vmem:[#allocation109_spill] sm:$0xff] %v21671_v48  ;;  %17146 = vmatpush1.bf16.msra.mxu1 %v21657_v37  ;;  %v2187_v3 = vsub.f32 %v21459_v60, %v24651_v14  ;;  %v24652_v12 = vand.u32 4294901760, %v21482_v7  ;;  %v24653_v36 = vand.u32 4294901760, %v21484_v34  ;;  %v21687_v32 = vpack.c.bf16 %v2158_v23, %v2146_v31 }
  0xb6   :  { %v2175_v10 = vsub.f32 %v21457_v35, %v24650_v40  ;;  %17148 = vmatprep.subr.bf16.mxu1 %v21659_v42  ;;  %v2170_v24 = vand.u32 4294901760, %v2169_v25  ;;  %v2182_v28 = vand.u32 4294901760, %v2181_v47  ;;  %17070 = vmatpush1.bf16.msra.mxu0 %v24655_v21  ;;  %v24656_v40 = vld [vmem:[#allocation67_spill] sm:$0xff]  ;;  %v21691_v57 = vpack.c.bf16 %v2164_v29, %v2152_v1  ;;  %v24663_v42 = vld [vmem:[#allocation68_spill] sm:$0xff] }
  0xb7   :  { %v2193_v63 = vsub.f32 %v21482_v7, %v24652_v12  ;;  %v2205_v45 = vsub.f32 %v21484_v34, %v24653_v36  ;;  %24654 = vst [vmem:[#allocation110_spill] sm:$0xff] %v21687_v32  ;;  %17072 = vmatprep.subr.bf16.mxu0 %v24656_v40  ;;  %v24658_v14 = vand.u32 4294901760, %v21489_v16  ;;  %v24659_v37 = vand.u32 4294901760, %v21491_v46 }
  0xb8   :  { %24657 = vst [vmem:[#allocation111_spill] sm:$0xff] %v21691_v57  ;;  %v2176_v31 = vand.u32 4294901760, %v2175_v10  ;;  %v2188_v23 = vand.u32 4294901760, %v2187_v3  ;;  %v21701_v21 = vpack.c.bf16 %v2182_v28, %v2170_v24  ;;  %v24661_v1 = vand.u32 4294901760, %v21516_v59 }
  0xb9   :  { %v2199_v12 = vsub.f32 %v21489_v16, %v24658_v14  ;;  %v2211_v36 = vsub.f32 %v21491_v46, %v24659_v37  ;;  %17150 = vmatpush1.bf16.msra.mxu1 %v21671_v48  ;;  %v2194_v25 = vand.u32 4294901760, %v2193_v63  ;;  %v2206_v47 = vand.u32 4294901760, %v2205_v45  ;;  %v24664_v37 = vld [vmem:[#allocation9_spill] sm:$0xff] }
  0xba   :  { %17152 = vmatprep.subr.bf16.mxu1 %v21687_v32  ;;  %24660 = vst [vmem:[#allocation112_spill] sm:$0xff] %v21701_v21  ;;  %v2217_v29 = vsub.f32 %v21516_v59, %v24661_v1  ;;  %v24662_v14 = vand.u32 4294901760, %v21518_v33  ;;  %17074 = vmatpush1.bf16.msra.mxu0 %v24663_v42  ;;  %v21712_v63 = vpack.c.bf16 %v2188_v23, %v2176_v31  ;;  %v24667_v24 = vand.u32 4294901760, %v21523_v18 }
  0xbb   :  { %17076 = vmatprep.subr.bf16.mxu0 %v24664_v37  ;;  %v2200_v10 = vand.u32 4294901760, %v2199_v12  ;;  %v2212_v3 = vand.u32 4294901760, %v2211_v36  ;;  %v21714_v45 = vpack.c.bf16 %v2206_v47, %v2194_v25  ;;  %v24668_v1 = vand.u32 4294901760, %v21525_v39  ;;  %v24671_v47 = vld [vmem:[#allocation10_spill] sm:$0xff] }
  0xbc   :  { %v2229_v40 = vsub.f32 %v21518_v33, %v24662_v14  ;;  %24665 = vst [vmem:[#allocation9_spill] sm:$0xff] %v21712_v63  ;;  %v2223_v28 = vsub.f32 %v21523_v18, %v24667_v24  ;;  %v2218_v12 = vand.u32 4294901760, %v2217_v29  ;;  %v24669_v42 = vand.u32 4294901760, %v21556_v53  ;;  %v24672_v24 = vld [vmem:[#allocation12_spill] sm:$0xff] }
  0xbd   :  { %17154 = vmatpush1.bf16.msra.mxu1 %v21691_v57  ;;  %24666 = vst [vmem:[#allocation113_spill] sm:$0xff] %v21714_v45  ;;  %v2235_v14 = vsub.f32 %v21525_v39, %v24668_v1  ;;  %1858 = vmatmul.mubr.f32.vlgmr.msra.gmra.mrb[2].mxu0 %v24455_v17  ;;  %v24670_v23 = vand.u32 4294901760, %v21558_v0  ;;  %v21733_v1 = vpack.c.bf16 %v2212_v3, %v2200_v10  ;;  %v24675_v57 = vand.u32 4294901760, %v21565_v58  ;;  %v24677_v10 = vld [vmem:[#allocation13_spill] sm:$0xff]  ;;  %v24678_v3 = vld [vmem:[#allocation14_spill] sm:$0xff] }
  0xbe   :  { %17156 = vmatprep.subr.bf16.mxu1 %v21701_v21  ;;  %v2230_v36 = vand.u32 4294901760, %v2229_v40  ;;  %v2241_v31 = vsub.f32 %v21556_v53, %v24669_v42  ;;  %17078 = vmatpush1.bf16.msra.mxu0 %v24671_v47  ;;  %v2224_v29 = vand.u32 4294901760, %v2223_v28  ;;  %v24674_v21 = vand.u32 4294901760, %v21563_v8 }
  0xbf   :  { %v2253_v25 = vsub.f32 %v21558_v0, %v24670_v23  ;;  %1960 = vmatprep.mubr.f32.mxu0 %v24455_v17  ;;  %17080 = vmatprep.subr.bf16.mxu0 %v24672_v24  ;;  %24673 = vst [vmem:[#allocation10_spill] sm:$0xff] %v21733_v1  ;;  %v2236_v40 = vand.u32 4294901760, %v2235_v14  ;;  %v2259_v23 = vsub.f32 %v21565_v58, %v24675_v57  ;;  %v24681_v57 = vld [vmem:[#allocation17_spill] sm:$0xff] }
  0xc0   :  { %v2247_v42 = vsub.f32 %v21563_v8, %v24674_v21  ;;  %v21743_v32 = vpack.c.bf16 %v2230_v36, %v2218_v12  ;;  %v2242_v48 = vand.u32 4294901760, %v2241_v31  ;;  %v24682_v12 = vld [vmem:[#allocation20_spill] sm:$0xff]  ;;  %v21761_v31 = vpack.c.bf16 %v21337_v26, %v21335_v5  ;;  %v24691_v26 = vld [vmem:[#allocation27_spill] sm:$0xff] }
  0xc1   :  { %17158 = vmatpush1.bf16.msra.mxu1 %v21712_v63  ;;  %v2254_v51 = vand.u32 4294901760, %v2253_v25  ;;  %v21748_v28 = vpack.c.bf16 %v2236_v40, %v2224_v29  ;;  %v2260_v21 = vand.u32 4294901760, %v2259_v23  ;;  %v24685_v25 = vld [vmem:[#allocation21_spill] sm:$0xff]  ;;  %v24686_v29 = vld [vmem:[#allocation24_spill] sm:$0xff]  ;;  %v21773_v40 = vpack.c.bf16 %v21350_v11, %v21348_v19  ;;  %v24694_v19 = vld [vmem:[#allocation30_spill] sm:$0xff] }
  0xc2   :  { %17160 = vmatprep.subr.bf16.mxu1 %v21714_v45  ;;  %24676 = vst [vmem:[#allocation12_spill] sm:$0xff] %v21743_v32  ;;  %17082 = vmatpush1.bf16.msra.mxu0 %v24677_v10  ;;  %v2248_v14 = vand.u32 4294901760, %v2247_v42  ;;  %24684 = vst [vmem:[#allocation116_spill] sm:$0xff] %v21761_v31  ;;  %v24690_v42 = vld [vmem:[#allocation26_spill] sm:$0xff]  ;;  %v21781_v5 = vpack.c.bf16 %v21359_v56, %v21357_v9  ;;  %v21787_v11 = vpack.c.bf16 %v21375_v62, %v21373_v22  ;;  %v24698_v56 = vld [vmem:[#allocation31_spill] sm:$0xff] }
  0xc3   :  { %17084 = vmatprep.subr.bf16.mxu0 %v24678_v3  ;;  %24679 = vst [vmem:[#allocation13_spill] sm:$0xff] %v21748_v28  ;;  %v21751_v63 = vpack.c.bf16 %v2254_v51, %v2242_v48  ;;  %v24687_v51 = vld [vmem:[#allocation37_spill] sm:$0xff]  ;;  %24689 = vst [vmem:[#allocation117_spill] sm:$0xff] %v21773_v40  ;;  %v21794_v23 = vpack.c.bf16 %v21383_v20, %v21381_v61  ;;  %v21799_v9 = vpack.c.bf16 %v21419_v41, %v21417_v30  ;;  %v24699_v62 = vld [vmem:[#allocation32_spill] sm:$0xff] }
  0xc4   :  { %v21756_v36 = vpack.c.bf16 %v2260_v21, %v2248_v14  ;;  %v21768_v48 = vpack.c.bf16 %v24687_v51, %v21339_v15  ;;  %24692 = vst [vmem:[#allocation118_spill] sm:$0xff] %v21781_v5  ;;  %24693 = vst [vmem:[#allocation119_spill] sm:$0xff] %v21787_v11  ;;  %v24695_v15 = vld [vmem:[#allocation29_spill] sm:$0xff]  ;;  %v21806_v22 = vpack.c.bf16 %v21427_v49, %v21425_v4  ;;  %v24702_v20 = vld [vmem:[#allocation34_spill] sm:$0xff] }
  0xc5   :  { %17162 = vmatpush1.bf16.msra.mxu1 %v21733_v1  ;;  %24680 = vst [vmem:[#allocation114_spill] sm:$0xff] %v21751_v63  ;;  %24696 = vst [vmem:[#allocation120_spill] sm:$0xff] %v21794_v23  ;;  %v21811_v61 = vpack.c.bf16 %v21452_v52, %v21450_v27  ;;  %v21818_v41 = vpack.c.bf16 %v21459_v60, %v21457_v35  ;;  %v21824_v30 = vpack.c.bf16 %v21484_v34, %v21482_v7  ;;  %v24710_v27 = vld [vmem:[#allocation36_spill] sm:$0xff]  ;;  %v24711_v35 = vld [vmem:[#allocation39_spill] sm:$0xff] }
  0xc6   :  { %17164 = vmatprep.subr.bf16.mxu1 %v21743_v32  ;;  %17086 = vmatpush1.bf16.msra.mxu0 %v24681_v57  ;;  %24683 = vst [vmem:[#allocation115_spill] sm:$0xff] %v21756_v36  ;;  %24688 = vst [vmem:[#allocation37_spill] sm:$0xff] %v21768_v48  ;;  %v21832_v52 = vpack.c.bf16 %v21491_v46, %v21489_v16  ;;  %v21837_v4 = vpack.c.bf16 %v21518_v33, %v21516_v59  ;;  %v24713_v60 = vld [vmem:[#allocation77_spill] sm:$0xff]  ;;  %v24714_v7 = vld [vmem:[#allocation78_spill] sm:$0xff] }
  0xc7   :  { %17088 = vmatprep.subr.bf16.mxu0 %v24682_v12  ;;  %24697 = vst [vmem:[#allocation121_spill] sm:$0xff] %v21799_v9  ;;  %24700 = vst [vmem:[#allocation122_spill] sm:$0xff] %v21806_v22  ;;  %v21844_v34 = vpack.c.bf16 %v21525_v39, %v21523_v18  ;;  %v21849_v49 = vpack.c.bf16 %v21558_v0, %v21556_v53  ;;  %v21856_v33 = vpack.c.bf16 %v21565_v58, %v21563_v8  ;;  %v24712_v8 = vld [vmem:[#allocation76_spill] sm:$0xff]  ;;  %v24715_v0 = vld [vmem:[#allocation79_spill] sm:$0xff]  ;;  %v119_v58 = vlaneseq }
  0xc8   :  { %24701 = vst [vmem:[#allocation123_spill] sm:$0xff] %v21811_v61  ;;  %24703 = vst [vmem:[#allocation124_spill] sm:$0xff] %v21818_v41  ;;  %v24716_v16 = vld [vmem:[#allocation80_spill] sm:$0xff]  ;;  %v24717_v59 = vld [vmem:[#allocation11_spill] sm:$0xff] }
  0xc9   :  { %17166 = vmatpush1.bf16.msra.mxu1 %v21748_v28  ;;  %24704 = vst [vmem:[#allocation125_spill] sm:$0xff] %v21824_v30  ;;  %24705 = vst [vmem:[#allocation126_spill] sm:$0xff] %v21832_v52  ;;  %v24718_v18 = vld [vmem:[#allocation85_spill] sm:$0xff]  ;;  %v24719_v53 = vld [vmem:[#allocation87_spill] sm:$0xff]  ;;  %v21883_v51 = vshrl.u32 %v119_v58, 7 }
  0xca   :  { %17168 = vmatprep.subr.bf16.mxu1 %v21751_v63  ;;  %17090 = vmatpush1.bf16.msra.mxu0 %v24685_v25  ;;  %24706 = vst [vmem:[#allocation127_spill] sm:$0xff] %v21837_v4  ;;  %24707 = vst [vmem:[#allocation128_spill] sm:$0xff] %v21844_v34  ;;  %v24720_v14 = vld [vmem:[#allocation89_spill] sm:$0xff]  ;;  %v24721_v21 = vld [vmem:[#allocation91_spill] sm:$0xff] }
  0xcb   :  { %17092 = vmatprep.subr.bf16.mxu0 %v24686_v29  ;;  %24708 = vst [vmem:[#allocation129_spill] sm:$0xff] %v21849_v49  ;;  %24709 = vst [vmem:[#allocation130_spill] sm:$0xff] %v21856_v33 }
  0xcd   :  { %17170 = vmatpush1.bf16.msra.mxu1 %v21756_v36 }
  0xce   :  { %17172 = vmatprep.subr.bf16.mxu1 %v21761_v31  ;;  %17094 = vmatpush1.bf16.msra.mxu0 %v24690_v42 }
  0xcf   :  { %17096 = vmatprep.subr.bf16.mxu0 %v24691_v26 }
  0xd0   :  { %2295 = vmatmul.mubr.f32.vlgmr.msra.gmra.mrb[6].mxu1 %v24455_v17 }
  0xd1   :  { %17174 = vmatpush1.bf16.msra.mxu1 %v21768_v48  ;;  %2429 = vmatprep.mubr.f32.mxu1 %v24455_v17 }
  0xd2   :  { %17176 = vmatprep.subr.bf16.mxu1 %v21773_v40  ;;  %17098 = vmatpush1.bf16.msra.mxu0 %v24694_v19 }
  0xd3   :  { %17100 = vmatprep.subr.bf16.mxu0 %v24695_v15 }
  0xd5   :  { %17178 = vmatpush1.bf16.msra.mxu1 %v21781_v5 }
  0xd6   :  { %17180 = vmatprep.subr.bf16.mxu1 %v21787_v11  ;;  %17102 = vmatpush1.bf16.msra.mxu0 %v24698_v56 }
  0xd7   :  { %17104 = vmatprep.subr.bf16.mxu0 %v24699_v62 }
  0xd9   :  { %17182 = vmatpush1.bf16.msra.mxu1 %v21794_v23 }
  0xda   :  { %17184 = vmatprep.subr.bf16.mxu1 %v21799_v9  ;;  %17106 = vmatpush1.bf16.msra.mxu0 %v24702_v20 }
  0xdb   :  { %17300 = vmatprep.subr.bf16.mxu0 %v24664_v37 }
  0xdd   :  { %17186 = vmatpush1.bf16.msra.mxu1 %v21806_v22  ;;  %1961 = vmatmul.mubr.f32.vlgmr.msra.gmra.mrb[2].mxu0 %v24455_v17 }
  0xde   :  { %17188 = vmatprep.subr.bf16.mxu1 %v21811_v61  ;;  %17302 = vmatpush1.bf16.msra.mxu0 %v24671_v47 }
  0xdf   :  { %2933 = vmatprep.mubr.f32.mxu0 %v24455_v17  ;;  %17304 = vmatprep.subr.bf16.mxu0 %v24672_v24 }
  0xe1   :  { %17190 = vmatpush1.bf16.msra.mxu1 %v21818_v41 }
  0xe2   :  { %17192 = vmatprep.subr.bf16.mxu1 %v21824_v30  ;;  %17306 = vmatpush1.bf16.msra.mxu0 %v24677_v10 }
  0xe3   :  { %17308 = vmatprep.subr.bf16.mxu0 %v24678_v3  ;;  %v24726_v3 = vld [vmem:[#allocation86_spill] sm:$0xff] }
  0xe5   :  { %17194 = vmatpush1.bf16.msra.mxu1 %v21832_v52 }
  0xe6   :  { %17196 = vmatprep.subr.bf16.mxu1 %v21837_v4  ;;  %17310 = vmatpush1.bf16.msra.mxu0 %v24681_v57 }
  0xe7   :  { %17312 = vmatprep.subr.bf16.mxu0 %v24682_v12  ;;  %v24723_v12 = vld [vmem:[#allocation82_spill] sm:$0xff] }
  0xe9   :  { %17198 = vmatpush1.bf16.msra.mxu1 %v21844_v34 }
  0xea   :  { %17200 = vmatprep.subr.bf16.mxu1 %v21849_v49  ;;  %17314 = vmatpush1.bf16.msra.mxu0 %v24685_v25 }
  0xeb   :  { %17316 = vmatprep.subr.bf16.mxu0 %v24686_v29 }
  0xed   :  { %17202 = vmatpush1.bf16.msra.mxu1 %v21856_v33 }
  0xee   :  { %17204 = vmatprep.subr.bf16.mxu1 %v24710_v27  ;;  %17318 = vmatpush1.bf16.msra.mxu0 %v24690_v42 }
  0xef   :  { %17320 = vmatprep.subr.bf16.mxu0 %v24691_v26 }
  0xf0   :  { %2430 = vmatmul.mubr.f32.vlgmr.msra.gmra.mrb[6].mxu1 %v24455_v17 }
  0xf1   :  { %17206 = vmatpush1.bf16.msra.mxu1 %v24711_v35  ;;  %2532 = vmatprep.mubr.f32.mxu1 %v24455_v17 }
  0xf2   :  { %17208 = vmatprep.subr.bf16.mxu1 %v24712_v8  ;;  %17322 = vmatpush1.bf16.msra.mxu0 %v24694_v19  ;;  %v24722_v19 = vld [vmem:[#allocation81_spill] sm:$0xff] }
  0xf3   :  { %17324 = vmatprep.subr.bf16.mxu0 %v24695_v15 }
  0xf5   :  { %17210 = vmatpush1.bf16.msra.mxu1 %v24713_v60 }
  0xf6   :  { %17212 = vmatprep.subr.bf16.mxu1 %v24714_v7  ;;  %17326 = vmatpush1.bf16.msra.mxu0 %v24698_v56 }
  0xf7   :  { %17328 = vmatprep.subr.bf16.mxu0 %v24699_v62  ;;  %v125_v62 = vsub.s32 1, %v21883_v51 }
  0xf9   :  { %17214 = vmatpush1.bf16.msra.mxu1 %v24715_v0 }
  0xfa   :  { %17216 = vmatprep.subr.bf16.mxu1 %v24716_v16  ;;  %17330 = vmatpush1.bf16.msra.mxu0 %v24702_v20  ;;  %v121_v20 = vsub.s32 0, %v21883_v51 }
  0xfb   :  { %17332 = vmatprep.subr.bf16.mxu0 %v24717_v59  ;;  %v21891_v59 = vld [vmem:[%s24069_s3] sm:$0xf] }
  0xfc   :  { %v629_v46 = vpop.f32.mrb[0].mxu0  ;;  %v122_v58 = vrot.slane %v21891_v59, %v121_v20  ;;  %v126_v56 = vrot.slane %v21891_v59, %v125_v62  ;;  %v24724_v20 = vld [vmem:[#allocation83_spill] sm:$0xff]  ;;  %v24725_v62 = vld [vmem:[#allocation84_spill] sm:$0xff] }
  0xfd   :  { %17218 = vmatpush1.bf16.msra.mxu1 %v24718_v18  ;;  %v631_v39 = vpop.f32.mrb[1].mxu0 }
  0xfe   :  { %17220 = vmatprep.subr.bf16.mxu1 %v24719_v53 }
 0x101   :  { %17222 = vmatpush1.bf16.msra.mxu1 %v24720_v14 }
 0x102   :  { %17224 = vmatprep.subr.bf16.mxu1 %v24721_v21 }
 0x105   :  { %17226 = vmatpush1.bf16.msra.mxu1 %v21494_v50 }
 0x106   :  { %17228 = vmatprep.subr.bf16.mxu1 %v21504_v44 }
 0x109   :  { %17230 = vmatpush1.bf16.msra.mxu1 %v21568_v43 }
 0x10a   :  { %17232 = vmatprep.subr.bf16.mxu1 %v21570_v6 }
 0x10d   :  { %17234 = vmatpush1.bf16.msra.mxu1 %v21592_v38  ;;  %v469_v15 = vpop.f32.mrb[0].mxu1 }
 0x10e   :  { %17236 = vmatprep.subr.bf16.mxu1 %v24722_v19  ;;  %v20203_v26 = vadd.f32 %v469_v15, %v122_v58  ;;  %v471_v42 = vpop.f32.mrb[1].mxu1  ;;  %v24727_v19 = vld [vmem:[#allocation88_spill] sm:$0xff]  ;;  %v24728_v15 = vld [vmem:[#allocation90_spill] sm:$0xff]  ;;  %v24735_v58 = vld [vmem:[#allocation105_spill] sm:$0xff] }
 0x10f   :  { %v20205_v29 = vadd.f32 %v471_v42, %v126_v56  ;;  %v24729_v42 = vld [vmem:[#allocation92_spill] sm:$0xff]  ;;  %v24731_v56 = vld [vmem:[#allocation95_spill] sm:$0xff] }
 0x110   :  { %2533 = vmatmul.mubr.f32.vlgmr.msra.gmra.mrb[6].mxu1 %v24455_v17  ;;  %v21901_v25 = vadd.f32 %v20203_v26, %v629_v46  ;;  %v24730_v26 = vld [vmem:[#allocation93_spill] sm:$0xff]  ;;  %v24733_v46 = vld [vmem:[#allocation100_spill] sm:$0xff] }
 0x111   :  { %17238 = vmatpush1.bf16.msra.mxu1 %v24723_v12  ;;  %v21904_v57 = vadd.f32 %v20205_v29, %v631_v39  ;;  %2699 = vmatprep.mubr.f32.mxu1 %v24455_v17  ;;  %v24732_v29 = vld [vmem:[#allocation96_spill] sm:$0xff]  ;;  %v24734_v39 = vld [vmem:[#allocation101_spill] sm:$0xff]  ;;  %v129_v12 = vsub.s32 2, %v21883_v51 }
 0x112   :  { %17240 = vmatprep.subr.bf16.mxu1 %v24724_v20 }
 0x115   :  { %17242 = vmatpush1.bf16.msra.mxu1 %v24725_v62 }
 0x116   :  { %17244 = vmatprep.subr.bf16.mxu1 %v24726_v3 }
 0x119   :  { %17246 = vmatpush1.bf16.msra.mxu1 %v24727_v19 }
 0x11a   :  { %17248 = vmatprep.subr.bf16.mxu1 %v24728_v15 }
 0x11d   :  { %17250 = vmatpush1.bf16.msra.mxu1 %v24729_v42 }
 0x11e   :  { %17252 = vmatprep.subr.bf16.mxu1 %v24730_v26 }
 0x121   :  { %17254 = vmatpush1.bf16.msra.mxu1 %v24731_v56 }
 0x122   :  { %17256 = vmatprep.subr.bf16.mxu1 %v24732_v29 }
 0x125   :  { %17258 = vmatpush1.bf16.msra.mxu1 %v21551_v55 }
 0x126   :  { %17260 = vmatprep.subr.bf16.mxu1 %v24733_v46 }
 0x129   :  { %17262 = vmatpush1.bf16.msra.mxu1 %v24734_v39 }
 0x12a   :  { %17264 = vmatprep.subr.bf16.mxu1 %v21616_v13 }
 0x12d   :  { %17266 = vmatpush1.bf16.msra.mxu1 %v24735_v58 }
 0x12e   :  { %17268 = vmatprep.subr.bf16.mxu1 %v24710_v27 }
 0x130   :  { %2700 = vmatmul.mubr.f32.vlgmr.msra.gmra.mrb[6].mxu1 %v24455_v17 }
 0x131   :  { %17270 = vmatpush1.bf16.msra.mxu1 %v24711_v35  ;;  %2802 = vmatprep.mubr.f32.mxu1 %v24455_v17 }
 0x132   :  { %17272 = vmatprep.subr.bf16.mxu1 %v24712_v8 }
 0x135   :  { %17274 = vmatpush1.bf16.msra.mxu1 %v24713_v60 }
 0x136   :  { %17276 = vmatprep.subr.bf16.mxu1 %v24714_v7 }
 0x139   :  { %17278 = vmatpush1.bf16.msra.mxu1 %v24715_v0 }
 0x13a   :  { %17280 = vmatprep.subr.bf16.mxu1 %v24716_v16 }
 0x13d   :  { %17282 = vmatpush1.bf16.msra.mxu1 %v24718_v18 }
 0x13e   :  { %17284 = vmatprep.subr.bf16.mxu1 %v24719_v53 }
 0x141   :  { %17286 = vmatpush1.bf16.msra.mxu1 %v24720_v14 }
 0x142   :  { %17288 = vmatprep.subr.bf16.mxu1 %v24721_v21 }
 0x143   :  { %v1120_v58 = vpop.f32.mrb[2].mxu1 }
 0x144   :  { %v1122_v13 = vpop.f32.mrb[3].mxu1 }
 0x145   :  { %17290 = vmatpush1.bf16.msra.mxu1 %v21494_v50 }
 0x146   :  { %17292 = vmatprep.subr.bf16.mxu1 %v21504_v44 }
 0x149   :  { %17294 = vmatpush1.bf16.msra.mxu1 %v21568_v43 }
 0x14a   :  { %17296 = vmatprep.subr.bf16.mxu1 %v21570_v6 }
 0x14d   :  { %17298 = vmatpush1.bf16.msra.mxu1 %v21592_v38 }
 0x14e   :  { %17492 = vmatprep.subr.bf16.mxu1 %v24710_v27 }
 0x150   :  { %2803 = vmatmul.mubr.f32.vlgmr.msra.gmra.mrb[6].mxu1 %v24455_v17 }
 0x151   :  { %17494 = vmatpush1.bf16.msra.mxu1 %v24711_v35  ;;  %3788 = vmatprep.mubr.f32.mxu1 %v24455_v17 }
 0x152   :  { %17496 = vmatprep.subr.bf16.mxu1 %v24712_v8 }
 0x155   :  { %17498 = vmatpush1.bf16.msra.mxu1 %v24713_v60 }
 0x156   :  { %17500 = vmatprep.subr.bf16.mxu1 %v24714_v7 }
 0x159   :  { %17502 = vmatpush1.bf16.msra.mxu1 %v24715_v0 }
 0x15a   :  { %17504 = vmatprep.subr.bf16.mxu1 %v24716_v16 }
 0x15d   :  { %17506 = vmatpush1.bf16.msra.mxu1 %v24718_v18 }
 0x15e   :  { %17508 = vmatprep.subr.bf16.mxu1 %v24719_v53 }
 0x161   :  { %17510 = vmatpush1.bf16.msra.mxu1 %v24720_v14 }
 0x162   :  { %17512 = vmatprep.subr.bf16.mxu1 %v24721_v21 }
 0x163   :  { %v1223_v39 = vpop.f32.mrb[4].mxu1 }
 0x164   :  { %v1225_v46 = vpop.f32.mrb[5].mxu1 }
 0x165   :  { %17514 = vmatpush1.bf16.msra.mxu1 %v21494_v50 }
 0x166   :  { %17516 = vmatprep.subr.bf16.mxu1 %v21504_v44 }
 0x169   :  { %17518 = vmatpush1.bf16.msra.mxu1 %v21568_v43 }
 0x16a   :  { %17520 = vmatprep.subr.bf16.mxu1 %v21570_v6 }
 0x16d   :  { %17522 = vmatpush1.bf16.msra.mxu1 %v21592_v38  ;;  %v133_v38 = vsub.s32 3, %v21883_v51 }
 0x16e   :  { %17524 = vmatprep.subr.bf16.mxu1 %v21619_v54 }
 0x1b0   :  { %v1962_v55 = vpop.f32.mrb[2].mxu0 }
 0x1b1   :  { %v20209_v29 = vadd.f32 %v1962_v55, %v1223_v39  ;;  %v1964_v56 = vpop.f32.mrb[3].mxu0  ;;  %v130_v55 = vrot.slane %v21891_v59, %v129_v12 }
 0x1b2   :  { %v20210_v26 = vadd.f32 %v1964_v56, %v1225_v46  ;;  %v134_v56 = vrot.slane %v21891_v59, %v133_v38 }
 0x1b3   :  { %v2809_v15 = vadd.f32 %v20209_v29, %v21901_v25  ;;  %v21964_v39 = vadd.f32 %v1120_v58, %v130_v55 }
 0x1b4   :  { %v2810_v42 = vadd.f32 %v20210_v26, %v21904_v57 }
 0x1b5   :  { %v2813_v3 = vsub.f32 0.0, %v2809_v15 }
 0x1b6   :  { %v2819_v19 = vsub.f32 0.0, %v2810_v42  ;;  %v21966_v42 = vadd.f32 %v1122_v13, %v134_v56 }
 0x1b7   :  { %v2814_v20 = vmul.f32 1.442695, %v2813_v3 }
 0x1b8   :  { %v2820_v62 = vmul.f32 1.442695, %v2819_v19 }
 0x1ba   :  { %20416 = vpow2.f32 %v2820_v62 }
 0x1bb   :  { %20418 = vpow2.f32 %v2814_v20 }
 0x1c4   :  { %v20417_v6 = vpop.eup %20416 }
 0x1c5   :  { %v20419_v54 = vpop.eup %20418  ;;  %v2822_v46 = vadd.f32 1.0, %v20417_v6 }
 0x1c6   :  { %v2816_v26 = vadd.f32 1.0, %v20419_v54 }
 0x1c7   :  { %20420 = vrcp.f32 %v2822_v46 }
 0x1c8   :  { %20422 = vrcp.f32 %v2816_v26 }
 0x1d1   :  { %v20421_v12 = vpop.eup %20420 }
 0x1d2   :  { %v20423_v38 = vpop.eup %20422  ;;  %v2832_v54 = vmul.f32 0.0, %v20421_v12  ;;  %v24739_v12 = vld [vmem:[#allocation106_spill] sm:$0xff] }
 0x223   :  { %v2804_v19 = vpop.f32.mrb[6].mxu1 }
 0x224   :  { %v2811_v3 = vadd.f32 %v21964_v39, %v2804_v19  ;;  %v2806_v20 = vpop.f32.mrb[7].mxu1 }
 0x225   :  { %v2812_v51 = vadd.f32 %v21966_v42, %v2806_v20 }
 0x226   :  { %20424 = vtanh.f32 %v2811_v3 }
 0x227   :  { %v2826_v62 = vsub.f32 0.0, %v2812_v51 }
 0x229   :  { %v2827_v15 = vmul.f32 1.442695, %v2826_v62  ;;  %v24737_v62 = vld [vmem:[#allocation15_spill] sm:$0xff] }
 0x22b   :  { %20426 = vpow2.f32 %v2827_v15  ;;  %v24738_v15 = vld [vmem:[#allocation16_spill] sm:$0xff] }
 0x230   :  { %v20425_v6 = vpop.eup %20424 }
 0x231   :  { %v2833_v59 = vmul.f32 %v20425_v6, %v20423_v38  ;;  %v24740_v38 = vld [vmem:[#allocation18_spill] sm:$0xff]  ;;  %v24741_v6 = vld [vmem:[#allocation107_spill] sm:$0xff] }
 0x233   :  { %v21970_v29 = vadd.f32 %v2833_v59, %v2832_v54  ;;  %v24742_v54 = vld [vmem:[#allocation19_spill] sm:$0xff]  ;;  %v24743_v59 = vld [vmem:[#allocation108_spill] sm:$0xff] }
 0x235   :  { %v20427_v13 = vpop.eup %20426  ;;  %20428 = vtanh.f32 %v21970_v29 }
 0x236   :  { %v2829_v58 = vadd.f32 1.0, %v20427_v13  ;;  %v24744_v13 = vld [vmem:[#allocation22_spill] sm:$0xff] }
 0x238   :  { %20430 = vrcp.f32 %v2829_v58  ;;  %v24745_v58 = vld [vmem:[#allocation109_spill] sm:$0xff] }
 0x23f   :  { %v20429_v55 = vpop.eup %20428 }
 0x242   :  { %v20431_v56 = vpop.eup %20430 }
 0x243   :  { %v21973_v46 = vmul.f32 %v20431_v56, %v20429_v55  ;;  %v24746_v55 = vld [vmem:[#allocation23_spill] sm:$0xff]  ;;  %v24747_v56 = vld [vmem:[#allocation110_spill] sm:$0xff] }
 0x245   :  { %24736 = vst [vmem:[#allocation36_spill] sm:$0xff] %v21973_v46  ;;  %v21976_v26 = vand.u32 4294901760, %v21973_v46 }
 0x247   :  { %v21980_v19 = vsub.f32 %v21973_v46, %v21976_v26  ;;  %v24750_v46 = vld [vmem:[#allocation28_spill] sm:$0xff] }
 0x249   :  { %v21983_v3 = vand.u32 4294901760, %v21980_v19 }
 0x24b   :  { %v2937_v20 = vsub.f32 %v21980_v19, %v21983_v3 }
 0x24d   :  { %v2938_v51 = vand.u32 4294901760, %v2937_v20  ;;  %v24748_v20 = vld [vmem:[#allocation25_spill] sm:$0xff] }
 0x24f   :  { %2939 = vmatmul.mubr.f32.vlgmr.msra.gmra.mrb[4].mxu0 %v2938_v51  ;;  %3794 = vmatmul.mubr.f32.vlgmr.msra.gmra.mrb[8].mxu1 %v2938_v51  ;;  %v24749_v51 = vld [vmem:[#allocation111_spill] sm:$0xff] }
 0x250   :  { %17334 = vmatpush1.bf16.msra.mxu0 %v24737_v62  ;;  %17526 = vmatpush1.bf16.msra.mxu1 %v21636_v2 }
 0x251   :  { %17336 = vmatprep.subr.bf16.mxu0 %v24738_v15  ;;  %17528 = vmatprep.subr.bf16.mxu1 %v24739_v12 }
 0x252   :  { %3169 = vmatprep.mubr.f32.mxu0 %v24455_v17  ;;  %4024 = vmatprep.mubr.f32.mxu1 %v24455_v17 }
 0x254   :  { %17338 = vmatpush1.bf16.msra.mxu0 %v24740_v38  ;;  %17530 = vmatpush1.bf16.msra.mxu1 %v24741_v6  ;;  %v24751_v38 = vld [vmem:[#allocation112_spill] sm:$0xff]  ;;  %v24752_v6 = vld [vmem:[#allocation33_spill] sm:$0xff] }
 0x255   :  { %17340 = vmatprep.subr.bf16.mxu0 %v24742_v54  ;;  %17532 = vmatprep.subr.bf16.mxu1 %v24743_v59  ;;  %v24753_v54 = vld [vmem:[#allocation9_spill] sm:$0xff]  ;;  %v24754_v59 = vld [vmem:[#allocation35_spill] sm:$0xff] }
 0x258   :  { %17342 = vmatpush1.bf16.msra.mxu0 %v24744_v13  ;;  %17534 = vmatpush1.bf16.msra.mxu1 %v24745_v58  ;;  %v24755_v58 = vld [vmem:[#allocation38_spill] sm:$0xff] }
 0x259   :  { %17344 = vmatprep.subr.bf16.mxu0 %v24746_v55  ;;  %17536 = vmatprep.subr.bf16.mxu1 %v24747_v56  ;;  %v24756_v56 = vld [vmem:[#allocation40_spill] sm:$0xff] }
 0x25c   :  { %17346 = vmatpush1.bf16.msra.mxu0 %v24748_v20  ;;  %17538 = vmatpush1.bf16.msra.mxu1 %v24749_v51  ;;  %v24757_v51 = vld [vmem:[#allocation41_spill] sm:$0xff] }
 0x25d   :  { %17348 = vmatprep.subr.bf16.mxu0 %v24750_v46  ;;  %17540 = vmatprep.subr.bf16.mxu1 %v24751_v38  ;;  %v24758_v38 = vld [vmem:[#allocation42_spill] sm:$0xff] }
 0x260   :  { %17350 = vmatpush1.bf16.msra.mxu0 %v24752_v6  ;;  %17542 = vmatpush1.bf16.msra.mxu1 %v24753_v54  ;;  %v24759_v54 = vld [vmem:[#allocation44_spill] sm:$0xff] }
 0x261   :  { %17352 = vmatprep.subr.bf16.mxu0 %v24754_v59  ;;  %17544 = vmatprep.subr.bf16.mxu1 %v21714_v45  ;;  %v24760_v45 = vld [vmem:[#allocation43_spill] sm:$0xff] }
 0x264   :  { %17354 = vmatpush1.bf16.msra.mxu0 %v24755_v58  ;;  %17546 = vmatpush1.bf16.msra.mxu1 %v21733_v1 }
 0x265   :  { %17356 = vmatprep.subr.bf16.mxu0 %v24756_v56  ;;  %17548 = vmatprep.subr.bf16.mxu1 %v21743_v32  ;;  %v24761_v32 = vld [vmem:[#allocation46_spill] sm:$0xff] }
 0x268   :  { %17358 = vmatpush1.bf16.msra.mxu0 %v24757_v51  ;;  %17550 = vmatpush1.bf16.msra.mxu1 %v21748_v28  ;;  %v24762_v28 = vld [vmem:[#allocation48_spill] sm:$0xff] }
 0x269   :  { %17360 = vmatprep.subr.bf16.mxu0 %v24758_v38  ;;  %17552 = vmatprep.subr.bf16.mxu1 %v21751_v63  ;;  %v24805_v63 = vld [vmem:[#allocation92_spill] sm:$0xff]  ;;  %v24806_v38 = vld [vmem:[#allocation57_spill] sm:$0xff] }
 0x26c   :  { %17362 = vmatpush1.bf16.msra.mxu0 %v24759_v54  ;;  %17554 = vmatpush1.bf16.msra.mxu1 %v21756_v36  ;;  %v24763_v36 = vld [vmem:[#allocation52_spill] sm:$0xff]  ;;  %v24799_v54 = vld [vmem:[#allocation86_spill] sm:$0xff] }
 0x26d   :  { %17364 = vmatprep.subr.bf16.mxu0 %v24760_v45  ;;  %17556 = vmatprep.subr.bf16.mxu1 %v21761_v31  ;;  %v24764_v31 = vld [vmem:[#allocation54_spill] sm:$0xff] }
 0x26e   :  { %v24765_v45 = vld [vmem:[#allocation58_spill] sm:$0xff] }
 0x26f   :  { %3171 = vmatmul.mubr.f32.vlgmr.msra.gmra.mrb[4].mxu0 %v21976_v26  ;;  %4026 = vmatmul.mubr.f32.vlgmr.msra.gmra.mrb[8].mxu1 %v21976_v26 }
 0x270   :  { %17366 = vmatpush1.bf16.msra.mxu0 %v24761_v32  ;;  %17558 = vmatpush1.bf16.msra.mxu1 %v21768_v48  ;;  %v24766_v48 = vld [vmem:[#allocation60_spill] sm:$0xff]  ;;  %v24796_v32 = vld [vmem:[#allocation50_spill] sm:$0xff] }
 0x271   :  { %17368 = vmatprep.subr.bf16.mxu0 %v24762_v28  ;;  %17560 = vmatprep.subr.bf16.mxu1 %v21773_v40  ;;  %v24767_v40 = vld [vmem:[#allocation64_spill] sm:$0xff]  ;;  %v24768_v28 = vld [vmem:[#allocation66_spill] sm:$0xff] }
 0x272   :  { %3305 = vmatprep.mubr.f32.mxu0 %v24455_v17  ;;  %4160 = vmatprep.mubr.f32.mxu1 %v24455_v17 }
 0x274   :  { %17370 = vmatpush1.bf16.msra.mxu0 %v24763_v36  ;;  %17562 = vmatpush1.bf16.msra.mxu1 %v21781_v5  ;;  %v24769_v5 = vld [vmem:[#allocation69_spill] sm:$0xff]  ;;  %v24795_v36 = vld [vmem:[#allocation83_spill] sm:$0xff] }
 0x275   :  { %17372 = vmatprep.subr.bf16.mxu0 %v24764_v31  ;;  %17564 = vmatprep.subr.bf16.mxu1 %v21787_v11  ;;  %v24770_v11 = vld [vmem:[#allocation70_spill] sm:$0xff]  ;;  %v24794_v31 = vld [vmem:[#allocation49_spill] sm:$0xff] }
 0x278   :  { %17374 = vmatpush1.bf16.msra.mxu0 %v24765_v45  ;;  %17566 = vmatpush1.bf16.msra.mxu1 %v21794_v23  ;;  %v24771_v23 = vld [vmem:[#allocation71_spill] sm:$0xff]  ;;  %v24793_v45 = vld [vmem:[#allocation82_spill] sm:$0xff] }
 0x279   :  { %17376 = vmatprep.subr.bf16.mxu0 %v24766_v48  ;;  %17568 = vmatprep.subr.bf16.mxu1 %v21799_v9  ;;  %v24772_v9 = vld [vmem:[#allocation72_spill] sm:$0xff]  ;;  %v24792_v48 = vld [vmem:[#allocation47_spill] sm:$0xff] }
 0x27c   :  { %17378 = vmatpush1.bf16.msra.mxu0 %v24767_v40  ;;  %17570 = vmatpush1.bf16.msra.mxu1 %v21806_v22  ;;  %v24773_v22 = vld [vmem:[#allocation73_spill] sm:$0xff] }
 0x27d   :  { %17380 = vmatprep.subr.bf16.mxu0 %v24768_v28  ;;  %17572 = vmatprep.subr.bf16.mxu1 %v21811_v61  ;;  %v24774_v61 = vld [vmem:[#allocation74_spill] sm:$0xff]  ;;  %v24790_v28 = vld [vmem:[#allocation45_spill] sm:$0xff] }
 0x27e   :  { %v24791_v40 = vld [vmem:[#allocation81_spill] sm:$0xff] }
 0x280   :  { %17382 = vmatpush1.bf16.msra.mxu0 %v24769_v5  ;;  %17574 = vmatpush1.bf16.msra.mxu1 %v21818_v41  ;;  %v24775_v41 = vld [vmem:[#allocation75_spill] sm:$0xff]  ;;  %v24789_v5 = vld [vmem:[#allocation102_spill] sm:$0xff] }
 0x281   :  { %17384 = vmatprep.subr.bf16.mxu0 %v24770_v11  ;;  %17576 = vmatprep.subr.bf16.mxu1 %v21824_v30  ;;  %v24787_v30 = vld [vmem:[#allocation99_spill] sm:$0xff]  ;;  %v24788_v11 = vld [vmem:[#allocation34_spill] sm:$0xff] }
 0x284   :  { %17386 = vmatpush1.bf16.msra.mxu0 %v24771_v23  ;;  %17578 = vmatpush1.bf16.msra.mxu1 %v21832_v52  ;;  %v24785_v52 = vld [vmem:[#allocation31_spill] sm:$0xff]  ;;  %v24786_v23 = vld [vmem:[#allocation32_spill] sm:$0xff] }
 0x285   :  { %17388 = vmatprep.subr.bf16.mxu0 %v24772_v9  ;;  %17580 = vmatprep.subr.bf16.mxu1 %v21837_v4  ;;  %v24783_v4 = vld [vmem:[#allocation30_spill] sm:$0xff]  ;;  %v24784_v9 = vld [vmem:[#allocation29_spill] sm:$0xff] }
 0x288   :  { %17390 = vmatpush1.bf16.msra.mxu0 %v24773_v22  ;;  %17582 = vmatpush1.bf16.msra.mxu1 %v21844_v34  ;;  %v24781_v34 = vld [vmem:[#allocation26_spill] sm:$0xff]  ;;  %v24782_v22 = vld [vmem:[#allocation27_spill] sm:$0xff] }
 0x289   :  { %17392 = vmatprep.subr.bf16.mxu0 %v24774_v61  ;;  %17584 = vmatprep.subr.bf16.mxu1 %v21849_v49  ;;  %v24779_v49 = vld [vmem:[#allocation21_spill] sm:$0xff]  ;;  %v24780_v61 = vld [vmem:[#allocation24_spill] sm:$0xff] }
 0x28c   :  { %17394 = vmatpush1.bf16.msra.mxu0 %v24775_v41  ;;  %17586 = vmatpush1.bf16.msra.mxu1 %v21856_v33  ;;  %v24776_v33 = vld [vmem:[#allocation14_spill] sm:$0xff]  ;;  %v24778_v41 = vld [vmem:[#allocation20_spill] sm:$0xff] }
 0x28d   :  { %17396 = vmatprep.subr.bf16.mxu0 %v24664_v37  ;;  %17588 = vmatprep.subr.bf16.mxu1 %v24710_v27 }
 0x28f   :  { %3308 = vmatmul.mubr.f32.vlgmr.msra.gmra.mrb[4].mxu0 %v21980_v19  ;;  %4163 = vmatmul.mubr.f32.vlgmr.msra.gmra.mrb[8].mxu1 %v21980_v19  ;;  %v24777_v19 = vld [vmem:[#allocation17_spill] sm:$0xff] }
 0x290   :  { %17398 = vmatpush1.bf16.msra.mxu0 %v24671_v47  ;;  %17590 = vmatpush1.bf16.msra.mxu1 %v24711_v35 }
 0x291   :  { %17400 = vmatprep.subr.bf16.mxu0 %v24672_v24  ;;  %17592 = vmatprep.subr.bf16.mxu1 %v24712_v8 }
 0x292   :  { %3410 = vmatprep.mubr.f32.mxu0 %v24455_v17  ;;  %4265 = vmatprep.mubr.f32.mxu1 %v24455_v17 }
 0x294   :  { %17402 = vmatpush1.bf16.msra.mxu0 %v24677_v10  ;;  %17594 = vmatpush1.bf16.msra.mxu1 %v24713_v60 }
 0x295   :  { %17404 = vmatprep.subr.bf16.mxu0 %v24776_v33  ;;  %17596 = vmatprep.subr.bf16.mxu1 %v24714_v7 }
 0x298   :  { %17406 = vmatpush1.bf16.msra.mxu0 %v24777_v19  ;;  %17598 = vmatpush1.bf16.msra.mxu1 %v24715_v0 }
 0x299   :  { %17408 = vmatprep.subr.bf16.mxu0 %v24778_v41  ;;  %17600 = vmatprep.subr.bf16.mxu1 %v24716_v16 }
 0x29c   :  { %17410 = vmatpush1.bf16.msra.mxu0 %v24779_v49  ;;  %17602 = vmatpush1.bf16.msra.mxu1 %v24718_v18 }
 0x29d   :  { %17412 = vmatprep.subr.bf16.mxu0 %v24780_v61  ;;  %17604 = vmatprep.subr.bf16.mxu1 %v24719_v53 }
 0x2a0   :  { %17414 = vmatpush1.bf16.msra.mxu0 %v24781_v34  ;;  %17606 = vmatpush1.bf16.msra.mxu1 %v24720_v14 }
 0x2a1   :  { %17416 = vmatprep.subr.bf16.mxu0 %v24782_v22  ;;  %17608 = vmatprep.subr.bf16.mxu1 %v24721_v21 }
 0x2a4   :  { %17418 = vmatpush1.bf16.msra.mxu0 %v24783_v4  ;;  %17610 = vmatpush1.bf16.msra.mxu1 %v21494_v50 }
 0x2a5   :  { %17420 = vmatprep.subr.bf16.mxu0 %v24784_v9  ;;  %17612 = vmatprep.subr.bf16.mxu1 %v21504_v44 }
 0x2a8   :  { %17422 = vmatpush1.bf16.msra.mxu0 %v24785_v52  ;;  %17614 = vmatpush1.bf16.msra.mxu1 %v21568_v43 }
 0x2a9   :  { %17424 = vmatprep.subr.bf16.mxu0 %v24786_v23  ;;  %17616 = vmatprep.subr.bf16.mxu1 %v24787_v30 }
 0x2ac   :  { %17426 = vmatpush1.bf16.msra.mxu0 %v24788_v11  ;;  %17618 = vmatpush1.bf16.msra.mxu1 %v24789_v5 }
 0x2ad   :  { %17428 = vmatprep.subr.bf16.mxu0 %v24790_v28  ;;  %17620 = vmatprep.subr.bf16.mxu1 %v24791_v40  ;;  %v24797_v28 = vld [vmem:[#allocation84_spill] sm:$0xff]  ;;  %v24798_v40 = vld [vmem:[#allocation51_spill] sm:$0xff] }
 0x2af   :  { %3414 = vmatmul.mubr.f32.vlgmr.msra.gmra.mrb[4].mxu0 %v21983_v3  ;;  %4269 = vmatmul.mubr.f32.vlgmr.msra.gmra.mrb[8].mxu1 %v21983_v3  ;;  %v24800_v3 = vld [vmem:[#allocation53_spill] sm:$0xff] }
 0x2b0   :  { %17430 = vmatpush1.bf16.msra.mxu0 %v24792_v48  ;;  %17622 = vmatpush1.bf16.msra.mxu1 %v24793_v45  ;;  %v24801_v48 = vld [vmem:[#allocation88_spill] sm:$0xff]  ;;  %v24802_v45 = vld [vmem:[#allocation55_spill] sm:$0xff] }
 0x2b1   :  { %17432 = vmatprep.subr.bf16.mxu0 %v24794_v31  ;;  %17624 = vmatprep.subr.bf16.mxu1 %v24795_v36  ;;  %v24803_v31 = vld [vmem:[#allocation90_spill] sm:$0xff]  ;;  %v24804_v36 = vld [vmem:[#allocation56_spill] sm:$0xff] }
 0x2b2   :  { %3580 = vmatprep.mubr.f32.mxu0 %v24455_v17  ;;  %4435 = vmatprep.mubr.f32.mxu1 %v24455_v17 }
 0x2b4   :  { %17434 = vmatpush1.bf16.msra.mxu0 %v24796_v32  ;;  %17626 = vmatpush1.bf16.msra.mxu1 %v24797_v28  ;;  %v24807_v32 = vld [vmem:[#allocation93_spill] sm:$0xff]  ;;  %v24808_v28 = vld [vmem:[#allocation59_spill] sm:$0xff] }
 0x2b5   :  { %17436 = vmatprep.subr.bf16.mxu0 %v24798_v40  ;;  %17628 = vmatprep.subr.bf16.mxu1 %v24799_v54  ;;  %v24809_v40 = vld [vmem:[#allocation95_spill] sm:$0xff]  ;;  %v24810_v54 = vld [vmem:[#allocation61_spill] sm:$0xff] }
 0x2b8   :  { %17438 = vmatpush1.bf16.msra.mxu0 %v24800_v3  ;;  %17630 = vmatpush1.bf16.msra.mxu1 %v24801_v48  ;;  %v24811_v3 = vld [vmem:[#allocation96_spill] sm:$0xff]  ;;  %v24812_v48 = vld [vmem:[#allocation62_spill] sm:$0xff] }
 0x2b9   :  { %17440 = vmatprep.subr.bf16.mxu0 %v24802_v45  ;;  %17632 = vmatprep.subr.bf16.mxu1 %v24803_v31  ;;  %v24813_v45 = vld [vmem:[#allocation97_spill] sm:$0xff]  ;;  %v24814_v31 = vld [vmem:[#allocation63_spill] sm:$0xff] }
 0x2bc   :  { %17442 = vmatpush1.bf16.msra.mxu0 %v24804_v36  ;;  %17634 = vmatpush1.bf16.msra.mxu1 %v24805_v63  ;;  %v24815_v36 = vld [vmem:[#allocation100_spill] sm:$0xff]  ;;  %v24816_v63 = vld [vmem:[#allocation65_spill] sm:$0xff] }
 0x2bd   :  { %17444 = vmatprep.subr.bf16.mxu0 %v24806_v38  ;;  %17636 = vmatprep.subr.bf16.mxu1 %v24807_v32  ;;  %v24817_v38 = vld [vmem:[#allocation101_spill] sm:$0xff]  ;;  %v24818_v32 = vld [vmem:[#allocation67_spill] sm:$0xff] }
 0x2c0   :  { %17446 = vmatpush1.bf16.msra.mxu0 %v24808_v28  ;;  %17638 = vmatpush1.bf16.msra.mxu1 %v24809_v40  ;;  %v24819_v28 = vld [vmem:[#allocation103_spill] sm:$0xff]  ;;  %v24820_v40 = vld [vmem:[#allocation68_spill] sm:$0xff] }
 0x2c1   :  { %17448 = vmatprep.subr.bf16.mxu0 %v24810_v54  ;;  %17640 = vmatprep.subr.bf16.mxu1 %v24811_v3  ;;  %v24821_v54 = vld [vmem:[#allocation105_spill] sm:$0xff] }
 0x2c4   :  { %17450 = vmatpush1.bf16.msra.mxu0 %v24812_v48  ;;  %17642 = vmatpush1.bf16.msra.mxu1 %v24813_v45 }
 0x2c5   :  { %17452 = vmatprep.subr.bf16.mxu0 %v24814_v31  ;;  %17644 = vmatprep.subr.bf16.mxu1 %v24815_v36 }
 0x2c8   :  { %17454 = vmatpush1.bf16.msra.mxu0 %v24816_v63  ;;  %17646 = vmatpush1.bf16.msra.mxu1 %v24817_v38 }
 0x2c9   :  { %17456 = vmatprep.subr.bf16.mxu0 %v24818_v32  ;;  %17648 = vmatprep.subr.bf16.mxu1 %v24819_v28 }
 0x2cc   :  { %17458 = vmatpush1.bf16.msra.mxu0 %v24820_v40  ;;  %17650 = vmatpush1.bf16.msra.mxu1 %v24821_v54  ;;  %v24823_v54 = vld [vmem:[#allocation104_spill] sm:$0xff] }
 0x2cd   :  { %17460 = vmatprep.subr.bf16.mxu0 %v24664_v37  ;;  %17652 = vmatprep.subr.bf16.mxu1 %v24710_v27 }
 0x2cf   :  { %3582 = vmatmul.mubr.f32.vlgmr.msra.gmra.mrb[4].mxu0 %v21976_v26  ;;  %4437 = vmatmul.mubr.f32.vlgmr.msra.gmra.mrb[8].mxu1 %v21976_v26 }
 0x2d0   :  { %17462 = vmatpush1.bf16.msra.mxu0 %v24671_v47  ;;  %17654 = vmatpush1.bf16.msra.mxu1 %v24711_v35 }
 0x2d1   :  { %17464 = vmatprep.subr.bf16.mxu0 %v24672_v24  ;;  %17656 = vmatprep.subr.bf16.mxu1 %v24712_v8 }
 0x2d2   :  { %3684 = vmatprep.mubr.f32.mxu0 %v24455_v17  ;;  %4539 = vmatprep.mubr.f32.mxu1 %v24455_v17 }
 0x2d4   :  { %17466 = vmatpush1.bf16.msra.mxu0 %v24677_v10  ;;  %17658 = vmatpush1.bf16.msra.mxu1 %v24713_v60 }
 0x2d5   :  { %17468 = vmatprep.subr.bf16.mxu0 %v24776_v33  ;;  %17660 = vmatprep.subr.bf16.mxu1 %v24714_v7 }
 0x2d8   :  { %17470 = vmatpush1.bf16.msra.mxu0 %v24777_v19  ;;  %17662 = vmatpush1.bf16.msra.mxu1 %v24715_v0 }
 0x2d9   :  { %17472 = vmatprep.subr.bf16.mxu0 %v24778_v41  ;;  %17664 = vmatprep.subr.bf16.mxu1 %v24716_v16 }
 0x2dc   :  { %17474 = vmatpush1.bf16.msra.mxu0 %v24779_v49  ;;  %17666 = vmatpush1.bf16.msra.mxu1 %v24718_v18 }
 0x2dd   :  { %17476 = vmatprep.subr.bf16.mxu0 %v24780_v61  ;;  %17668 = vmatprep.subr.bf16.mxu1 %v24719_v53 }
 0x2e0   :  { %17478 = vmatpush1.bf16.msra.mxu0 %v24781_v34  ;;  %17670 = vmatpush1.bf16.msra.mxu1 %v24720_v14 }
 0x2e1   :  { %17480 = vmatprep.subr.bf16.mxu0 %v24782_v22  ;;  %17672 = vmatprep.subr.bf16.mxu1 %v24721_v21 }
 0x2e4   :  { %17482 = vmatpush1.bf16.msra.mxu0 %v24783_v4  ;;  %17674 = vmatpush1.bf16.msra.mxu1 %v21494_v50 }
 0x2e5   :  { %17484 = vmatprep.subr.bf16.mxu0 %v24784_v9  ;;  %17676 = vmatprep.subr.bf16.mxu1 %v21504_v44 }
 0x2e8   :  { %17486 = vmatpush1.bf16.msra.mxu0 %v24785_v52  ;;  %17678 = vmatpush1.bf16.msra.mxu1 %v21568_v43 }
 0x2e9   :  { %17488 = vmatprep.subr.bf16.mxu0 %v24786_v23  ;;  %17680 = vmatprep.subr.bf16.mxu1 %v24787_v30 }
 0x2ec   :  { %17490 = vmatpush1.bf16.msra.mxu0 %v24788_v11  ;;  %17682 = vmatpush1.bf16.msra.mxu1 %v24789_v5 }
 0x2ed   :  { %17684 = vmatprep.subr.bf16.mxu0 %v24664_v37  ;;  %17876 = vmatprep.subr.bf16.mxu1 %v24710_v27 }
 0x2ef   :  { %3686 = vmatmul.mubr.f32.vlgmr.msra.gmra.mrb[4].mxu0 %v21976_v26  ;;  %4541 = vmatmul.mubr.f32.vlgmr.msra.gmra.mrb[8].mxu1 %v21976_v26  ;;  %v24822_v26 = vld [vmem:[#allocation11_spill] sm:$0xff] }
 0x2f0   :  { %17686 = vmatpush1.bf16.msra.mxu0 %v24671_v47  ;;  %17878 = vmatpush1.bf16.msra.mxu1 %v24711_v35 }
 0x2f1   :  { %17688 = vmatprep.subr.bf16.mxu0 %v24672_v24  ;;  %17880 = vmatprep.subr.bf16.mxu1 %v24712_v8 }
 0x2f2   :  { %4689 = vmatprep.mubr.f32.mxu0 %v24455_v17  ;;  %5544 = vmatprep.mubr.f32.mxu1 %v24455_v17 }
 0x2f4   :  { %17690 = vmatpush1.bf16.msra.mxu0 %v24677_v10  ;;  %17882 = vmatpush1.bf16.msra.mxu1 %v24713_v60 }
 0x2f5   :  { %17692 = vmatprep.subr.bf16.mxu0 %v24776_v33  ;;  %17884 = vmatprep.subr.bf16.mxu1 %v24714_v7 }
 0x2f8   :  { %17694 = vmatpush1.bf16.msra.mxu0 %v24777_v19  ;;  %17886 = vmatpush1.bf16.msra.mxu1 %v24715_v0 }
 0x2f9   :  { %17696 = vmatprep.subr.bf16.mxu0 %v24778_v41  ;;  %17888 = vmatprep.subr.bf16.mxu1 %v24716_v16 }
 0x2fc   :  { %17698 = vmatpush1.bf16.msra.mxu0 %v24779_v49  ;;  %17890 = vmatpush1.bf16.msra.mxu1 %v24718_v18 }
 0x2fd   :  { %17700 = vmatprep.subr.bf16.mxu0 %v24780_v61  ;;  %17892 = vmatprep.subr.bf16.mxu1 %v24719_v53 }
 0x300   :  { %17702 = vmatpush1.bf16.msra.mxu0 %v24781_v34  ;;  %17894 = vmatpush1.bf16.msra.mxu1 %v24720_v14 }
 0x301   :  { %17704 = vmatprep.subr.bf16.mxu0 %v24782_v22  ;;  %17896 = vmatprep.subr.bf16.mxu1 %v24721_v21 }
 0x304   :  { %17706 = vmatpush1.bf16.msra.mxu0 %v24783_v4  ;;  %17898 = vmatpush1.bf16.msra.mxu1 %v21494_v50 }
 0x305   :  { %17708 = vmatprep.subr.bf16.mxu0 %v24784_v9  ;;  %17900 = vmatprep.subr.bf16.mxu1 %v21504_v44 }
 0x308   :  { %17710 = vmatpush1.bf16.msra.mxu0 %v24785_v52  ;;  %17902 = vmatpush1.bf16.msra.mxu1 %v21568_v43 }
 0x309   :  { %17712 = vmatprep.subr.bf16.mxu0 %v24786_v23  ;;  %17904 = vmatprep.subr.bf16.mxu1 %v24787_v30 }
 0x30c   :  { %17714 = vmatpush1.bf16.msra.mxu0 %v24788_v11  ;;  %17906 = vmatpush1.bf16.msra.mxu1 %v24789_v5 }
 0x30d   :  { %17716 = vmatprep.subr.bf16.mxu0 %v24822_v26  ;;  %17908 = vmatprep.subr.bf16.mxu1 %v24823_v54 }
 0x3c2   :  { %v3687_v40 = vpop.f32.mrb[4].mxu0  ;;  %v4542_v28 = vpop.f32.mrb[8].mxu1 }
 0x3c3   :  { %v4551_v32 = vrot.slane %v3687_v40, 7  ;;  %v3689_v38 = vpop.f32.mrb[5].mxu0  ;;  %v4544_v63 = vpop.f32.mrb[9].mxu1  ;;  %v4553_v26 = vrot.slane %v4542_v28, 7 }
 0x3c4   :  { %v4552_v36 = vrot.slane %v3689_v38, 7  ;;  %v4554_v48 = vrot.slane %v4544_v63, 7 }
 0x3c5   :  { %v4559_v31 = vadd.f32 %v21901_v25, %v4551_v32  ;;  %v4561_v40 = vadd.f32 %v21964_v39, %v4553_v26 }
 0x3c6   :  { %v4560_v45 = vadd.f32 %v21904_v57, %v4552_v36  ;;  %v4562_v5 = vadd.f32 %v21966_v42, %v4554_v48 }
 0x3c7   :  { %v4563_v3 = vsub.f32 0.0, %v4559_v31  ;;  %v4583_v31 = vrot.slane %v21970_v29, 7 }
 0x3c8   :  { %v4569_v30 = vsub.f32 0.0, %v4560_v45  ;;  %v4576_v54 = vsub.f32 0.0, %v4562_v5 }
 0x3c9   :  { %v4564_v11 = vmul.f32 1.442695, %v4563_v3 }
 0x3ca   :  { %v4570_v23 = vmul.f32 1.442695, %v4569_v30  ;;  %v4577_v43 = vmul.f32 1.442695, %v4576_v54 }
 0x3cb   :  { %20432 = vpow2.f32 %v4564_v11 }
 0x3cc   :  { %20434 = vpow2.f32 %v4570_v23 }
 0x3cd   :  { %20436 = vpow2.f32 %v4577_v43 }
 0x3ce   :  { %20438 = vtanh.f32 %v4561_v40 }
 0x3d5   :  { %v20433_v52 = vpop.eup %20432 }
 0x3d6   :  { %v20435_v38 = vpop.eup %20434  ;;  %v4566_v44 = vadd.f32 1.0, %v20433_v52 }
 0x3d7   :  { %v4572_v32 = vadd.f32 1.0, %v20435_v38  ;;  %v20437_v63 = vpop.eup %20436  ;;  %v24824_v38 = vld [vmem:[#allocation18_spill] sm:$0xff] }
 0x3d8   :  { %20440 = vrcp.f32 %v4566_v44  ;;  %v20439_v45 = vpop.eup %20438  ;;  %v4579_v5 = vadd.f32 1.0, %v20437_v63  ;;  %v24826_v63 = vld [vmem:[#allocation19_spill] sm:$0xff] }
 0x3d9   :  { %20442 = vrcp.f32 %v4572_v32  ;;  %v24825_v32 = vld [vmem:[#allocation107_spill] sm:$0xff] }
 0x3da   :  { %20444 = vrcp.f32 %v4579_v5  ;;  %v24832_v5 = vld [vmem:[#allocation9_spill] sm:$0xff] }
 0x3e2   :  { %v20441_v36 = vpop.eup %20440 }
 0x3e3   :  { %v20443_v48 = vpop.eup %20442  ;;  %v4586_v11 = vmul.f32 %v20441_v36, %v20439_v45  ;;  %v24827_v45 = vld [vmem:[#allocation108_spill] sm:$0xff]  ;;  %v24828_v36 = vld [vmem:[#allocation109_spill] sm:$0xff] }
 0x3e4   :  { %v4585_v28 = vmul.f32 %v20443_v48, %v4583_v31  ;;  %v20445_v30 = vpop.eup %20444  ;;  %v24829_v31 = vld [vmem:[#allocation110_spill] sm:$0xff]  ;;  %v24830_v48 = vld [vmem:[#allocation111_spill] sm:$0xff] }
 0x3e6   :  { %v22206_v23 = vadd.f32 %v4586_v11, %v4585_v28  ;;  %v24831_v11 = vld [vmem:[#allocation112_spill] sm:$0xff]  ;;  %v24833_v28 = vld [vmem:[#allocation113_spill] sm:$0xff] }
 0x3e8   :  { %20446 = vtanh.f32 %v22206_v23 }
 0x3f2   :  { %v20447_v43 = vpop.eup %20446 }
 0x3f3   :  { %v22209_v52 = vmul.f32 %v20447_v43, %v20445_v30  ;;  %v24834_v30 = vld [vmem:[#allocation12_spill] sm:$0xff]  ;;  %v24835_v43 = vld [vmem:[#allocation13_spill] sm:$0xff] }
 0x3f5   :  { %v4591_v44 = vrot.slane %v22209_v52, 1 }
 0x3f7   :  { %v22212_v54 = vand.u32 4294901760, %v4591_v44 }
 0x3f9   :  { %v22215_v3 = vsub.f32 %v4591_v44, %v22212_v54  ;;  %v24836_v44 = vld [vmem:[#allocation42_spill] sm:$0xff] }
 0x3fb   :  { %v22218_v29 = vand.u32 4294901760, %v22215_v3 }
 0x3fd   :  { %v4693_v26 = vsub.f32 %v22215_v3, %v22218_v29 }
 0x3ff   :  { %v4694_v40 = vand.u32 4294901760, %v4693_v26  ;;  %v24837_v26 = vld [vmem:[#allocation114_spill] sm:$0xff] }
 0x401   :  { %4695 = vmatmul.mubr.f32.vlgmr.msra.gmra.mrb[6].mxu0 %v4694_v40  ;;  %5550 = vmatmul.mubr.f32.vlgmr.msra.gmra.mrb[10].mxu1 %v4694_v40  ;;  %v24838_v40 = vld [vmem:[#allocation44_spill] sm:$0xff] }
 0x402   :  { %17718 = vmatpush1.bf16.msra.mxu0 %v24737_v62  ;;  %17910 = vmatpush1.bf16.msra.mxu1 %v21636_v2 }
 0x403   :  { %17720 = vmatprep.subr.bf16.mxu0 %v24738_v15  ;;  %17912 = vmatprep.subr.bf16.mxu1 %v24739_v12 }
 0x404   :  { %4925 = vmatprep.mubr.f32.mxu0 %v24455_v17  ;;  %5780 = vmatprep.mubr.f32.mxu1 %v24455_v17 }
 0x406   :  { %17722 = vmatpush1.bf16.msra.mxu0 %v24824_v38  ;;  %17914 = vmatpush1.bf16.msra.mxu1 %v24825_v32 }
 0x407   :  { %17724 = vmatprep.subr.bf16.mxu0 %v24826_v63  ;;  %17916 = vmatprep.subr.bf16.mxu1 %v24827_v45 }
 0x40a   :  { %17726 = vmatpush1.bf16.msra.mxu0 %v24744_v13  ;;  %17918 = vmatpush1.bf16.msra.mxu1 %v24828_v36 }
 0x40b   :  { %17728 = vmatprep.subr.bf16.mxu0 %v24746_v55  ;;  %17920 = vmatprep.subr.bf16.mxu1 %v24829_v31 }
 0x40e   :  { %17730 = vmatpush1.bf16.msra.mxu0 %v24748_v20  ;;  %17922 = vmatpush1.bf16.msra.mxu1 %v24830_v48  ;;  %v24895_v48 = vld [vmem:[#allocation57_spill] sm:$0xff] }
 0x40f   :  { %17732 = vmatprep.subr.bf16.mxu0 %v24750_v46  ;;  %17924 = vmatprep.subr.bf16.mxu1 %v24831_v11  ;;  %v24888_v11 = vld [vmem:[#allocation86_spill] sm:$0xff]  ;;  %v24894_v46 = vld [vmem:[#allocation92_spill] sm:$0xff] }
 0x412   :  { %17734 = vmatpush1.bf16.msra.mxu0 %v24752_v6  ;;  %17926 = vmatpush1.bf16.msra.mxu1 %v24832_v5  ;;  %v24884_v5 = vld [vmem:[#allocation83_spill] sm:$0xff]  ;;  %v24885_v6 = vld [vmem:[#allocation50_spill] sm:$0xff] }
 0x413   :  { %17736 = vmatprep.subr.bf16.mxu0 %v24754_v59  ;;  %17928 = vmatprep.subr.bf16.mxu1 %v24833_v28  ;;  %v24839_v59 = vld [vmem:[#allocation115_spill] sm:$0xff] }
 0x414   :  { %v24840_v28 = vld [vmem:[#allocation43_spill] sm:$0xff] }
 0x416   :  { %17738 = vmatpush1.bf16.msra.mxu0 %v24755_v58  ;;  %17930 = vmatpush1.bf16.msra.mxu1 %v21733_v1  ;;  %v24841_v58 = vld [vmem:[#allocation116_spill] sm:$0xff]  ;;  %v24856_v1 = vld [vmem:[#allocation66_spill] sm:$0xff] }
 0x417   :  { %17740 = vmatprep.subr.bf16.mxu0 %v24756_v56  ;;  %17932 = vmatprep.subr.bf16.mxu1 %v24834_v30  ;;  %v24842_v30 = vld [vmem:[#allocation46_spill] sm:$0xff] }
 0x418   :  { %v24855_v56 = vld [vmem:[#allocation122_spill] sm:$0xff] }
 0x41a   :  { %17742 = vmatpush1.bf16.msra.mxu0 %v24757_v51  ;;  %17934 = vmatpush1.bf16.msra.mxu1 %v24835_v43  ;;  %v24843_v51 = vld [vmem:[#allocation37_spill] sm:$0xff]  ;;  %v24844_v43 = vld [vmem:[#allocation48_spill] sm:$0xff] }
 0x41b   :  { %17744 = vmatprep.subr.bf16.mxu0 %v24836_v44  ;;  %17936 = vmatprep.subr.bf16.mxu1 %v24837_v26  ;;  %v24845_v44 = vld [vmem:[#allocation117_spill] sm:$0xff]  ;;  %v24850_v26 = vld [vmem:[#allocation58_spill] sm:$0xff] }
 0x41e   :  { %17746 = vmatpush1.bf16.msra.mxu0 %v24838_v40  ;;  %17938 = vmatpush1.bf16.msra.mxu1 %v24839_v59  ;;  %v24846_v59 = vld [vmem:[#allocation52_spill] sm:$0xff]  ;;  %v24849_v40 = vld [vmem:[#allocation119_spill] sm:$0xff] }
 0x41f   :  { %17748 = vmatprep.subr.bf16.mxu0 %v24840_v28  ;;  %17940 = vmatprep.subr.bf16.mxu1 %v24841_v58  ;;  %v24847_v28 = vld [vmem:[#allocation118_spill] sm:$0xff] }
 0x420   :  { %v24848_v58 = vld [vmem:[#allocation54_spill] sm:$0xff] }
 0x421   :  { %4927 = vmatmul.mubr.f32.vlgmr.msra.gmra.mrb[6].mxu0 %v22212_v54  ;;  %5782 = vmatmul.mubr.f32.vlgmr.msra.gmra.mrb[10].mxu1 %v22212_v54 }
 0x422   :  { %17750 = vmatpush1.bf16.msra.mxu0 %v24842_v30  ;;  %17942 = vmatpush1.bf16.msra.mxu1 %v24843_v51  ;;  %v24851_v30 = vld [vmem:[#allocation120_spill] sm:$0xff] }
 0x423   :  { %17752 = vmatprep.subr.bf16.mxu0 %v24844_v43  ;;  %17944 = vmatprep.subr.bf16.mxu1 %v24845_v44  ;;  %v24852_v51 = vld [vmem:[#allocation60_spill] sm:$0xff]  ;;  %v24853_v43 = vld [vmem:[#allocation121_spill] sm:$0xff] }
 0x424   :  { %5061 = vmatprep.mubr.f32.mxu0 %v24455_v17  ;;  %5916 = vmatprep.mubr.f32.mxu1 %v24455_v17  ;;  %v24854_v44 = vld [vmem:[#allocation64_spill] sm:$0xff] }
 0x426   :  { %17754 = vmatpush1.bf16.msra.mxu0 %v24846_v59  ;;  %17946 = vmatpush1.bf16.msra.mxu1 %v24847_v28  ;;  %v24857_v59 = vld [vmem:[#allocation123_spill] sm:$0xff]  ;;  %v24858_v28 = vld [vmem:[#allocation69_spill] sm:$0xff] }
 0x427   :  { %17756 = vmatprep.subr.bf16.mxu0 %v24848_v58  ;;  %17948 = vmatprep.subr.bf16.mxu1 %v24849_v40  ;;  %v24859_v58 = vld [vmem:[#allocation124_spill] sm:$0xff]  ;;  %v24860_v40 = vld [vmem:[#allocation70_spill] sm:$0xff] }
 0x42a   :  { %17758 = vmatpush1.bf16.msra.mxu0 %v24850_v26  ;;  %17950 = vmatpush1.bf16.msra.mxu1 %v24851_v30  ;;  %v24861_v26 = vld [vmem:[#allocation125_spill] sm:$0xff]  ;;  %v24862_v30 = vld [vmem:[#allocation71_spill] sm:$0xff] }
 0x42b   :  { %17760 = vmatprep.subr.bf16.mxu0 %v24852_v51  ;;  %17952 = vmatprep.subr.bf16.mxu1 %v24853_v43  ;;  %v24863_v51 = vld [vmem:[#allocation126_spill] sm:$0xff]  ;;  %v24864_v43 = vld [vmem:[#allocation72_spill] sm:$0xff] }
 0x42e   :  { %17762 = vmatpush1.bf16.msra.mxu0 %v24854_v44  ;;  %17954 = vmatpush1.bf16.msra.mxu1 %v24855_v56  ;;  %v24865_v44 = vld [vmem:[#allocation127_spill] sm:$0xff]  ;;  %v24866_v56 = vld [vmem:[#allocation73_spill] sm:$0xff] }
 0x42f   :  { %17764 = vmatprep.subr.bf16.mxu0 %v24856_v1  ;;  %17956 = vmatprep.subr.bf16.mxu1 %v24857_v59  ;;  %v24867_v1 = vld [vmem:[#allocation128_spill] sm:$0xff]  ;;  %v24868_v59 = vld [vmem:[#allocation74_spill] sm:$0xff] }
 0x432   :  { %17766 = vmatpush1.bf16.msra.mxu0 %v24858_v28  ;;  %17958 = vmatpush1.bf16.msra.mxu1 %v24859_v58  ;;  %v24869_v28 = vld [vmem:[#allocation129_spill] sm:$0xff]  ;;  %v24870_v58 = vld [vmem:[#allocation75_spill] sm:$0xff] }
 0x433   :  { %17768 = vmatprep.subr.bf16.mxu0 %v24860_v40  ;;  %17960 = vmatprep.subr.bf16.mxu1 %v24861_v26  ;;  %v24871_v40 = vld [vmem:[#allocation130_spill] sm:$0xff]  ;;  %v24883_v26 = vld [vmem:[#allocation49_spill] sm:$0xff] }
 0x436   :  { %17770 = vmatpush1.bf16.msra.mxu0 %v24862_v30  ;;  %17962 = vmatpush1.bf16.msra.mxu1 %v24863_v51  ;;  %v24881_v51 = vld [vmem:[#allocation47_spill] sm:$0xff]  ;;  %v24882_v30 = vld [vmem:[#allocation82_spill] sm:$0xff] }
 0x437   :  { %17772 = vmatprep.subr.bf16.mxu0 %v24864_v43  ;;  %17964 = vmatprep.subr.bf16.mxu1 %v24865_v44  ;;  %v24879_v44 = vld [vmem:[#allocation45_spill] sm:$0xff] }
 0x438   :  { %v24880_v43 = vld [vmem:[#allocation81_spill] sm:$0xff] }
 0x43a   :  { %17774 = vmatpush1.bf16.msra.mxu0 %v24866_v56  ;;  %17966 = vmatpush1.bf16.msra.mxu1 %v24867_v1  ;;  %v24877_v1 = vld [vmem:[#allocation34_spill] sm:$0xff] }
 0x43b   :  { %17776 = vmatprep.subr.bf16.mxu0 %v24868_v59  ;;  %17968 = vmatprep.subr.bf16.mxu1 %v24869_v28  ;;  %v24875_v28 = vld [vmem:[#allocation32_spill] sm:$0xff]  ;;  %v24876_v59 = vld [vmem:[#allocation99_spill] sm:$0xff]  ;;  %v24878_v56 = vld [vmem:[#allocation102_spill] sm:$0xff] }
 0x43e   :  { %17778 = vmatpush1.bf16.msra.mxu0 %v24870_v58  ;;  %17970 = vmatpush1.bf16.msra.mxu1 %v24871_v40  ;;  %v24873_v40 = vld [vmem:[#allocation31_spill] sm:$0xff]  ;;  %v24874_v58 = vld [vmem:[#allocation98_spill] sm:$0xff] }
 0x43f   :  { %17780 = vmatprep.subr.bf16.mxu0 %v24664_v37  ;;  %17972 = vmatprep.subr.bf16.mxu1 %v24710_v27 }
 0x441   :  { %5064 = vmatmul.mubr.f32.vlgmr.msra.gmra.mrb[6].mxu0 %v22215_v3  ;;  %5919 = vmatmul.mubr.f32.vlgmr.msra.gmra.mrb[10].mxu1 %v22215_v3  ;;  %v24872_v3 = vld [vmem:[#allocation94_spill] sm:$0xff] }
 0x442   :  { %17782 = vmatpush1.bf16.msra.mxu0 %v24671_v47  ;;  %17974 = vmatpush1.bf16.msra.mxu1 %v24711_v35 }
 0x443   :  { %17784 = vmatprep.subr.bf16.mxu0 %v24672_v24  ;;  %17976 = vmatprep.subr.bf16.mxu1 %v24712_v8 }
 0x444   :  { %5166 = vmatprep.mubr.f32.mxu0 %v24455_v17  ;;  %6021 = vmatprep.mubr.f32.mxu1 %v24455_v17 }
 0x446   :  { %17786 = vmatpush1.bf16.msra.mxu0 %v24677_v10  ;;  %17978 = vmatpush1.bf16.msra.mxu1 %v24713_v60 }
 0x447   :  { %17788 = vmatprep.subr.bf16.mxu0 %v24776_v33  ;;  %17980 = vmatprep.subr.bf16.mxu1 %v24714_v7 }
 0x44a   :  { %17790 = vmatpush1.bf16.msra.mxu0 %v24777_v19  ;;  %17982 = vmatpush1.bf16.msra.mxu1 %v24715_v0 }
 0x44b   :  { %17792 = vmatprep.subr.bf16.mxu0 %v24778_v41  ;;  %17984 = vmatprep.subr.bf16.mxu1 %v24716_v16 }
 0x44e   :  { %17794 = vmatpush1.bf16.msra.mxu0 %v24779_v49  ;;  %17986 = vmatpush1.bf16.msra.mxu1 %v24718_v18 }
 0x44f   :  { %17796 = vmatprep.subr.bf16.mxu0 %v24780_v61  ;;  %17988 = vmatprep.subr.bf16.mxu1 %v24719_v53 }
 0x452   :  { %17798 = vmatpush1.bf16.msra.mxu0 %v24781_v34  ;;  %17990 = vmatpush1.bf16.msra.mxu1 %v24720_v14 }
 0x453   :  { %17800 = vmatprep.subr.bf16.mxu0 %v24782_v22  ;;  %17992 = vmatprep.subr.bf16.mxu1 %v24721_v21 }
 0x456   :  { %17802 = vmatpush1.bf16.msra.mxu0 %v24783_v4  ;;  %17994 = vmatpush1.bf16.msra.mxu1 %v21494_v50 }
 0x457   :  { %17804 = vmatprep.subr.bf16.mxu0 %v24784_v9  ;;  %17996 = vmatprep.subr.bf16.mxu1 %v24872_v3 }
 0x45a   :  { %17806 = vmatpush1.bf16.msra.mxu0 %v24873_v40  ;;  %17998 = vmatpush1.bf16.msra.mxu1 %v24874_v58 }
 0x45b   :  { %17808 = vmatprep.subr.bf16.mxu0 %v24875_v28  ;;  %18000 = vmatprep.subr.bf16.mxu1 %v24876_v59 }
 0x45e   :  { %17810 = vmatpush1.bf16.msra.mxu0 %v24877_v1  ;;  %18002 = vmatpush1.bf16.msra.mxu1 %v24878_v56 }
 0x45f   :  { %17812 = vmatprep.subr.bf16.mxu0 %v24879_v44  ;;  %18004 = vmatprep.subr.bf16.mxu1 %v24880_v43  ;;  %v24886_v44 = vld [vmem:[#allocation84_spill] sm:$0xff]  ;;  %v24887_v43 = vld [vmem:[#allocation51_spill] sm:$0xff] }
 0x461   :  { %5170 = vmatmul.mubr.f32.vlgmr.msra.gmra.mrb[6].mxu0 %v22218_v29  ;;  %6025 = vmatmul.mubr.f32.vlgmr.msra.gmra.mrb[10].mxu1 %v22218_v29  ;;  %v24889_v29 = vld [vmem:[#allocation53_spill] sm:$0xff] }
 0x462   :  { %17814 = vmatpush1.bf16.msra.mxu0 %v24881_v51  ;;  %18006 = vmatpush1.bf16.msra.mxu1 %v24882_v30  ;;  %v24890_v51 = vld [vmem:[#allocation88_spill] sm:$0xff]  ;;  %v24891_v30 = vld [vmem:[#allocation55_spill] sm:$0xff] }
 0x463   :  { %17816 = vmatprep.subr.bf16.mxu0 %v24883_v26  ;;  %18008 = vmatprep.subr.bf16.mxu1 %v24884_v5  ;;  %v24892_v26 = vld [vmem:[#allocation90_spill] sm:$0xff]  ;;  %v24893_v5 = vld [vmem:[#allocation56_spill] sm:$0xff] }
 0x464   :  { %5336 = vmatprep.mubr.f32.mxu0 %v24455_v17  ;;  %6191 = vmatprep.mubr.f32.mxu1 %v24455_v17 }
 0x466   :  { %17818 = vmatpush1.bf16.msra.mxu0 %v24885_v6  ;;  %18010 = vmatpush1.bf16.msra.mxu1 %v24886_v44  ;;  %v24896_v6 = vld [vmem:[#allocation93_spill] sm:$0xff]  ;;  %v24897_v44 = vld [vmem:[#allocation59_spill] sm:$0xff] }
 0x467   :  { %17820 = vmatprep.subr.bf16.mxu0 %v24887_v43  ;;  %18012 = vmatprep.subr.bf16.mxu1 %v24888_v11  ;;  %v24898_v43 = vld [vmem:[#allocation95_spill] sm:$0xff]  ;;  %v24899_v11 = vld [vmem:[#allocation61_spill] sm:$0xff] }
 0x46a   :  { %17822 = vmatpush1.bf16.msra.mxu0 %v24889_v29  ;;  %18014 = vmatpush1.bf16.msra.mxu1 %v24890_v51  ;;  %v24900_v29 = vld [vmem:[#allocation96_spill] sm:$0xff]  ;;  %v24901_v51 = vld [vmem:[#allocation62_spill] sm:$0xff] }
 0x46b   :  { %17824 = vmatprep.subr.bf16.mxu0 %v24891_v30  ;;  %18016 = vmatprep.subr.bf16.mxu1 %v24892_v26  ;;  %v24902_v30 = vld [vmem:[#allocation97_spill] sm:$0xff]  ;;  %v24903_v26 = vld [vmem:[#allocation63_spill] sm:$0xff] }
 0x46e   :  { %17826 = vmatpush1.bf16.msra.mxu0 %v24893_v5  ;;  %18018 = vmatpush1.bf16.msra.mxu1 %v24894_v46  ;;  %v24904_v5 = vld [vmem:[#allocation100_spill] sm:$0xff]  ;;  %v24905_v46 = vld [vmem:[#allocation65_spill] sm:$0xff] }
 0x46f   :  { %17828 = vmatprep.subr.bf16.mxu0 %v24895_v48  ;;  %18020 = vmatprep.subr.bf16.mxu1 %v24896_v6  ;;  %v24906_v48 = vld [vmem:[#allocation101_spill] sm:$0xff]  ;;  %v24907_v6 = vld [vmem:[#allocation67_spill] sm:$0xff] }
 0x472   :  { %17830 = vmatpush1.bf16.msra.mxu0 %v24897_v44  ;;  %18022 = vmatpush1.bf16.msra.mxu1 %v24898_v43  ;;  %v24908_v44 = vld [vmem:[#allocation103_spill] sm:$0xff]  ;;  %v24909_v43 = vld [vmem:[#allocation68_spill] sm:$0xff] }
 0x473   :  { %17832 = vmatprep.subr.bf16.mxu0 %v24899_v11  ;;  %18024 = vmatprep.subr.bf16.mxu1 %v24900_v29  ;;  %v24910_v11 = vld [vmem:[#allocation105_spill] sm:$0xff] }
 0x476   :  { %17834 = vmatpush1.bf16.msra.mxu0 %v24901_v51  ;;  %18026 = vmatpush1.bf16.msra.mxu1 %v24902_v30 }
 0x477   :  { %17836 = vmatprep.subr.bf16.mxu0 %v24903_v26  ;;  %18028 = vmatprep.subr.bf16.mxu1 %v24904_v5 }
 0x47a   :  { %17838 = vmatpush1.bf16.msra.mxu0 %v24905_v46  ;;  %18030 = vmatpush1.bf16.msra.mxu1 %v24906_v48 }
 0x47b   :  { %17840 = vmatprep.subr.bf16.mxu0 %v24907_v6  ;;  %18032 = vmatprep.subr.bf16.mxu1 %v24908_v44 }
 0x47e   :  { %17842 = vmatpush1.bf16.msra.mxu0 %v24909_v43  ;;  %18034 = vmatpush1.bf16.msra.mxu1 %v24910_v11  ;;  %v24912_v11 = vld [vmem:[#allocation104_spill] sm:$0xff] }
 0x47f   :  { %17844 = vmatprep.subr.bf16.mxu0 %v24664_v37  ;;  %18036 = vmatprep.subr.bf16.mxu1 %v24710_v27 }
 0x481   :  { %5338 = vmatmul.mubr.f32.vlgmr.msra.gmra.mrb[6].mxu0 %v22212_v54  ;;  %6193 = vmatmul.mubr.f32.vlgmr.msra.gmra.mrb[10].mxu1 %v22212_v54 }
 0x482   :  { %17846 = vmatpush1.bf16.msra.mxu0 %v24671_v47  ;;  %18038 = vmatpush1.bf16.msra.mxu1 %v24711_v35 }
 0x483   :  { %17848 = vmatprep.subr.bf16.mxu0 %v24672_v24  ;;  %18040 = vmatprep.subr.bf16.mxu1 %v24712_v8 }
 0x484   :  { %5440 = vmatprep.mubr.f32.mxu0 %v24455_v17  ;;  %6295 = vmatprep.mubr.f32.mxu1 %v24455_v17 }
 0x486   :  { %17850 = vmatpush1.bf16.msra.mxu0 %v24677_v10  ;;  %18042 = vmatpush1.bf16.msra.mxu1 %v24713_v60 }
 0x487   :  { %17852 = vmatprep.subr.bf16.mxu0 %v24776_v33  ;;  %18044 = vmatprep.subr.bf16.mxu1 %v24714_v7 }
 0x48a   :  { %17854 = vmatpush1.bf16.msra.mxu0 %v24777_v19  ;;  %18046 = vmatpush1.bf16.msra.mxu1 %v24715_v0 }
 0x48b   :  { %17856 = vmatprep.subr.bf16.mxu0 %v24778_v41  ;;  %18048 = vmatprep.subr.bf16.mxu1 %v24716_v16 }
 0x48e   :  { %17858 = vmatpush1.bf16.msra.mxu0 %v24779_v49  ;;  %18050 = vmatpush1.bf16.msra.mxu1 %v24718_v18 }
 0x48f   :  { %17860 = vmatprep.subr.bf16.mxu0 %v24780_v61  ;;  %18052 = vmatprep.subr.bf16.mxu1 %v24719_v53 }
 0x492   :  { %17862 = vmatpush1.bf16.msra.mxu0 %v24781_v34  ;;  %18054 = vmatpush1.bf16.msra.mxu1 %v24720_v14 }
 0x493   :  { %17864 = vmatprep.subr.bf16.mxu0 %v24782_v22  ;;  %18056 = vmatprep.subr.bf16.mxu1 %v24721_v21 }
 0x496   :  { %17866 = vmatpush1.bf16.msra.mxu0 %v24783_v4  ;;  %18058 = vmatpush1.bf16.msra.mxu1 %v21494_v50 }
 0x497   :  { %17868 = vmatprep.subr.bf16.mxu0 %v24784_v9  ;;  %18060 = vmatprep.subr.bf16.mxu1 %v24872_v3 }
 0x49a   :  { %17870 = vmatpush1.bf16.msra.mxu0 %v24873_v40  ;;  %18062 = vmatpush1.bf16.msra.mxu1 %v24874_v58 }
 0x49b   :  { %17872 = vmatprep.subr.bf16.mxu0 %v24875_v28  ;;  %18064 = vmatprep.subr.bf16.mxu1 %v24876_v59 }
 0x49e   :  { %17874 = vmatpush1.bf16.msra.mxu0 %v24877_v1  ;;  %18066 = vmatpush1.bf16.msra.mxu1 %v24878_v56 }
 0x49f   :  { %18068 = vmatprep.subr.bf16.mxu0 %v24664_v37  ;;  %18260 = vmatprep.subr.bf16.mxu1 %v24710_v27 }
 0x4a1   :  { %5442 = vmatmul.mubr.f32.vlgmr.msra.gmra.mrb[6].mxu0 %v22212_v54  ;;  %6297 = vmatmul.mubr.f32.vlgmr.msra.gmra.mrb[10].mxu1 %v22212_v54  ;;  %v24911_v54 = vld [vmem:[#allocation11_spill] sm:$0xff] }
 0x4a2   :  { %18070 = vmatpush1.bf16.msra.mxu0 %v24671_v47  ;;  %18262 = vmatpush1.bf16.msra.mxu1 %v24711_v35 }
 0x4a3   :  { %18072 = vmatprep.subr.bf16.mxu0 %v24672_v24  ;;  %18264 = vmatprep.subr.bf16.mxu1 %v24712_v8 }
 0x4a4   :  { %6445 = vmatprep.mubr.f32.mxu0 %v24455_v17  ;;  %7300 = vmatprep.mubr.f32.mxu1 %v24455_v17 }
 0x4a6   :  { %18074 = vmatpush1.bf16.msra.mxu0 %v24677_v10  ;;  %18266 = vmatpush1.bf16.msra.mxu1 %v24713_v60 }
 0x4a7   :  { %18076 = vmatprep.subr.bf16.mxu0 %v24776_v33  ;;  %18268 = vmatprep.subr.bf16.mxu1 %v24714_v7 }
 0x4aa   :  { %18078 = vmatpush1.bf16.msra.mxu0 %v24777_v19  ;;  %18270 = vmatpush1.bf16.msra.mxu1 %v24715_v0 }
 0x4ab   :  { %18080 = vmatprep.subr.bf16.mxu0 %v24778_v41  ;;  %18272 = vmatprep.subr.bf16.mxu1 %v24716_v16 }
 0x4ae   :  { %18082 = vmatpush1.bf16.msra.mxu0 %v24779_v49  ;;  %18274 = vmatpush1.bf16.msra.mxu1 %v24718_v18 }
 0x4af   :  { %18084 = vmatprep.subr.bf16.mxu0 %v24780_v61  ;;  %18276 = vmatprep.subr.bf16.mxu1 %v24719_v53 }
 0x4b2   :  { %18086 = vmatpush1.bf16.msra.mxu0 %v24781_v34  ;;  %18278 = vmatpush1.bf16.msra.mxu1 %v24720_v14 }
 0x4b3   :  { %18088 = vmatprep.subr.bf16.mxu0 %v24782_v22  ;;  %18280 = vmatprep.subr.bf16.mxu1 %v24721_v21 }
 0x4b6   :  { %18090 = vmatpush1.bf16.msra.mxu0 %v24783_v4  ;;  %18282 = vmatpush1.bf16.msra.mxu1 %v21494_v50 }
 0x4b7   :  { %18092 = vmatprep.subr.bf16.mxu0 %v24784_v9  ;;  %18284 = vmatprep.subr.bf16.mxu1 %v24872_v3 }
 0x4ba   :  { %18094 = vmatpush1.bf16.msra.mxu0 %v24873_v40  ;;  %18286 = vmatpush1.bf16.msra.mxu1 %v24874_v58 }
 0x4bb   :  { %18096 = vmatprep.subr.bf16.mxu0 %v24875_v28  ;;  %18288 = vmatprep.subr.bf16.mxu1 %v24876_v59 }
 0x4be   :  { %18098 = vmatpush1.bf16.msra.mxu0 %v24877_v1  ;;  %18290 = vmatpush1.bf16.msra.mxu1 %v24878_v56 }
 0x4bf   :  { %18100 = vmatprep.subr.bf16.mxu0 %v24911_v54  ;;  %18292 = vmatprep.subr.bf16.mxu1 %v24912_v11 }
 0x574   :  { %v5443_v43 = vpop.f32.mrb[6].mxu0  ;;  %v6298_v44 = vpop.f32.mrb[10].mxu1 }
 0x575   :  { %v6307_v6 = vrot.slane %v5443_v43, 6  ;;  %v5445_v48 = vpop.f32.mrb[7].mxu0  ;;  %v6300_v46 = vpop.f32.mrb[11].mxu1  ;;  %v6309_v54 = vrot.slane %v6298_v44, 6 }
 0x576   :  { %v6308_v5 = vrot.slane %v5445_v48, 6  ;;  %v6310_v51 = vrot.slane %v6300_v46, 6 }
 0x577   :  { %v6315_v26 = vadd.f32 %v21901_v25, %v6307_v6  ;;  %v6317_v43 = vadd.f32 %v21964_v39, %v6309_v54 }
 0x578   :  { %v6316_v30 = vadd.f32 %v21904_v57, %v6308_v5  ;;  %v6318_v56 = vadd.f32 %v21966_v42, %v6310_v51  ;;  %v6339_v51 = vrot.slane %v22206_v23, 7 }
 0x579   :  { %v6319_v29 = vsub.f32 0.0, %v6315_v26 }
 0x57a   :  { %v6325_v59 = vsub.f32 0.0, %v6316_v30  ;;  %v6332_v11 = vsub.f32 0.0, %v6318_v56 }
 0x57b   :  { %v6320_v1 = vmul.f32 1.442695, %v6319_v29 }
 0x57c   :  { %v6326_v28 = vmul.f32 1.442695, %v6325_v59  ;;  %v6333_v58 = vmul.f32 1.442695, %v6332_v11 }
 0x57d   :  { %20448 = vpow2.f32 %v6320_v1 }
 0x57e   :  { %20450 = vpow2.f32 %v6326_v28 }
 0x57f   :  { %20452 = vpow2.f32 %v6333_v58 }
 0x580   :  { %20454 = vtanh.f32 %v6317_v43 }
 0x587   :  { %v20449_v40 = vpop.eup %20448 }
 0x588   :  { %v20451_v48 = vpop.eup %20450  ;;  %v6322_v3 = vadd.f32 1.0, %v20449_v40  ;;  %v24913_v40 = vld [vmem:[#allocation36_spill] sm:$0xff] }
 0x589   :  { %v6328_v6 = vadd.f32 1.0, %v20451_v48  ;;  %v20453_v46 = vpop.eup %20452 }
 0x58a   :  { %20456 = vrcp.f32 %v6322_v3  ;;  %v20455_v5 = vpop.eup %20454  ;;  %v6335_v56 = vadd.f32 1.0, %v20453_v46  ;;  %v15127_v3 = vsel %vm15126_vm1, %v24913_v40, %v22209_v52  ;;  %v24914_v52 = vld [vmem:[#allocation111_spill] sm:$0xff]  ;;  %v24925_v40 = vld [vmem:[#allocation41_spill] sm:$0xff] }
 0x58b   :  { %20458 = vrcp.f32 %v6328_v6 }
 0x58c   :  { %20460 = vrcp.f32 %v6335_v56  ;;  %v24920_v56 = vld [vmem:[#allocation113_spill] sm:$0xff] }
 0x594   :  { %v20457_v59 = vpop.eup %20456 }
 0x595   :  { %v20459_v1 = vpop.eup %20458  ;;  %v6342_v28 = vmul.f32 %v20457_v59, %v20455_v5  ;;  %v24915_v5 = vld [vmem:[#allocation28_spill] sm:$0xff] }
 0x596   :  { %v6341_v30 = vmul.f32 %v20459_v1, %v6339_v51  ;;  %v20461_v44 = vpop.eup %20460  ;;  %v24916_v59 = vld [vmem:[#allocation112_spill] sm:$0xff]  ;;  %v24917_v51 = vld [vmem:[#allocation33_spill] sm:$0xff] }
 0x597   :  { %v24918_v1 = vld [vmem:[#allocation9_spill] sm:$0xff] }
 0x598   :  { %v22441_v11 = vadd.f32 %v6342_v28, %v6341_v30  ;;  %v24919_v28 = vld [vmem:[#allocation35_spill] sm:$0xff]  ;;  %v24921_v30 = vld [vmem:[#allocation38_spill] sm:$0xff] }
 0x59a   :  { %20462 = vtanh.f32 %v22441_v11 }
 0x5a4   :  { %v20463_v58 = vpop.eup %20462 }
 0x5a5   :  { %v6345_v26 = vmul.f32 %v20463_v58, %v20461_v44  ;;  %v24922_v44 = vld [vmem:[#allocation10_spill] sm:$0xff]  ;;  %v24923_v58 = vld [vmem:[#allocation40_spill] sm:$0xff] }
 0x5a7   :  { %v22446_v29 = vsel %vm15128_vm2, %v15127_v3, %v6345_v26  ;;  %v6347_v23 = vrot.slane %v6345_v26, 2  ;;  %v24924_v26 = vld [vmem:[#allocation12_spill] sm:$0xff]  ;;  %v24926_v3 = vld [vmem:[#allocation13_spill] sm:$0xff] }
 0x5a9   :  { %v22448_v54 = vand.u32 4294901760, %v6347_v23 }
 0x5ab   :  { %v22451_v43 = vsub.f32 %v6347_v23, %v22448_v54  ;;  %v24927_v23 = vld [vmem:[#allocation42_spill] sm:$0xff] }
 0x5ad   :  { %v22454_v48 = vand.u32 4294901760, %v22451_v43 }
 0x5af   :  { %v6449_v6 = vsub.f32 %v22451_v43, %v22454_v48 }
 0x5b1   :  { %v6450_v46 = vand.u32 4294901760, %v6449_v6  ;;  %v24928_v6 = vld [vmem:[#allocation114_spill] sm:$0xff] }
 0x5b3   :  { %6451 = vmatmul.mubr.f32.vlgmr.msra.gmra.mrb[8].mxu0 %v6450_v46  ;;  %7306 = vmatmul.mubr.f32.vlgmr.msra.gmra.mrb[12].mxu1 %v6450_v46  ;;  %v24929_v46 = vld [vmem:[#allocation44_spill] sm:$0xff] }
 0x5b4   :  { %18102 = vmatpush1.bf16.msra.mxu0 %v24737_v62  ;;  %18294 = vmatpush1.bf16.msra.mxu1 %v21636_v2 }
 0x5b5   :  { %18104 = vmatprep.subr.bf16.mxu0 %v24738_v15  ;;  %18296 = vmatprep.subr.bf16.mxu1 %v24739_v12 }
 0x5b6   :  { %6681 = vmatprep.mubr.f32.mxu0 %v24455_v17  ;;  %7536 = vmatprep.mubr.f32.mxu1 %v24455_v17 }
 0x5b8   :  { %18106 = vmatpush1.bf16.msra.mxu0 %v24824_v38  ;;  %18298 = vmatpush1.bf16.msra.mxu1 %v24825_v32 }
 0x5b9   :  { %18108 = vmatprep.subr.bf16.mxu0 %v24826_v63  ;;  %18300 = vmatprep.subr.bf16.mxu1 %v24827_v45 }
 0x5bc   :  { %18110 = vmatpush1.bf16.msra.mxu0 %v24744_v13  ;;  %18302 = vmatpush1.bf16.msra.mxu1 %v24828_v36 }
 0x5bd   :  { %18112 = vmatprep.subr.bf16.mxu0 %v24746_v55  ;;  %18304 = vmatprep.subr.bf16.mxu1 %v24829_v31 }
 0x5c0   :  { %18114 = vmatpush1.bf16.msra.mxu0 %v24748_v20  ;;  %18306 = vmatpush1.bf16.msra.mxu1 %v24914_v52  ;;  %v24986_v52 = vld [vmem:[#allocation57_spill] sm:$0xff] }
 0x5c1   :  { %18116 = vmatprep.subr.bf16.mxu0 %v24915_v5  ;;  %18308 = vmatprep.subr.bf16.mxu1 %v24916_v59  ;;  %v24979_v59 = vld [vmem:[#allocation86_spill] sm:$0xff]  ;;  %v24985_v5 = vld [vmem:[#allocation92_spill] sm:$0xff] }
 0x5c4   :  { %18118 = vmatpush1.bf16.msra.mxu0 %v24917_v51  ;;  %18310 = vmatpush1.bf16.msra.mxu1 %v24918_v1  ;;  %v24975_v1 = vld [vmem:[#allocation83_spill] sm:$0xff]  ;;  %v24976_v51 = vld [vmem:[#allocation50_spill] sm:$0xff] }
 0x5c5   :  { %18120 = vmatprep.subr.bf16.mxu0 %v24919_v28  ;;  %18312 = vmatprep.subr.bf16.mxu1 %v24920_v56  ;;  %v24930_v28 = vld [vmem:[#allocation115_spill] sm:$0xff] }
 0x5c6   :  { %v24931_v56 = vld [vmem:[#allocation43_spill] sm:$0xff] }
 0x5c8   :  { %18122 = vmatpush1.bf16.msra.mxu0 %v24921_v30  ;;  %18314 = vmatpush1.bf16.msra.mxu1 %v24922_v44  ;;  %v24932_v30 = vld [vmem:[#allocation116_spill] sm:$0xff]  ;;  %v24947_v44 = vld [vmem:[#allocation66_spill] sm:$0xff] }
 0x5c9   :  { %18124 = vmatprep.subr.bf16.mxu0 %v24923_v58  ;;  %18316 = vmatprep.subr.bf16.mxu1 %v24924_v26  ;;  %v24933_v26 = vld [vmem:[#allocation46_spill] sm:$0xff] }
 0x5ca   :  { %v24946_v58 = vld [vmem:[#allocation122_spill] sm:$0xff] }
 0x5cc   :  { %18126 = vmatpush1.bf16.msra.mxu0 %v24925_v40  ;;  %18318 = vmatpush1.bf16.msra.mxu1 %v24926_v3  ;;  %v24934_v40 = vld [vmem:[#allocation37_spill] sm:$0xff]  ;;  %v24935_v3 = vld [vmem:[#allocation48_spill] sm:$0xff] }
 0x5cd   :  { %18128 = vmatprep.subr.bf16.mxu0 %v24927_v23  ;;  %18320 = vmatprep.subr.bf16.mxu1 %v24928_v6  ;;  %v24936_v23 = vld [vmem:[#allocation117_spill] sm:$0xff]  ;;  %v24941_v6 = vld [vmem:[#allocation58_spill] sm:$0xff] }
 0x5d0   :  { %18130 = vmatpush1.bf16.msra.mxu0 %v24929_v46  ;;  %18322 = vmatpush1.bf16.msra.mxu1 %v24930_v28  ;;  %v24937_v28 = vld [vmem:[#allocation52_spill] sm:$0xff]  ;;  %v24940_v46 = vld [vmem:[#allocation119_spill] sm:$0xff] }
 0x5d1   :  { %18132 = vmatprep.subr.bf16.mxu0 %v24931_v56  ;;  %18324 = vmatprep.subr.bf16.mxu1 %v24932_v30  ;;  %v24938_v56 = vld [vmem:[#allocation118_spill] sm:$0xff] }
 0x5d2   :  { %v24939_v30 = vld [vmem:[#allocation54_spill] sm:$0xff] }
 0x5d3   :  { %6683 = vmatmul.mubr.f32.vlgmr.msra.gmra.mrb[8].mxu0 %v22448_v54  ;;  %7538 = vmatmul.mubr.f32.vlgmr.msra.gmra.mrb[12].mxu1 %v22448_v54 }
 0x5d4   :  { %18134 = vmatpush1.bf16.msra.mxu0 %v24933_v26  ;;  %18326 = vmatpush1.bf16.msra.mxu1 %v24934_v40  ;;  %v24942_v26 = vld [vmem:[#allocation120_spill] sm:$0xff] }
 0x5d5   :  { %18136 = vmatprep.subr.bf16.mxu0 %v24935_v3  ;;  %18328 = vmatprep.subr.bf16.mxu1 %v24936_v23  ;;  %v24943_v40 = vld [vmem:[#allocation60_spill] sm:$0xff]  ;;  %v24944_v3 = vld [vmem:[#allocation121_spill] sm:$0xff] }
 0x5d6   :  { %6817 = vmatprep.mubr.f32.mxu0 %v24455_v17  ;;  %7672 = vmatprep.mubr.f32.mxu1 %v24455_v17  ;;  %v24945_v23 = vld [vmem:[#allocation64_spill] sm:$0xff] }
 0x5d8   :  { %18138 = vmatpush1.bf16.msra.mxu0 %v24937_v28  ;;  %18330 = vmatpush1.bf16.msra.mxu1 %v24938_v56  ;;  %v24948_v28 = vld [vmem:[#allocation123_spill] sm:$0xff]  ;;  %v24949_v56 = vld [vmem:[#allocation69_spill] sm:$0xff] }
 0x5d9   :  { %18140 = vmatprep.subr.bf16.mxu0 %v24939_v30  ;;  %18332 = vmatprep.subr.bf16.mxu1 %v24940_v46  ;;  %v24950_v30 = vld [vmem:[#allocation124_spill] sm:$0xff]  ;;  %v24951_v46 = vld [vmem:[#allocation70_spill] sm:$0xff] }
 0x5dc   :  { %18142 = vmatpush1.bf16.msra.mxu0 %v24941_v6  ;;  %18334 = vmatpush1.bf16.msra.mxu1 %v24942_v26  ;;  %v24952_v6 = vld [vmem:[#allocation125_spill] sm:$0xff]  ;;  %v24953_v26 = vld [vmem:[#allocation71_spill] sm:$0xff] }
 0x5dd   :  { %18144 = vmatprep.subr.bf16.mxu0 %v24943_v40  ;;  %18336 = vmatprep.subr.bf16.mxu1 %v24944_v3  ;;  %v24954_v40 = vld [vmem:[#allocation126_spill] sm:$0xff]  ;;  %v24955_v3 = vld [vmem:[#allocation72_spill] sm:$0xff] }
 0x5e0   :  { %18146 = vmatpush1.bf16.msra.mxu0 %v24945_v23  ;;  %18338 = vmatpush1.bf16.msra.mxu1 %v24946_v58  ;;  %v24956_v23 = vld [vmem:[#allocation127_spill] sm:$0xff]  ;;  %v24957_v58 = vld [vmem:[#allocation73_spill] sm:$0xff] }
 0x5e1   :  { %18148 = vmatprep.subr.bf16.mxu0 %v24947_v44  ;;  %18340 = vmatprep.subr.bf16.mxu1 %v24948_v28  ;;  %v24958_v44 = vld [vmem:[#allocation128_spill] sm:$0xff]  ;;  %v24959_v28 = vld [vmem:[#allocation74_spill] sm:$0xff] }
 0x5e4   :  { %18150 = vmatpush1.bf16.msra.mxu0 %v24949_v56  ;;  %18342 = vmatpush1.bf16.msra.mxu1 %v24950_v30  ;;  %v24960_v56 = vld [vmem:[#allocation129_spill] sm:$0xff]  ;;  %v24961_v30 = vld [vmem:[#allocation75_spill] sm:$0xff] }
 0x5e5   :  { %18152 = vmatprep.subr.bf16.mxu0 %v24951_v46  ;;  %18344 = vmatprep.subr.bf16.mxu1 %v24952_v6  ;;  %v24962_v46 = vld [vmem:[#allocation130_spill] sm:$0xff]  ;;  %v24974_v6 = vld [vmem:[#allocation49_spill] sm:$0xff] }
 0x5e8   :  { %18154 = vmatpush1.bf16.msra.mxu0 %v24953_v26  ;;  %18346 = vmatpush1.bf16.msra.mxu1 %v24954_v40  ;;  %v24972_v40 = vld [vmem:[#allocation47_spill] sm:$0xff]  ;;  %v24973_v26 = vld [vmem:[#allocation82_spill] sm:$0xff] }
 0x5e9   :  { %18156 = vmatprep.subr.bf16.mxu0 %v24955_v3  ;;  %18348 = vmatprep.subr.bf16.mxu1 %v24956_v23  ;;  %v24970_v23 = vld [vmem:[#allocation45_spill] sm:$0xff] }
 0x5ea   :  { %v24971_v3 = vld [vmem:[#allocation81_spill] sm:$0xff] }
 0x5ec   :  { %18158 = vmatpush1.bf16.msra.mxu0 %v24957_v58  ;;  %18350 = vmatpush1.bf16.msra.mxu1 %v24958_v44  ;;  %v24968_v44 = vld [vmem:[#allocation34_spill] sm:$0xff] }
 0x5ed   :  { %18160 = vmatprep.subr.bf16.mxu0 %v24959_v28  ;;  %18352 = vmatprep.subr.bf16.mxu1 %v24960_v56  ;;  %v24966_v56 = vld [vmem:[#allocation32_spill] sm:$0xff]  ;;  %v24967_v28 = vld [vmem:[#allocation99_spill] sm:$0xff]  ;;  %v24969_v58 = vld [vmem:[#allocation102_spill] sm:$0xff] }
 0x5f0   :  { %18162 = vmatpush1.bf16.msra.mxu0 %v24961_v30  ;;  %18354 = vmatpush1.bf16.msra.mxu1 %v24962_v46  ;;  %v24964_v46 = vld [vmem:[#allocation31_spill] sm:$0xff]  ;;  %v24965_v30 = vld [vmem:[#allocation98_spill] sm:$0xff] }
 0x5f1   :  { %18164 = vmatprep.subr.bf16.mxu0 %v24664_v37  ;;  %18356 = vmatprep.subr.bf16.mxu1 %v24710_v27 }
 0x5f3   :  { %6820 = vmatmul.mubr.f32.vlgmr.msra.gmra.mrb[8].mxu0 %v22451_v43  ;;  %7675 = vmatmul.mubr.f32.vlgmr.msra.gmra.mrb[12].mxu1 %v22451_v43  ;;  %v24963_v43 = vld [vmem:[#allocation94_spill] sm:$0xff] }
 0x5f4   :  { %18166 = vmatpush1.bf16.msra.mxu0 %v24671_v47  ;;  %18358 = vmatpush1.bf16.msra.mxu1 %v24711_v35 }
 0x5f5   :  { %18168 = vmatprep.subr.bf16.mxu0 %v24672_v24  ;;  %18360 = vmatprep.subr.bf16.mxu1 %v24712_v8 }
 0x5f6   :  { %6922 = vmatprep.mubr.f32.mxu0 %v24455_v17  ;;  %7777 = vmatprep.mubr.f32.mxu1 %v24455_v17 }
 0x5f8   :  { %18170 = vmatpush1.bf16.msra.mxu0 %v24677_v10  ;;  %18362 = vmatpush1.bf16.msra.mxu1 %v24713_v60 }
 0x5f9   :  { %18172 = vmatprep.subr.bf16.mxu0 %v24776_v33  ;;  %18364 = vmatprep.subr.bf16.mxu1 %v24714_v7 }
 0x5fc   :  { %18174 = vmatpush1.bf16.msra.mxu0 %v24777_v19  ;;  %18366 = vmatpush1.bf16.msra.mxu1 %v24715_v0 }
 0x5fd   :  { %18176 = vmatprep.subr.bf16.mxu0 %v24778_v41  ;;  %18368 = vmatprep.subr.bf16.mxu1 %v24716_v16 }
 0x600   :  { %18178 = vmatpush1.bf16.msra.mxu0 %v24779_v49  ;;  %18370 = vmatpush1.bf16.msra.mxu1 %v24718_v18 }
 0x601   :  { %18180 = vmatprep.subr.bf16.mxu0 %v24780_v61  ;;  %18372 = vmatprep.subr.bf16.mxu1 %v24719_v53 }
 0x604   :  { %18182 = vmatpush1.bf16.msra.mxu0 %v24781_v34  ;;  %18374 = vmatpush1.bf16.msra.mxu1 %v24720_v14 }
 0x605   :  { %18184 = vmatprep.subr.bf16.mxu0 %v24782_v22  ;;  %18376 = vmatprep.subr.bf16.mxu1 %v24721_v21 }
 0x608   :  { %18186 = vmatpush1.bf16.msra.mxu0 %v24783_v4  ;;  %18378 = vmatpush1.bf16.msra.mxu1 %v21494_v50 }
 0x609   :  { %18188 = vmatprep.subr.bf16.mxu0 %v24784_v9  ;;  %18380 = vmatprep.subr.bf16.mxu1 %v24963_v43 }
 0x60c   :  { %18190 = vmatpush1.bf16.msra.mxu0 %v24964_v46  ;;  %18382 = vmatpush1.bf16.msra.mxu1 %v24965_v30 }
 0x60d   :  { %18192 = vmatprep.subr.bf16.mxu0 %v24966_v56  ;;  %18384 = vmatprep.subr.bf16.mxu1 %v24967_v28 }
 0x610   :  { %18194 = vmatpush1.bf16.msra.mxu0 %v24968_v44  ;;  %18386 = vmatpush1.bf16.msra.mxu1 %v24969_v58 }
 0x611   :  { %18196 = vmatprep.subr.bf16.mxu0 %v24970_v23  ;;  %18388 = vmatprep.subr.bf16.mxu1 %v24971_v3  ;;  %v24977_v23 = vld [vmem:[#allocation84_spill] sm:$0xff]  ;;  %v24978_v3 = vld [vmem:[#allocation51_spill] sm:$0xff] }
 0x613   :  { %6926 = vmatmul.mubr.f32.vlgmr.msra.gmra.mrb[8].mxu0 %v22454_v48  ;;  %7781 = vmatmul.mubr.f32.vlgmr.msra.gmra.mrb[12].mxu1 %v22454_v48  ;;  %v24980_v48 = vld [vmem:[#allocation53_spill] sm:$0xff] }
 0x614   :  { %18198 = vmatpush1.bf16.msra.mxu0 %v24972_v40  ;;  %18390 = vmatpush1.bf16.msra.mxu1 %v24973_v26  ;;  %v24981_v40 = vld [vmem:[#allocation88_spill] sm:$0xff]  ;;  %v24982_v26 = vld [vmem:[#allocation55_spill] sm:$0xff] }
 0x615   :  { %18200 = vmatprep.subr.bf16.mxu0 %v24974_v6  ;;  %18392 = vmatprep.subr.bf16.mxu1 %v24975_v1  ;;  %v24983_v6 = vld [vmem:[#allocation90_spill] sm:$0xff]  ;;  %v24984_v1 = vld [vmem:[#allocation56_spill] sm:$0xff] }
 0x616   :  { %7092 = vmatprep.mubr.f32.mxu0 %v24455_v17  ;;  %7947 = vmatprep.mubr.f32.mxu1 %v24455_v17 }
 0x618   :  { %18202 = vmatpush1.bf16.msra.mxu0 %v24976_v51  ;;  %18394 = vmatpush1.bf16.msra.mxu1 %v24977_v23  ;;  %v24987_v51 = vld [vmem:[#allocation93_spill] sm:$0xff]  ;;  %v24988_v23 = vld [vmem:[#allocation59_spill] sm:$0xff] }
 0x619   :  { %18204 = vmatprep.subr.bf16.mxu0 %v24978_v3  ;;  %18396 = vmatprep.subr.bf16.mxu1 %v24979_v59  ;;  %v24989_v3 = vld [vmem:[#allocation95_spill] sm:$0xff]  ;;  %v24990_v59 = vld [vmem:[#allocation61_spill] sm:$0xff] }
 0x61c   :  { %18206 = vmatpush1.bf16.msra.mxu0 %v24980_v48  ;;  %18398 = vmatpush1.bf16.msra.mxu1 %v24981_v40  ;;  %v24991_v48 = vld [vmem:[#allocation96_spill] sm:$0xff]  ;;  %v24992_v40 = vld [vmem:[#allocation62_spill] sm:$0xff] }
 0x61d   :  { %18208 = vmatprep.subr.bf16.mxu0 %v24982_v26  ;;  %18400 = vmatprep.subr.bf16.mxu1 %v24983_v6  ;;  %v24993_v26 = vld [vmem:[#allocation97_spill] sm:$0xff]  ;;  %v24994_v6 = vld [vmem:[#allocation63_spill] sm:$0xff] }
 0x620   :  { %18210 = vmatpush1.bf16.msra.mxu0 %v24984_v1  ;;  %18402 = vmatpush1.bf16.msra.mxu1 %v24985_v5  ;;  %v24995_v1 = vld [vmem:[#allocation100_spill] sm:$0xff]  ;;  %v24996_v5 = vld [vmem:[#allocation65_spill] sm:$0xff] }
 0x621   :  { %18212 = vmatprep.subr.bf16.mxu0 %v24986_v52  ;;  %18404 = vmatprep.subr.bf16.mxu1 %v24987_v51  ;;  %v24997_v52 = vld [vmem:[#allocation101_spill] sm:$0xff]  ;;  %v24998_v51 = vld [vmem:[#allocation67_spill] sm:$0xff] }
 0x624   :  { %18214 = vmatpush1.bf16.msra.mxu0 %v24988_v23  ;;  %18406 = vmatpush1.bf16.msra.mxu1 %v24989_v3  ;;  %v24999_v23 = vld [vmem:[#allocation103_spill] sm:$0xff]  ;;  %v25000_v3 = vld [vmem:[#allocation68_spill] sm:$0xff] }
 0x625   :  { %18216 = vmatprep.subr.bf16.mxu0 %v24990_v59  ;;  %18408 = vmatprep.subr.bf16.mxu1 %v24991_v48  ;;  %v25001_v59 = vld [vmem:[#allocation105_spill] sm:$0xff] }
 0x628   :  { %18218 = vmatpush1.bf16.msra.mxu0 %v24992_v40  ;;  %18410 = vmatpush1.bf16.msra.mxu1 %v24993_v26 }
 0x629   :  { %18220 = vmatprep.subr.bf16.mxu0 %v24994_v6  ;;  %18412 = vmatprep.subr.bf16.mxu1 %v24995_v1 }
 0x62c   :  { %18222 = vmatpush1.bf16.msra.mxu0 %v24996_v5  ;;  %18414 = vmatpush1.bf16.msra.mxu1 %v24997_v52 }
 0x62d   :  { %18224 = vmatprep.subr.bf16.mxu0 %v24998_v51  ;;  %18416 = vmatprep.subr.bf16.mxu1 %v24999_v23 }
 0x630   :  { %18226 = vmatpush1.bf16.msra.mxu0 %v25000_v3  ;;  %18418 = vmatpush1.bf16.msra.mxu1 %v25001_v59  ;;  %v25003_v59 = vld [vmem:[#allocation104_spill] sm:$0xff] }
 0x631   :  { %18228 = vmatprep.subr.bf16.mxu0 %v24664_v37  ;;  %18420 = vmatprep.subr.bf16.mxu1 %v24710_v27 }
 0x633   :  { %7094 = vmatmul.mubr.f32.vlgmr.msra.gmra.mrb[8].mxu0 %v22448_v54  ;;  %7949 = vmatmul.mubr.f32.vlgmr.msra.gmra.mrb[12].mxu1 %v22448_v54 }
 0x634   :  { %18230 = vmatpush1.bf16.msra.mxu0 %v24671_v47  ;;  %18422 = vmatpush1.bf16.msra.mxu1 %v24711_v35 }
 0x635   :  { %18232 = vmatprep.subr.bf16.mxu0 %v24672_v24  ;;  %18424 = vmatprep.subr.bf16.mxu1 %v24712_v8 }
 0x636   :  { %7196 = vmatprep.mubr.f32.mxu0 %v24455_v17  ;;  %8051 = vmatprep.mubr.f32.mxu1 %v24455_v17 }
 0x638   :  { %18234 = vmatpush1.bf16.msra.mxu0 %v24677_v10  ;;  %18426 = vmatpush1.bf16.msra.mxu1 %v24713_v60 }
 0x639   :  { %18236 = vmatprep.subr.bf16.mxu0 %v24776_v33  ;;  %18428 = vmatprep.subr.bf16.mxu1 %v24714_v7 }
 0x63c   :  { %18238 = vmatpush1.bf16.msra.mxu0 %v24777_v19  ;;  %18430 = vmatpush1.bf16.msra.mxu1 %v24715_v0 }
 0x63d   :  { %18240 = vmatprep.subr.bf16.mxu0 %v24778_v41  ;;  %18432 = vmatprep.subr.bf16.mxu1 %v24716_v16 }
 0x640   :  { %18242 = vmatpush1.bf16.msra.mxu0 %v24779_v49  ;;  %18434 = vmatpush1.bf16.msra.mxu1 %v24718_v18 }
 0x641   :  { %18244 = vmatprep.subr.bf16.mxu0 %v24780_v61  ;;  %18436 = vmatprep.subr.bf16.mxu1 %v24719_v53 }
 0x644   :  { %18246 = vmatpush1.bf16.msra.mxu0 %v24781_v34  ;;  %18438 = vmatpush1.bf16.msra.mxu1 %v24720_v14 }
 0x645   :  { %18248 = vmatprep.subr.bf16.mxu0 %v24782_v22  ;;  %18440 = vmatprep.subr.bf16.mxu1 %v24721_v21 }
 0x648   :  { %18250 = vmatpush1.bf16.msra.mxu0 %v24783_v4  ;;  %18442 = vmatpush1.bf16.msra.mxu1 %v21494_v50 }
 0x649   :  { %18252 = vmatprep.subr.bf16.mxu0 %v24784_v9  ;;  %18444 = vmatprep.subr.bf16.mxu1 %v24963_v43 }
 0x64c   :  { %18254 = vmatpush1.bf16.msra.mxu0 %v24964_v46  ;;  %18446 = vmatpush1.bf16.msra.mxu1 %v24965_v30 }
 0x64d   :  { %18256 = vmatprep.subr.bf16.mxu0 %v24966_v56  ;;  %18448 = vmatprep.subr.bf16.mxu1 %v24967_v28 }
 0x650   :  { %18258 = vmatpush1.bf16.msra.mxu0 %v24968_v44  ;;  %18450 = vmatpush1.bf16.msra.mxu1 %v24969_v58 }
 0x651   :  { %18452 = vmatprep.subr.bf16.mxu0 %v24664_v37  ;;  %18644 = vmatprep.subr.bf16.mxu1 %v24710_v27 }
 0x653   :  { %7198 = vmatmul.mubr.f32.vlgmr.msra.gmra.mrb[8].mxu0 %v22448_v54  ;;  %8053 = vmatmul.mubr.f32.vlgmr.msra.gmra.mrb[12].mxu1 %v22448_v54  ;;  %v25002_v54 = vld [vmem:[#allocation11_spill] sm:$0xff] }
 0x654   :  { %18454 = vmatpush1.bf16.msra.mxu0 %v24671_v47  ;;  %18646 = vmatpush1.bf16.msra.mxu1 %v24711_v35 }
 0x655   :  { %18456 = vmatprep.subr.bf16.mxu0 %v24672_v24  ;;  %18648 = vmatprep.subr.bf16.mxu1 %v24712_v8 }
 0x656   :  { %8201 = vmatprep.mubr.f32.mxu0 %v24455_v17  ;;  %9056 = vmatprep.mubr.f32.mxu1 %v24455_v17 }
 0x658   :  { %18458 = vmatpush1.bf16.msra.mxu0 %v24677_v10  ;;  %18650 = vmatpush1.bf16.msra.mxu1 %v24713_v60 }
 0x659   :  { %18460 = vmatprep.subr.bf16.mxu0 %v24776_v33  ;;  %18652 = vmatprep.subr.bf16.mxu1 %v24714_v7 }
 0x65c   :  { %18462 = vmatpush1.bf16.msra.mxu0 %v24777_v19  ;;  %18654 = vmatpush1.bf16.msra.mxu1 %v24715_v0 }
 0x65d   :  { %18464 = vmatprep.subr.bf16.mxu0 %v24778_v41  ;;  %18656 = vmatprep.subr.bf16.mxu1 %v24716_v16 }
 0x660   :  { %18466 = vmatpush1.bf16.msra.mxu0 %v24779_v49  ;;  %18658 = vmatpush1.bf16.msra.mxu1 %v24718_v18 }
 0x661   :  { %18468 = vmatprep.subr.bf16.mxu0 %v24780_v61  ;;  %18660 = vmatprep.subr.bf16.mxu1 %v24719_v53 }
 0x664   :  { %18470 = vmatpush1.bf16.msra.mxu0 %v24781_v34  ;;  %18662 = vmatpush1.bf16.msra.mxu1 %v24720_v14 }
 0x665   :  { %18472 = vmatprep.subr.bf16.mxu0 %v24782_v22  ;;  %18664 = vmatprep.subr.bf16.mxu1 %v24721_v21 }
 0x668   :  { %18474 = vmatpush1.bf16.msra.mxu0 %v24783_v4  ;;  %18666 = vmatpush1.bf16.msra.mxu1 %v21494_v50 }
 0x669   :  { %18476 = vmatprep.subr.bf16.mxu0 %v24784_v9  ;;  %18668 = vmatprep.subr.bf16.mxu1 %v24963_v43 }
 0x66c   :  { %18478 = vmatpush1.bf16.msra.mxu0 %v24964_v46  ;;  %18670 = vmatpush1.bf16.msra.mxu1 %v24965_v30 }
 0x66d   :  { %18480 = vmatprep.subr.bf16.mxu0 %v24966_v56  ;;  %18672 = vmatprep.subr.bf16.mxu1 %v24967_v28 }
 0x670   :  { %18482 = vmatpush1.bf16.msra.mxu0 %v24968_v44  ;;  %18674 = vmatpush1.bf16.msra.mxu1 %v24969_v58 }
 0x671   :  { %18484 = vmatprep.subr.bf16.mxu0 %v25002_v54  ;;  %18676 = vmatprep.subr.bf16.mxu1 %v25003_v59 }
 0x726   :  { %v7199_v3 = vpop.f32.mrb[8].mxu0  ;;  %v8054_v23 = vpop.f32.mrb[12].mxu1 }
 0x727   :  { %v8063_v51 = vrot.slane %v7199_v3, 5  ;;  %v7201_v52 = vpop.f32.mrb[9].mxu0  ;;  %v8056_v5 = vpop.f32.mrb[13].mxu1  ;;  %v8065_v54 = vrot.slane %v8054_v23, 5 }
 0x728   :  { %v8064_v1 = vrot.slane %v7201_v52, 5  ;;  %v8066_v40 = vrot.slane %v8056_v5, 5 }
 0x729   :  { %v8071_v6 = vadd.f32 %v21901_v25, %v8063_v51  ;;  %v8073_v3 = vadd.f32 %v21964_v39, %v8065_v54 }
 0x72a   :  { %v8072_v26 = vadd.f32 %v21904_v57, %v8064_v1  ;;  %v8074_v58 = vadd.f32 %v21966_v42, %v8066_v40 }
 0x72b   :  { %v8075_v48 = vsub.f32 0.0, %v8071_v6 }
 0x72c   :  { %v8081_v28 = vsub.f32 0.0, %v8072_v26  ;;  %v8088_v59 = vsub.f32 0.0, %v8074_v58  ;;  %v8095_v26 = vrot.slane %v22441_v11, 7 }
 0x72d   :  { %v8076_v44 = vmul.f32 1.442695, %v8075_v48 }
 0x72e   :  { %v8082_v56 = vmul.f32 1.442695, %v8081_v28  ;;  %v8089_v30 = vmul.f32 1.442695, %v8088_v59 }
 0x72f   :  { %20464 = vpow2.f32 %v8076_v44 }
 0x730   :  { %20466 = vpow2.f32 %v8082_v56 }
 0x731   :  { %20468 = vpow2.f32 %v8089_v30 }
 0x732   :  { %20470 = vtanh.f32 %v8073_v3 }
 0x739   :  { %v20465_v46 = vpop.eup %20464 }
 0x73a   :  { %v20467_v52 = vpop.eup %20466  ;;  %v8078_v43 = vadd.f32 1.0, %v20465_v46 }
 0x73b   :  { %v8084_v51 = vadd.f32 1.0, %v20467_v52  ;;  %v20469_v5 = vpop.eup %20468 }
 0x73c   :  { %20472 = vrcp.f32 %v8078_v43  ;;  %v20471_v1 = vpop.eup %20470  ;;  %v8091_v58 = vadd.f32 1.0, %v20469_v5  ;;  %v25006_v5 = vld [vmem:[#allocation112_spill] sm:$0xff] }
 0x73d   :  { %20474 = vrcp.f32 %v8084_v51  ;;  %v25005_v51 = vld [vmem:[#allocation28_spill] sm:$0xff] }
 0x73e   :  { %20476 = vrcp.f32 %v8091_v58  ;;  %v25012_v58 = vld [vmem:[#allocation10_spill] sm:$0xff] }
 0x746   :  { %v20473_v28 = vpop.eup %20472 }
 0x747   :  { %v20475_v44 = vpop.eup %20474  ;;  %v8098_v56 = vmul.f32 %v20473_v28, %v20471_v1  ;;  %v25007_v1 = vld [vmem:[#allocation33_spill] sm:$0xff] }
 0x748   :  { %v8097_v40 = vmul.f32 %v20475_v44, %v8095_v26  ;;  %v20477_v23 = vpop.eup %20476  ;;  %v25008_v28 = vld [vmem:[#allocation9_spill] sm:$0xff]  ;;  %v25009_v26 = vld [vmem:[#allocation35_spill] sm:$0xff] }
 0x749   :  { %v25010_v44 = vld [vmem:[#allocation113_spill] sm:$0xff] }
 0x74a   :  { %v22677_v59 = vadd.f32 %v8098_v56, %v8097_v40  ;;  %v25011_v56 = vld [vmem:[#allocation38_spill] sm:$0xff]  ;;  %v25013_v40 = vld [vmem:[#allocation40_spill] sm:$0xff] }
 0x74c   :  { %20478 = vtanh.f32 %v22677_v59 }
 0x756   :  { %v20479_v30 = vpop.eup %20478 }
 0x757   :  { %v8101_v6 = vmul.f32 %v20479_v30, %v20477_v23  ;;  %v25014_v23 = vld [vmem:[#allocation12_spill] sm:$0xff]  ;;  %v25015_v30 = vld [vmem:[#allocation41_spill] sm:$0xff] }
 0x759   :  { %v8103_v46 = vrot.slane %v8101_v6, 3  ;;  %v22681_v43 = vsel %vm15130_vm3, %v22446_v29, %v8101_v6  ;;  %v25004_v29 = vld [vmem:[#allocation111_spill] sm:$0xff]  ;;  %v25016_v6 = vld [vmem:[#allocation13_spill] sm:$0xff] }
 0x75b   :  { %v22683_v48 = vand.u32 4294901760, %v8103_v46 }
 0x75d   :  { %v22686_v11 = vsub.f32 %v8103_v46, %v22683_v48  ;;  %v25017_v46 = vld [vmem:[#allocation42_spill] sm:$0xff] }
 0x75f   :  { %v22689_v54 = vand.u32 4294901760, %v22686_v11 }
 0x761   :  { %v8205_v3 = vsub.f32 %v22686_v11, %v22689_v54 }
 0x763   :  { %v8206_v52 = vand.u32 4294901760, %v8205_v3  ;;  %v25018_v3 = vld [vmem:[#allocation114_spill] sm:$0xff] }
 0x765   :  { %8207 = vmatmul.mubr.f32.vlgmr.msra.gmra.mrb[10].mxu0 %v8206_v52  ;;  %9062 = vmatmul.mubr.f32.vlgmr.msra.gmra.mrb[14].mxu1 %v8206_v52  ;;  %v25019_v52 = vld [vmem:[#allocation44_spill] sm:$0xff] }
 0x766   :  { %18486 = vmatpush1.bf16.msra.mxu0 %v24737_v62  ;;  %18678 = vmatpush1.bf16.msra.mxu1 %v21636_v2 }
 0x767   :  { %18488 = vmatprep.subr.bf16.mxu0 %v24738_v15  ;;  %18680 = vmatprep.subr.bf16.mxu1 %v24739_v12 }
 0x768   :  { %8437 = vmatprep.mubr.f32.mxu0 %v24455_v17  ;;  %9292 = vmatprep.mubr.f32.mxu1 %v24455_v17 }
 0x76a   :  { %18490 = vmatpush1.bf16.msra.mxu0 %v24824_v38  ;;  %18682 = vmatpush1.bf16.msra.mxu1 %v24825_v32 }
 0x76b   :  { %18492 = vmatprep.subr.bf16.mxu0 %v24826_v63  ;;  %18684 = vmatprep.subr.bf16.mxu1 %v24827_v45 }
 0x76e   :  { %18494 = vmatpush1.bf16.msra.mxu0 %v24744_v13  ;;  %18686 = vmatpush1.bf16.msra.mxu1 %v24828_v36 }
 0x76f   :  { %18496 = vmatprep.subr.bf16.mxu0 %v24746_v55  ;;  %18688 = vmatprep.subr.bf16.mxu1 %v24829_v31 }
 0x772   :  { %18498 = vmatpush1.bf16.msra.mxu0 %v24748_v20  ;;  %18690 = vmatpush1.bf16.msra.mxu1 %v25004_v29  ;;  %v25076_v29 = vld [vmem:[#allocation57_spill] sm:$0xff] }
 0x773   :  { %18500 = vmatprep.subr.bf16.mxu0 %v25005_v51  ;;  %18692 = vmatprep.subr.bf16.mxu1 %v25006_v5  ;;  %v25069_v5 = vld [vmem:[#allocation86_spill] sm:$0xff]  ;;  %v25075_v51 = vld [vmem:[#allocation92_spill] sm:$0xff] }
 0x776   :  { %18502 = vmatpush1.bf16.msra.mxu0 %v25007_v1  ;;  %18694 = vmatpush1.bf16.msra.mxu1 %v25008_v28  ;;  %v25065_v28 = vld [vmem:[#allocation83_spill] sm:$0xff]  ;;  %v25066_v1 = vld [vmem:[#allocation50_spill] sm:$0xff] }
 0x777   :  { %18504 = vmatprep.subr.bf16.mxu0 %v25009_v26  ;;  %18696 = vmatprep.subr.bf16.mxu1 %v25010_v44  ;;  %v25020_v26 = vld [vmem:[#allocation115_spill] sm:$0xff] }
 0x778   :  { %v25021_v44 = vld [vmem:[#allocation43_spill] sm:$0xff] }
 0x77a   :  { %18506 = vmatpush1.bf16.msra.mxu0 %v25011_v56  ;;  %18698 = vmatpush1.bf16.msra.mxu1 %v25012_v58  ;;  %v25022_v56 = vld [vmem:[#allocation116_spill] sm:$0xff]  ;;  %v25037_v58 = vld [vmem:[#allocation66_spill] sm:$0xff] }
 0x77b   :  { %18508 = vmatprep.subr.bf16.mxu0 %v25013_v40  ;;  %18700 = vmatprep.subr.bf16.mxu1 %v25014_v23  ;;  %v25023_v23 = vld [vmem:[#allocation46_spill] sm:$0xff] }
 0x77c   :  { %v25036_v40 = vld [vmem:[#allocation122_spill] sm:$0xff] }
 0x77e   :  { %18510 = vmatpush1.bf16.msra.mxu0 %v25015_v30  ;;  %18702 = vmatpush1.bf16.msra.mxu1 %v25016_v6  ;;  %v25024_v30 = vld [vmem:[#allocation37_spill] sm:$0xff]  ;;  %v25025_v6 = vld [vmem:[#allocation48_spill] sm:$0xff] }
 0x77f   :  { %18512 = vmatprep.subr.bf16.mxu0 %v25017_v46  ;;  %18704 = vmatprep.subr.bf16.mxu1 %v25018_v3  ;;  %v25026_v46 = vld [vmem:[#allocation117_spill] sm:$0xff]  ;;  %v25031_v3 = vld [vmem:[#allocation58_spill] sm:$0xff] }
 0x782   :  { %18514 = vmatpush1.bf16.msra.mxu0 %v25019_v52  ;;  %18706 = vmatpush1.bf16.msra.mxu1 %v25020_v26  ;;  %v25027_v26 = vld [vmem:[#allocation52_spill] sm:$0xff]  ;;  %v25030_v52 = vld [vmem:[#allocation119_spill] sm:$0xff] }
 0x783   :  { %18516 = vmatprep.subr.bf16.mxu0 %v25021_v44  ;;  %18708 = vmatprep.subr.bf16.mxu1 %v25022_v56  ;;  %v25028_v44 = vld [vmem:[#allocation118_spill] sm:$0xff] }
 0x784   :  { %v25029_v56 = vld [vmem:[#allocation54_spill] sm:$0xff] }
 0x785   :  { %8439 = vmatmul.mubr.f32.vlgmr.msra.gmra.mrb[10].mxu0 %v22683_v48  ;;  %9294 = vmatmul.mubr.f32.vlgmr.msra.gmra.mrb[14].mxu1 %v22683_v48 }
 0x786   :  { %18518 = vmatpush1.bf16.msra.mxu0 %v25023_v23  ;;  %18710 = vmatpush1.bf16.msra.mxu1 %v25024_v30  ;;  %v25032_v23 = vld [vmem:[#allocation120_spill] sm:$0xff] }
 0x787   :  { %18520 = vmatprep.subr.bf16.mxu0 %v25025_v6  ;;  %18712 = vmatprep.subr.bf16.mxu1 %v25026_v46  ;;  %v25033_v30 = vld [vmem:[#allocation60_spill] sm:$0xff]  ;;  %v25034_v6 = vld [vmem:[#allocation121_spill] sm:$0xff] }
 0x788   :  { %8573 = vmatprep.mubr.f32.mxu0 %v24455_v17  ;;  %9428 = vmatprep.mubr.f32.mxu1 %v24455_v17  ;;  %v25035_v46 = vld [vmem:[#allocation64_spill] sm:$0xff] }
 0x78a   :  { %18522 = vmatpush1.bf16.msra.mxu0 %v25027_v26  ;;  %18714 = vmatpush1.bf16.msra.mxu1 %v25028_v44  ;;  %v25038_v26 = vld [vmem:[#allocation123_spill] sm:$0xff]  ;;  %v25039_v44 = vld [vmem:[#allocation69_spill] sm:$0xff] }
 0x78b   :  { %18524 = vmatprep.subr.bf16.mxu0 %v25029_v56  ;;  %18716 = vmatprep.subr.bf16.mxu1 %v25030_v52  ;;  %v25040_v56 = vld [vmem:[#allocation124_spill] sm:$0xff]  ;;  %v25041_v52 = vld [vmem:[#allocation70_spill] sm:$0xff] }
 0x78e   :  { %18526 = vmatpush1.bf16.msra.mxu0 %v25031_v3  ;;  %18718 = vmatpush1.bf16.msra.mxu1 %v25032_v23  ;;  %v25042_v3 = vld [vmem:[#allocation125_spill] sm:$0xff]  ;;  %v25043_v23 = vld [vmem:[#allocation71_spill] sm:$0xff] }
 0x78f   :  { %18528 = vmatprep.subr.bf16.mxu0 %v25033_v30  ;;  %18720 = vmatprep.subr.bf16.mxu1 %v25034_v6  ;;  %v25044_v30 = vld [vmem:[#allocation126_spill] sm:$0xff]  ;;  %v25045_v6 = vld [vmem:[#allocation72_spill] sm:$0xff] }
 0x792   :  { %18530 = vmatpush1.bf16.msra.mxu0 %v25035_v46  ;;  %18722 = vmatpush1.bf16.msra.mxu1 %v25036_v40  ;;  %v25046_v46 = vld [vmem:[#allocation127_spill] sm:$0xff]  ;;  %v25047_v40 = vld [vmem:[#allocation73_spill] sm:$0xff] }
 0x793   :  { %18532 = vmatprep.subr.bf16.mxu0 %v25037_v58  ;;  %18724 = vmatprep.subr.bf16.mxu1 %v25038_v26  ;;  %v25048_v58 = vld [vmem:[#allocation128_spill] sm:$0xff]  ;;  %v25049_v26 = vld [vmem:[#allocation74_spill] sm:$0xff] }
 0x796   :  { %18534 = vmatpush1.bf16.msra.mxu0 %v25039_v44  ;;  %18726 = vmatpush1.bf16.msra.mxu1 %v25040_v56  ;;  %v25050_v44 = vld [vmem:[#allocation129_spill] sm:$0xff]  ;;  %v25051_v56 = vld [vmem:[#allocation75_spill] sm:$0xff] }
 0x797   :  { %18536 = vmatprep.subr.bf16.mxu0 %v25041_v52  ;;  %18728 = vmatprep.subr.bf16.mxu1 %v25042_v3  ;;  %v25052_v52 = vld [vmem:[#allocation130_spill] sm:$0xff]  ;;  %v25064_v3 = vld [vmem:[#allocation49_spill] sm:$0xff] }
 0x79a   :  { %18538 = vmatpush1.bf16.msra.mxu0 %v25043_v23  ;;  %18730 = vmatpush1.bf16.msra.mxu1 %v25044_v30  ;;  %v25062_v30 = vld [vmem:[#allocation47_spill] sm:$0xff]  ;;  %v25063_v23 = vld [vmem:[#allocation82_spill] sm:$0xff] }
 0x79b   :  { %18540 = vmatprep.subr.bf16.mxu0 %v25045_v6  ;;  %18732 = vmatprep.subr.bf16.mxu1 %v25046_v46  ;;  %v25060_v46 = vld [vmem:[#allocation45_spill] sm:$0xff] }
 0x79c   :  { %v25061_v6 = vld [vmem:[#allocation81_spill] sm:$0xff] }
 0x79e   :  { %18542 = vmatpush1.bf16.msra.mxu0 %v25047_v40  ;;  %18734 = vmatpush1.bf16.msra.mxu1 %v25048_v58  ;;  %v25058_v58 = vld [vmem:[#allocation34_spill] sm:$0xff] }
 0x79f   :  { %18544 = vmatprep.subr.bf16.mxu0 %v25049_v26  ;;  %18736 = vmatprep.subr.bf16.mxu1 %v25050_v44  ;;  %v25056_v44 = vld [vmem:[#allocation32_spill] sm:$0xff]  ;;  %v25057_v26 = vld [vmem:[#allocation99_spill] sm:$0xff]  ;;  %v25059_v40 = vld [vmem:[#allocation102_spill] sm:$0xff] }
 0x7a2   :  { %18546 = vmatpush1.bf16.msra.mxu0 %v25051_v56  ;;  %18738 = vmatpush1.bf16.msra.mxu1 %v25052_v52  ;;  %v25054_v52 = vld [vmem:[#allocation31_spill] sm:$0xff]  ;;  %v25055_v56 = vld [vmem:[#allocation98_spill] sm:$0xff] }
 0x7a3   :  { %18548 = vmatprep.subr.bf16.mxu0 %v24664_v37  ;;  %18740 = vmatprep.subr.bf16.mxu1 %v24710_v27 }
 0x7a5   :  { %8576 = vmatmul.mubr.f32.vlgmr.msra.gmra.mrb[10].mxu0 %v22686_v11  ;;  %9431 = vmatmul.mubr.f32.vlgmr.msra.gmra.mrb[14].mxu1 %v22686_v11  ;;  %v25053_v11 = vld [vmem:[#allocation94_spill] sm:$0xff] }
 0x7a6   :  { %18550 = vmatpush1.bf16.msra.mxu0 %v24671_v47  ;;  %18742 = vmatpush1.bf16.msra.mxu1 %v24711_v35 }
 0x7a7   :  { %18552 = vmatprep.subr.bf16.mxu0 %v24672_v24  ;;  %18744 = vmatprep.subr.bf16.mxu1 %v24712_v8 }
 0x7a8   :  { %8678 = vmatprep.mubr.f32.mxu0 %v24455_v17  ;;  %9533 = vmatprep.mubr.f32.mxu1 %v24455_v17 }
 0x7aa   :  { %18554 = vmatpush1.bf16.msra.mxu0 %v24677_v10  ;;  %18746 = vmatpush1.bf16.msra.mxu1 %v24713_v60 }
 0x7ab   :  { %18556 = vmatprep.subr.bf16.mxu0 %v24776_v33  ;;  %18748 = vmatprep.subr.bf16.mxu1 %v24714_v7 }
 0x7ae   :  { %18558 = vmatpush1.bf16.msra.mxu0 %v24777_v19  ;;  %18750 = vmatpush1.bf16.msra.mxu1 %v24715_v0 }
 0x7af   :  { %18560 = vmatprep.subr.bf16.mxu0 %v24778_v41  ;;  %18752 = vmatprep.subr.bf16.mxu1 %v24716_v16 }
 0x7b2   :  { %18562 = vmatpush1.bf16.msra.mxu0 %v24779_v49  ;;  %18754 = vmatpush1.bf16.msra.mxu1 %v24718_v18 }
 0x7b3   :  { %18564 = vmatprep.subr.bf16.mxu0 %v24780_v61  ;;  %18756 = vmatprep.subr.bf16.mxu1 %v24719_v53 }
 0x7b6   :  { %18566 = vmatpush1.bf16.msra.mxu0 %v24781_v34  ;;  %18758 = vmatpush1.bf16.msra.mxu1 %v24720_v14 }
 0x7b7   :  { %18568 = vmatprep.subr.bf16.mxu0 %v24782_v22  ;;  %18760 = vmatprep.subr.bf16.mxu1 %v24721_v21 }
 0x7ba   :  { %18570 = vmatpush1.bf16.msra.mxu0 %v24783_v4  ;;  %18762 = vmatpush1.bf16.msra.mxu1 %v21494_v50 }
 0x7bb   :  { %18572 = vmatprep.subr.bf16.mxu0 %v24784_v9  ;;  %18764 = vmatprep.subr.bf16.mxu1 %v25053_v11 }
 0x7be   :  { %18574 = vmatpush1.bf16.msra.mxu0 %v25054_v52  ;;  %18766 = vmatpush1.bf16.msra.mxu1 %v25055_v56 }
 0x7bf   :  { %18576 = vmatprep.subr.bf16.mxu0 %v25056_v44  ;;  %18768 = vmatprep.subr.bf16.mxu1 %v25057_v26 }
 0x7c2   :  { %18578 = vmatpush1.bf16.msra.mxu0 %v25058_v58  ;;  %18770 = vmatpush1.bf16.msra.mxu1 %v25059_v40 }
 0x7c3   :  { %18580 = vmatprep.subr.bf16.mxu0 %v25060_v46  ;;  %18772 = vmatprep.subr.bf16.mxu1 %v25061_v6  ;;  %v25067_v46 = vld [vmem:[#allocation84_spill] sm:$0xff]  ;;  %v25068_v6 = vld [vmem:[#allocation51_spill] sm:$0xff] }
 0x7c5   :  { %8682 = vmatmul.mubr.f32.vlgmr.msra.gmra.mrb[10].mxu0 %v22689_v54  ;;  %9537 = vmatmul.mubr.f32.vlgmr.msra.gmra.mrb[14].mxu1 %v22689_v54  ;;  %v25070_v54 = vld [vmem:[#allocation53_spill] sm:$0xff] }
 0x7c6   :  { %18582 = vmatpush1.bf16.msra.mxu0 %v25062_v30  ;;  %18774 = vmatpush1.bf16.msra.mxu1 %v25063_v23  ;;  %v25071_v30 = vld [vmem:[#allocation88_spill] sm:$0xff]  ;;  %v25072_v23 = vld [vmem:[#allocation55_spill] sm:$0xff] }
 0x7c7   :  { %18584 = vmatprep.subr.bf16.mxu0 %v25064_v3  ;;  %18776 = vmatprep.subr.bf16.mxu1 %v25065_v28  ;;  %v25073_v3 = vld [vmem:[#allocation90_spill] sm:$0xff]  ;;  %v25074_v28 = vld [vmem:[#allocation56_spill] sm:$0xff] }
 0x7c8   :  { %8848 = vmatprep.mubr.f32.mxu0 %v24455_v17  ;;  %9703 = vmatprep.mubr.f32.mxu1 %v24455_v17 }
 0x7ca   :  { %18586 = vmatpush1.bf16.msra.mxu0 %v25066_v1  ;;  %18778 = vmatpush1.bf16.msra.mxu1 %v25067_v46  ;;  %v25077_v1 = vld [vmem:[#allocation93_spill] sm:$0xff]  ;;  %v25078_v46 = vld [vmem:[#allocation59_spill] sm:$0xff] }
 0x7cb   :  { %18588 = vmatprep.subr.bf16.mxu0 %v25068_v6  ;;  %18780 = vmatprep.subr.bf16.mxu1 %v25069_v5  ;;  %v25079_v6 = vld [vmem:[#allocation95_spill] sm:$0xff]  ;;  %v25080_v5 = vld [vmem:[#allocation61_spill] sm:$0xff] }
 0x7ce   :  { %18590 = vmatpush1.bf16.msra.mxu0 %v25070_v54  ;;  %18782 = vmatpush1.bf16.msra.mxu1 %v25071_v30  ;;  %v25081_v54 = vld [vmem:[#allocation96_spill] sm:$0xff]  ;;  %v25082_v30 = vld [vmem:[#allocation62_spill] sm:$0xff] }
 0x7cf   :  { %18592 = vmatprep.subr.bf16.mxu0 %v25072_v23  ;;  %18784 = vmatprep.subr.bf16.mxu1 %v25073_v3  ;;  %v25083_v23 = vld [vmem:[#allocation97_spill] sm:$0xff]  ;;  %v25084_v3 = vld [vmem:[#allocation63_spill] sm:$0xff] }
 0x7d2   :  { %18594 = vmatpush1.bf16.msra.mxu0 %v25074_v28  ;;  %18786 = vmatpush1.bf16.msra.mxu1 %v25075_v51  ;;  %v25085_v28 = vld [vmem:[#allocation100_spill] sm:$0xff]  ;;  %v25086_v51 = vld [vmem:[#allocation65_spill] sm:$0xff] }
 0x7d3   :  { %18596 = vmatprep.subr.bf16.mxu0 %v25076_v29  ;;  %18788 = vmatprep.subr.bf16.mxu1 %v25077_v1  ;;  %v25087_v29 = vld [vmem:[#allocation101_spill] sm:$0xff]  ;;  %v25088_v1 = vld [vmem:[#allocation67_spill] sm:$0xff] }
 0x7d6   :  { %18598 = vmatpush1.bf16.msra.mxu0 %v25078_v46  ;;  %18790 = vmatpush1.bf16.msra.mxu1 %v25079_v6  ;;  %v25089_v46 = vld [vmem:[#allocation103_spill] sm:$0xff]  ;;  %v25090_v6 = vld [vmem:[#allocation68_spill] sm:$0xff] }
 0x7d7   :  { %18600 = vmatprep.subr.bf16.mxu0 %v25080_v5  ;;  %18792 = vmatprep.subr.bf16.mxu1 %v25081_v54  ;;  %v25091_v5 = vld [vmem:[#allocation105_spill] sm:$0xff] }
 0x7da   :  { %18602 = vmatpush1.bf16.msra.mxu0 %v25082_v30  ;;  %18794 = vmatpush1.bf16.msra.mxu1 %v25083_v23 }
 0x7db   :  { %18604 = vmatprep.subr.bf16.mxu0 %v25084_v3  ;;  %18796 = vmatprep.subr.bf16.mxu1 %v25085_v28 }
 0x7de   :  { %18606 = vmatpush1.bf16.msra.mxu0 %v25086_v51  ;;  %18798 = vmatpush1.bf16.msra.mxu1 %v25087_v29 }
 0x7df   :  { %18608 = vmatprep.subr.bf16.mxu0 %v25088_v1  ;;  %18800 = vmatprep.subr.bf16.mxu1 %v25089_v46 }
 0x7e2   :  { %18610 = vmatpush1.bf16.msra.mxu0 %v25090_v6  ;;  %18802 = vmatpush1.bf16.msra.mxu1 %v25091_v5  ;;  %v25093_v5 = vld [vmem:[#allocation104_spill] sm:$0xff] }
 0x7e3   :  { %18612 = vmatprep.subr.bf16.mxu0 %v24664_v37  ;;  %18804 = vmatprep.subr.bf16.mxu1 %v24710_v27 }
 0x7e5   :  { %8850 = vmatmul.mubr.f32.vlgmr.msra.gmra.mrb[10].mxu0 %v22683_v48  ;;  %9705 = vmatmul.mubr.f32.vlgmr.msra.gmra.mrb[14].mxu1 %v22683_v48 }
 0x7e6   :  { %18614 = vmatpush1.bf16.msra.mxu0 %v24671_v47  ;;  %18806 = vmatpush1.bf16.msra.mxu1 %v24711_v35 }
 0x7e7   :  { %18616 = vmatprep.subr.bf16.mxu0 %v24672_v24  ;;  %18808 = vmatprep.subr.bf16.mxu1 %v24712_v8 }
 0x7e8   :  { %8952 = vmatprep.mubr.f32.mxu0 %v24455_v17  ;;  %9807 = vmatprep.mubr.f32.mxu1 %v24455_v17 }
 0x7ea   :  { %18618 = vmatpush1.bf16.msra.mxu0 %v24677_v10  ;;  %18810 = vmatpush1.bf16.msra.mxu1 %v24713_v60 }
 0x7eb   :  { %18620 = vmatprep.subr.bf16.mxu0 %v24776_v33  ;;  %18812 = vmatprep.subr.bf16.mxu1 %v24714_v7 }
 0x7ee   :  { %18622 = vmatpush1.bf16.msra.mxu0 %v24777_v19  ;;  %18814 = vmatpush1.bf16.msra.mxu1 %v24715_v0 }
 0x7ef   :  { %18624 = vmatprep.subr.bf16.mxu0 %v24778_v41  ;;  %18816 = vmatprep.subr.bf16.mxu1 %v24716_v16 }
 0x7f2   :  { %18626 = vmatpush1.bf16.msra.mxu0 %v24779_v49  ;;  %18818 = vmatpush1.bf16.msra.mxu1 %v24718_v18 }
 0x7f3   :  { %18628 = vmatprep.subr.bf16.mxu0 %v24780_v61  ;;  %18820 = vmatprep.subr.bf16.mxu1 %v24719_v53 }
 0x7f6   :  { %18630 = vmatpush1.bf16.msra.mxu0 %v24781_v34  ;;  %18822 = vmatpush1.bf16.msra.mxu1 %v24720_v14 }
 0x7f7   :  { %18632 = vmatprep.subr.bf16.mxu0 %v24782_v22  ;;  %18824 = vmatprep.subr.bf16.mxu1 %v24721_v21 }
 0x7fa   :  { %18634 = vmatpush1.bf16.msra.mxu0 %v24783_v4  ;;  %18826 = vmatpush1.bf16.msra.mxu1 %v21494_v50 }
 0x7fb   :  { %18636 = vmatprep.subr.bf16.mxu0 %v24784_v9  ;;  %18828 = vmatprep.subr.bf16.mxu1 %v25053_v11 }
 0x7fe   :  { %18638 = vmatpush1.bf16.msra.mxu0 %v25054_v52  ;;  %18830 = vmatpush1.bf16.msra.mxu1 %v25055_v56 }
 0x7ff   :  { %18640 = vmatprep.subr.bf16.mxu0 %v25056_v44  ;;  %18832 = vmatprep.subr.bf16.mxu1 %v25057_v26 }
 0x802   :  { %18642 = vmatpush1.bf16.msra.mxu0 %v25058_v58  ;;  %18834 = vmatpush1.bf16.msra.mxu1 %v25059_v40 }
 0x803   :  { %18836 = vmatprep.subr.bf16.mxu0 %v24664_v37  ;;  %19028 = vmatprep.subr.bf16.mxu1 %v24710_v27 }
 0x805   :  { %8954 = vmatmul.mubr.f32.vlgmr.msra.gmra.mrb[10].mxu0 %v22683_v48  ;;  %9809 = vmatmul.mubr.f32.vlgmr.msra.gmra.mrb[14].mxu1 %v22683_v48  ;;  %v25092_v48 = vld [vmem:[#allocation11_spill] sm:$0xff] }
 0x806   :  { %18838 = vmatpush1.bf16.msra.mxu0 %v24671_v47  ;;  %19030 = vmatpush1.bf16.msra.mxu1 %v24711_v35 }
 0x807   :  { %18840 = vmatprep.subr.bf16.mxu0 %v24672_v24  ;;  %19032 = vmatprep.subr.bf16.mxu1 %v24712_v8 }
 0x808   :  { %9957 = vmatprep.mubr.f32.mxu0 %v24455_v17  ;;  %10812 = vmatprep.mubr.f32.mxu1 %v24455_v17 }
 0x80a   :  { %18842 = vmatpush1.bf16.msra.mxu0 %v24677_v10  ;;  %19034 = vmatpush1.bf16.msra.mxu1 %v24713_v60 }
 0x80b   :  { %18844 = vmatprep.subr.bf16.mxu0 %v24776_v33  ;;  %19036 = vmatprep.subr.bf16.mxu1 %v24714_v7 }
 0x80e   :  { %18846 = vmatpush1.bf16.msra.mxu0 %v24777_v19  ;;  %19038 = vmatpush1.bf16.msra.mxu1 %v24715_v0 }
 0x80f   :  { %18848 = vmatprep.subr.bf16.mxu0 %v24778_v41  ;;  %19040 = vmatprep.subr.bf16.mxu1 %v24716_v16 }
 0x812   :  { %18850 = vmatpush1.bf16.msra.mxu0 %v24779_v49  ;;  %19042 = vmatpush1.bf16.msra.mxu1 %v24718_v18 }
 0x813   :  { %18852 = vmatprep.subr.bf16.mxu0 %v24780_v61  ;;  %19044 = vmatprep.subr.bf16.mxu1 %v24719_v53 }
 0x816   :  { %18854 = vmatpush1.bf16.msra.mxu0 %v24781_v34  ;;  %19046 = vmatpush1.bf16.msra.mxu1 %v24720_v14 }
 0x817   :  { %18856 = vmatprep.subr.bf16.mxu0 %v24782_v22  ;;  %19048 = vmatprep.subr.bf16.mxu1 %v24721_v21 }
 0x81a   :  { %18858 = vmatpush1.bf16.msra.mxu0 %v24783_v4  ;;  %19050 = vmatpush1.bf16.msra.mxu1 %v21494_v50 }
 0x81b   :  { %18860 = vmatprep.subr.bf16.mxu0 %v24784_v9  ;;  %19052 = vmatprep.subr.bf16.mxu1 %v25053_v11 }
 0x81e   :  { %18862 = vmatpush1.bf16.msra.mxu0 %v25054_v52  ;;  %19054 = vmatpush1.bf16.msra.mxu1 %v25055_v56 }
 0x81f   :  { %18864 = vmatprep.subr.bf16.mxu0 %v25056_v44  ;;  %19056 = vmatprep.subr.bf16.mxu1 %v25057_v26 }
 0x822   :  { %18866 = vmatpush1.bf16.msra.mxu0 %v25058_v58  ;;  %19058 = vmatpush1.bf16.msra.mxu1 %v25059_v40 }
 0x823   :  { %18868 = vmatprep.subr.bf16.mxu0 %v25092_v48  ;;  %19060 = vmatprep.subr.bf16.mxu1 %v25093_v5 }
 0x8d8   :  { %v8955_v6 = vpop.f32.mrb[10].mxu0  ;;  %v9810_v46 = vpop.f32.mrb[14].mxu1 }
 0x8d9   :  { %v9819_v1 = vrot.slane %v8955_v6, 4  ;;  %v8957_v29 = vpop.f32.mrb[11].mxu0  ;;  %v9812_v51 = vpop.f32.mrb[15].mxu1  ;;  %v9821_v48 = vrot.slane %v9810_v46, 4 }
 0x8da   :  { %v9820_v28 = vrot.slane %v8957_v29, 4  ;;  %v9822_v30 = vrot.slane %v9812_v51, 4 }
 0x8db   :  { %v9827_v3 = vadd.f32 %v21901_v25, %v9819_v1  ;;  %v9829_v6 = vadd.f32 %v21964_v39, %v9821_v48 }
 0x8dc   :  { %v9828_v23 = vadd.f32 %v21904_v57, %v9820_v28  ;;  %v9830_v40 = vadd.f32 %v21966_v42, %v9822_v30 }
 0x8dd   :  { %v9831_v54 = vsub.f32 0.0, %v9827_v3 }
 0x8de   :  { %v9837_v26 = vsub.f32 0.0, %v9828_v23  ;;  %v9844_v5 = vsub.f32 0.0, %v9830_v40  ;;  %v9851_v23 = vrot.slane %v22677_v59, 7 }
 0x8df   :  { %v9832_v58 = vmul.f32 1.442695, %v9831_v54 }
 0x8e0   :  { %v9838_v44 = vmul.f32 1.442695, %v9837_v26  ;;  %v9845_v56 = vmul.f32 1.442695, %v9844_v5 }
 0x8e1   :  { %20480 = vpow2.f32 %v9832_v58 }
 0x8e2   :  { %20482 = vpow2.f32 %v9838_v44 }
 0x8e3   :  { %20484 = vpow2.f32 %v9845_v56 }
 0x8e4   :  { %20486 = vtanh.f32 %v9829_v6 }
 0x8eb   :  { %v20481_v52 = vpop.eup %20480 }
 0x8ec   :  { %v20483_v29 = vpop.eup %20482  ;;  %v9834_v11 = vadd.f32 1.0, %v20481_v52 }
 0x8ed   :  { %v9840_v1 = vadd.f32 1.0, %v20483_v29  ;;  %v20485_v51 = vpop.eup %20484 }
 0x8ee   :  { %20488 = vrcp.f32 %v9834_v11  ;;  %v20487_v28 = vpop.eup %20486  ;;  %v9847_v40 = vadd.f32 1.0, %v20485_v51  ;;  %v25096_v51 = vld [vmem:[#allocation112_spill] sm:$0xff] }
 0x8ef   :  { %20490 = vrcp.f32 %v9840_v1  ;;  %v25095_v1 = vld [vmem:[#allocation28_spill] sm:$0xff] }
 0x8f0   :  { %20492 = vrcp.f32 %v9847_v40  ;;  %v25102_v40 = vld [vmem:[#allocation10_spill] sm:$0xff] }
 0x8f8   :  { %v20489_v26 = vpop.eup %20488 }
 0x8f9   :  { %v20491_v58 = vpop.eup %20490  ;;  %v9854_v44 = vmul.f32 %v20489_v26, %v20487_v28  ;;  %v25097_v28 = vld [vmem:[#allocation33_spill] sm:$0xff] }
 0x8fa   :  { %v9853_v30 = vmul.f32 %v20491_v58, %v9851_v23  ;;  %v20493_v46 = vpop.eup %20492  ;;  %v25098_v26 = vld [vmem:[#allocation9_spill] sm:$0xff]  ;;  %v25099_v23 = vld [vmem:[#allocation35_spill] sm:$0xff] }
 0x8fb   :  { %v25100_v58 = vld [vmem:[#allocation113_spill] sm:$0xff] }
 0x8fc   :  { %v22912_v5 = vadd.f32 %v9854_v44, %v9853_v30  ;;  %v25101_v44 = vld [vmem:[#allocation38_spill] sm:$0xff]  ;;  %v25103_v30 = vld [vmem:[#allocation40_spill] sm:$0xff] }
 0x8fe   :  { %20494 = vtanh.f32 %v22912_v5 }
 0x908   :  { %v20495_v56 = vpop.eup %20494 }
 0x909   :  { %v9857_v3 = vmul.f32 %v20495_v56, %v20493_v46  ;;  %v25104_v46 = vld [vmem:[#allocation12_spill] sm:$0xff]  ;;  %v25105_v56 = vld [vmem:[#allocation41_spill] sm:$0xff] }
 0x90b   :  { %v9859_v52 = vrot.slane %v9857_v3, 4  ;;  %v22916_v11 = vsel %vm15132_vm4, %v22681_v43, %v9857_v3  ;;  %v25094_v43 = vld [vmem:[#allocation111_spill] sm:$0xff]  ;;  %v25106_v3 = vld [vmem:[#allocation13_spill] sm:$0xff] }
 0x90d   :  { %v22918_v54 = vand.u32 4294901760, %v9859_v52 }
 0x90f   :  { %v22921_v59 = vsub.f32 %v9859_v52, %v22918_v54  ;;  %v25107_v52 = vld [vmem:[#allocation42_spill] sm:$0xff] }
 0x911   :  { %v22924_v48 = vand.u32 4294901760, %v22921_v59 }
 0x913   :  { %v9961_v6 = vsub.f32 %v22921_v59, %v22924_v48 }
 0x915   :  { %v9962_v29 = vand.u32 4294901760, %v9961_v6  ;;  %v25108_v6 = vld [vmem:[#allocation114_spill] sm:$0xff] }
 0x917   :  { %9963 = vmatmul.mubr.f32.vlgmr.msra.gmra.mrb[12].mxu0 %v9962_v29  ;;  %10818 = vmatmul.mubr.f32.vlgmr.msra.gmra.mrb[16].mxu1 %v9962_v29  ;;  %v25109_v29 = vld [vmem:[#allocation44_spill] sm:$0xff] }
 0x918   :  { %18870 = vmatpush1.bf16.msra.mxu0 %v24737_v62  ;;  %19062 = vmatpush1.bf16.msra.mxu1 %v21636_v2 }
 0x919   :  { %18872 = vmatprep.subr.bf16.mxu0 %v24738_v15  ;;  %19064 = vmatprep.subr.bf16.mxu1 %v24739_v12 }
 0x91a   :  { %10193 = vmatprep.mubr.f32.mxu0 %v24455_v17  ;;  %11048 = vmatprep.mubr.f32.mxu1 %v24455_v17 }
 0x91c   :  { %18874 = vmatpush1.bf16.msra.mxu0 %v24824_v38  ;;  %19066 = vmatpush1.bf16.msra.mxu1 %v24825_v32 }
 0x91d   :  { %18876 = vmatprep.subr.bf16.mxu0 %v24826_v63  ;;  %19068 = vmatprep.subr.bf16.mxu1 %v24827_v45 }
 0x920   :  { %18878 = vmatpush1.bf16.msra.mxu0 %v24744_v13  ;;  %19070 = vmatpush1.bf16.msra.mxu1 %v24828_v36 }
 0x921   :  { %18880 = vmatprep.subr.bf16.mxu0 %v24746_v55  ;;  %19072 = vmatprep.subr.bf16.mxu1 %v24829_v31 }
 0x924   :  { %18882 = vmatpush1.bf16.msra.mxu0 %v24748_v20  ;;  %19074 = vmatpush1.bf16.msra.mxu1 %v25094_v43  ;;  %v25166_v43 = vld [vmem:[#allocation57_spill] sm:$0xff] }
 0x925   :  { %18884 = vmatprep.subr.bf16.mxu0 %v25095_v1  ;;  %19076 = vmatprep.subr.bf16.mxu1 %v25096_v51  ;;  %v25159_v51 = vld [vmem:[#allocation86_spill] sm:$0xff]  ;;  %v25165_v1 = vld [vmem:[#allocation92_spill] sm:$0xff] }
 0x928   :  { %18886 = vmatpush1.bf16.msra.mxu0 %v25097_v28  ;;  %19078 = vmatpush1.bf16.msra.mxu1 %v25098_v26  ;;  %v25155_v26 = vld [vmem:[#allocation83_spill] sm:$0xff]  ;;  %v25156_v28 = vld [vmem:[#allocation50_spill] sm:$0xff] }
 0x929   :  { %18888 = vmatprep.subr.bf16.mxu0 %v25099_v23  ;;  %19080 = vmatprep.subr.bf16.mxu1 %v25100_v58  ;;  %v25110_v23 = vld [vmem:[#allocation115_spill] sm:$0xff] }
 0x92a   :  { %v25111_v58 = vld [vmem:[#allocation43_spill] sm:$0xff] }
 0x92c   :  { %18890 = vmatpush1.bf16.msra.mxu0 %v25101_v44  ;;  %19082 = vmatpush1.bf16.msra.mxu1 %v25102_v40  ;;  %v25112_v44 = vld [vmem:[#allocation116_spill] sm:$0xff]  ;;  %v25127_v40 = vld [vmem:[#allocation66_spill] sm:$0xff] }
 0x92d   :  { %18892 = vmatprep.subr.bf16.mxu0 %v25103_v30  ;;  %19084 = vmatprep.subr.bf16.mxu1 %v25104_v46  ;;  %v25113_v46 = vld [vmem:[#allocation46_spill] sm:$0xff] }
 0x92e   :  { %v25126_v30 = vld [vmem:[#allocation122_spill] sm:$0xff] }
 0x930   :  { %18894 = vmatpush1.bf16.msra.mxu0 %v25105_v56  ;;  %19086 = vmatpush1.bf16.msra.mxu1 %v25106_v3  ;;  %v25114_v56 = vld [vmem:[#allocation37_spill] sm:$0xff]  ;;  %v25115_v3 = vld [vmem:[#allocation48_spill] sm:$0xff] }
 0x931   :  { %18896 = vmatprep.subr.bf16.mxu0 %v25107_v52  ;;  %19088 = vmatprep.subr.bf16.mxu1 %v25108_v6  ;;  %v25116_v52 = vld [vmem:[#allocation117_spill] sm:$0xff]  ;;  %v25121_v6 = vld [vmem:[#allocation58_spill] sm:$0xff] }
 0x934   :  { %18898 = vmatpush1.bf16.msra.mxu0 %v25109_v29  ;;  %19090 = vmatpush1.bf16.msra.mxu1 %v25110_v23  ;;  %v25117_v23 = vld [vmem:[#allocation52_spill] sm:$0xff]  ;;  %v25120_v29 = vld [vmem:[#allocation119_spill] sm:$0xff] }
 0x935   :  { %18900 = vmatprep.subr.bf16.mxu0 %v25111_v58  ;;  %19092 = vmatprep.subr.bf16.mxu1 %v25112_v44  ;;  %v25118_v58 = vld [vmem:[#allocation118_spill] sm:$0xff] }
 0x936   :  { %v25119_v44 = vld [vmem:[#allocation54_spill] sm:$0xff] }
 0x937   :  { %10195 = vmatmul.mubr.f32.vlgmr.msra.gmra.mrb[12].mxu0 %v22918_v54  ;;  %11050 = vmatmul.mubr.f32.vlgmr.msra.gmra.mrb[16].mxu1 %v22918_v54 }
 0x938   :  { %18902 = vmatpush1.bf16.msra.mxu0 %v25113_v46  ;;  %19094 = vmatpush1.bf16.msra.mxu1 %v25114_v56  ;;  %v25122_v46 = vld [vmem:[#allocation120_spill] sm:$0xff] }
 0x939   :  { %18904 = vmatprep.subr.bf16.mxu0 %v25115_v3  ;;  %19096 = vmatprep.subr.bf16.mxu1 %v25116_v52  ;;  %v25123_v56 = vld [vmem:[#allocation60_spill] sm:$0xff]  ;;  %v25124_v3 = vld [vmem:[#allocation121_spill] sm:$0xff] }
 0x93a   :  { %10329 = vmatprep.mubr.f32.mxu0 %v24455_v17  ;;  %11184 = vmatprep.mubr.f32.mxu1 %v24455_v17  ;;  %v25125_v52 = vld [vmem:[#allocation64_spill] sm:$0xff] }
 0x93c   :  { %18906 = vmatpush1.bf16.msra.mxu0 %v25117_v23  ;;  %19098 = vmatpush1.bf16.msra.mxu1 %v25118_v58  ;;  %v25128_v23 = vld [vmem:[#allocation123_spill] sm:$0xff]  ;;  %v25129_v58 = vld [vmem:[#allocation69_spill] sm:$0xff] }
 0x93d   :  { %18908 = vmatprep.subr.bf16.mxu0 %v25119_v44  ;;  %19100 = vmatprep.subr.bf16.mxu1 %v25120_v29  ;;  %v25130_v44 = vld [vmem:[#allocation124_spill] sm:$0xff]  ;;  %v25131_v29 = vld [vmem:[#allocation70_spill] sm:$0xff] }
 0x940   :  { %18910 = vmatpush1.bf16.msra.mxu0 %v25121_v6  ;;  %19102 = vmatpush1.bf16.msra.mxu1 %v25122_v46  ;;  %v25132_v6 = vld [vmem:[#allocation125_spill] sm:$0xff]  ;;  %v25133_v46 = vld [vmem:[#allocation71_spill] sm:$0xff] }
 0x941   :  { %18912 = vmatprep.subr.bf16.mxu0 %v25123_v56  ;;  %19104 = vmatprep.subr.bf16.mxu1 %v25124_v3  ;;  %v25134_v56 = vld [vmem:[#allocation126_spill] sm:$0xff]  ;;  %v25135_v3 = vld [vmem:[#allocation72_spill] sm:$0xff] }
 0x944   :  { %18914 = vmatpush1.bf16.msra.mxu0 %v25125_v52  ;;  %19106 = vmatpush1.bf16.msra.mxu1 %v25126_v30  ;;  %v25136_v52 = vld [vmem:[#allocation127_spill] sm:$0xff]  ;;  %v25137_v30 = vld [vmem:[#allocation73_spill] sm:$0xff] }
 0x945   :  { %18916 = vmatprep.subr.bf16.mxu0 %v25127_v40  ;;  %19108 = vmatprep.subr.bf16.mxu1 %v25128_v23  ;;  %v25138_v40 = vld [vmem:[#allocation128_spill] sm:$0xff]  ;;  %v25139_v23 = vld [vmem:[#allocation74_spill] sm:$0xff] }
 0x948   :  { %18918 = vmatpush1.bf16.msra.mxu0 %v25129_v58  ;;  %19110 = vmatpush1.bf16.msra.mxu1 %v25130_v44  ;;  %v25140_v58 = vld [vmem:[#allocation129_spill] sm:$0xff]  ;;  %v25141_v44 = vld [vmem:[#allocation75_spill] sm:$0xff] }
 0x949   :  { %18920 = vmatprep.subr.bf16.mxu0 %v25131_v29  ;;  %19112 = vmatprep.subr.bf16.mxu1 %v25132_v6  ;;  %v25142_v29 = vld [vmem:[#allocation130_spill] sm:$0xff]  ;;  %v25154_v6 = vld [vmem:[#allocation49_spill] sm:$0xff] }
 0x94c   :  { %18922 = vmatpush1.bf16.msra.mxu0 %v25133_v46  ;;  %19114 = vmatpush1.bf16.msra.mxu1 %v25134_v56  ;;  %v25152_v56 = vld [vmem:[#allocation47_spill] sm:$0xff]  ;;  %v25153_v46 = vld [vmem:[#allocation82_spill] sm:$0xff] }
 0x94d   :  { %18924 = vmatprep.subr.bf16.mxu0 %v25135_v3  ;;  %19116 = vmatprep.subr.bf16.mxu1 %v25136_v52  ;;  %v25150_v52 = vld [vmem:[#allocation45_spill] sm:$0xff] }
 0x94e   :  { %v25151_v3 = vld [vmem:[#allocation81_spill] sm:$0xff] }
 0x950   :  { %18926 = vmatpush1.bf16.msra.mxu0 %v25137_v30  ;;  %19118 = vmatpush1.bf16.msra.mxu1 %v25138_v40  ;;  %v25148_v40 = vld [vmem:[#allocation34_spill] sm:$0xff] }
 0x951   :  { %18928 = vmatprep.subr.bf16.mxu0 %v25139_v23  ;;  %19120 = vmatprep.subr.bf16.mxu1 %v25140_v58  ;;  %v25146_v58 = vld [vmem:[#allocation32_spill] sm:$0xff]  ;;  %v25147_v23 = vld [vmem:[#allocation99_spill] sm:$0xff]  ;;  %v25149_v30 = vld [vmem:[#allocation102_spill] sm:$0xff] }
 0x954   :  { %18930 = vmatpush1.bf16.msra.mxu0 %v25141_v44  ;;  %19122 = vmatpush1.bf16.msra.mxu1 %v25142_v29  ;;  %v25144_v29 = vld [vmem:[#allocation31_spill] sm:$0xff]  ;;  %v25145_v44 = vld [vmem:[#allocation98_spill] sm:$0xff] }
 0x955   :  { %18932 = vmatprep.subr.bf16.mxu0 %v24664_v37  ;;  %19124 = vmatprep.subr.bf16.mxu1 %v24710_v27 }
 0x957   :  { %10332 = vmatmul.mubr.f32.vlgmr.msra.gmra.mrb[12].mxu0 %v22921_v59  ;;  %11187 = vmatmul.mubr.f32.vlgmr.msra.gmra.mrb[16].mxu1 %v22921_v59  ;;  %v25143_v59 = vld [vmem:[#allocation94_spill] sm:$0xff] }
 0x958   :  { %18934 = vmatpush1.bf16.msra.mxu0 %v24671_v47  ;;  %19126 = vmatpush1.bf16.msra.mxu1 %v24711_v35 }
 0x959   :  { %18936 = vmatprep.subr.bf16.mxu0 %v24672_v24  ;;  %19128 = vmatprep.subr.bf16.mxu1 %v24712_v8 }
 0x95a   :  { %10434 = vmatprep.mubr.f32.mxu0 %v24455_v17  ;;  %11289 = vmatprep.mubr.f32.mxu1 %v24455_v17 }
 0x95c   :  { %18938 = vmatpush1.bf16.msra.mxu0 %v24677_v10  ;;  %19130 = vmatpush1.bf16.msra.mxu1 %v24713_v60 }
 0x95d   :  { %18940 = vmatprep.subr.bf16.mxu0 %v24776_v33  ;;  %19132 = vmatprep.subr.bf16.mxu1 %v24714_v7 }
 0x960   :  { %18942 = vmatpush1.bf16.msra.mxu0 %v24777_v19  ;;  %19134 = vmatpush1.bf16.msra.mxu1 %v24715_v0 }
 0x961   :  { %18944 = vmatprep.subr.bf16.mxu0 %v24778_v41  ;;  %19136 = vmatprep.subr.bf16.mxu1 %v24716_v16 }
 0x964   :  { %18946 = vmatpush1.bf16.msra.mxu0 %v24779_v49  ;;  %19138 = vmatpush1.bf16.msra.mxu1 %v24718_v18 }
 0x965   :  { %18948 = vmatprep.subr.bf16.mxu0 %v24780_v61  ;;  %19140 = vmatprep.subr.bf16.mxu1 %v24719_v53 }
 0x968   :  { %18950 = vmatpush1.bf16.msra.mxu0 %v24781_v34  ;;  %19142 = vmatpush1.bf16.msra.mxu1 %v24720_v14 }
 0x969   :  { %18952 = vmatprep.subr.bf16.mxu0 %v24782_v22  ;;  %19144 = vmatprep.subr.bf16.mxu1 %v24721_v21 }
 0x96c   :  { %18954 = vmatpush1.bf16.msra.mxu0 %v24783_v4  ;;  %19146 = vmatpush1.bf16.msra.mxu1 %v21494_v50 }
 0x96d   :  { %18956 = vmatprep.subr.bf16.mxu0 %v24784_v9  ;;  %19148 = vmatprep.subr.bf16.mxu1 %v25143_v59 }
 0x970   :  { %18958 = vmatpush1.bf16.msra.mxu0 %v25144_v29  ;;  %19150 = vmatpush1.bf16.msra.mxu1 %v25145_v44 }
 0x971   :  { %18960 = vmatprep.subr.bf16.mxu0 %v25146_v58  ;;  %19152 = vmatprep.subr.bf16.mxu1 %v25147_v23 }
 0x974   :  { %18962 = vmatpush1.bf16.msra.mxu0 %v25148_v40  ;;  %19154 = vmatpush1.bf16.msra.mxu1 %v25149_v30 }
 0x975   :  { %18964 = vmatprep.subr.bf16.mxu0 %v25150_v52  ;;  %19156 = vmatprep.subr.bf16.mxu1 %v25151_v3  ;;  %v25157_v52 = vld [vmem:[#allocation84_spill] sm:$0xff]  ;;  %v25158_v3 = vld [vmem:[#allocation51_spill] sm:$0xff] }
 0x977   :  { %10438 = vmatmul.mubr.f32.vlgmr.msra.gmra.mrb[12].mxu0 %v22924_v48  ;;  %11293 = vmatmul.mubr.f32.vlgmr.msra.gmra.mrb[16].mxu1 %v22924_v48  ;;  %v25160_v48 = vld [vmem:[#allocation53_spill] sm:$0xff] }
 0x978   :  { %18966 = vmatpush1.bf16.msra.mxu0 %v25152_v56  ;;  %19158 = vmatpush1.bf16.msra.mxu1 %v25153_v46  ;;  %v25161_v56 = vld [vmem:[#allocation88_spill] sm:$0xff]  ;;  %v25162_v46 = vld [vmem:[#allocation55_spill] sm:$0xff] }
 0x979   :  { %18968 = vmatprep.subr.bf16.mxu0 %v25154_v6  ;;  %19160 = vmatprep.subr.bf16.mxu1 %v25155_v26  ;;  %v25163_v6 = vld [vmem:[#allocation90_spill] sm:$0xff]  ;;  %v25164_v26 = vld [vmem:[#allocation56_spill] sm:$0xff] }
 0x97a   :  { %10604 = vmatprep.mubr.f32.mxu0 %v24455_v17  ;;  %11459 = vmatprep.mubr.f32.mxu1 %v24455_v17 }
 0x97c   :  { %18970 = vmatpush1.bf16.msra.mxu0 %v25156_v28  ;;  %19162 = vmatpush1.bf16.msra.mxu1 %v25157_v52  ;;  %v25167_v28 = vld [vmem:[#allocation93_spill] sm:$0xff]  ;;  %v25168_v52 = vld [vmem:[#allocation59_spill] sm:$0xff] }
 0x97d   :  { %18972 = vmatprep.subr.bf16.mxu0 %v25158_v3  ;;  %19164 = vmatprep.subr.bf16.mxu1 %v25159_v51  ;;  %v25169_v3 = vld [vmem:[#allocation95_spill] sm:$0xff]  ;;  %v25170_v51 = vld [vmem:[#allocation61_spill] sm:$0xff] }
 0x980   :  { %18974 = vmatpush1.bf16.msra.mxu0 %v25160_v48  ;;  %19166 = vmatpush1.bf16.msra.mxu1 %v25161_v56  ;;  %v25171_v48 = vld [vmem:[#allocation96_spill] sm:$0xff]  ;;  %v25172_v56 = vld [vmem:[#allocation62_spill] sm:$0xff] }
 0x981   :  { %18976 = vmatprep.subr.bf16.mxu0 %v25162_v46  ;;  %19168 = vmatprep.subr.bf16.mxu1 %v25163_v6  ;;  %v25173_v46 = vld [vmem:[#allocation97_spill] sm:$0xff]  ;;  %v25174_v6 = vld [vmem:[#allocation63_spill] sm:$0xff] }
 0x984   :  { %18978 = vmatpush1.bf16.msra.mxu0 %v25164_v26  ;;  %19170 = vmatpush1.bf16.msra.mxu1 %v25165_v1  ;;  %v25175_v26 = vld [vmem:[#allocation100_spill] sm:$0xff]  ;;  %v25176_v1 = vld [vmem:[#allocation65_spill] sm:$0xff] }
 0x985   :  { %18980 = vmatprep.subr.bf16.mxu0 %v25166_v43  ;;  %19172 = vmatprep.subr.bf16.mxu1 %v25167_v28  ;;  %v25177_v43 = vld [vmem:[#allocation101_spill] sm:$0xff]  ;;  %v25178_v28 = vld [vmem:[#allocation67_spill] sm:$0xff] }
 0x988   :  { %18982 = vmatpush1.bf16.msra.mxu0 %v25168_v52  ;;  %19174 = vmatpush1.bf16.msra.mxu1 %v25169_v3  ;;  %v25179_v52 = vld [vmem:[#allocation103_spill] sm:$0xff]  ;;  %v25180_v3 = vld [vmem:[#allocation68_spill] sm:$0xff] }
 0x989   :  { %18984 = vmatprep.subr.bf16.mxu0 %v25170_v51  ;;  %19176 = vmatprep.subr.bf16.mxu1 %v25171_v48  ;;  %v25181_v51 = vld [vmem:[#allocation105_spill] sm:$0xff] }
 0x98c   :  { %18986 = vmatpush1.bf16.msra.mxu0 %v25172_v56  ;;  %19178 = vmatpush1.bf16.msra.mxu1 %v25173_v46 }
 0x98d   :  { %18988 = vmatprep.subr.bf16.mxu0 %v25174_v6  ;;  %19180 = vmatprep.subr.bf16.mxu1 %v25175_v26 }
 0x990   :  { %18990 = vmatpush1.bf16.msra.mxu0 %v25176_v1  ;;  %19182 = vmatpush1.bf16.msra.mxu1 %v25177_v43 }
 0x991   :  { %18992 = vmatprep.subr.bf16.mxu0 %v25178_v28  ;;  %19184 = vmatprep.subr.bf16.mxu1 %v25179_v52 }
 0x994   :  { %18994 = vmatpush1.bf16.msra.mxu0 %v25180_v3  ;;  %19186 = vmatpush1.bf16.msra.mxu1 %v25181_v51  ;;  %v25183_v51 = vld [vmem:[#allocation104_spill] sm:$0xff] }
 0x995   :  { %18996 = vmatprep.subr.bf16.mxu0 %v24664_v37  ;;  %19188 = vmatprep.subr.bf16.mxu1 %v24710_v27 }
 0x997   :  { %10606 = vmatmul.mubr.f32.vlgmr.msra.gmra.mrb[12].mxu0 %v22918_v54  ;;  %11461 = vmatmul.mubr.f32.vlgmr.msra.gmra.mrb[16].mxu1 %v22918_v54 }
 0x998   :  { %18998 = vmatpush1.bf16.msra.mxu0 %v24671_v47  ;;  %19190 = vmatpush1.bf16.msra.mxu1 %v24711_v35 }
 0x999   :  { %19000 = vmatprep.subr.bf16.mxu0 %v24672_v24  ;;  %19192 = vmatprep.subr.bf16.mxu1 %v24712_v8 }
 0x99a   :  { %10708 = vmatprep.mubr.f32.mxu0 %v24455_v17  ;;  %11563 = vmatprep.mubr.f32.mxu1 %v24455_v17 }
 0x99c   :  { %19002 = vmatpush1.bf16.msra.mxu0 %v24677_v10  ;;  %19194 = vmatpush1.bf16.msra.mxu1 %v24713_v60 }
 0x99d   :  { %19004 = vmatprep.subr.bf16.mxu0 %v24776_v33  ;;  %19196 = vmatprep.subr.bf16.mxu1 %v24714_v7 }
 0x9a0   :  { %19006 = vmatpush1.bf16.msra.mxu0 %v24777_v19  ;;  %19198 = vmatpush1.bf16.msra.mxu1 %v24715_v0 }
 0x9a1   :  { %19008 = vmatprep.subr.bf16.mxu0 %v24778_v41  ;;  %19200 = vmatprep.subr.bf16.mxu1 %v24716_v16 }
 0x9a4   :  { %19010 = vmatpush1.bf16.msra.mxu0 %v24779_v49  ;;  %19202 = vmatpush1.bf16.msra.mxu1 %v24718_v18 }
 0x9a5   :  { %19012 = vmatprep.subr.bf16.mxu0 %v24780_v61  ;;  %19204 = vmatprep.subr.bf16.mxu1 %v24719_v53 }
 0x9a8   :  { %19014 = vmatpush1.bf16.msra.mxu0 %v24781_v34  ;;  %19206 = vmatpush1.bf16.msra.mxu1 %v24720_v14 }
 0x9a9   :  { %19016 = vmatprep.subr.bf16.mxu0 %v24782_v22  ;;  %19208 = vmatprep.subr.bf16.mxu1 %v24721_v21 }
 0x9ac   :  { %19018 = vmatpush1.bf16.msra.mxu0 %v24783_v4  ;;  %19210 = vmatpush1.bf16.msra.mxu1 %v21494_v50 }
 0x9ad   :  { %19020 = vmatprep.subr.bf16.mxu0 %v24784_v9  ;;  %19212 = vmatprep.subr.bf16.mxu1 %v25143_v59 }
 0x9b0   :  { %19022 = vmatpush1.bf16.msra.mxu0 %v25144_v29  ;;  %19214 = vmatpush1.bf16.msra.mxu1 %v25145_v44 }
 0x9b1   :  { %19024 = vmatprep.subr.bf16.mxu0 %v25146_v58  ;;  %19216 = vmatprep.subr.bf16.mxu1 %v25147_v23 }
 0x9b4   :  { %19026 = vmatpush1.bf16.msra.mxu0 %v25148_v40  ;;  %19218 = vmatpush1.bf16.msra.mxu1 %v25149_v30 }
 0x9b5   :  { %19220 = vmatprep.subr.bf16.mxu0 %v24664_v37  ;;  %19412 = vmatprep.subr.bf16.mxu1 %v24710_v27 }
 0x9b7   :  { %10710 = vmatmul.mubr.f32.vlgmr.msra.gmra.mrb[12].mxu0 %v22918_v54  ;;  %11565 = vmatmul.mubr.f32.vlgmr.msra.gmra.mrb[16].mxu1 %v22918_v54  ;;  %v25182_v54 = vld [vmem:[#allocation11_spill] sm:$0xff] }
 0x9b8   :  { %19222 = vmatpush1.bf16.msra.mxu0 %v24671_v47  ;;  %19414 = vmatpush1.bf16.msra.mxu1 %v24711_v35 }
 0x9b9   :  { %19224 = vmatprep.subr.bf16.mxu0 %v24672_v24  ;;  %19416 = vmatprep.subr.bf16.mxu1 %v24712_v8 }
 0x9ba   :  { %11713 = vmatprep.mubr.f32.mxu0 %v24455_v17  ;;  %12568 = vmatprep.mubr.f32.mxu1 %v24455_v17 }
 0x9bc   :  { %19226 = vmatpush1.bf16.msra.mxu0 %v24677_v10  ;;  %19418 = vmatpush1.bf16.msra.mxu1 %v24713_v60 }
 0x9bd   :  { %19228 = vmatprep.subr.bf16.mxu0 %v24776_v33  ;;  %19420 = vmatprep.subr.bf16.mxu1 %v24714_v7 }
 0x9c0   :  { %19230 = vmatpush1.bf16.msra.mxu0 %v24777_v19  ;;  %19422 = vmatpush1.bf16.msra.mxu1 %v24715_v0 }
 0x9c1   :  { %19232 = vmatprep.subr.bf16.mxu0 %v24778_v41  ;;  %19424 = vmatprep.subr.bf16.mxu1 %v24716_v16 }
 0x9c4   :  { %19234 = vmatpush1.bf16.msra.mxu0 %v24779_v49  ;;  %19426 = vmatpush1.bf16.msra.mxu1 %v24718_v18 }
 0x9c5   :  { %19236 = vmatprep.subr.bf16.mxu0 %v24780_v61  ;;  %19428 = vmatprep.subr.bf16.mxu1 %v24719_v53 }
 0x9c8   :  { %19238 = vmatpush1.bf16.msra.mxu0 %v24781_v34  ;;  %19430 = vmatpush1.bf16.msra.mxu1 %v24720_v14 }
 0x9c9   :  { %19240 = vmatprep.subr.bf16.mxu0 %v24782_v22  ;;  %19432 = vmatprep.subr.bf16.mxu1 %v24721_v21 }
 0x9cc   :  { %19242 = vmatpush1.bf16.msra.mxu0 %v24783_v4  ;;  %19434 = vmatpush1.bf16.msra.mxu1 %v21494_v50 }
 0x9cd   :  { %19244 = vmatprep.subr.bf16.mxu0 %v24784_v9  ;;  %19436 = vmatprep.subr.bf16.mxu1 %v25143_v59 }
 0x9d0   :  { %19246 = vmatpush1.bf16.msra.mxu0 %v25144_v29  ;;  %19438 = vmatpush1.bf16.msra.mxu1 %v25145_v44 }
 0x9d1   :  { %19248 = vmatprep.subr.bf16.mxu0 %v25146_v58  ;;  %19440 = vmatprep.subr.bf16.mxu1 %v25147_v23 }
 0x9d4   :  { %19250 = vmatpush1.bf16.msra.mxu0 %v25148_v40  ;;  %19442 = vmatpush1.bf16.msra.mxu1 %v25149_v30 }
 0x9d5   :  { %19252 = vmatprep.subr.bf16.mxu0 %v25182_v54  ;;  %19444 = vmatprep.subr.bf16.mxu1 %v25183_v51 }
 0xa8a   :  { %v10711_v3 = vpop.f32.mrb[12].mxu0  ;;  %v11566_v52 = vpop.f32.mrb[16].mxu1 }
 0xa8b   :  { %v11575_v28 = vrot.slane %v10711_v3, 3  ;;  %v10713_v43 = vpop.f32.mrb[13].mxu0  ;;  %v11568_v1 = vpop.f32.mrb[17].mxu1  ;;  %v11577_v54 = vrot.slane %v11566_v52, 3 }
 0xa8c   :  { %v11576_v26 = vrot.slane %v10713_v43, 3  ;;  %v11578_v56 = vrot.slane %v11568_v1, 3 }
 0xa8d   :  { %v11583_v6 = vadd.f32 %v21901_v25, %v11575_v28  ;;  %v11585_v3 = vadd.f32 %v21964_v39, %v11577_v54 }
 0xa8e   :  { %v11584_v46 = vadd.f32 %v21904_v57, %v11576_v26  ;;  %v11586_v30 = vadd.f32 %v21966_v42, %v11578_v56 }
 0xa8f   :  { %v11587_v48 = vsub.f32 0.0, %v11583_v6 }
 0xa90   :  { %v11593_v23 = vsub.f32 0.0, %v11584_v46  ;;  %v11600_v51 = vsub.f32 0.0, %v11586_v30  ;;  %v11607_v46 = vrot.slane %v22912_v5, 7 }
 0xa91   :  { %v11588_v40 = vmul.f32 1.442695, %v11587_v48 }
 0xa92   :  { %v11594_v58 = vmul.f32 1.442695, %v11593_v23  ;;  %v11601_v44 = vmul.f32 1.442695, %v11600_v51 }
 0xa93   :  { %20496 = vpow2.f32 %v11588_v40 }
 0xa94   :  { %20498 = vpow2.f32 %v11594_v58 }
 0xa95   :  { %20500 = vpow2.f32 %v11601_v44 }
 0xa96   :  { %20502 = vtanh.f32 %v11585_v3 }
 0xa9d   :  { %v20497_v29 = vpop.eup %20496 }
 0xa9e   :  { %v20499_v43 = vpop.eup %20498  ;;  %v11590_v59 = vadd.f32 1.0, %v20497_v29 }
 0xa9f   :  { %v11596_v28 = vadd.f32 1.0, %v20499_v43  ;;  %v20501_v1 = vpop.eup %20500 }
 0xaa0   :  { %20504 = vrcp.f32 %v11590_v59  ;;  %v20503_v26 = vpop.eup %20502  ;;  %v11603_v30 = vadd.f32 1.0, %v20501_v1  ;;  %v25186_v1 = vld [vmem:[#allocation112_spill] sm:$0xff] }
 0xaa1   :  { %20506 = vrcp.f32 %v11596_v28  ;;  %v25185_v28 = vld [vmem:[#allocation28_spill] sm:$0xff] }
 0xaa2   :  { %20508 = vrcp.f32 %v11603_v30  ;;  %v25192_v30 = vld [vmem:[#allocation10_spill] sm:$0xff] }
 0xaaa   :  { %v20505_v23 = vpop.eup %20504 }
 0xaab   :  { %v20507_v40 = vpop.eup %20506  ;;  %v11610_v58 = vmul.f32 %v20505_v23, %v20503_v26  ;;  %v25187_v26 = vld [vmem:[#allocation33_spill] sm:$0xff] }
 0xaac   :  { %v11609_v56 = vmul.f32 %v20507_v40, %v11607_v46  ;;  %v20509_v52 = vpop.eup %20508  ;;  %v25188_v23 = vld [vmem:[#allocation9_spill] sm:$0xff]  ;;  %v25189_v46 = vld [vmem:[#allocation35_spill] sm:$0xff] }
 0xaad   :  { %v25190_v40 = vld [vmem:[#allocation113_spill] sm:$0xff] }
 0xaae   :  { %v23147_v51 = vadd.f32 %v11610_v58, %v11609_v56  ;;  %v25191_v58 = vld [vmem:[#allocation38_spill] sm:$0xff]  ;;  %v25193_v56 = vld [vmem:[#allocation40_spill] sm:$0xff] }
 0xab0   :  { %20510 = vtanh.f32 %v23147_v51 }
 0xaba   :  { %v20511_v44 = vpop.eup %20510 }
 0xabb   :  { %v11613_v6 = vmul.f32 %v20511_v44, %v20509_v52  ;;  %v25194_v52 = vld [vmem:[#allocation12_spill] sm:$0xff]  ;;  %v25195_v44 = vld [vmem:[#allocation41_spill] sm:$0xff] }
 0xabd   :  { %v11615_v29 = vrot.slane %v11613_v6, 5  ;;  %v23151_v59 = vsel %vm15134_vm5, %v22916_v11, %v11613_v6  ;;  %v25184_v11 = vld [vmem:[#allocation111_spill] sm:$0xff]  ;;  %v25196_v6 = vld [vmem:[#allocation13_spill] sm:$0xff] }
 0xabf   :  { %v23153_v48 = vand.u32 4294901760, %v11615_v29 }
 0xac1   :  { %v23156_v5 = vsub.f32 %v11615_v29, %v23153_v48  ;;  %v25197_v29 = vld [vmem:[#allocation42_spill] sm:$0xff] }
 0xac3   :  { %v23159_v54 = vand.u32 4294901760, %v23156_v5 }
 0xac5   :  { %v11717_v3 = vsub.f32 %v23156_v5, %v23159_v54 }
 0xac7   :  { %v11718_v43 = vand.u32 4294901760, %v11717_v3  ;;  %v25198_v3 = vld [vmem:[#allocation114_spill] sm:$0xff] }
 0xac9   :  { %11719 = vmatmul.mubr.f32.vlgmr.msra.gmra.mrb[14].mxu0 %v11718_v43  ;;  %12574 = vmatmul.mubr.f32.vlgmr.msra.gmra.mrb[18].mxu1 %v11718_v43  ;;  %v25199_v43 = vld [vmem:[#allocation44_spill] sm:$0xff] }
 0xaca   :  { %19254 = vmatpush1.bf16.msra.mxu0 %v24737_v62  ;;  %19446 = vmatpush1.bf16.msra.mxu1 %v21636_v2 }
 0xacb   :  { %19256 = vmatprep.subr.bf16.mxu0 %v24738_v15  ;;  %19448 = vmatprep.subr.bf16.mxu1 %v24739_v12 }
 0xacc   :  { %11949 = vmatprep.mubr.f32.mxu0 %v24455_v17  ;;  %12804 = vmatprep.mubr.f32.mxu1 %v24455_v17 }
 0xace   :  { %19258 = vmatpush1.bf16.msra.mxu0 %v24824_v38  ;;  %19450 = vmatpush1.bf16.msra.mxu1 %v24825_v32 }
 0xacf   :  { %19260 = vmatprep.subr.bf16.mxu0 %v24826_v63  ;;  %19452 = vmatprep.subr.bf16.mxu1 %v24827_v45 }
 0xad2   :  { %19262 = vmatpush1.bf16.msra.mxu0 %v24744_v13  ;;  %19454 = vmatpush1.bf16.msra.mxu1 %v24828_v36 }
 0xad3   :  { %19264 = vmatprep.subr.bf16.mxu0 %v24746_v55  ;;  %19456 = vmatprep.subr.bf16.mxu1 %v24829_v31 }
 0xad6   :  { %19266 = vmatpush1.bf16.msra.mxu0 %v24748_v20  ;;  %19458 = vmatpush1.bf16.msra.mxu1 %v25184_v11  ;;  %v25256_v11 = vld [vmem:[#allocation57_spill] sm:$0xff] }
 0xad7   :  { %19268 = vmatprep.subr.bf16.mxu0 %v25185_v28  ;;  %19460 = vmatprep.subr.bf16.mxu1 %v25186_v1  ;;  %v25249_v1 = vld [vmem:[#allocation86_spill] sm:$0xff]  ;;  %v25255_v28 = vld [vmem:[#allocation92_spill] sm:$0xff] }
 0xada   :  { %19270 = vmatpush1.bf16.msra.mxu0 %v25187_v26  ;;  %19462 = vmatpush1.bf16.msra.mxu1 %v25188_v23  ;;  %v25245_v23 = vld [vmem:[#allocation83_spill] sm:$0xff]  ;;  %v25246_v26 = vld [vmem:[#allocation50_spill] sm:$0xff] }
 0xadb   :  { %19272 = vmatprep.subr.bf16.mxu0 %v25189_v46  ;;  %19464 = vmatprep.subr.bf16.mxu1 %v25190_v40  ;;  %v25200_v46 = vld [vmem:[#allocation115_spill] sm:$0xff] }
 0xadc   :  { %v25201_v40 = vld [vmem:[#allocation43_spill] sm:$0xff] }
 0xade   :  { %19274 = vmatpush1.bf16.msra.mxu0 %v25191_v58  ;;  %19466 = vmatpush1.bf16.msra.mxu1 %v25192_v30  ;;  %v25202_v58 = vld [vmem:[#allocation116_spill] sm:$0xff]  ;;  %v25217_v30 = vld [vmem:[#allocation66_spill] sm:$0xff] }
 0xadf   :  { %19276 = vmatprep.subr.bf16.mxu0 %v25193_v56  ;;  %19468 = vmatprep.subr.bf16.mxu1 %v25194_v52  ;;  %v25203_v52 = vld [vmem:[#allocation46_spill] sm:$0xff] }
 0xae0   :  { %v25216_v56 = vld [vmem:[#allocation122_spill] sm:$0xff] }
 0xae2   :  { %19278 = vmatpush1.bf16.msra.mxu0 %v25195_v44  ;;  %19470 = vmatpush1.bf16.msra.mxu1 %v25196_v6  ;;  %v25204_v44 = vld [vmem:[#allocation37_spill] sm:$0xff]  ;;  %v25205_v6 = vld [vmem:[#allocation48_spill] sm:$0xff] }
 0xae3   :  { %19280 = vmatprep.subr.bf16.mxu0 %v25197_v29  ;;  %19472 = vmatprep.subr.bf16.mxu1 %v25198_v3  ;;  %v25206_v29 = vld [vmem:[#allocation117_spill] sm:$0xff]  ;;  %v25211_v3 = vld [vmem:[#allocation58_spill] sm:$0xff] }
 0xae6   :  { %19282 = vmatpush1.bf16.msra.mxu0 %v25199_v43  ;;  %19474 = vmatpush1.bf16.msra.mxu1 %v25200_v46  ;;  %v25207_v46 = vld [vmem:[#allocation52_spill] sm:$0xff]  ;;  %v25210_v43 = vld [vmem:[#allocation119_spill] sm:$0xff] }
 0xae7   :  { %19284 = vmatprep.subr.bf16.mxu0 %v25201_v40  ;;  %19476 = vmatprep.subr.bf16.mxu1 %v25202_v58  ;;  %v25208_v40 = vld [vmem:[#allocation118_spill] sm:$0xff] }
 0xae8   :  { %v25209_v58 = vld [vmem:[#allocation54_spill] sm:$0xff] }
 0xae9   :  { %11951 = vmatmul.mubr.f32.vlgmr.msra.gmra.mrb[14].mxu0 %v23153_v48  ;;  %12806 = vmatmul.mubr.f32.vlgmr.msra.gmra.mrb[18].mxu1 %v23153_v48 }
 0xaea   :  { %19286 = vmatpush1.bf16.msra.mxu0 %v25203_v52  ;;  %19478 = vmatpush1.bf16.msra.mxu1 %v25204_v44  ;;  %v25212_v52 = vld [vmem:[#allocation120_spill] sm:$0xff] }
 0xaeb   :  { %19288 = vmatprep.subr.bf16.mxu0 %v25205_v6  ;;  %19480 = vmatprep.subr.bf16.mxu1 %v25206_v29  ;;  %v25213_v44 = vld [vmem:[#allocation60_spill] sm:$0xff]  ;;  %v25214_v6 = vld [vmem:[#allocation121_spill] sm:$0xff] }
 0xaec   :  { %12085 = vmatprep.mubr.f32.mxu0 %v24455_v17  ;;  %12940 = vmatprep.mubr.f32.mxu1 %v24455_v17  ;;  %v25215_v29 = vld [vmem:[#allocation64_spill] sm:$0xff] }
 0xaee   :  { %19290 = vmatpush1.bf16.msra.mxu0 %v25207_v46  ;;  %19482 = vmatpush1.bf16.msra.mxu1 %v25208_v40  ;;  %v25218_v46 = vld [vmem:[#allocation123_spill] sm:$0xff]  ;;  %v25219_v40 = vld [vmem:[#allocation69_spill] sm:$0xff] }
 0xaef   :  { %19292 = vmatprep.subr.bf16.mxu0 %v25209_v58  ;;  %19484 = vmatprep.subr.bf16.mxu1 %v25210_v43  ;;  %v25220_v58 = vld [vmem:[#allocation124_spill] sm:$0xff]  ;;  %v25221_v43 = vld [vmem:[#allocation70_spill] sm:$0xff] }
 0xaf2   :  { %19294 = vmatpush1.bf16.msra.mxu0 %v25211_v3  ;;  %19486 = vmatpush1.bf16.msra.mxu1 %v25212_v52  ;;  %v25222_v3 = vld [vmem:[#allocation125_spill] sm:$0xff]  ;;  %v25223_v52 = vld [vmem:[#allocation71_spill] sm:$0xff] }
 0xaf3   :  { %19296 = vmatprep.subr.bf16.mxu0 %v25213_v44  ;;  %19488 = vmatprep.subr.bf16.mxu1 %v25214_v6  ;;  %v25224_v44 = vld [vmem:[#allocation126_spill] sm:$0xff]  ;;  %v25225_v6 = vld [vmem:[#allocation72_spill] sm:$0xff] }
 0xaf6   :  { %19298 = vmatpush1.bf16.msra.mxu0 %v25215_v29  ;;  %19490 = vmatpush1.bf16.msra.mxu1 %v25216_v56  ;;  %v25226_v29 = vld [vmem:[#allocation127_spill] sm:$0xff]  ;;  %v25227_v56 = vld [vmem:[#allocation73_spill] sm:$0xff] }
 0xaf7   :  { %19300 = vmatprep.subr.bf16.mxu0 %v25217_v30  ;;  %19492 = vmatprep.subr.bf16.mxu1 %v25218_v46  ;;  %v25228_v30 = vld [vmem:[#allocation128_spill] sm:$0xff]  ;;  %v25229_v46 = vld [vmem:[#allocation74_spill] sm:$0xff] }
 0xafa   :  { %19302 = vmatpush1.bf16.msra.mxu0 %v25219_v40  ;;  %19494 = vmatpush1.bf16.msra.mxu1 %v25220_v58  ;;  %v25230_v40 = vld [vmem:[#allocation129_spill] sm:$0xff]  ;;  %v25231_v58 = vld [vmem:[#allocation75_spill] sm:$0xff] }
 0xafb   :  { %19304 = vmatprep.subr.bf16.mxu0 %v25221_v43  ;;  %19496 = vmatprep.subr.bf16.mxu1 %v25222_v3  ;;  %v25232_v43 = vld [vmem:[#allocation130_spill] sm:$0xff]  ;;  %v25244_v3 = vld [vmem:[#allocation49_spill] sm:$0xff] }
 0xafe   :  { %19306 = vmatpush1.bf16.msra.mxu0 %v25223_v52  ;;  %19498 = vmatpush1.bf16.msra.mxu1 %v25224_v44  ;;  %v25242_v44 = vld [vmem:[#allocation47_spill] sm:$0xff]  ;;  %v25243_v52 = vld [vmem:[#allocation82_spill] sm:$0xff] }
 0xaff   :  { %19308 = vmatprep.subr.bf16.mxu0 %v25225_v6  ;;  %19500 = vmatprep.subr.bf16.mxu1 %v25226_v29  ;;  %v25240_v29 = vld [vmem:[#allocation45_spill] sm:$0xff] }
 0xb00   :  { %v25241_v6 = vld [vmem:[#allocation81_spill] sm:$0xff] }
 0xb02   :  { %19310 = vmatpush1.bf16.msra.mxu0 %v25227_v56  ;;  %19502 = vmatpush1.bf16.msra.mxu1 %v25228_v30  ;;  %v25238_v30 = vld [vmem:[#allocation34_spill] sm:$0xff] }
 0xb03   :  { %19312 = vmatprep.subr.bf16.mxu0 %v25229_v46  ;;  %19504 = vmatprep.subr.bf16.mxu1 %v25230_v40  ;;  %v25236_v40 = vld [vmem:[#allocation32_spill] sm:$0xff]  ;;  %v25237_v46 = vld [vmem:[#allocation99_spill] sm:$0xff]  ;;  %v25239_v56 = vld [vmem:[#allocation102_spill] sm:$0xff] }
 0xb06   :  { %19314 = vmatpush1.bf16.msra.mxu0 %v25231_v58  ;;  %19506 = vmatpush1.bf16.msra.mxu1 %v25232_v43  ;;  %v25234_v43 = vld [vmem:[#allocation31_spill] sm:$0xff]  ;;  %v25235_v58 = vld [vmem:[#allocation98_spill] sm:$0xff] }
 0xb07   :  { %19316 = vmatprep.subr.bf16.mxu0 %v24664_v37  ;;  %19508 = vmatprep.subr.bf16.mxu1 %v24710_v27 }
 0xb09   :  { %12088 = vmatmul.mubr.f32.vlgmr.msra.gmra.mrb[14].mxu0 %v23156_v5  ;;  %12943 = vmatmul.mubr.f32.vlgmr.msra.gmra.mrb[18].mxu1 %v23156_v5  ;;  %v25233_v5 = vld [vmem:[#allocation94_spill] sm:$0xff] }
 0xb0a   :  { %19318 = vmatpush1.bf16.msra.mxu0 %v24671_v47  ;;  %19510 = vmatpush1.bf16.msra.mxu1 %v24711_v35 }
 0xb0b   :  { %19320 = vmatprep.subr.bf16.mxu0 %v24672_v24  ;;  %19512 = vmatprep.subr.bf16.mxu1 %v24712_v8 }
 0xb0c   :  { %12190 = vmatprep.mubr.f32.mxu0 %v24455_v17  ;;  %13045 = vmatprep.mubr.f32.mxu1 %v24455_v17 }
 0xb0e   :  { %19322 = vmatpush1.bf16.msra.mxu0 %v24677_v10  ;;  %19514 = vmatpush1.bf16.msra.mxu1 %v24713_v60 }
 0xb0f   :  { %19324 = vmatprep.subr.bf16.mxu0 %v24776_v33  ;;  %19516 = vmatprep.subr.bf16.mxu1 %v24714_v7 }
 0xb12   :  { %19326 = vmatpush1.bf16.msra.mxu0 %v24777_v19  ;;  %19518 = vmatpush1.bf16.msra.mxu1 %v24715_v0 }
 0xb13   :  { %19328 = vmatprep.subr.bf16.mxu0 %v24778_v41  ;;  %19520 = vmatprep.subr.bf16.mxu1 %v24716_v16 }
 0xb16   :  { %19330 = vmatpush1.bf16.msra.mxu0 %v24779_v49  ;;  %19522 = vmatpush1.bf16.msra.mxu1 %v24718_v18 }
 0xb17   :  { %19332 = vmatprep.subr.bf16.mxu0 %v24780_v61  ;;  %19524 = vmatprep.subr.bf16.mxu1 %v24719_v53 }
 0xb1a   :  { %19334 = vmatpush1.bf16.msra.mxu0 %v24781_v34  ;;  %19526 = vmatpush1.bf16.msra.mxu1 %v24720_v14 }
 0xb1b   :  { %19336 = vmatprep.subr.bf16.mxu0 %v24782_v22  ;;  %19528 = vmatprep.subr.bf16.mxu1 %v24721_v21 }
 0xb1e   :  { %19338 = vmatpush1.bf16.msra.mxu0 %v24783_v4  ;;  %19530 = vmatpush1.bf16.msra.mxu1 %v21494_v50 }
 0xb1f   :  { %19340 = vmatprep.subr.bf16.mxu0 %v24784_v9  ;;  %19532 = vmatprep.subr.bf16.mxu1 %v25233_v5 }
 0xb22   :  { %19342 = vmatpush1.bf16.msra.mxu0 %v25234_v43  ;;  %19534 = vmatpush1.bf16.msra.mxu1 %v25235_v58 }
 0xb23   :  { %19344 = vmatprep.subr.bf16.mxu0 %v25236_v40  ;;  %19536 = vmatprep.subr.bf16.mxu1 %v25237_v46 }
 0xb26   :  { %19346 = vmatpush1.bf16.msra.mxu0 %v25238_v30  ;;  %19538 = vmatpush1.bf16.msra.mxu1 %v25239_v56 }
 0xb27   :  { %19348 = vmatprep.subr.bf16.mxu0 %v25240_v29  ;;  %19540 = vmatprep.subr.bf16.mxu1 %v25241_v6  ;;  %v25247_v29 = vld [vmem:[#allocation84_spill] sm:$0xff]  ;;  %v25248_v6 = vld [vmem:[#allocation51_spill] sm:$0xff] }
 0xb29   :  { %12194 = vmatmul.mubr.f32.vlgmr.msra.gmra.mrb[14].mxu0 %v23159_v54  ;;  %13049 = vmatmul.mubr.f32.vlgmr.msra.gmra.mrb[18].mxu1 %v23159_v54  ;;  %v25250_v54 = vld [vmem:[#allocation53_spill] sm:$0xff] }
 0xb2a   :  { %19350 = vmatpush1.bf16.msra.mxu0 %v25242_v44  ;;  %19542 = vmatpush1.bf16.msra.mxu1 %v25243_v52  ;;  %v25251_v44 = vld [vmem:[#allocation88_spill] sm:$0xff]  ;;  %v25252_v52 = vld [vmem:[#allocation55_spill] sm:$0xff] }
 0xb2b   :  { %19352 = vmatprep.subr.bf16.mxu0 %v25244_v3  ;;  %19544 = vmatprep.subr.bf16.mxu1 %v25245_v23  ;;  %v25253_v3 = vld [vmem:[#allocation90_spill] sm:$0xff]  ;;  %v25254_v23 = vld [vmem:[#allocation56_spill] sm:$0xff] }
 0xb2c   :  { %12360 = vmatprep.mubr.f32.mxu0 %v24455_v17  ;;  %13215 = vmatprep.mubr.f32.mxu1 %v24455_v17 }
 0xb2e   :  { %19354 = vmatpush1.bf16.msra.mxu0 %v25246_v26  ;;  %19546 = vmatpush1.bf16.msra.mxu1 %v25247_v29  ;;  %v25257_v26 = vld [vmem:[#allocation93_spill] sm:$0xff]  ;;  %v25258_v29 = vld [vmem:[#allocation59_spill] sm:$0xff] }
 0xb2f   :  { %19356 = vmatprep.subr.bf16.mxu0 %v25248_v6  ;;  %19548 = vmatprep.subr.bf16.mxu1 %v25249_v1  ;;  %v25259_v6 = vld [vmem:[#allocation95_spill] sm:$0xff]  ;;  %v25260_v1 = vld [vmem:[#allocation61_spill] sm:$0xff] }
 0xb32   :  { %19358 = vmatpush1.bf16.msra.mxu0 %v25250_v54  ;;  %19550 = vmatpush1.bf16.msra.mxu1 %v25251_v44  ;;  %v25261_v54 = vld [vmem:[#allocation96_spill] sm:$0xff]  ;;  %v25262_v44 = vld [vmem:[#allocation62_spill] sm:$0xff] }
 0xb33   :  { %19360 = vmatprep.subr.bf16.mxu0 %v25252_v52  ;;  %19552 = vmatprep.subr.bf16.mxu1 %v25253_v3  ;;  %v25263_v52 = vld [vmem:[#allocation97_spill] sm:$0xff]  ;;  %v25264_v3 = vld [vmem:[#allocation63_spill] sm:$0xff] }
 0xb36   :  { %19362 = vmatpush1.bf16.msra.mxu0 %v25254_v23  ;;  %19554 = vmatpush1.bf16.msra.mxu1 %v25255_v28  ;;  %v25265_v23 = vld [vmem:[#allocation100_spill] sm:$0xff]  ;;  %v25266_v28 = vld [vmem:[#allocation65_spill] sm:$0xff] }
 0xb37   :  { %19364 = vmatprep.subr.bf16.mxu0 %v25256_v11  ;;  %19556 = vmatprep.subr.bf16.mxu1 %v25257_v26  ;;  %v25267_v11 = vld [vmem:[#allocation101_spill] sm:$0xff]  ;;  %v25268_v26 = vld [vmem:[#allocation67_spill] sm:$0xff] }
 0xb3a   :  { %19366 = vmatpush1.bf16.msra.mxu0 %v25258_v29  ;;  %19558 = vmatpush1.bf16.msra.mxu1 %v25259_v6  ;;  %v25269_v29 = vld [vmem:[#allocation103_spill] sm:$0xff]  ;;  %v25270_v6 = vld [vmem:[#allocation68_spill] sm:$0xff] }
 0xb3b   :  { %19368 = vmatprep.subr.bf16.mxu0 %v25260_v1  ;;  %19560 = vmatprep.subr.bf16.mxu1 %v25261_v54  ;;  %v25271_v1 = vld [vmem:[#allocation105_spill] sm:$0xff] }
 0xb3e   :  { %19370 = vmatpush1.bf16.msra.mxu0 %v25262_v44  ;;  %19562 = vmatpush1.bf16.msra.mxu1 %v25263_v52 }
 0xb3f   :  { %19372 = vmatprep.subr.bf16.mxu0 %v25264_v3  ;;  %19564 = vmatprep.subr.bf16.mxu1 %v25265_v23 }
 0xb42   :  { %19374 = vmatpush1.bf16.msra.mxu0 %v25266_v28  ;;  %19566 = vmatpush1.bf16.msra.mxu1 %v25267_v11 }
 0xb43   :  { %19376 = vmatprep.subr.bf16.mxu0 %v25268_v26  ;;  %19568 = vmatprep.subr.bf16.mxu1 %v25269_v29 }
 0xb46   :  { %19378 = vmatpush1.bf16.msra.mxu0 %v25270_v6  ;;  %19570 = vmatpush1.bf16.msra.mxu1 %v25271_v1  ;;  %v25273_v1 = vld [vmem:[#allocation104_spill] sm:$0xff] }
 0xb47   :  { %19380 = vmatprep.subr.bf16.mxu0 %v24664_v37  ;;  %19572 = vmatprep.subr.bf16.mxu1 %v24710_v27 }
 0xb49   :  { %12362 = vmatmul.mubr.f32.vlgmr.msra.gmra.mrb[14].mxu0 %v23153_v48  ;;  %13217 = vmatmul.mubr.f32.vlgmr.msra.gmra.mrb[18].mxu1 %v23153_v48 }
 0xb4a   :  { %19382 = vmatpush1.bf16.msra.mxu0 %v24671_v47  ;;  %19574 = vmatpush1.bf16.msra.mxu1 %v24711_v35 }
 0xb4b   :  { %19384 = vmatprep.subr.bf16.mxu0 %v24672_v24  ;;  %19576 = vmatprep.subr.bf16.mxu1 %v24712_v8 }
 0xb4c   :  { %12464 = vmatprep.mubr.f32.mxu0 %v24455_v17  ;;  %13319 = vmatprep.mubr.f32.mxu1 %v24455_v17 }
 0xb4e   :  { %19386 = vmatpush1.bf16.msra.mxu0 %v24677_v10  ;;  %19578 = vmatpush1.bf16.msra.mxu1 %v24713_v60 }
 0xb4f   :  { %19388 = vmatprep.subr.bf16.mxu0 %v24776_v33  ;;  %19580 = vmatprep.subr.bf16.mxu1 %v24714_v7 }
 0xb52   :  { %19390 = vmatpush1.bf16.msra.mxu0 %v24777_v19  ;;  %19582 = vmatpush1.bf16.msra.mxu1 %v24715_v0 }
 0xb53   :  { %19392 = vmatprep.subr.bf16.mxu0 %v24778_v41  ;;  %19584 = vmatprep.subr.bf16.mxu1 %v24716_v16 }
 0xb56   :  { %19394 = vmatpush1.bf16.msra.mxu0 %v24779_v49  ;;  %19586 = vmatpush1.bf16.msra.mxu1 %v24718_v18 }
 0xb57   :  { %19396 = vmatprep.subr.bf16.mxu0 %v24780_v61  ;;  %19588 = vmatprep.subr.bf16.mxu1 %v24719_v53 }
 0xb5a   :  { %19398 = vmatpush1.bf16.msra.mxu0 %v24781_v34  ;;  %19590 = vmatpush1.bf16.msra.mxu1 %v24720_v14 }
 0xb5b   :  { %19400 = vmatprep.subr.bf16.mxu0 %v24782_v22  ;;  %19592 = vmatprep.subr.bf16.mxu1 %v24721_v21 }
 0xb5e   :  { %19402 = vmatpush1.bf16.msra.mxu0 %v24783_v4  ;;  %19594 = vmatpush1.bf16.msra.mxu1 %v21494_v50 }
 0xb5f   :  { %19404 = vmatprep.subr.bf16.mxu0 %v24784_v9  ;;  %19596 = vmatprep.subr.bf16.mxu1 %v25233_v5 }
 0xb62   :  { %19406 = vmatpush1.bf16.msra.mxu0 %v25234_v43  ;;  %19598 = vmatpush1.bf16.msra.mxu1 %v25235_v58 }
 0xb63   :  { %19408 = vmatprep.subr.bf16.mxu0 %v25236_v40  ;;  %19600 = vmatprep.subr.bf16.mxu1 %v25237_v46 }
 0xb66   :  { %19410 = vmatpush1.bf16.msra.mxu0 %v25238_v30  ;;  %19602 = vmatpush1.bf16.msra.mxu1 %v25239_v56 }
 0xb67   :  { %19604 = vmatprep.subr.bf16.mxu0 %v24664_v37  ;;  %19796 = vmatprep.subr.bf16.mxu1 %v24710_v27 }
 0xb69   :  { %12466 = vmatmul.mubr.f32.vlgmr.msra.gmra.mrb[14].mxu0 %v23153_v48  ;;  %13321 = vmatmul.mubr.f32.vlgmr.msra.gmra.mrb[18].mxu1 %v23153_v48  ;;  %v25272_v48 = vld [vmem:[#allocation11_spill] sm:$0xff] }
 0xb6a   :  { %19606 = vmatpush1.bf16.msra.mxu0 %v24671_v47  ;;  %19798 = vmatpush1.bf16.msra.mxu1 %v24711_v35 }
 0xb6b   :  { %19608 = vmatprep.subr.bf16.mxu0 %v24672_v24  ;;  %19800 = vmatprep.subr.bf16.mxu1 %v24712_v8 }
 0xb6c   :  { %13469 = vmatprep.mubr.f32.mxu0 %v24455_v17  ;;  %14324 = vmatprep.mubr.f32.mxu1 %v24455_v17 }
 0xb6e   :  { %19610 = vmatpush1.bf16.msra.mxu0 %v24677_v10  ;;  %19802 = vmatpush1.bf16.msra.mxu1 %v24713_v60 }
 0xb6f   :  { %19612 = vmatprep.subr.bf16.mxu0 %v24776_v33  ;;  %19804 = vmatprep.subr.bf16.mxu1 %v24714_v7 }
 0xb72   :  { %19614 = vmatpush1.bf16.msra.mxu0 %v24777_v19  ;;  %19806 = vmatpush1.bf16.msra.mxu1 %v24715_v0 }
 0xb73   :  { %19616 = vmatprep.subr.bf16.mxu0 %v24778_v41  ;;  %19808 = vmatprep.subr.bf16.mxu1 %v24716_v16 }
 0xb76   :  { %19618 = vmatpush1.bf16.msra.mxu0 %v24779_v49  ;;  %19810 = vmatpush1.bf16.msra.mxu1 %v24718_v18 }
 0xb77   :  { %19620 = vmatprep.subr.bf16.mxu0 %v24780_v61  ;;  %19812 = vmatprep.subr.bf16.mxu1 %v24719_v53 }
 0xb7a   :  { %19622 = vmatpush1.bf16.msra.mxu0 %v24781_v34  ;;  %19814 = vmatpush1.bf16.msra.mxu1 %v24720_v14 }
 0xb7b   :  { %19624 = vmatprep.subr.bf16.mxu0 %v24782_v22  ;;  %19816 = vmatprep.subr.bf16.mxu1 %v24721_v21 }
 0xb7e   :  { %19626 = vmatpush1.bf16.msra.mxu0 %v24783_v4  ;;  %19818 = vmatpush1.bf16.msra.mxu1 %v21494_v50 }
 0xb7f   :  { %19628 = vmatprep.subr.bf16.mxu0 %v24784_v9  ;;  %19820 = vmatprep.subr.bf16.mxu1 %v25233_v5 }
 0xb82   :  { %19630 = vmatpush1.bf16.msra.mxu0 %v25234_v43  ;;  %19822 = vmatpush1.bf16.msra.mxu1 %v25235_v58 }
 0xb83   :  { %19632 = vmatprep.subr.bf16.mxu0 %v25236_v40  ;;  %19824 = vmatprep.subr.bf16.mxu1 %v25237_v46 }
 0xb86   :  { %19634 = vmatpush1.bf16.msra.mxu0 %v25238_v30  ;;  %19826 = vmatpush1.bf16.msra.mxu1 %v25239_v56 }
 0xb87   :  { %19636 = vmatprep.subr.bf16.mxu0 %v25272_v48  ;;  %19828 = vmatprep.subr.bf16.mxu1 %v25273_v1 }
 0xc3c   :  { %v12467_v6 = vpop.f32.mrb[14].mxu0  ;;  %v13322_v29 = vpop.f32.mrb[18].mxu1 }
 0xc3d   :  { %v13331_v26 = vrot.slane %v12467_v6, 2  ;;  %v12469_v11 = vpop.f32.mrb[15].mxu0  ;;  %v13324_v28 = vpop.f32.mrb[19].mxu1  ;;  %v13333_v48 = vrot.slane %v13322_v29, 2 }
 0xc3e   :  { %v13332_v23 = vrot.slane %v12469_v11, 2  ;;  %v13334_v44 = vrot.slane %v13324_v28, 2 }
 0xc3f   :  { %v13339_v3 = vadd.f32 %v21901_v25, %v13331_v26  ;;  %v13341_v6 = vadd.f32 %v21964_v39, %v13333_v48 }
 0xc40   :  { %v13340_v52 = vadd.f32 %v21904_v57, %v13332_v23  ;;  %v13342_v56 = vadd.f32 %v21966_v42, %v13334_v44 }
 0xc41   :  { %v13343_v54 = vsub.f32 0.0, %v13339_v3 }
 0xc42   :  { %v13349_v46 = vsub.f32 0.0, %v13340_v52  ;;  %v13356_v1 = vsub.f32 0.0, %v13342_v56  ;;  %v13363_v52 = vrot.slane %v23147_v51, 7 }
 0xc43   :  { %v13344_v30 = vmul.f32 1.442695, %v13343_v54 }
 0xc44   :  { %v13350_v40 = vmul.f32 1.442695, %v13349_v46  ;;  %v13357_v58 = vmul.f32 1.442695, %v13356_v1 }
 0xc45   :  { %20512 = vpow2.f32 %v13344_v30 }
 0xc46   :  { %20514 = vpow2.f32 %v13350_v40 }
 0xc47   :  { %20516 = vpow2.f32 %v13357_v58 }
 0xc48   :  { %20518 = vtanh.f32 %v13341_v6 }
 0xc4f   :  { %v20513_v43 = vpop.eup %20512 }
 0xc50   :  { %v20515_v11 = vpop.eup %20514  ;;  %v13346_v5 = vadd.f32 1.0, %v20513_v43 }
 0xc51   :  { %v13352_v26 = vadd.f32 1.0, %v20515_v11  ;;  %v20517_v28 = vpop.eup %20516 }
 0xc52   :  { %20520 = vrcp.f32 %v13346_v5  ;;  %v20519_v23 = vpop.eup %20518  ;;  %v13359_v56 = vadd.f32 1.0, %v20517_v28  ;;  %v25289_v28 = vld [vmem:[#allocation44_spill] sm:$0xff] }
 0xc53   :  { %20522 = vrcp.f32 %v13352_v26  ;;  %v25288_v26 = vld [vmem:[#allocation114_spill] sm:$0xff] }
 0xc54   :  { %20524 = vrcp.f32 %v13359_v56  ;;  %v25295_v56 = vld [vmem:[#allocation48_spill] sm:$0xff] }
 0xc5c   :  { %v20521_v46 = vpop.eup %20520 }
 0xc5d   :  { %v20523_v30 = vpop.eup %20522  ;;  %v13366_v40 = vmul.f32 %v20521_v46, %v20519_v23  ;;  %v25290_v23 = vld [vmem:[#allocation115_spill] sm:$0xff] }
 0xc5e   :  { %v13365_v44 = vmul.f32 %v20523_v30, %v13363_v52  ;;  %v20525_v3 = vpop.eup %20524  ;;  %v25291_v46 = vld [vmem:[#allocation43_spill] sm:$0xff]  ;;  %v25292_v52 = vld [vmem:[#allocation116_spill] sm:$0xff]  ;;  %v25293_v30 = vld [vmem:[#allocation46_spill] sm:$0xff] }
 0xc60   :  { %v23382_v29 = vadd.f32 %v13366_v40, %v13365_v44  ;;  %v25294_v40 = vld [vmem:[#allocation37_spill] sm:$0xff] }
 0xc61   :  { %v25296_v44 = vld [vmem:[#allocation117_spill] sm:$0xff] }
 0xc62   :  { %20526 = vtanh.f32 %v23382_v29 }
 0xc6c   :  { %v20527_v58 = vpop.eup %20526 }
 0xc6d   :  { %v13369_v43 = vmul.f32 %v20527_v58, %v20525_v3  ;;  %v25297_v3 = vld [vmem:[#allocation52_spill] sm:$0xff]  ;;  %v25298_v58 = vld [vmem:[#allocation118_spill] sm:$0xff] }
 0xc6f   :  { %v13371_v5 = vrot.slane %v13369_v43, 6  ;;  %v23386_v54 = vsel %vm15136_vm6, %v23151_v59, %v13369_v43  ;;  %v25287_v59 = vld [vmem:[#allocation42_spill] sm:$0xff] }
 0xc70   :  { %v25299_v43 = vld [vmem:[#allocation54_spill] sm:$0xff] }
 0xc71   :  { %v23388_v1 = vand.u32 4294901760, %v13371_v5 }
 0xc73   :  { %v23391_v51 = vsub.f32 %v13371_v5, %v23388_v1  ;;  %v25300_v5 = vld [vmem:[#allocation119_spill] sm:$0xff] }
 0xc75   :  { %v23394_v48 = vand.u32 4294901760, %v23391_v51 }
 0xc77   :  { %v13473_v6 = vsub.f32 %v23391_v51, %v23394_v48 }
 0xc79   :  { %v13474_v11 = vand.u32 4294901760, %v13473_v6  ;;  %v25301_v6 = vld [vmem:[#allocation58_spill] sm:$0xff] }
 0xc7b   :  { %13475 = vmatmul.mubr.f32.vlgmr.msra.gmra.mrb[16].mxu0 %v13474_v11  ;;  %14330 = vmatmul.mubr.f32.vlgmr.msra.gmra.mrb[20].mxu1 %v13474_v11  ;;  %v25302_v11 = vld [vmem:[#allocation120_spill] sm:$0xff] }
 0xc7c   :  { %19638 = vmatpush1.bf16.msra.mxu0 %v24737_v62  ;;  %19830 = vmatpush1.bf16.msra.mxu1 %v21636_v2  ;;  %v25274_v2 = vld [vmem:[#allocation111_spill] sm:$0xff]  ;;  %v25275_v62 = vld [vmem:[#allocation28_spill] sm:$0xff] }
 0xc7d   :  { %19640 = vmatprep.subr.bf16.mxu0 %v24738_v15  ;;  %19832 = vmatprep.subr.bf16.mxu1 %v24739_v12  ;;  %v25276_v15 = vld [vmem:[#allocation112_spill] sm:$0xff]  ;;  %v25277_v12 = vld [vmem:[#allocation33_spill] sm:$0xff] }
 0xc7e   :  { %13705 = vmatprep.mubr.f32.mxu0 %v24455_v17  ;;  %14560 = vmatprep.mubr.f32.mxu1 %v24455_v17 }
 0xc80   :  { %19642 = vmatpush1.bf16.msra.mxu0 %v24824_v38  ;;  %19834 = vmatpush1.bf16.msra.mxu1 %v24825_v32  ;;  %v25278_v38 = vld [vmem:[#allocation9_spill] sm:$0xff]  ;;  %v25279_v32 = vld [vmem:[#allocation35_spill] sm:$0xff] }
 0xc81   :  { %19644 = vmatprep.subr.bf16.mxu0 %v24826_v63  ;;  %19836 = vmatprep.subr.bf16.mxu1 %v24827_v45  ;;  %v25281_v63 = vld [vmem:[#allocation38_spill] sm:$0xff]  ;;  %v25283_v45 = vld [vmem:[#allocation40_spill] sm:$0xff] }
 0xc84   :  { %19646 = vmatpush1.bf16.msra.mxu0 %v24744_v13  ;;  %19838 = vmatpush1.bf16.msra.mxu1 %v24828_v36  ;;  %v25280_v13 = vld [vmem:[#allocation113_spill] sm:$0xff] }
 0xc85   :  { %19648 = vmatprep.subr.bf16.mxu0 %v24746_v55  ;;  %19840 = vmatprep.subr.bf16.mxu1 %v24829_v31  ;;  %v25282_v55 = vld [vmem:[#allocation10_spill] sm:$0xff]  ;;  %v25285_v36 = vld [vmem:[#allocation41_spill] sm:$0xff] }
 0xc86   :  { %v25286_v31 = vld [vmem:[#allocation13_spill] sm:$0xff] }
 0xc88   :  { %19650 = vmatpush1.bf16.msra.mxu0 %v24748_v20  ;;  %19842 = vmatpush1.bf16.msra.mxu1 %v25274_v2  ;;  %v25284_v20 = vld [vmem:[#allocation12_spill] sm:$0xff] }
 0xc89   :  { %19652 = vmatprep.subr.bf16.mxu0 %v25275_v62  ;;  %19844 = vmatprep.subr.bf16.mxu1 %v25276_v15  ;;  %v25303_v2 = vld [vmem:[#allocation60_spill] sm:$0xff]  ;;  %v25304_v62 = vld [vmem:[#allocation121_spill] sm:$0xff] }
 0xc8a   :  { %v25305_v15 = vld [vmem:[#allocation64_spill] sm:$0xff] }
 0xc8c   :  { %19654 = vmatpush1.bf16.msra.mxu0 %v25277_v12  ;;  %19846 = vmatpush1.bf16.msra.mxu1 %v25278_v38  ;;  %v25306_v12 = vld [vmem:[#allocation122_spill] sm:$0xff] }
 0xc8d   :  { %19656 = vmatprep.subr.bf16.mxu0 %v25279_v32  ;;  %19848 = vmatprep.subr.bf16.mxu1 %v25280_v13  ;;  %v25307_v38 = vld [vmem:[#allocation66_spill] sm:$0xff]  ;;  %v25308_v32 = vld [vmem:[#allocation123_spill] sm:$0xff]  ;;  %v25309_v13 = vld [vmem:[#allocation69_spill] sm:$0xff] }
 0xc90   :  { %19658 = vmatpush1.bf16.msra.mxu0 %v25281_v63  ;;  %19850 = vmatpush1.bf16.msra.mxu1 %v25282_v55  ;;  %v25310_v63 = vld [vmem:[#allocation124_spill] sm:$0xff]  ;;  %v25311_v55 = vld [vmem:[#allocation70_spill] sm:$0xff] }
 0xc91   :  { %19660 = vmatprep.subr.bf16.mxu0 %v25283_v45  ;;  %19852 = vmatprep.subr.bf16.mxu1 %v25284_v20  ;;  %v25312_v45 = vld [vmem:[#allocation125_spill] sm:$0xff]  ;;  %v25313_v20 = vld [vmem:[#allocation71_spill] sm:$0xff] }
 0xc94   :  { %19662 = vmatpush1.bf16.msra.mxu0 %v25285_v36  ;;  %19854 = vmatpush1.bf16.msra.mxu1 %v25286_v31  ;;  %v25314_v36 = vld [vmem:[#allocation126_spill] sm:$0xff]  ;;  %v25315_v31 = vld [vmem:[#allocation72_spill] sm:$0xff] }
 0xc95   :  { %19664 = vmatprep.subr.bf16.mxu0 %v25287_v59  ;;  %19856 = vmatprep.subr.bf16.mxu1 %v25288_v26  ;;  %v25316_v59 = vld [vmem:[#allocation127_spill] sm:$0xff]  ;;  %v25317_v26 = vld [vmem:[#allocation73_spill] sm:$0xff] }
 0xc98   :  { %19666 = vmatpush1.bf16.msra.mxu0 %v25289_v28  ;;  %19858 = vmatpush1.bf16.msra.mxu1 %v25290_v23  ;;  %v25318_v28 = vld [vmem:[#allocation128_spill] sm:$0xff]  ;;  %v25319_v23 = vld [vmem:[#allocation74_spill] sm:$0xff] }
 0xc99   :  { %19668 = vmatprep.subr.bf16.mxu0 %v25291_v46  ;;  %19860 = vmatprep.subr.bf16.mxu1 %v25292_v52  ;;  %v25320_v46 = vld [vmem:[#allocation129_spill] sm:$0xff]  ;;  %v25321_v52 = vld [vmem:[#allocation75_spill] sm:$0xff] }
 0xc9b   :  { %13707 = vmatmul.mubr.f32.vlgmr.msra.gmra.mrb[16].mxu0 %v23388_v1  ;;  %14562 = vmatmul.mubr.f32.vlgmr.msra.gmra.mrb[20].mxu1 %v23388_v1 }
 0xc9c   :  { %19670 = vmatpush1.bf16.msra.mxu0 %v25293_v30  ;;  %19862 = vmatpush1.bf16.msra.mxu1 %v25294_v40  ;;  %v25322_v30 = vld [vmem:[#allocation130_spill] sm:$0xff]  ;;  %v25324_v40 = vld [vmem:[#allocation31_spill] sm:$0xff] }
 0xc9d   :  { %19672 = vmatprep.subr.bf16.mxu0 %v25295_v56  ;;  %19864 = vmatprep.subr.bf16.mxu1 %v25296_v44  ;;  %v25325_v56 = vld [vmem:[#allocation98_spill] sm:$0xff]  ;;  %v25326_v44 = vld [vmem:[#allocation32_spill] sm:$0xff] }
 0xc9e   :  { %13841 = vmatprep.mubr.f32.mxu0 %v24455_v17  ;;  %14696 = vmatprep.mubr.f32.mxu1 %v24455_v17 }
 0xca0   :  { %19674 = vmatpush1.bf16.msra.mxu0 %v25297_v3  ;;  %19866 = vmatpush1.bf16.msra.mxu1 %v25298_v58  ;;  %v25327_v3 = vld [vmem:[#allocation99_spill] sm:$0xff]  ;;  %v25328_v58 = vld [vmem:[#allocation34_spill] sm:$0xff] }
 0xca1   :  { %19676 = vmatprep.subr.bf16.mxu0 %v25299_v43  ;;  %19868 = vmatprep.subr.bf16.mxu1 %v25300_v5  ;;  %v25329_v43 = vld [vmem:[#allocation102_spill] sm:$0xff]  ;;  %v25330_v5 = vld [vmem:[#allocation45_spill] sm:$0xff] }
 0xca4   :  { %19678 = vmatpush1.bf16.msra.mxu0 %v25301_v6  ;;  %19870 = vmatpush1.bf16.msra.mxu1 %v25302_v11  ;;  %v25331_v6 = vld [vmem:[#allocation81_spill] sm:$0xff]  ;;  %v25332_v11 = vld [vmem:[#allocation47_spill] sm:$0xff] }
 0xca5   :  { %19680 = vmatprep.subr.bf16.mxu0 %v25303_v2  ;;  %19872 = vmatprep.subr.bf16.mxu1 %v25304_v62  ;;  %v25333_v2 = vld [vmem:[#allocation82_spill] sm:$0xff]  ;;  %v25334_v62 = vld [vmem:[#allocation49_spill] sm:$0xff] }
 0xca8   :  { %19682 = vmatpush1.bf16.msra.mxu0 %v25305_v15  ;;  %19874 = vmatpush1.bf16.msra.mxu1 %v25306_v12  ;;  %v25335_v15 = vld [vmem:[#allocation83_spill] sm:$0xff]  ;;  %v25336_v12 = vld [vmem:[#allocation50_spill] sm:$0xff] }
 0xca9   :  { %19684 = vmatprep.subr.bf16.mxu0 %v25307_v38  ;;  %19876 = vmatprep.subr.bf16.mxu1 %v25308_v32  ;;  %v25337_v38 = vld [vmem:[#allocation84_spill] sm:$0xff]  ;;  %v25338_v32 = vld [vmem:[#allocation51_spill] sm:$0xff] }
 0xcac   :  { %19686 = vmatpush1.bf16.msra.mxu0 %v25309_v13  ;;  %19878 = vmatpush1.bf16.msra.mxu1 %v25310_v63  ;;  %v25339_v13 = vld [vmem:[#allocation86_spill] sm:$0xff]  ;;  %v25341_v63 = vld [vmem:[#allocation88_spill] sm:$0xff] }
 0xcad   :  { %19688 = vmatprep.subr.bf16.mxu0 %v25311_v55  ;;  %19880 = vmatprep.subr.bf16.mxu1 %v25312_v45  ;;  %v25342_v55 = vld [vmem:[#allocation55_spill] sm:$0xff]  ;;  %v25343_v45 = vld [vmem:[#allocation90_spill] sm:$0xff] }
 0xcb0   :  { %19690 = vmatpush1.bf16.msra.mxu0 %v25313_v20  ;;  %19882 = vmatpush1.bf16.msra.mxu1 %v25314_v36  ;;  %v25344_v20 = vld [vmem:[#allocation56_spill] sm:$0xff] }
 0xcb1   :  { %19692 = vmatprep.subr.bf16.mxu0 %v25315_v31  ;;  %19884 = vmatprep.subr.bf16.mxu1 %v25316_v59  ;;  %v25345_v36 = vld [vmem:[#allocation92_spill] sm:$0xff]  ;;  %v25346_v31 = vld [vmem:[#allocation57_spill] sm:$0xff] }
 0xcb2   :  { %v25347_v59 = vld [vmem:[#allocation93_spill] sm:$0xff] }
 0xcb4   :  { %19694 = vmatpush1.bf16.msra.mxu0 %v25317_v26  ;;  %19886 = vmatpush1.bf16.msra.mxu1 %v25318_v28  ;;  %v25348_v26 = vld [vmem:[#allocation59_spill] sm:$0xff] }
 0xcb5   :  { %19696 = vmatprep.subr.bf16.mxu0 %v25319_v23  ;;  %19888 = vmatprep.subr.bf16.mxu1 %v25320_v46  ;;  %v25349_v28 = vld [vmem:[#allocation95_spill] sm:$0xff]  ;;  %v25350_v23 = vld [vmem:[#allocation61_spill] sm:$0xff]  ;;  %v25351_v46 = vld [vmem:[#allocation96_spill] sm:$0xff] }
 0xcb8   :  { %19698 = vmatpush1.bf16.msra.mxu0 %v25321_v52  ;;  %19890 = vmatpush1.bf16.msra.mxu1 %v25322_v30  ;;  %v25352_v52 = vld [vmem:[#allocation62_spill] sm:$0xff]  ;;  %v25353_v30 = vld [vmem:[#allocation97_spill] sm:$0xff] }
 0xcb9   :  { %19700 = vmatprep.subr.bf16.mxu0 %v24664_v37  ;;  %19892 = vmatprep.subr.bf16.mxu1 %v24710_v27 }
 0xcbb   :  { %13844 = vmatmul.mubr.f32.vlgmr.msra.gmra.mrb[16].mxu0 %v23391_v51  ;;  %14699 = vmatmul.mubr.f32.vlgmr.msra.gmra.mrb[20].mxu1 %v23391_v51  ;;  %v25323_v51 = vld [vmem:[#allocation94_spill] sm:$0xff] }
 0xcbc   :  { %19702 = vmatpush1.bf16.msra.mxu0 %v24671_v47  ;;  %19894 = vmatpush1.bf16.msra.mxu1 %v24711_v35 }
 0xcbd   :  { %19704 = vmatprep.subr.bf16.mxu0 %v24672_v24  ;;  %19896 = vmatprep.subr.bf16.mxu1 %v24712_v8 }
 0xcbe   :  { %13946 = vmatprep.mubr.f32.mxu0 %v24455_v17  ;;  %14801 = vmatprep.mubr.f32.mxu1 %v24455_v17 }
 0xcc0   :  { %19706 = vmatpush1.bf16.msra.mxu0 %v24677_v10  ;;  %19898 = vmatpush1.bf16.msra.mxu1 %v24713_v60 }
 0xcc1   :  { %19708 = vmatprep.subr.bf16.mxu0 %v24776_v33  ;;  %19900 = vmatprep.subr.bf16.mxu1 %v24714_v7 }
 0xcc4   :  { %19710 = vmatpush1.bf16.msra.mxu0 %v24777_v19  ;;  %19902 = vmatpush1.bf16.msra.mxu1 %v24715_v0 }
 0xcc5   :  { %19712 = vmatprep.subr.bf16.mxu0 %v24778_v41  ;;  %19904 = vmatprep.subr.bf16.mxu1 %v24716_v16 }
 0xcc8   :  { %19714 = vmatpush1.bf16.msra.mxu0 %v24779_v49  ;;  %19906 = vmatpush1.bf16.msra.mxu1 %v24718_v18 }
 0xcc9   :  { %19716 = vmatprep.subr.bf16.mxu0 %v24780_v61  ;;  %19908 = vmatprep.subr.bf16.mxu1 %v24719_v53 }
 0xccc   :  { %19718 = vmatpush1.bf16.msra.mxu0 %v24781_v34  ;;  %19910 = vmatpush1.bf16.msra.mxu1 %v24720_v14 }
 0xccd   :  { %19720 = vmatprep.subr.bf16.mxu0 %v24782_v22  ;;  %19912 = vmatprep.subr.bf16.mxu1 %v24721_v21 }
 0xcd0   :  { %19722 = vmatpush1.bf16.msra.mxu0 %v24783_v4  ;;  %19914 = vmatpush1.bf16.msra.mxu1 %v21494_v50 }
 0xcd1   :  { %19724 = vmatprep.subr.bf16.mxu0 %v24784_v9  ;;  %19916 = vmatprep.subr.bf16.mxu1 %v25323_v51 }
 0xcd4   :  { %19726 = vmatpush1.bf16.msra.mxu0 %v25324_v40  ;;  %19918 = vmatpush1.bf16.msra.mxu1 %v25325_v56 }
 0xcd5   :  { %19728 = vmatprep.subr.bf16.mxu0 %v25326_v44  ;;  %19920 = vmatprep.subr.bf16.mxu1 %v25327_v3 }
 0xcd8   :  { %19730 = vmatpush1.bf16.msra.mxu0 %v25328_v58  ;;  %19922 = vmatpush1.bf16.msra.mxu1 %v25329_v43 }
 0xcd9   :  { %19732 = vmatprep.subr.bf16.mxu0 %v25330_v5  ;;  %19924 = vmatprep.subr.bf16.mxu1 %v25331_v6  ;;  %v25354_v5 = vld [vmem:[#allocation63_spill] sm:$0xff]  ;;  %v25355_v6 = vld [vmem:[#allocation100_spill] sm:$0xff] }
 0xcdb   :  { %13950 = vmatmul.mubr.f32.vlgmr.msra.gmra.mrb[16].mxu0 %v23394_v48  ;;  %14805 = vmatmul.mubr.f32.vlgmr.msra.gmra.mrb[20].mxu1 %v23394_v48  ;;  %v25340_v48 = vld [vmem:[#allocation53_spill] sm:$0xff] }
 0xcdc   :  { %19734 = vmatpush1.bf16.msra.mxu0 %v25332_v11  ;;  %19926 = vmatpush1.bf16.msra.mxu1 %v25333_v2  ;;  %v25356_v11 = vld [vmem:[#allocation65_spill] sm:$0xff] }
 0xcdd   :  { %19736 = vmatprep.subr.bf16.mxu0 %v25334_v62  ;;  %19928 = vmatprep.subr.bf16.mxu1 %v25335_v15  ;;  %v25357_v2 = vld [vmem:[#allocation101_spill] sm:$0xff]  ;;  %v25358_v62 = vld [vmem:[#allocation67_spill] sm:$0xff] }
 0xcde   :  { %14116 = vmatprep.mubr.f32.mxu0 %v24455_v17  ;;  %14971 = vmatprep.mubr.f32.mxu1 %v24455_v17  ;;  %v25359_v15 = vld [vmem:[#allocation103_spill] sm:$0xff] }
 0xce0   :  { %19738 = vmatpush1.bf16.msra.mxu0 %v25336_v12  ;;  %19930 = vmatpush1.bf16.msra.mxu1 %v25337_v38  ;;  %v25360_v12 = vld [vmem:[#allocation68_spill] sm:$0xff]  ;;  %v25361_v38 = vld [vmem:[#allocation105_spill] sm:$0xff] }
 0xce1   :  { %19740 = vmatprep.subr.bf16.mxu0 %v25338_v32  ;;  %19932 = vmatprep.subr.bf16.mxu1 %v25339_v13  ;;  %v15155_v32 = vld [vmem:[%s24070_s4 + $0x68] sm:$0xff] }
 0xce4   :  { %19742 = vmatpush1.bf16.msra.mxu0 %v25340_v48  ;;  %19934 = vmatpush1.bf16.msra.mxu1 %v25341_v63 }
 0xce5   :  { %19744 = vmatprep.subr.bf16.mxu0 %v25342_v55  ;;  %19936 = vmatprep.subr.bf16.mxu1 %v25343_v45  ;;  %v15156_v45 = vld [vmem:[%s24070_s4 + $0x70] sm:$0xff] }
 0xce8   :  { %19746 = vmatpush1.bf16.msra.mxu0 %v25344_v20  ;;  %19938 = vmatpush1.bf16.msra.mxu1 %v25345_v36 }
 0xce9   :  { %19748 = vmatprep.subr.bf16.mxu0 %v25346_v31  ;;  %19940 = vmatprep.subr.bf16.mxu1 %v25347_v59  ;;  %v15205_v59 = vand.u32 4294901760, %v15155_v32 }
 0xcec   :  { %19750 = vmatpush1.bf16.msra.mxu0 %v25348_v26  ;;  %19942 = vmatpush1.bf16.msra.mxu1 %v25349_v28  ;;  %v15157_v26 = vld [vmem:[%s24070_s4 + $0x78] sm:$0xff] }
 0xced   :  { %19752 = vmatprep.subr.bf16.mxu0 %v25350_v23  ;;  %19944 = vmatprep.subr.bf16.mxu1 %v25351_v46 }
 0xcf0   :  { %19754 = vmatpush1.bf16.msra.mxu0 %v25352_v52  ;;  %19946 = vmatpush1.bf16.msra.mxu1 %v25353_v30  ;;  %v23666_v30 = vsub.f32 %v15155_v32, %v15205_v59 }
 0xcf1   :  { %19756 = vmatprep.subr.bf16.mxu0 %v25354_v5  ;;  %19948 = vmatprep.subr.bf16.mxu1 %v25355_v6  ;;  %v15208_v5 = vand.u32 4294901760, %v15156_v45 }
 0xcf4   :  { %19758 = vmatpush1.bf16.msra.mxu0 %v25356_v11  ;;  %19950 = vmatpush1.bf16.msra.mxu1 %v25357_v2  ;;  %v15211_v11 = vand.u32 4294901760, %v15157_v26  ;;  %v23672_v2 = vsub.f32 %v15156_v45, %v15208_v5 }
 0xcf5   :  { %19760 = vmatprep.subr.bf16.mxu0 %v25358_v62  ;;  %19952 = vmatprep.subr.bf16.mxu1 %v25359_v15 }
 0xcf6   :  { %v23676_v62 = vsub.f32 %v15157_v26, %v15211_v11 }
 0xcf8   :  { %19762 = vmatpush1.bf16.msra.mxu0 %v25360_v12  ;;  %19954 = vmatpush1.bf16.msra.mxu1 %v25361_v38 }
 0xcf9   :  { %19764 = vmatprep.subr.bf16.mxu0 %v24664_v37  ;;  %19956 = vmatprep.subr.bf16.mxu1 %v24710_v27  ;;  %v15143_v37 = vld [vmem:[%s24070_s4 + $0x8] sm:$0xff] }
 0xcfb   :  { %14118 = vmatmul.mubr.f32.vlgmr.msra.gmra.mrb[16].mxu0 %v23388_v1  ;;  %14973 = vmatmul.mubr.f32.vlgmr.msra.gmra.mrb[20].mxu1 %v23388_v1 }
 0xcfc   :  { %19766 = vmatpush1.bf16.msra.mxu0 %v24671_v47  ;;  %19958 = vmatpush1.bf16.msra.mxu1 %v24711_v35 }
 0xcfd   :  { %19768 = vmatprep.subr.bf16.mxu0 %v24672_v24  ;;  %19960 = vmatprep.subr.bf16.mxu1 %v24712_v8  ;;  %v15169_v24 = vand.u32 4294901760, %v15143_v37 }
 0xcfe   :  { %14220 = vmatprep.mubr.f32.mxu0 %v24455_v17  ;;  %15075 = vmatprep.mubr.f32.mxu1 %v24455_v17 }
 0xd00   :  { %19770 = vmatpush1.bf16.msra.mxu0 %v24677_v10  ;;  %19962 = vmatpush1.bf16.msra.mxu1 %v24713_v60  ;;  %v23606_v60 = vsub.f32 %v15143_v37, %v15169_v24  ;;  %v23691_v37 = vpack.c.bf16 %v15211_v11, %v15208_v5 }
 0xd01   :  { %19772 = vmatprep.subr.bf16.mxu0 %v24776_v33  ;;  %19964 = vmatprep.subr.bf16.mxu1 %v24714_v7  ;;  %v15147_v33 = vld [vmem:[%s24070_s4 + $0x28] sm:$0xff] }
 0xd02   :  { %v15181_v35 = vand.u32 4294901760, %v15147_v33 }
 0xd04   :  { %19774 = vmatpush1.bf16.msra.mxu0 %v24777_v19  ;;  %19966 = vmatpush1.bf16.msra.mxu1 %v24715_v0  ;;  %v23625_v19 = vsub.f32 %v15147_v33, %v15181_v35 }
 0xd05   :  { %19776 = vmatprep.subr.bf16.mxu0 %v24778_v41  ;;  %19968 = vmatprep.subr.bf16.mxu1 %v24716_v16  ;;  %v15148_v16 = vld [vmem:[%s24070_s4 + $0x30] sm:$0xff] }
 0xd08   :  { %19778 = vmatpush1.bf16.msra.mxu0 %v24779_v49  ;;  %19970 = vmatpush1.bf16.msra.mxu1 %v24718_v18  ;;  %v15146_v49 = vld [vmem:[%s24070_s4 + $0x20] sm:$0xff]  ;;  %v15149_v18 = vld [vmem:[%s24070_s4 + $0x38] sm:$0xff] }
 0xd09   :  { %19780 = vmatprep.subr.bf16.mxu0 %v24780_v61  ;;  %19972 = vmatprep.subr.bf16.mxu1 %v24719_v53  ;;  %v15145_v61 = vld [vmem:[%s24070_s4 + $0x18] sm:$0xff]  ;;  %v15178_v27 = vand.u32 4294901760, %v15146_v49  ;;  %v15150_v53 = vld [vmem:[%s24070_s4 + $0x40] sm:$0xff] }
 0xd0c   :  { %19782 = vmatpush1.bf16.msra.mxu0 %v24781_v34  ;;  %19974 = vmatpush1.bf16.msra.mxu1 %v24720_v14  ;;  %v23621_v14 = vpack.c.bf16 %v15181_v35, %v15178_v27 }
 0xd0d   :  { %19784 = vmatprep.subr.bf16.mxu0 %v24782_v22  ;;  %19976 = vmatprep.subr.bf16.mxu1 %v24721_v21  ;;  %v15144_v22 = vld [vmem:[%s24070_s4 + $0x10] sm:$0xff]  ;;  %v23623_v21 = vsub.f32 %v15146_v49, %v15178_v27 }
 0xd0e   :  { %v15172_v41 = vand.u32 4294901760, %v15144_v22 }
 0xd10   :  { %19786 = vmatpush1.bf16.msra.mxu0 %v24783_v4  ;;  %19978 = vmatpush1.bf16.msra.mxu1 %v21494_v50  ;;  %v15142_v50 = vld [vmem:[%s24070_s4] sm:$0xff]  ;;  %v15175_v4 = vand.u32 4294901760, %v15145_v61  ;;  %v23608_v7 = vsub.f32 %v15144_v22, %v15172_v41 }
 0xd11   :  { %19788 = vmatprep.subr.bf16.mxu0 %v24784_v9  ;;  %19980 = vmatprep.subr.bf16.mxu1 %v25323_v51  ;;  %v15166_v47 = vand.u32 4294901760, %v15142_v50  ;;  %v20600_v9 = vmov 0.0|0.0   ;;  %v15151_v51 = vld [vmem:[%s24070_s4 + $0x48] sm:$0xff] }
 0xd12   :  { %v23594_v34 = vpack.c.bf16 %v15175_v4, %v15172_v41  ;;  %v23610_v0 = vsub.f32 %v15145_v61, %v15175_v4  ;;  %v24433_v41 = vand.u32 4294901760, %v23608_v7 }
 0xd13   :  { %v23582_v10 = vpack.c.bf16 %v15169_v24, %v15166_v47  ;;  %v23604_v8 = vsub.f32 %v15142_v50, %v15166_v47  ;;  %v24434_v50 = vand.u32 4294901760, %v23606_v60 }
 0xd14   :  { %19790 = vmatpush1.bf16.msra.mxu0 %v25324_v40  ;;  %19982 = vmatpush1.bf16.msra.mxu1 %v25325_v56  ;;  %v15152_v40 = vld [vmem:[%s24070_s4 + $0x50] sm:$0xff]  ;;  %v15153_v56 = vld [vmem:[%s24070_s4 + $0x58] sm:$0xff]  ;;  %v24432_v4 = vand.u32 4294901760, %v23610_v0  ;;  %v15274_v33 = vsub.f32 %v23608_v7, %v24433_v41 }
 0xd15   :  { %19792 = vmatprep.subr.bf16.mxu0 %v25326_v44  ;;  %19984 = vmatprep.subr.bf16.mxu1 %v25327_v3  ;;  %v15187_v44 = vand.u32 4294901760, %v15149_v18  ;;  %v15190_v3 = vand.u32 4294901760, %v15150_v53  ;;  %v15196_v48 = vand.u32 4294901760, %v15152_v40  ;;  %v15199_v63 = vand.u32 4294901760, %v15153_v56 }
 0xd16   :  { %v24435_v38 = vand.u32 4294901760, %v23604_v8  ;;  %v15267_v24 = vsub.f32 %v23606_v60, %v24434_v50  ;;  %v15281_v27 = vsub.f32 %v23610_v0, %v24432_v4  ;;  %v15275_v35 = vand.u32 4294901760, %v15274_v33 }
 0xd17   :  { %v23651_v36 = vsub.f32 %v15149_v18, %v15187_v44  ;;  %v23653_v31 = vsub.f32 %v15150_v53, %v15190_v3  ;;  %v23660_v23 = vsub.f32 %v15152_v40, %v15196_v48  ;;  %v23662_v46 = vsub.f32 %v15153_v56, %v15199_v63 }
 0xd18   :  { %19794 = vmatpush1.bf16.msra.mxu0 %v25328_v58  ;;  %19986 = vmatpush1.bf16.msra.mxu1 %v25329_v43  ;;  %v15193_v58 = vand.u32 4294901760, %v15151_v51  ;;  %v15154_v43 = vld [vmem:[%s24070_s4 + $0x60] sm:$0xff]  ;;  %v23681_v15 = vpack.c.bf16 %v15199_v63, %v15196_v48  ;;  %v15260_v47 = vsub.f32 %v23604_v8, %v24435_v38  ;;  %v15268_v61 = vand.u32 4294901760, %v15267_v24 }
 0xd19   :  { %19987 = vmatprep.subr.bf16.mxu0 %v20600_v9  ;;  %20131 = vmatprep.subr.bf16.mxu1 %v20600_v9  ;;  %v15202_v55 = vand.u32 4294901760, %v15154_v43  ;;  %v24431_v18 = vand.u32 4294901760, %v23623_v21  ;;  %v24430_v53 = vand.u32 4294901760, %v23625_v19  ;;  %v24427_v45 = vand.u32 4294901760, %v23653_v31 }
 0xd1a   :  { %v23658_v28 = vsub.f32 %v15151_v51, %v15193_v58  ;;  %v23669_v6 = vpack.c.bf16 %v15193_v58, %v15190_v3  ;;  %v15261_v22 = vand.u32 4294901760, %v15260_v47  ;;  %v24428_v58 = vand.u32 4294901760, %v23651_v36 }
 0xd1b   :  { %14222 = vmatmul.mubr.f32.vlgmr.msra.gmra.mrb[16].mxu0 %v23388_v1  ;;  %15077 = vmatmul.mubr.f32.vlgmr.msra.gmra.mrb[20].mxu1 %v23388_v1  ;;  %v15184_v1 = vand.u32 4294901760, %v15148_v16  ;;  %v23664_v52 = vsub.f32 %v15154_v43, %v15202_v55  ;;  %v23685_v12 = vpack.c.bf16 %v15205_v59, %v15202_v55  ;;  %v15288_v51 = vsub.f32 %v23623_v21, %v24431_v18 }
 0xd1c   :  { %19989 = vmatpush3.bf16.msra.mxu0 %v23582_v10  ;;  %16575 = vmatprep.mubr.msk.f32.mxu0 %vm20601_vm7, %v24455_v17  ;;  %v23704_v49 = vpack.c.bf16 %v15268_v61, %v15261_v22  ;;  %v15295_v40 = vsub.f32 %v23625_v19, %v24430_v53  ;;  %v15309_v48 = vsub.f32 %v23651_v36, %v24428_v58  ;;  %v24426_v59 = vand.u32 4294901760, %v23658_v28 }
 0xd1d   :  { %19990 = vmatprep.subr.bf16.mxu0 %v20600_v9  ;;  %v23643_v13 = vsub.f32 %v15148_v16, %v15184_v1  ;;  %v23649_v20 = vpack.c.bf16 %v15187_v44, %v15184_v1  ;;  %16769 = vmatprep.mubr.msk.f32.mxu1 %vm20601_vm7, %v24455_v17  ;;  %v15282_v16 = vand.u32 4294901760, %v15281_v27  ;;  %v15289_v56 = vand.u32 4294901760, %v15288_v51 }
 0xd1e   :  { %v15296_v44 = vand.u32 4294901760, %v15295_v40  ;;  %v15310_v55 = vand.u32 4294901760, %v15309_v48  ;;  %v15316_v5 = vsub.f32 %v23653_v31, %v24427_v45  ;;  %v15323_v11 = vsub.f32 %v23658_v28, %v24426_v59 }
 0xd1f   :  { %v23714_v1 = vpack.c.bf16 %v15282_v16, %v15275_v35  ;;  %v24429_v3 = vand.u32 4294901760, %v23643_v13  ;;  %v24425_v22 = vand.u32 4294901760, %v23660_v23  ;;  %v24424_v61 = vand.u32 4294901760, %v23662_v46 }
 0xd20   :  { %19992 = vmatpush3.bf16.msra.mxu0 %v23594_v34  ;;  %v23724_v43 = vpack.c.bf16 %v15296_v44, %v15289_v56  ;;  %v15317_v47 = vand.u32 4294901760, %v15316_v5  ;;  %v15324_v24 = vand.u32 4294901760, %v15323_v11  ;;  %v24423_v40 = vand.u32 4294901760, %v23664_v52 }
 0xd21   :  { %19993 = vmatprep.subr.bf16.mxu0 %v20600_v9  ;;  %v15302_v32 = vsub.f32 %v23643_v13, %v24429_v3  ;;  %v15330_v27 = vsub.f32 %v23660_v23, %v24425_v22  ;;  %v15337_v35 = vsub.f32 %v23662_v46, %v24424_v61  ;;  %v24422_v56 = vand.u32 4294901760, %v23666_v30 }
 0xd22   :  { %v23744_v33 = vpack.c.bf16 %v15324_v24, %v15317_v47  ;;  %v24420_v5 = vand.u32 4294901760, %v23672_v2  ;;  %v24421_v11 = vand.u32 4294901760, %v23676_v62 }
 0xd23   :  { %v15303_v63 = vand.u32 4294901760, %v15302_v32  ;;  %v15331_v16 = vand.u32 4294901760, %v15330_v27  ;;  %v15338_v51 = vand.u32 4294901760, %v15337_v35  ;;  %v15344_v32 = vsub.f32 %v23664_v52, %v24423_v40 }
 0xd24   :  { %19995 = vmatpush3.bf16.msra.mxu0 %v23621_v14  ;;  %v15351_v48 = vsub.f32 %v23666_v30, %v24422_v56  ;;  %v15358_v24 = vsub.f32 %v23672_v2, %v24420_v5  ;;  %v15365_v27 = vsub.f32 %v23676_v62, %v24421_v11  ;;  %v20048_v5 = vpack.c.bf16 %v23658_v28, %v23653_v31 }
 0xd25   :  { %19996 = vmatprep.subr.bf16.mxu0 %v20600_v9  ;;  %v23734_v26 = vpack.c.bf16 %v15310_v55, %v15303_v63  ;;  %v23754_v44 = vpack.c.bf16 %v15338_v51, %v15331_v16  ;;  %v15345_v63 = vand.u32 4294901760, %v15344_v32  ;;  %v20036_v32 = vpack.c.bf16 %v23606_v60, %v23604_v8 }
 0xd26   :  { %v15352_v55 = vand.u32 4294901760, %v15351_v48  ;;  %v15359_v35 = vand.u32 4294901760, %v15358_v24  ;;  %v15366_v16 = vand.u32 4294901760, %v15365_v27  ;;  %v20039_v48 = vpack.c.bf16 %v23610_v0, %v23608_v7 }
 0xd28   :  { %19998 = vmatpush3.bf16.msra.mxu0 %v23649_v20  ;;  %v23764_v47 = vpack.c.bf16 %v15352_v55, %v15345_v63  ;;  %v23772_v51 = vpack.c.bf16 %v15366_v16, %v15359_v35  ;;  %v20042_v63 = vpack.c.bf16 %v23625_v19, %v23623_v21  ;;  %v20045_v55 = vpack.c.bf16 %v23651_v36, %v23643_v13 }
 0xd29   :  { %19999 = vmatprep.subr.bf16.mxu0 %v20600_v9 }
 0xd2c   :  { %20001 = vmatpush3.bf16.msra.mxu0 %v23669_v6 }
 0xd2d   :  { %20002 = vmatprep.subr.bf16.mxu0 %v20600_v9 }
 0xd30   :  { %20004 = vmatpush3.bf16.msra.mxu0 %v23681_v15 }
 0xd31   :  { %20005 = vmatprep.subr.bf16.mxu0 %v20600_v9 }
 0xd34   :  { %20007 = vmatpush3.bf16.msra.mxu0 %v23685_v12 }
 0xd35   :  { %20008 = vmatprep.subr.bf16.mxu0 %v20600_v9 }
 0xd38   :  { %20010 = vmatpush3.bf16.msra.mxu0 %v23691_v37 }
 0xd39   :  { %20011 = vmatprep.subr.bf16.mxu0 %v20600_v9 }
 0xdee   :  { %v14223_v16 = vpop.f32.mrb[16].mxu0  ;;  %v15078_v11 = vpop.f32.mrb[20].mxu1 }
 0xdef   :  { %v15087_v56 = vrot.slane %v14223_v16, 1  ;;  %v14225_v40 = vpop.f32.mrb[17].mxu0  ;;  %v15080_v61 = vpop.f32.mrb[21].mxu1  ;;  %v15089_v38 = vrot.slane %v15078_v11, 1 }
 0xdf0   :  { %v15088_v22 = vrot.slane %v14225_v40, 1  ;;  %v15090_v58 = vrot.slane %v15080_v61, 1 }
 0xdf1   :  { %v15095_v59 = vadd.f32 %v21901_v25, %v15087_v56  ;;  %v15097_v16 = vadd.f32 %v21964_v39, %v15089_v38 }
 0xdf2   :  { %v15096_v45 = vadd.f32 %v21904_v57, %v15088_v22  ;;  %v15098_v41 = vadd.f32 %v21966_v42, %v15090_v58  ;;  %v15119_v42 = vrot.slane %v23382_v29, 7 }
 0xdf3   :  { %v15099_v3 = vsub.f32 0.0, %v15095_v59 }
 0xdf4   :  { %v15105_v53 = vsub.f32 0.0, %v15096_v45  ;;  %v15112_v50 = vsub.f32 0.0, %v15098_v41 }
 0xdf5   :  { %v15100_v18 = vmul.f32 1.442695, %v15099_v3 }
 0xdf6   :  { %v15106_v4 = vmul.f32 1.442695, %v15105_v53  ;;  %v15113_v35 = vmul.f32 1.442695, %v15112_v50 }
 0xdf7   :  { %20528 = vpow2.f32 %v15100_v18 }
 0xdf8   :  { %20530 = vpow2.f32 %v15106_v4 }
 0xdf9   :  { %20532 = vpow2.f32 %v15113_v35 }
 0xdfa   :  { %20534 = vtanh.f32 %v15097_v16 }
 0xe01   :  { %v20529_v27 = vpop.eup %20528 }
 0xe02   :  { %v20531_v40 = vpop.eup %20530  ;;  %v15102_v24 = vadd.f32 1.0, %v20529_v27 }
 0xe03   :  { %v15108_v57 = vadd.f32 1.0, %v20531_v40  ;;  %v20533_v25 = vpop.eup %20532 }
 0xe04   :  { %20536 = vrcp.f32 %v15102_v24  ;;  %v20535_v3 = vpop.eup %20534  ;;  %v15115_v41 = vadd.f32 1.0, %v20533_v25  ;;  %v15813_v25 = vld [vmem:[%s24072_s6 + $0x30] sm:$0xff] }
 0xe05   :  { %20538 = vrcp.f32 %v15108_v57 }
 0xe06   :  { %20540 = vrcp.f32 %v15115_v41 }
 0xe0e   :  { %v20537_v53 = vpop.eup %20536 }
 0xe0f   :  { %v20539_v18 = vpop.eup %20538  ;;  %v15122_v4 = vmul.f32 %v20537_v53, %v20535_v3  ;;  %v15814_v3 = vld [vmem:[%s24072_s6 + $0x38] sm:$0xff]  ;;  %v15845_v53 = vand.u32 4294901760, %v15813_v25 }
 0xe10   :  { %v15121_v58 = vmul.f32 %v20539_v18, %v15119_v42  ;;  %v20541_v39 = vpop.eup %20540  ;;  %v15848_v42 = vand.u32 4294901760, %v15814_v3 }
 0xe12   :  { %v15123_v50 = vadd.f32 %v15122_v4, %v15121_v58 }
 0xe14   :  { %20542 = vtanh.f32 %v15123_v50 }
 0xe1e   :  { %v20543_v38 = vpop.eup %20542 }
 0xe1f   :  { %v15125_v45 = vmul.f32 %v20543_v38, %v20541_v39  ;;  %v23981_v38 = vpack.c.bf16 %v15848_v42, %v15845_v53 }
 0xe21   :  { %v15139_v59 = vsel %vm15138_vm8, %v23386_v54, %v15125_v45  ;;  %v25362_v54 = vpack.c.bf16 %v23662_v46, %v23660_v23  ;;  %v23983_v45 = vsub.f32 %v15813_v25, %v15845_v53 }
 0xe22   :  { %v23796_v22 = vand.u32 4294901760, %v15139_v59 }
 0xe24   :  { %v15247_v61 = vsub.f32 %v15139_v59, %v23796_v22  ;;  %v23985_v59 = vsub.f32 %v15814_v3, %v15848_v42 }
 0xe26   :  { %v15248_v56 = vand.u32 4294901760, %v15247_v61 }
 0xe28   :  { %v15249_v11 = vsub.f32 %v15247_v61, %v15248_v56 }
 0xe2a   :  { %v15250_v29 = vand.u32 4294901760, %v15249_v11 }
 0xe2c   :  { %16576 = vmatmul.mubr.f32.vlgmr.msra.gmra.mrb[18].mxu0 %v15250_v29 }
 0xe2d   :  { %20013 = vmatpush3.bf16.msra.mxu0 %v23704_v49  ;;  %16610 = vmatprep.mubr.msk.f32.mxu0 %vm20601_vm7, %v24455_v17  ;;  %v25363_v49 = vpack.c.bf16 %v23666_v30, %v23664_v52 }
 0xe2e   :  { %20014 = vmatprep.subr.bf16.mxu0 %v20600_v9 }
 0xe31   :  { %20016 = vmatpush3.bf16.msra.mxu0 %v23714_v1  ;;  %v25364_v1 = vpack.c.bf16 %v23676_v62, %v23672_v2 }
 0xe32   :  { %20017 = vmatprep.subr.bf16.mxu0 %v20600_v9 }
 0xe35   :  { %20019 = vmatpush3.bf16.msra.mxu0 %v23724_v43  ;;  %v25365_v43 = vand.u32 4294901760, %v23604_v8  ;;  %v25369_v8 = vand.u32 4294901760, %v23623_v21  ;;  %v25375_v21 = vand.u32 4294901760, %v23660_v23 }
 0xe36   :  { %20020 = vmatprep.subr.bf16.mxu0 %v20600_v9 }
 0xe39   :  { %20022 = vmatpush3.bf16.msra.mxu0 %v23734_v26  ;;  %v25366_v26 = vand.u32 4294901760, %v23606_v60  ;;  %v25370_v60 = vand.u32 4294901760, %v23625_v19  ;;  %v25376_v19 = vand.u32 4294901760, %v23662_v46  ;;  %v15809_v46 = vld [vmem:[%s24072_s6 + $0x10] sm:$0xff] }
 0xe3a   :  { %20023 = vmatprep.subr.bf16.mxu0 %v20600_v9 }
 0xe3b   :  { %v20099_v24 = vpack.c.bf16 %v25376_v19, %v25375_v21 }
 0xe3d   :  { %20025 = vmatpush3.bf16.msra.mxu0 %v23744_v33  ;;  %v20084_v33 = vpack.c.bf16 %v25366_v26, %v25365_v43 }
 0xe3e   :  { %20026 = vmatprep.subr.bf16.mxu0 %v20600_v9 }
 0xe41   :  { %20028 = vmatpush3.bf16.msra.mxu0 %v23754_v44  ;;  %v25367_v44 = vand.u32 4294901760, %v23608_v7  ;;  %v25372_v7 = vand.u32 4294901760, %v23651_v36  ;;  %v25378_v36 = vand.u32 4294901760, %v23666_v30  ;;  %v15833_v30 = vand.u32 4294901760, %v15809_v46 }
 0xe42   :  { %20029 = vmatprep.subr.bf16.mxu0 %v20600_v9 }
 0xe43   :  { %v23972_v41 = vsub.f32 %v15809_v46, %v15833_v30 }
 0xe45   :  { %20031 = vmatpush3.bf16.msra.mxu0 %v23764_v47  ;;  %v15926_v11 = vand.u32 4294901760, %v23972_v41 }
 0xe46   :  { %20032 = vmatprep.subr.bf16.mxu0 %v20600_v9 }
 0xe49   :  { %20034 = vmatpush3.bf16.msra.mxu0 %v23772_v51  ;;  %v20090_v51 = vpack.c.bf16 %v25370_v60, %v25369_v8 }
 0xe4a   :  { %20035 = vmatprep.subr.bf16.mxu0 %v20600_v9 }
 0xe4c   :  { %16611 = vmatmul.mubr.f32.vlgmr.msra.gmra.mrb[18].mxu0 %v23796_v22 }
 0xe4d   :  { %20037 = vmatpush3.bf16.msra.mxu0 %v20036_v32  ;;  %16645 = vmatprep.mubr.msk.f32.mxu0 %vm20601_vm7, %v24455_v17  ;;  %v25371_v32 = vand.u32 4294901760, %v23643_v13  ;;  %v25377_v13 = vand.u32 4294901760, %v23664_v52  ;;  %v15810_v52 = vld [vmem:[%s24072_s6 + $0x18] sm:$0xff] }
 0xe4e   :  { %20038 = vmatprep.subr.bf16.mxu0 %v20600_v9 }
 0xe4f   :  { %v20102_v27 = vpack.c.bf16 %v25378_v36, %v25377_v13 }
 0xe51   :  { %20040 = vmatpush3.bf16.msra.mxu0 %v20039_v48  ;;  %v25373_v48 = vand.u32 4294901760, %v23653_v31  ;;  %v25379_v31 = vand.u32 4294901760, %v23672_v2 }
 0xe52   :  { %20041 = vmatprep.subr.bf16.mxu0 %v20600_v9 }
 0xe55   :  { %20043 = vmatpush3.bf16.msra.mxu0 %v20042_v63  ;;  %v25374_v63 = vand.u32 4294901760, %v23658_v28  ;;  %v25380_v28 = vand.u32 4294901760, %v23676_v62  ;;  %v15811_v62 = vld [vmem:[%s24072_s6 + $0x20] sm:$0xff] }
 0xe56   :  { %20044 = vmatprep.subr.bf16.mxu0 %v20600_v9 }
 0xe57   :  { %v20105_v35 = vpack.c.bf16 %v25380_v28, %v25379_v31  ;;  %v20165_v31 = vpack.c.bf16 %v23985_v59, %v23983_v45 }
 0xe59   :  { %20046 = vmatpush3.bf16.msra.mxu0 %v20045_v55  ;;  %v20096_v55 = vpack.c.bf16 %v25374_v63, %v25373_v48 }
 0xe5a   :  { %20047 = vmatprep.subr.bf16.mxu0 %v20600_v9 }
 0xe5d   :  { %20049 = vmatpush3.bf16.msra.mxu0 %v20048_v5  ;;  %v25368_v5 = vand.u32 4294901760, %v23610_v0  ;;  %v20093_v0 = vpack.c.bf16 %v25372_v7, %v25371_v32  ;;  %v15954_v7 = vand.u32 4294901760, %v23983_v45 }
 0xe5e   :  { %20050 = vmatprep.subr.bf16.mxu0 %v20600_v9 }
 0xe5f   :  { %v20087_v47 = vpack.c.bf16 %v25368_v5, %v25367_v44  ;;  %v15955_v63 = vsub.f32 %v23983_v45, %v15954_v7 }
 0xe61   :  { %20052 = vmatpush3.bf16.msra.mxu0 %v25362_v54  ;;  %v15956_v21 = vand.u32 4294901760, %v15955_v63 }
 0xe62   :  { %20053 = vmatprep.subr.bf16.mxu0 %v20600_v9 }
 0xe65   :  { %20055 = vmatpush3.bf16.msra.mxu0 %v25363_v49  ;;  %v15927_v49 = vsub.f32 %v23972_v41, %v15926_v11 }
 0xe66   :  { %20056 = vmatprep.subr.bf16.mxu0 %v20600_v9 }
 0xe67   :  { %v15928_v26 = vand.u32 4294901760, %v15927_v49 }
 0xe69   :  { %20058 = vmatpush3.bf16.msra.mxu0 %v25364_v1 }
 0xe6a   :  { %20059 = vmatprep.subr.bf16.mxu0 %v20600_v9 }
 0xe6c   :  { %16646 = vmatmul.mubr.f32.vlgmr.msra.gmra.mrb[18].mxu0 %v15247_v61 }
 0xe6d   :  { %20061 = vmatpush3.bf16.msra.mxu0 %v23582_v10  ;;  %16680 = vmatprep.mubr.msk.f32.mxu0 %vm20601_vm7, %v24455_v17 }
 0xe6e   :  { %20062 = vmatprep.subr.bf16.mxu0 %v20600_v9 }
 0xe71   :  { %20064 = vmatpush3.bf16.msra.mxu0 %v23594_v34 }
 0xe72   :  { %20065 = vmatprep.subr.bf16.mxu0 %v20600_v9 }
 0xe75   :  { %20067 = vmatpush3.bf16.msra.mxu0 %v23621_v14 }
 0xe76   :  { %20068 = vmatprep.subr.bf16.mxu0 %v20600_v9 }
 0xe79   :  { %20070 = vmatpush3.bf16.msra.mxu0 %v23649_v20 }
 0xe7a   :  { %20071 = vmatprep.subr.bf16.mxu0 %v20600_v9 }
 0xe7d   :  { %20073 = vmatpush3.bf16.msra.mxu0 %v23669_v6 }
 0xe7e   :  { %20074 = vmatprep.subr.bf16.mxu0 %v20600_v9 }
 0xe81   :  { %20076 = vmatpush3.bf16.msra.mxu0 %v23681_v15 }
 0xe82   :  { %20077 = vmatprep.subr.bf16.mxu0 %v20600_v9 }
 0xe85   :  { %20079 = vmatpush3.bf16.msra.mxu0 %v23685_v12 }
 0xe86   :  { %20080 = vmatprep.subr.bf16.mxu0 %v20600_v9 }
 0xe89   :  { %20082 = vmatpush3.bf16.msra.mxu0 %v23691_v37 }
 0xe8a   :  { %20083 = vmatprep.subr.bf16.mxu0 %v20600_v9 }
 0xe8c   :  { %16681 = vmatmul.mubr.f32.vlgmr.msra.gmra.mrb[18].mxu0 %v15248_v56 }
 0xe8d   :  { %20085 = vmatpush3.bf16.msra.mxu0 %v20084_v33  ;;  %16715 = vmatprep.mubr.msk.f32.mxu0 %vm20601_vm7, %v24455_v17 }
 0xe8e   :  { %20086 = vmatprep.subr.bf16.mxu0 %v20600_v9 }
 0xe91   :  { %20088 = vmatpush3.bf16.msra.mxu0 %v20087_v47 }
 0xe92   :  { %20089 = vmatprep.subr.bf16.mxu0 %v20600_v9 }
 0xe95   :  { %20091 = vmatpush3.bf16.msra.mxu0 %v20090_v51 }
 0xe96   :  { %20092 = vmatprep.subr.bf16.mxu0 %v20600_v9 }
 0xe99   :  { %20094 = vmatpush3.bf16.msra.mxu0 %v20093_v0  ;;  %v15961_v0 = vand.u32 4294901760, %v23985_v59 }
 0xe9a   :  { %20095 = vmatprep.subr.bf16.mxu0 %v20600_v9 }
 0xe9d   :  { %20097 = vmatpush3.bf16.msra.mxu0 %v20096_v55  ;;  %v15962_v55 = vsub.f32 %v23985_v59, %v15961_v0 }
 0xe9e   :  { %20098 = vmatprep.subr.bf16.mxu0 %v20600_v9 }
 0xe9f   :  { %v15963_v19 = vand.u32 4294901760, %v15962_v55 }
 0xea1   :  { %20100 = vmatpush3.bf16.msra.mxu0 %v20099_v24  ;;  %v20153_v24 = vpack.c.bf16 %v15963_v19, %v15956_v21 }
 0xea2   :  { %20101 = vmatprep.subr.bf16.mxu0 %v20600_v9 }
 0xea5   :  { %20103 = vmatpush3.bf16.msra.mxu0 %v20102_v27 }
 0xea6   :  { %20104 = vmatprep.subr.bf16.mxu0 %v20600_v9 }
 0xea9   :  { %20106 = vmatpush3.bf16.msra.mxu0 %v20105_v35 }
 0xeaa   :  { %20107 = vmatprep.subr.bf16.mxu0 %v20600_v9 }
 0xeac   :  { %16716 = vmatmul.mubr.f32.vlgmr.msra.gmra.mrb[18].mxu0 %v23796_v22 }
 0xead   :  { %20109 = vmatpush3.bf16.msra.mxu0 %v23582_v10  ;;  %16750 = vmatprep.mubr.msk.f32.mxu0 %vm20601_vm7, %v24455_v17  ;;  %v15807_v10 = vld [vmem:[%s24072_s6] sm:$0xff] }
 0xeae   :  { %20110 = vmatprep.subr.bf16.mxu0 %v20600_v9 }
 0xeb1   :  { %20112 = vmatpush3.bf16.msra.mxu0 %v23594_v34  ;;  %v15808_v34 = vld [vmem:[%s24072_s6 + $0x8] sm:$0xff] }
 0xeb2   :  { %20113 = vmatprep.subr.bf16.mxu0 %v20600_v9 }
 0xeb5   :  { %20115 = vmatpush3.bf16.msra.mxu0 %v23621_v14  ;;  %v15827_v14 = vand.u32 4294901760, %v15807_v10 }
 0xeb6   :  { %20116 = vmatprep.subr.bf16.mxu0 %v20600_v9 }
 0xeb7   :  { %v23957_v16 = vsub.f32 %v15807_v10, %v15827_v14 }
 0xeb9   :  { %20118 = vmatpush3.bf16.msra.mxu0 %v23649_v20  ;;  %v15830_v20 = vand.u32 4294901760, %v15808_v34  ;;  %v15912_v18 = vand.u32 4294901760, %v23957_v16 }
 0xeba   :  { %20119 = vmatprep.subr.bf16.mxu0 %v20600_v9 }
 0xebb   :  { %v23937_v23 = vpack.c.bf16 %v15830_v20, %v15827_v14  ;;  %v23959_v40 = vsub.f32 %v15808_v34, %v15830_v20  ;;  %v20189_v34 = vpack.c.bf16 %v15961_v0, %v15954_v7  ;;  %v16385_v14 = vld [vmem:[%s24071_s5] ss:$0 sm:$0xff] }
 0xebd   :  { %20121 = vmatpush3.bf16.msra.mxu0 %v23669_v6  ;;  %20133 = vmatpush3.bf16.msra.mxu1 %v23937_v23  ;;  %v15836_v6 = vand.u32 4294901760, %v15810_v52  ;;  %v15919_v4 = vand.u32 4294901760, %v23959_v40  ;;  %v20156_v13 = vpack.c.bf16 %v23959_v40, %v23957_v16 }
 0xebe   :  { %20122 = vmatprep.subr.bf16.mxu0 %v20600_v9  ;;  %20134 = vmatprep.subr.bf16.mxu1 %v20600_v9 }
 0xebf   :  { %v23947_v2 = vpack.c.bf16 %v15836_v6, %v15833_v30  ;;  %v23974_v58 = vsub.f32 %v15810_v52, %v15836_v6  ;;  %v15920_v61 = vsub.f32 %v23959_v40, %v15919_v4  ;;  %v20180_v28 = vpack.c.bf16 %v15919_v4, %v15912_v18 }
 0xec1   :  { %20124 = vmatpush3.bf16.msra.mxu0 %v23681_v15  ;;  %v15812_v15 = vld [vmem:[%s24072_s6 + $0x28] sm:$0xff]  ;;  %20136 = vmatpush3.bf16.msra.mxu1 %v23947_v2  ;;  %v15933_v29 = vand.u32 4294901760, %v23974_v58  ;;  %v15921_v54 = vand.u32 4294901760, %v15920_v61  ;;  %v20159_v36 = vpack.c.bf16 %v23974_v58, %v23972_v41 }
 0xec2   :  { %20125 = vmatprep.subr.bf16.mxu0 %v20600_v9  ;;  %20137 = vmatprep.subr.bf16.mxu1 %v20600_v9 }
 0xec3   :  { %v15934_v1 = vsub.f32 %v23974_v58, %v15933_v29  ;;  %v20183_v35 = vpack.c.bf16 %v15933_v29, %v15926_v11 }
 0xec5   :  { %20127 = vmatpush3.bf16.msra.mxu0 %v23685_v12  ;;  %v15839_v12 = vand.u32 4294901760, %v15811_v62  ;;  %v15935_v33 = vand.u32 4294901760, %v15934_v1 }
 0xec6   :  { %20128 = vmatprep.subr.bf16.mxu0 %v20600_v9 }
 0xec7   :  { %v23976_v50 = vsub.f32 %v15811_v62, %v15839_v12  ;;  %v20147_v47 = vpack.c.bf16 %v15935_v33, %v15928_v26 }
 0xec9   :  { %20130 = vmatpush3.bf16.msra.mxu0 %v23691_v37  ;;  %v15842_v37 = vand.u32 4294901760, %v15812_v15  ;;  %v15940_v44 = vand.u32 4294901760, %v23976_v50 }
 0xecb   :  { %v23961_v57 = vpack.c.bf16 %v15842_v37, %v15839_v12  ;;  %v23978_v39 = vsub.f32 %v15812_v15, %v15842_v37  ;;  %v15941_v8 = vsub.f32 %v23976_v50, %v15940_v44 }
 0xecc   :  { %16751 = vmatmul.mubr.f32.vlgmr.msra.gmra.mrb[18].mxu0 %v23796_v22  ;;  %v15913_v22 = vsub.f32 %v23957_v16, %v15912_v18 }
 0xecd   :  { %20139 = vmatpush3.bf16.msra.mxu1 %v23961_v57  ;;  %v15947_v5 = vand.u32 4294901760, %v23978_v39  ;;  %v15942_v51 = vand.u32 4294901760, %v15941_v8  ;;  %v20162_v27 = vpack.c.bf16 %v23978_v39, %v23976_v50 }
 0xece   :  { %20140 = vmatprep.subr.bf16.mxu1 %v20600_v9  ;;  %v15914_v56 = vand.u32 4294901760, %v15913_v22 }
 0xecf   :  { %v15948_v60 = vsub.f32 %v23978_v39, %v15947_v5  ;;  %v20186_v10 = vpack.c.bf16 %v15947_v5, %v15940_v44 }
 0xed0   :  { %v20144_v43 = vpack.c.bf16 %v15921_v54, %v15914_v56 }
 0xed1   :  { %20142 = vmatpush3.bf16.msra.mxu1 %v23981_v38  ;;  %v15949_v32 = vand.u32 4294901760, %v15948_v60 }
 0xed2   :  { %20143 = vmatprep.subr.bf16.mxu1 %v20600_v9 }
 0xed3   :  { %v20150_v48 = vpack.c.bf16 %v15949_v32, %v15942_v51 }
 0xf9f   :  { %v15802_v20 = vpop.f32.mrb[18].mxu0 }
 0xfa0   :  { %v20211_v46 = vadd.f32 %v16385_v14, %v15802_v20  ;;  %v16752_v52 = vpop.f32.mrb[19].mxu0 }
 0xfa2   :  { %v15806_v30 = vmax.f32 %v20211_v46, 0.0 }
 0xfa4   :  { %v15824_v6 = vsel %vm15822_vm9, %v15806_v30, 0 }
 0xfa5   :  { %v15899_v62 = vand.u32 4294901760, %v15824_v6 }
 0xfa7   :  { %v15900_v15 = vsub.f32 %v15824_v6, %v15899_v62 }
 0xfa9   :  { %v15901_v12 = vand.u32 4294901760, %v15900_v15 }
 0xfab   :  { %v15902_v37 = vsub.f32 %v15900_v15, %v15901_v12 }
 0xfad   :  { %v15903_v16 = vand.u32 4294901760, %v15902_v37 }
 0xfaf   :  { %16770 = vmatmul.mubr.f32.vlgmr.msra.gmra.mrb[22].mxu1 %v15903_v16 }
 0xfb0   :  { %20145 = vmatpush3.bf16.msra.mxu1 %v20144_v43  ;;  %16788 = vmatprep.mubr.msk.f32.mxu1 %vm20601_vm7, %v24455_v17 }
 0xfb1   :  { %20146 = vmatprep.subr.bf16.mxu1 %v20600_v9 }
 0xfb4   :  { %20148 = vmatpush3.bf16.msra.mxu1 %v20147_v47 }
 0xfb5   :  { %20149 = vmatprep.subr.bf16.mxu1 %v20600_v9 }
 0xfb8   :  { %20151 = vmatpush3.bf16.msra.mxu1 %v20150_v48 }
 0xfb9   :  { %20152 = vmatprep.subr.bf16.mxu1 %v20600_v9 }
 0xfbc   :  { %20154 = vmatpush3.bf16.msra.mxu1 %v20153_v24 }
 0xfbd   :  { %20155 = vmatprep.subr.bf16.mxu1 %v20600_v9 }
 0xfbf   :  { %16789 = vmatmul.mubr.f32.vlgmr.msra.gmra.mrb[22].mxu1 %v15899_v62 }
 0xfc0   :  { %20157 = vmatpush3.bf16.msra.mxu1 %v20156_v13  ;;  %16807 = vmatprep.mubr.msk.f32.mxu1 %vm20601_vm7, %v24455_v17 }
 0xfc1   :  { %20158 = vmatprep.subr.bf16.mxu1 %v20600_v9 }
 0xfc4   :  { %20160 = vmatpush3.bf16.msra.mxu1 %v20159_v36 }
 0xfc5   :  { %20161 = vmatprep.subr.bf16.mxu1 %v20600_v9 }
 0xfc8   :  { %20163 = vmatpush3.bf16.msra.mxu1 %v20162_v27 }
 0xfc9   :  { %20164 = vmatprep.subr.bf16.mxu1 %v20600_v9 }
 0xfcc   :  { %20166 = vmatpush3.bf16.msra.mxu1 %v20165_v31 }
 0xfcd   :  { %20167 = vmatprep.subr.bf16.mxu1 %v20600_v9 }
 0xfcf   :  { %16808 = vmatmul.mubr.f32.vlgmr.msra.gmra.mrb[22].mxu1 %v15900_v15 }
 0xfd0   :  { %20169 = vmatpush3.bf16.msra.mxu1 %v23937_v23  ;;  %16826 = vmatprep.mubr.msk.f32.mxu1 %vm20601_vm7, %v24455_v17 }
 0xfd1   :  { %20170 = vmatprep.subr.bf16.mxu1 %v20600_v9 }
 0xfd4   :  { %20172 = vmatpush3.bf16.msra.mxu1 %v23947_v2 }
 0xfd5   :  { %20173 = vmatprep.subr.bf16.mxu1 %v20600_v9 }
 0xfd8   :  { %20175 = vmatpush3.bf16.msra.mxu1 %v23961_v57 }
 0xfd9   :  { %20176 = vmatprep.subr.bf16.mxu1 %v20600_v9 }
 0xfdc   :  { %20178 = vmatpush3.bf16.msra.mxu1 %v23981_v38 }
 0xfdd   :  { %20179 = vmatprep.subr.bf16.mxu1 %v20600_v9 }
 0xfdf   :  { %16827 = vmatmul.mubr.f32.vlgmr.msra.gmra.mrb[22].mxu1 %v15901_v12 }
 0xfe0   :  { %20181 = vmatpush3.bf16.msra.mxu1 %v20180_v28  ;;  %16845 = vmatprep.mubr.msk.f32.mxu1 %vm20601_vm7, %v24455_v17 }
 0xfe1   :  { %20182 = vmatprep.subr.bf16.mxu1 %v20600_v9 }
 0xfe4   :  { %20184 = vmatpush3.bf16.msra.mxu1 %v20183_v35 }
 0xfe5   :  { %20185 = vmatprep.subr.bf16.mxu1 %v20600_v9 }
 0xfe8   :  { %20187 = vmatpush3.bf16.msra.mxu1 %v20186_v10 }
 0xfe9   :  { %20188 = vmatprep.subr.bf16.mxu1 %v20600_v9 }
 0xfec   :  { %20190 = vmatpush3.bf16.msra.mxu1 %v20189_v34 }
 0xfed   :  { %20191 = vmatprep.subr.bf16.mxu1 %v20600_v9 }
 0xfef   :  { %16846 = vmatmul.mubr.f32.vlgmr.msra.gmra.mrb[22].mxu1 %v15899_v62 }
 0xff0   :  { %20193 = vmatpush3.bf16.msra.mxu1 %v23937_v23  ;;  %16864 = vmatprep.mubr.msk.f32.mxu1 %vm20601_vm7, %v24455_v17  ;;  %v16386_v23 = vld [vmem:[%s24073_s7] ss:$0 sm:$0xff] }
 0xff1   :  { %20194 = vmatprep.subr.bf16.mxu1 %v20600_v9 }
 0xff4   :  { %20196 = vmatpush3.bf16.msra.mxu1 %v23947_v2 }
 0xff5   :  { %20197 = vmatprep.subr.bf16.mxu1 %v20600_v9 }
 0xff8   :  { %20199 = vmatpush3.bf16.msra.mxu1 %v23961_v57 }
 0xff9   :  { %20200 = vmatprep.subr.bf16.mxu1 %v20600_v9 }
 0xffc   :  { %20202 = vmatpush3.bf16.msra.mxu1 %v23981_v38 }
 0xfff   :  { %16865 = vmatmul.mubr.f32.vlgmr.msra.gmra.mrb[22].mxu1 %v15899_v62 }
0x10d2   :  { %v16359_v40 = vpop.f32.mrb[22].mxu1 }
0x10d3   :  { %v20212_v25 = vadd.f32 %v16386_v23, %v16359_v40  ;;  %v16866_v17 = vpop.f32.mrb[23].mxu1 }
0x10d5   :  { %v16363_v3 = vsub.f32 0.0, %v20212_v25 }
0x10d7   :  { %v16364_v53 = vmul.f32 1.442695, %v16363_v3 }
0x10d9   :  { %20544 = vpow2.f32 %v16364_v53 }
0x10e3   :  { %v20545_v2 = vpop.eup %20544 }
0x10e4   :  { %v16366_v42 = vadd.f32 1.0, %v20545_v2 }
0x10e6   :  { %20546 = vrcp.f32 %v16366_v42 }
0x10f0   :  { %v20547_v9 = vpop.eup %20546 }
0x10f1   :  { %16369 = vst [vmem:[#allocation6] sm:$0xff] %v20547_v9 }
0x10f2   :  { %20581 = shalt.err (!%p20578_p12)
}
0x10f3   :  { %s20582_s14 = scalar_lea.hbm %s24074_s8, 128 }
0x10f4   :  { %p20583_p13 = scmp.ne.s32.totalorder %s24074_s8, %s20582_s14  ;;  %p20586_p0 = scmp.lt.u32.totalorder %s20582_s14, %s24074_s8 }
0x10f6   :  { %p20588_p1 = pnand %p20586_p0, %p20583_p13 }
0x10f8   :  { %20591 = shalt.err (!%p20588_p1)
}
0x10f9   :  { %16379 = dma.vmem_to_hbm [thread:$0]  %s16377_s1, 128, %s24074_s8, [#allocation5]  }
0x10fa   :  { %20594 = dma.done.wait [#allocation5], 128  }
0x10fb   :  { %20595 = vsyncadd [#allocation5], 4294967168 }
0x10fc   :  { %16383 = vsyncpa [#allocation4], 1 }
0x10fd   :  { %16384 = vsyncpa [#allocation5], 1 }

</bundles_post_ra>
